<compile_context>
chip_gen: v5e
topology: v5e:2x2
jax: 0.10.0
libtpu: 0.0.40
codegen_flags: <defaults>
</compile_context>

<pallas_src>
import functools

import jax
import jax.numpy as jnp
import numpy as np
from jax.experimental import pallas as pl
from jax.experimental.pallas import tpu as pltpu

LANE = 128           # TPU lane width: all matmul output (N) dims padded to this.
VMEM_LIMIT = 32 * 1024 * 1024   # explicit scoped-VMEM budget (safe on v5e/v6e/v7x)


# ----------------------------------------------------------------------------
# Pallas kernels
# ----------------------------------------------------------------------------
def _matmul_bias_kernel(x_ref, w_ref, b_ref, o_ref, *, relu: bool):
    """o = relu?(x @ w + b).  x:(tm,K) bf16, w:(K,128) bf16, b:(1,128) f32."""
    y = jnp.dot(x_ref[...], w_ref[...], preferred_element_type=jnp.float32)
    y = y + b_ref[...]                      # epilogue in f32 (no bf16 VALU on v5e)
    if relu:
        y = jnp.maximum(y, 0.0)
    o_ref[...] = y.astype(o_ref.dtype)


def _fc3_fused_kernel(x_ref, w1_ref, b1_ref, w2_ref, b2_ref, w3_ref, b3_ref, o_ref):
    """Fused fc1+relu -> fc2+relu -> fc3.  bf16 MXU operands, f32 accumulate/bias.
    All N dims are zero-padded to 128 so padded lanes stay exactly zero."""
    h = jnp.dot(x_ref[...], w1_ref[...], preferred_element_type=jnp.float32) + b1_ref[...]
    h = jnp.maximum(h, 0.0).astype(jnp.bfloat16)
    h = jnp.dot(h, w2_ref[...], preferred_element_type=jnp.float32) + b2_ref[...]
    h = jnp.maximum(h, 0.0).astype(jnp.bfloat16)
    o_ref[...] = jnp.dot(h, w3_ref[...], preferred_element_type=jnp.float32) + b3_ref[...]


# ----------------------------------------------------------------------------
# Tiling helpers
# ----------------------------------------------------------------------------
@functools.lru_cache(maxsize=None)
def _parallel_tiles():
    """2 grid tiles on v7x (2 TensorCores per chip), 1 everywhere else."""
    try:
        kind = jax.devices()[0].device_kind.lower()
    except Exception:
        return 1
    return 2 if ("v7" in kind or "7x" in kind) else 1


def _choose_tm(m, n_tiles, gran=16):
    """M tile rounded to `gran` (bf16 sublane packing); n_tiles equal tiles."""
    mg = -(-m // gran) * gran
    if n_tiles <= 1 or mg <= gran:
        return mg, mg
    tm = -(-mg // (gran * n_tiles)) * gran
    return tm, tm * n_tiles


# ----------------------------------------------------------------------------
# Wrappers
# ----------------------------------------------------------------------------
def matmul_bias_act(x, w, b, *, relu, n_tiles=1, out_dtype=jnp.bfloat16):
    """y = relu?(x @ w + b).  x:(M,K) bf16, w:(K,N) bf16 (N % 128 == 0), b:(1,N) f32."""
    M, K = x.shape
    K2, N = w.shape
    assert K == K2 and b.shape == (1, N) and N % LANE == 0
    tm, Mp = _choose_tm(M, n_tiles)
    if Mp != M:
        x = jnp.pad(x, ((0, Mp - M), (0, 0)))
    cost = pl.CostEstimate(
        flops=2 * Mp * K * N,
        transcendentals=0,
        bytes_accessed=(Mp * K * x.dtype.itemsize + K * N * w.dtype.itemsize
                        + N * b.dtype.itemsize + Mp * N * np.dtype(out_dtype).itemsize),
    )
    out = pl.pallas_call(
        functools.partial(_matmul_bias_kernel, relu=relu),
        out_shape=jax.ShapeDtypeStruct((Mp, N), out_dtype),
        grid_spec=pltpu.PrefetchScalarGridSpec(
            num_scalar_prefetch=0,
            grid=(Mp // tm,),
            in_specs=[
                pl.BlockSpec((tm, K), lambda i: (i, 0)),   # activations: tiled over M
                pl.BlockSpec((K, N), lambda i: (0, 0)),    # weights: VMEM-resident
                pl.BlockSpec((1, N), lambda i: (0, 0)),    # bias: resident
            ],
            out_specs=pl.BlockSpec((tm, N), lambda i: (i, 0)),
        ),
        compiler_params=pltpu.CompilerParams(
            dimension_semantics=("parallel",),
            vmem_limit_bytes=VMEM_LIMIT,
        ),
        cost_estimate=cost,
    )(x, w, b)
    return out[:M] if Mp != M else out


def fc3_fused(x, w1, b1, w2, b2, w3, b3):
    """Single-kernel fc1+relu+fc2+relu+fc3.  x:(M,3200) bf16; returns (M,128) f32."""
    M, K1 = x.shape
    tm, Mp = _choose_tm(M, 1)            # batch is tiny; one tile
    if Mp != M:
        x = jnp.pad(x, ((0, Mp - M), (0, 0)))
    H1, H2, N = w1.shape[1], w2.shape[1], w3.shape[1]
    cost = pl.CostEstimate(
        flops=2 * Mp * (K1 * H1 + H1 * H2 + H2 * N),
        transcendentals=0,
        bytes_accessed=(Mp * K1 * x.dtype.itemsize
                        + (K1 * H1 + H1 * H2 + H2 * N) * 2
                        + (H1 + H2 + N) * 4 + Mp * N * 4),
    )
    out = pl.pallas_call(
        _fc3_fused_kernel,
        out_shape=jax.ShapeDtypeStruct((Mp, N), jnp.float32),
        grid_spec=pltpu.PrefetchScalarGridSpec(
            num_scalar_prefetch=0,
            grid=(Mp // tm,),
            in_specs=[pl.BlockSpec((tm, K1), lambda i: (i, 0))]
                     + [pl.BlockSpec(a.shape, lambda i: (0, 0))
                        for a in (w1, b1, w2, b2, w3, b3)],
            out_specs=pl.BlockSpec((tm, N), lambda i: (i, 0)),
        ),
        compiler_params=pltpu.CompilerParams(
            dimension_semantics=("parallel",),
            vmem_limit_bytes=VMEM_LIMIT,
        ),
        cost_estimate=cost,
    )(x, w1, b1, w2, b2, w3, b3)
    return out[:M]


def conv2d_relu_pool(x_nhwc, w_mat, b_row, KH=5, KW=5):
    """Valid 5x5 conv + ReLU (Pallas MXU matmul) + 2x2/2 max-pool (XLA reshape-max).

    x_nhwc: (B, H, W, Cin) bf16.  w_mat: (Kp, 128) bf16 with Kp >= KH*KW*Cin
    (rows in (kh, kw, cin) order, zero-padded).  b_row: (1, 128) f32.
    Returns (B, (H-4)//2, (W-4)//2, 128) bf16 with real channels in [..., :Cout].
    """
    B, H, W, Cin = x_nhwc.shape
    OH, OW = H - KH + 1, W - KW + 1
    assert OH % 2 == 0 and OW % 2 == 0, "2x2 max-pool needs even conv output dims"
    # TODO(synk): im2col stays as XLA slice+concat (no transposes) instead of
    # in-kernel per-tap accumulation; for Cin=128 the slices are full-lane so
    # this is pure layout-free slicing.
    cols = [x_nhwc[:, kh:kh + OH, kw:kw + OW, :] for kh in range(KH) for kw in range(KW)]
    patches = jnp.concatenate(cols, axis=-1).reshape(B * OH * OW, KH * KW * Cin)
    K, Kp = patches.shape[1], w_mat.shape[0]
    if Kp != K:                                   # lane-align K (e.g. 75 -> 128)
        patches = jnp.pad(patches, ((0, 0), (0, Kp - K)))
    y = matmul_bias_act(patches.astype(jnp.bfloat16), w_mat, b_row,
                        relu=True, n_tiles=_parallel_tiles())   # (B*OH*OW, 128) bf16
    y = y.reshape(B, OH, OW, LANE)                              # contiguous (free)
    # Lane-dense 2x2 max-pool in channel-last layout: no transposes, no extra kernel.
    y = y.reshape(B, OH // 2, 2, OW // 2, 2, LANE).max(axis=(2, 4))
    return y


# ----------------------------------------------------------------------------
# Parameters: PyTorch-layout init + one-time layout prep (outside the hot path)
# ----------------------------------------------------------------------------
def init_params(key):
    ks = jax.random.split(key, 10)
    p = {}
    p["conv1_w"] = 0.1 * jax.random.normal(ks[0], (6, 3, 5, 5), jnp.float32)
    p["conv1_b"] = 0.1 * jax.random.normal(ks[1], (6,), jnp.float32)
    p["conv2_w"] = 0.1 * jax.random.normal(ks[2], (16, 6, 5, 5), jnp.float32)
    p["conv2_b"] = 0.1 * jax.random.normal(ks[3], (16,), jnp.float32)
    p["fc1_w"] = 0.05 * jax.random.normal(ks[4], (120, 400), jnp.float32)  # (out, in)
    p["fc1_b"] = 0.05 * jax.random.normal(ks[5], (120,), jnp.float32)
    p["fc2_w"] = 0.05 * jax.random.normal(ks[6], (84, 120), jnp.float32)
    p["fc2_b"] = 0.05 * jax.random.normal(ks[7], (84,), jnp.float32)
    p["fc3_w"] = 0.05 * jax.random.normal(ks[8], (10, 84), jnp.float32)
    p["fc3_b"] = 0.05 * jax.random.normal(ks[9], (10,), jnp.float32)
    return p


def _pad_to(x, shape):
    return jnp.pad(x, [(0, t - s) for s, t in zip(x.shape, shape)])


def prepare_params(p):
    """One-time transform of PyTorch-layout params into kernel-ready form:
    transposed to (in, out), permuted / channel-padded for NHWC-128 layout,
    zero-padded to 128 output lanes, weights cast to bf16 (biases stay f32)."""
    q = {}

    # conv1: rows = (kh, kw, cin[0:3]) then zero-padded 75 -> 128; cols 6 -> 128.
    w = p["conv1_w"]                                            # (6, 3, 5, 5)
    wm = w.transpose(2, 3, 1, 0).reshape(75, 6)
    q["conv1_w"] = _pad_to(wm, (LANE, LANE)).astype(jnp.bfloat16)
    q["conv1_b"] = _pad_to(p["conv1_b"].reshape(1, 6), (1, LANE))

    # conv2: rows = (kh, kw, cin[0:128]) with zeros for channels 6..127 so the
    # im2col can use full-128-lane tap slices; cols 16 -> 128.
    w = p["conv2_w"]                                            # (16, 6, 5, 5)
    wfull = jnp.zeros((5, 5, LANE, 16), jnp.float32)
    wfull = wfull.at[:, :, :6, :].set(w.transpose(2, 3, 1, 0))
    q["conv2_w"] = _pad_to(wfull.reshape(25 * LANE, 16), (25 * LANE, LANE)).astype(jnp.bfloat16)
    q["conv2_b"] = _pad_to(p["conv2_b"].reshape(1, 16), (1, LANE))

    # fc1: input features are flattened NHWC-128 (h, w, cpad); embed the real
    # (h, w, c<16) weights and zero-fill channels 16..127 so no sub-lane slice
    # is needed before the FC stack.  Matches PyTorch's NCHW .view() flatten.
    w1 = p["fc1_w"].reshape(120, 16, 5, 5).transpose(2, 3, 1, 0)   # (5,5,16,120)
    w1full = jnp.zeros((5, 5, LANE, 120), jnp.float32).at[:, :, :16, :].set(w1)
    q["fc1_w"] = _pad_to(w1full.reshape(25 * LANE, 120), (25 * LANE, LANE)).astype(jnp.bfloat16)
    q["fc1_b"] = _pad_to(p["fc1_b"].reshape(1, 120), (1, LANE))

    q["fc2_w"] = _pad_to(p["fc2_w"].T, (LANE, LANE)).astype(jnp.bfloat16)
    q["fc2_b"] = _pad_to(p["fc2_b"].reshape(1, 84), (1, LANE))
    q["fc3_w"] = _pad_to(p["fc3_w"].T, (LANE, LANE)).astype(jnp.bfloat16)
    q["fc3_b"] = _pad_to(p["fc3_b"].reshape(1, 10), (1, LANE))
    return q


# ----------------------------------------------------------------------------
# Forward pass (matches torch Net.forward)
# ----------------------------------------------------------------------------
def net_forward(q, x_nchw):
    # x: (B, 3, 32, 32) NCHW float32 (PyTorch convention); one NHWC conversion
    # + bf16 cast at the top, then everything stays channel-last / lane-dense.
    x = x_nchw.transpose(0, 2, 3, 1).astype(jnp.bfloat16)          # (B, 32, 32, 3)
    x = conv2d_relu_pool(x, q["conv1_w"], q["conv1_b"])            # (B, 14, 14, 128)
    x = conv2d_relu_pool(x, q["conv2_w"], q["conv2_b"])            # (B, 5, 5, 128)
    B = x.shape[0]
    feats = x.reshape(B, 5 * 5 * LANE)                             # (B, 3200), lane-dense
    out = fc3_fused(feats, q["fc1_w"], q["fc1_b"], q["fc2_w"], q["fc2_b"],
                    q["fc3_w"], q["fc3_b"])                        # (B, 128) lane-dense f32
    return out[:, :10]                                             # (B, 10)


if __name__ == "__main__":
    key = jax.random.PRNGKey(0)
    pkey, xkey = jax.random.split(key)
    params = init_params(pkey)
    prepped = prepare_params(params)      # one-time layout prep, outside jit
    # Smallest shape consistent with the module: batch=2, CIFAR 3x32x32 input.
    x = jax.random.normal(xkey, (2, 3, 32, 32), jnp.float32)
    out = jax.jit(net_forward)(prepped, x)
    jax.block_until_ready(out)
    assert out.shape == (2, 10) and out.dtype == jnp.float32
    assert bool(jnp.all(jnp.isfinite(out)))
    print("KERNEL_OK")
</pallas_src>

<mosaic_0001>
module attributes {stable_mosaic.version = 11 : i64} {
  func.func @_matmul_bias_kernel(%arg0: i32, %arg1: memref<1568x128xbf16, #tpu.memory_space<vmem>>, %arg2: memref<128x128xbf16, #tpu.memory_space<vmem>>, %arg3: memref<1x128xf32, #tpu.memory_space<vmem>>, %arg4: memref<1568x128xbf16, #tpu.memory_space<vmem>>) attributes {dimension_semantics = [#tpu.dimension_semantics<parallel>], iteration_bounds = array<i64: 1>, scalar_prefetch = 0 : i64, scratch_operands = 0 : i64, tpu.core_type = #tpu.core_type<tc>, window_params = [{transform_indices = @transform_0, window_bounds = array<i64: 1568, 128>}, {pipeline_mode = #tpu.pipeline_mode<synchronous>, transform_indices = @transform_1, window_bounds = array<i64: 128, 128>}, {pipeline_mode = #tpu.pipeline_mode<synchronous>, transform_indices = @transform_2, window_bounds = array<i64: 1, 128>}, {transform_indices = @transform_3, window_bounds = array<i64: 1568, 128>}]} {
    %c0 = arith.constant 0 : index
    %c0_0 = arith.constant 0 : index
    %0 = vector.load %arg1[%c0, %c0_0] : memref<1568x128xbf16, #tpu.memory_space<vmem>>, vector<1568x128xbf16>
    %c0_1 = arith.constant 0 : index
    %c0_2 = arith.constant 0 : index
    %1 = vector.load %arg2[%c0_1, %c0_2] : memref<128x128xbf16, #tpu.memory_space<vmem>>, vector<128x128xbf16>
    %cst = arith.constant dense<0.000000e+00> : vector<1568x128xf32>
    %2 = tpu.matmul %0, %1, %cst {dimension_numbers = #tpu.dot_dimension_numbers<[1], [0], [0], [1], [0, 0, 1, 1], [], []>} : vector<1568x128xbf16>, vector<128x128xbf16>, vector<1568x128xf32> -> vector<1568x128xf32>
    %c0_3 = arith.constant 0 : index
    %c0_4 = arith.constant 0 : index
    %3 = vector.load %arg3[%c0_3, %c0_4] : memref<1x128xf32, #tpu.memory_space<vmem>>, vector<1x128xf32>
    %4 = vector.broadcast %3 : vector<1x128xf32> to vector<1568x128xf32>
    %5 = arith.addf %2, %4 : vector<1568x128xf32>
    %cst_5 = arith.constant 0.000000e+00 : f32
    %6 = vector.broadcast %cst_5 : f32 to vector<1568x128xf32>
    %7 = arith.maximumf %5, %6 : vector<1568x128xf32>
    %8 = arith.truncf %7 : vector<1568x128xf32> to vector<1568x128xbf16>
    %c0_6 = arith.constant 0 : index
    %c0_7 = arith.constant 0 : index
    %9 = vector.load %arg4[%c0_6, %c0_7] : memref<1568x128xbf16, #tpu.memory_space<vmem>>, vector<1568x128xbf16>
    tpu.vector_store %arg4[%c0_6, %c0_7], %8 {strides = array<i32>} : memref<1568x128xbf16, #tpu.memory_space<vmem>>, vector<1568x128xbf16>,
    return
  }
  func.func @transform_0(%arg0: i32) -> (i32, i32) {
    %c0_i32 = arith.constant 0 : i32
    %c0_i32_0 = arith.constant 0 : i32
    return %arg0, %c0_i32 : i32, i32
  }
  func.func @transform_1(%arg0: i32) -> (i32, i32) {
    %c0_i32 = arith.constant 0 : i32
    %c0_i32_0 = arith.constant 0 : i32
    %c0_i32_1 = arith.constant 0 : i32
    return %c0_i32, %c0_i32_0 : i32, i32
  }
  func.func @transform_2(%arg0: i32) -> (i32, i32) {
    %c0_i32 = arith.constant 0 : i32
    %c0_i32_0 = arith.constant 0 : i32
    %c0_i32_1 = arith.constant 0 : i32
    return %c0_i32, %c0_i32_0 : i32, i32
  }
  func.func @transform_3(%arg0: i32) -> (i32, i32) {
    %c0_i32 = arith.constant 0 : i32
    %c0_i32_0 = arith.constant 0 : i32
    return %arg0, %c0_i32 : i32, i32
  }
}

module attributes {stable_mosaic.version = 11 : i64} {
  func.func @_matmul_bias_kernel(%arg0: i32, %arg1: memref<208x3200xbf16, #tpu.memory_space<vmem>>, %arg2: memref<3200x128xbf16, #tpu.memory_space<vmem>>, %arg3: memref<1x128xf32, #tpu.memory_space<vmem>>, %arg4: memref<208x128xbf16, #tpu.memory_space<vmem>>) attributes {dimension_semantics = [#tpu.dimension_semantics<parallel>], iteration_bounds = array<i64: 1>, scalar_prefetch = 0 : i64, scratch_operands = 0 : i64, tpu.core_type = #tpu.core_type<tc>, window_params = [{transform_indices = @transform_0, window_bounds = array<i64: 208, 3200>}, {pipeline_mode = #tpu.pipeline_mode<synchronous>, transform_indices = @transform_1, window_bounds = array<i64: 3200, 128>}, {pipeline_mode = #tpu.pipeline_mode<synchronous>, transform_indices = @transform_2, window_bounds = array<i64: 1, 128>}, {transform_indices = @transform_3, window_bounds = array<i64: 208, 128>}]} {
    %c0 = arith.constant 0 : index
    %c0_0 = arith.constant 0 : index
    %0 = vector.load %arg1[%c0, %c0_0] : memref<208x3200xbf16, #tpu.memory_space<vmem>>, vector<208x3200xbf16>
    %c0_1 = arith.constant 0 : index
    %c0_2 = arith.constant 0 : index
    %1 = vector.load %arg2[%c0_1, %c0_2] : memref<3200x128xbf16, #tpu.memory_space<vmem>>, vector<3200x128xbf16>
    %cst = arith.constant dense<0.000000e+00> : vector<208x128xf32>
    %2 = tpu.matmul %0, %1, %cst {dimension_numbers = #tpu.dot_dimension_numbers<[1], [0], [0], [1], [0, 0, 1, 1], [], []>} : vector<208x3200xbf16>, vector<3200x128xbf16>, vector<208x128xf32> -> vector<208x128xf32>
    %c0_3 = arith.constant 0 : index
    %c0_4 = arith.constant 0 : index
    %3 = vector.load %arg3[%c0_3, %c0_4] : memref<1x128xf32, #tpu.memory_space<vmem>>, vector<1x128xf32>
    %4 = vector.broadcast %3 : vector<1x128xf32> to vector<208x128xf32>
    %5 = arith.addf %2, %4 : vector<208x128xf32>
    %cst_5 = arith.constant 0.000000e+00 : f32
    %6 = vector.broadcast %cst_5 : f32 to vector<208x128xf32>
    %7 = arith.maximumf %5, %6 : vector<208x128xf32>
    %8 = arith.truncf %7 : vector<208x128xf32> to vector<208x128xbf16>
    %c0_6 = arith.constant 0 : index
    %c0_7 = arith.constant 0 : index
    %9 = vector.load %arg4[%c0_6, %c0_7] : memref<208x128xbf16, #tpu.memory_space<vmem>>, vector<208x128xbf16>
    tpu.vector_store %arg4[%c0_6, %c0_7], %8 {strides = array<i32>} : memref<208x128xbf16, #tpu.memory_space<vmem>>, vector<208x128xbf16>,
    return
  }
  func.func @transform_0(%arg0: i32) -> (i32, i32) {
    %c0_i32 = arith.constant 0 : i32
    %c0_i32_0 = arith.constant 0 : i32
    return %arg0, %c0_i32 : i32, i32
  }
  func.func @transform_1(%arg0: i32) -> (i32, i32) {
    %c0_i32 = arith.constant 0 : i32
    %c0_i32_0 = arith.constant 0 : i32
    %c0_i32_1 = arith.constant 0 : i32
    return %c0_i32, %c0_i32_0 : i32, i32
  }
  func.func @transform_2(%arg0: i32) -> (i32, i32) {
    %c0_i32 = arith.constant 0 : i32
    %c0_i32_0 = arith.constant 0 : i32
    %c0_i32_1 = arith.constant 0 : i32
    return %c0_i32, %c0_i32_0 : i32, i32
  }
  func.func @transform_3(%arg0: i32) -> (i32, i32) {
    %c0_i32 = arith.constant 0 : i32
    %c0_i32_0 = arith.constant 0 : i32
    return %arg0, %c0_i32 : i32, i32
  }
}

module attributes {stable_mosaic.version = 11 : i64} {
  func.func @_fc3_fused_kernel(%arg0: i32, %arg1: memref<16x3200xbf16, #tpu.memory_space<vmem>>, %arg2: memref<3200x128xbf16, #tpu.memory_space<vmem>>, %arg3: memref<1x128xf32, #tpu.memory_space<vmem>>, %arg4: memref<128x128xbf16, #tpu.memory_space<vmem>>, %arg5: memref<1x128xf32, #tpu.memory_space<vmem>>, %arg6: memref<128x128xbf16, #tpu.memory_space<vmem>>, %arg7: memref<1x128xf32, #tpu.memory_space<vmem>>, %arg8: memref<16x128xf32, #tpu.memory_space<vmem>>) attributes {dimension_semantics = [#tpu.dimension_semantics<parallel>], iteration_bounds = array<i64: 1>, scalar_prefetch = 0 : i64, scratch_operands = 0 : i64, tpu.core_type = #tpu.core_type<tc>, window_params = [{transform_indices = @transform_0, window_bounds = array<i64: 16, 3200>}, {pipeline_mode = #tpu.pipeline_mode<synchronous>, transform_indices = @transform_1, window_bounds = array<i64: 3200, 128>}, {pipeline_mode = #tpu.pipeline_mode<synchronous>, transform_indices = @transform_2, window_bounds = array<i64: 1, 128>}, {pipeline_mode = #tpu.pipeline_mode<synchronous>, transform_indices = @transform_3, window_bounds = array<i64: 128, 128>}, {pipeline_mode = #tpu.pipeline_mode<synchronous>, transform_indices = @transform_4, window_bounds = array<i64: 1, 128>}, {pipeline_mode = #tpu.pipeline_mode<synchronous>, transform_indices = @transform_5, window_bounds = array<i64: 128, 128>}, {pipeline_mode = #tpu.pipeline_mode<synchronous>, transform_indices = @transform_6, window_bounds = array<i64: 1, 128>}, {transform_indices = @transform_7, window_bounds = array<i64: 16, 128>}]} {
    %c0 = arith.constant 0 : index
    %c0_0 = arith.constant 0 : index
    %0 = vector.load %arg1[%c0, %c0_0] : memref<16x3200xbf16, #tpu.memory_space<vmem>>, vector<16x3200xbf16>
    %c0_1 = arith.constant 0 : index
    %c0_2 = arith.constant 0 : index
    %1 = vector.load %arg2[%c0_1, %c0_2] : memref<3200x128xbf16, #tpu.memory_space<vmem>>, vector<3200x128xbf16>
    %cst = arith.constant dense<0.000000e+00> : vector<16x128xf32>
    %2 = tpu.matmul %0, %1, %cst {dimension_numbers = #tpu.dot_dimension_numbers<[1], [0], [0], [1], [0, 0, 1, 1], [], []>} : vector<16x3200xbf16>, vector<3200x128xbf16>, vector<16x128xf32> -> vector<16x128xf32>
    %c0_3 = arith.constant 0 : index
    %c0_4 = arith.constant 0 : index
    %3 = vector.load %arg3[%c0_3, %c0_4] : memref<1x128xf32, #tpu.memory_space<vmem>>, vector<1x128xf32>
    %4 = vector.broadcast %3 : vector<1x128xf32> to vector<16x128xf32>
    %5 = arith.addf %2, %4 : vector<16x128xf32>
    %cst_5 = arith.constant 0.000000e+00 : f32
    %6 = vector.broadcast %cst_5 : f32 to vector<16x128xf32>
    %7 = arith.maximumf %5, %6 : vector<16x128xf32>
    %8 = arith.truncf %7 : vector<16x128xf32> to vector<16x128xbf16>
    %c0_6 = arith.constant 0 : index
    %c0_7 = arith.constant 0 : index
    %9 = vector.load %arg4[%c0_6, %c0_7] : memref<128x128xbf16, #tpu.memory_space<vmem>>, vector<128x128xbf16>
    %cst_8 = arith.constant dense<0.000000e+00> : vector<16x128xf32>
    %10 = tpu.matmul %8, %9, %cst_8 {dimension_numbers = #tpu.dot_dimension_numbers<[1], [0], [0], [1], [0, 0, 1, 1], [], []>} : vector<16x128xbf16>, vector<128x128xbf16>, vector<16x128xf32> -> vector<16x128xf32>
    %c0_9 = arith.constant 0 : index
    %c0_10 = arith.constant 0 : index
    %11 = vector.load %arg5[%c0_9, %c0_10] : memref<1x128xf32, #tpu.memory_space<vmem>>, vector<1x128xf32>
    %12 = vector.broadcast %11 : vector<1x128xf32> to vector<16x128xf32>
    %13 = arith.addf %10, %12 : vector<16x128xf32>
    %cst_11 = arith.constant 0.000000e+00 : f32
    %14 = vector.broadcast %cst_11 : f32 to vector<16x128xf32>
    %15 = arith.maximumf %13, %14 : vector<16x128xf32>
    %16 = arith.truncf %15 : vector<16x128xf32> to vector<16x128xbf16>
    %c0_12 = arith.constant 0 : index
    %c0_13 = arith.constant 0 : index
    %17 = vector.load %arg6[%c0_12, %c0_13] : memref<128x128xbf16, #tpu.memory_space<vmem>>, vector<128x128xbf16>
    %cst_14 = arith.constant dense<0.000000e+00> : vector<16x128xf32>
    %18 = tpu.matmul %16, %17, %cst_14 {dimension_numbers = #tpu.dot_dimension_numbers<[1], [0], [0], [1], [0, 0, 1, 1], [], []>} : vector<16x128xbf16>, vector<128x128xbf16>, vector<16x128xf32> -> vector<16x128xf32>
    %c0_15 = arith.constant 0 : index
    %c0_16 = arith.constant 0 : index
    %19 = vector.load %arg7[%c0_15, %c0_16] : memref<1x128xf32, #tpu.memory_space<vmem>>, vector<1x128xf32>
    %20 = vector.broadcast %19 : vector<1x128xf32> to vector<16x128xf32>
    %21 = arith.addf %18, %20 : vector<16x128xf32>
    %c0_17 = arith.constant 0 : index
    %c0_18 = arith.constant 0 : index
    %22 = vector.load %arg8[%c0_17, %c0_18] : memref<16x128xf32, #tpu.memory_space<vmem>>, vector<16x128xf32>
    tpu.vector_store %arg8[%c0_17, %c0_18], %21 {strides = array<i32>} : memref<16x128xf32, #tpu.memory_space<vmem>>, vector<16x128xf32>,
    return
  }
  func.func @transform_0(%arg0: i32) -> (i32, i32) {
    %c0_i32 = arith.constant 0 : i32
    %c0_i32_0 = arith.constant 0 : i32
    return %arg0, %c0_i32 : i32, i32
  }
  func.func @transform_1(%arg0: i32) -> (i32, i32) {
    %c0_i32 = arith.constant 0 : i32
    %c0_i32_0 = arith.constant 0 : i32
    %c0_i32_1 = arith.constant 0 : i32
    return %c0_i32, %c0_i32_0 : i32, i32
  }
  func.func @transform_2(%arg0: i32) -> (i32, i32) {
    %c0_i32 = arith.constant 0 : i32
    %c0_i32_0 = arith.constant 0 : i32
    %c0_i32_1 = arith.constant 0 : i32
    return %c0_i32, %c0_i32_0 : i32, i32
  }
  func.func @transform_3(%arg0: i32) -> (i32, i32) {
    %c0_i32 = arith.constant 0 : i32
    %c0_i32_0 = arith.constant 0 : i32
    %c0_i32_1 = arith.constant 0 : i32
    return %c0_i32, %c0_i32_0 : i32, i32
  }
  func.func @transform_4(%arg0: i32) -> (i32, i32) {
    %c0_i32 = arith.constant 0 : i32
    %c0_i32_0 = arith.constant 0 : i32
    %c0_i32_1 = arith.constant 0 : i32
    return %c0_i32, %c0_i32_0 : i32, i32
  }
  func.func @transform_5(%arg0: i32) -> (i32, i32) {
    %c0_i32 = arith.constant 0 : i32
    %c0_i32_0 = arith.constant 0 : i32
    %c0_i32_1 = arith.constant 0 : i32
    return %c0_i32, %c0_i32_0 : i32, i32
  }
  func.func @transform_6(%arg0: i32) -> (i32, i32) {
    %c0_i32 = arith.constant 0 : i32
    %c0_i32_0 = arith.constant 0 : i32
    %c0_i32_1 = arith.constant 0 : i32
    return %c0_i32, %c0_i32_0 : i32, i32
  }
  func.func @transform_7(%arg0: i32) -> (i32, i32) {
    %c0_i32 = arith.constant 0 : i32
    %c0_i32_0 = arith.constant 0 : i32
    return %arg0, %c0_i32 : i32, i32
  }
}

</mosaic_0001>

<bundles_post_ra>
// kernel: net_forward.3
= control target key start
LH: loop header
LB: loop body
LE: loop exit
PB: predicated region body
PF: predicated region fallthrough
CT: control target
= control target key end

     0   :  { %s3938_s1 = inlined_call_operand.vmem [shape: bf16[128,128], index: 1, kind: input, shape index: {}]   ;;  %s3939_s0 = inlined_call_operand.vmem [shape: bf16[1568,128], index: 0, kind: input, shape index: {}]   ;;  %s3940_s2 = inlined_call_operand.vmem [shape: f32[1,128], index: 2, kind: input, shape index: {}]   ;;  %s3941_s3 = inlined_call_operand.vmem [shape: bf16[1568,128], index: 3, kind: output, shape index: {}]  }
   0x1   :  { %v2486_v0 = vld [vmem:[%s3938_s1 + $0x38] sm:$0xff]  ;;  %v2485_v1 = vld [vmem:[%s3938_s1 + $0x30] sm:$0xff]  ;;  %v2484_v2 = vld [vmem:[%s3938_s1 + $0x28] sm:$0xff] }
   0x2   :  { %3075 = vmatpush.bf16.msra.mxu2 %v2486_v0  ;;  %3076 = vmatpush.bf16.msra.mxu3 %v2486_v0  ;;  %v2483_v3 = vld [vmem:[%s3938_s1 + $0x20] sm:$0xff]  ;;  %v2482_v4 = vld [vmem:[%s3938_s1 + $0x18] sm:$0xff]  ;;  %v2481_v5 = vld [vmem:[%s3938_s1 + $0x10] sm:$0xff] }
   0x3   :  { %866 = vmatpush.bf16.msra.mxu0 %v2486_v0  ;;  %3074 = vmatpush.bf16.msra.mxu1 %v2486_v0  ;;  %v2480_v6 = vld [vmem:[%s3938_s1 + $0x8] sm:$0xff]  ;;  %v2479_v7 = vld [vmem:[%s3938_s1] sm:$0xff]  ;;  %v2455_v13 = vld [vmem:[%s3939_s0 + $0x250] sm:$0xff] }
   0x4   :  { %v2429_v8 = vld [vmem:[%s3939_s0 + $0x180] sm:$0xff]  ;;  %v2454_v9 = vld [vmem:[%s3939_s0 + $0x248] sm:$0xff]  ;;  %v2431_v16 = vld [vmem:[%s3939_s0 + $0x190] sm:$0xff] }
   0x5   :  { %v2381_v10 = vld [vmem:[%s3939_s0] sm:$0xff]  ;;  %v2430_v12 = vld [vmem:[%s3939_s0 + $0x188] sm:$0xff]  ;;  %v2456_v17 = vld [vmem:[%s3939_s0 + $0x258] sm:$0xff] }
   0x6   :  { %3078 = vmatpush.bf16.msra.mxu2 %v2485_v1  ;;  %3079 = vmatpush.bf16.msra.mxu3 %v2485_v1  ;;  %v2405_v11 = vld [vmem:[%s3939_s0 + $0xc0] sm:$0xff]  ;;  %v2382_v14 = vld [vmem:[%s3939_s0 + $0x8] sm:$0xff]  ;;  %v2383_v18 = vld [vmem:[%s3939_s0 + $0x10] sm:$0xff] }
   0x7   :  { %867 = vmatpush.bf16.msra.mxu0 %v2485_v1  ;;  %3077 = vmatpush.bf16.msra.mxu1 %v2485_v1  ;;  %v2406_v15 = vld [vmem:[%s3939_s0 + $0xc8] sm:$0xff]  ;;  %v2407_v19 = vld [vmem:[%s3939_s0 + $0xd0] sm:$0xff]  ;;  %v2432_v20 = vld [vmem:[%s3939_s0 + $0x198] sm:$0xff] }
   0x8   :  { %v2457_v21 = vld [vmem:[%s3939_s0 + $0x260] sm:$0xff]  ;;  %v2384_v22 = vld [vmem:[%s3939_s0 + $0x18] sm:$0xff]  ;;  %v2458_v25 = vld [vmem:[%s3939_s0 + $0x268] sm:$0xff] }
   0x9   :  { %v2408_v23 = vld [vmem:[%s3939_s0 + $0xd8] sm:$0xff]  ;;  %v2433_v24 = vld [vmem:[%s3939_s0 + $0x1a0] sm:$0xff]  ;;  %v2434_v28 = vld [vmem:[%s3939_s0 + $0x1a8] sm:$0xff] }
   0xa   :  { %3081 = vmatpush.bf16.msra.mxu2 %v2484_v2  ;;  %3082 = vmatpush.bf16.msra.mxu3 %v2484_v2  ;;  %v2385_v26 = vld [vmem:[%s3939_s0 + $0x20] sm:$0xff]  ;;  %v2459_v29 = vld [vmem:[%s3939_s0 + $0x270] sm:$0xff]  ;;  %v2386_v30 = vld [vmem:[%s3939_s0 + $0x28] sm:$0xff] }
   0xb   :  { %868 = vmatpush.bf16.msra.mxu0 %v2484_v2  ;;  %3080 = vmatpush.bf16.msra.mxu1 %v2484_v2  ;;  %v2409_v27 = vld [vmem:[%s3939_s0 + $0xe0] sm:$0xff]  ;;  %v2410_v31 = vld [vmem:[%s3939_s0 + $0xe8] sm:$0xff]  ;;  %v2435_v32 = vld [vmem:[%s3939_s0 + $0x1b0] sm:$0xff] }
   0xc   :  { %v2460_v33 = vld [vmem:[%s3939_s0 + $0x278] sm:$0xff]  ;;  %v2387_v34 = vld [vmem:[%s3939_s0 + $0x30] sm:$0xff]  ;;  %v2461_v37 = vld [vmem:[%s3939_s0 + $0x280] sm:$0xff] }
   0xd   :  { %v2411_v35 = vld [vmem:[%s3939_s0 + $0xf0] sm:$0xff]  ;;  %v2436_v36 = vld [vmem:[%s3939_s0 + $0x1b8] sm:$0xff]  ;;  %v2437_v40 = vld [vmem:[%s3939_s0 + $0x1c0] sm:$0xff] }
   0xe   :  { %3084 = vmatpush.bf16.msra.mxu2 %v2483_v3  ;;  %3085 = vmatpush.bf16.msra.mxu3 %v2483_v3  ;;  %v2388_v38 = vld [vmem:[%s3939_s0 + $0x38] sm:$0xff]  ;;  %v2462_v41 = vld [vmem:[%s3939_s0 + $0x288] sm:$0xff]  ;;  %v2389_v42 = vld [vmem:[%s3939_s0 + $0x40] sm:$0xff] }
   0xf   :  { %869 = vmatpush.bf16.msra.mxu0 %v2483_v3  ;;  %3083 = vmatpush.bf16.msra.mxu1 %v2483_v3  ;;  %v2412_v39 = vld [vmem:[%s3939_s0 + $0xf8] sm:$0xff]  ;;  %v2413_v43 = vld [vmem:[%s3939_s0 + $0x100] sm:$0xff]  ;;  %v2438_v3 = vld [vmem:[%s3939_s0 + $0x1c8] sm:$0xff] }
  0x10   :  { %v3255_v46 = vld [vmem:[%s3940_s2] ss:$0 sm:$0xff] }
  0x12   :  { %3087 = vmatpush.bf16.msra.mxu2 %v2482_v4  ;;  %3088 = vmatpush.bf16.msra.mxu3 %v2482_v4 }
  0x13   :  { %870 = vmatpush.bf16.msra.mxu0 %v2482_v4  ;;  %3086 = vmatpush.bf16.msra.mxu1 %v2482_v4  ;;  %v2463_v4 = vld [vmem:[%s3939_s0 + $0x290] sm:$0xff] }
  0x16   :  { %3090 = vmatpush.bf16.msra.mxu2 %v2481_v5  ;;  %3091 = vmatpush.bf16.msra.mxu3 %v2481_v5 }
  0x17   :  { %871 = vmatpush.bf16.msra.mxu0 %v2481_v5  ;;  %3089 = vmatpush.bf16.msra.mxu1 %v2481_v5  ;;  %v2390_v5 = vld [vmem:[%s3939_s0 + $0x48] sm:$0xff] }
  0x1a   :  { %3093 = vmatpush.bf16.msra.mxu2 %v2480_v6  ;;  %3094 = vmatpush.bf16.msra.mxu3 %v2480_v6 }
  0x1b   :  { %872 = vmatpush.bf16.msra.mxu0 %v2480_v6  ;;  %3092 = vmatpush.bf16.msra.mxu1 %v2480_v6  ;;  %v2414_v6 = vld [vmem:[%s3939_s0 + $0x108] sm:$0xff] }
  0x1e   :  { %3096 = vmatpush.bf16.msra.mxu2 %v2479_v7  ;;  %3097 = vmatpush.bf16.msra.mxu3 %v2479_v7 }
  0x1f   :  { %873 = vmatpush.bf16.msra.mxu0 %v2479_v7  ;;  %3095 = vmatpush.bf16.msra.mxu1 %v2479_v7 }
  0x21   :  { %1114 = vmatmul.bf16.vlgmr.msra.gmra.mxu2 %v2429_v8  ;;  %1239 = vmatmul.bf16.vlgmr.msra.gmra.mxu3 %v2454_v9 }
  0x22   :  { %874 = vmatmul.bf16.vlgmr.msra.gmra.mxu0 %v2381_v10  ;;  %994 = vmatmul.bf16.vlgmr.msra.gmra.mxu1 %v2405_v11 }
  0x31   :  { %1119 = vmatmul.bf16.gmra.mxu2 %v2430_v12  ;;  %1244 = vmatmul.bf16.gmra.mxu3 %v2455_v13 }
  0x32   :  { %879 = vmatmul.bf16.gmra.mxu0 %v2382_v14  ;;  %999 = vmatmul.bf16.gmra.mxu1 %v2406_v15 }
  0x41   :  { %1124 = vmatmul.bf16.gmra.mxu2 %v2431_v16  ;;  %1249 = vmatmul.bf16.gmra.mxu3 %v2456_v17 }
  0x42   :  { %884 = vmatmul.bf16.gmra.mxu0 %v2383_v18  ;;  %1004 = vmatmul.bf16.gmra.mxu1 %v2407_v19 }
  0x51   :  { %1129 = vmatmul.bf16.gmra.mxu2 %v2432_v20  ;;  %1254 = vmatmul.bf16.gmra.mxu3 %v2457_v21 }
  0x52   :  { %889 = vmatmul.bf16.gmra.mxu0 %v2384_v22  ;;  %1009 = vmatmul.bf16.gmra.mxu1 %v2408_v23 }
  0x61   :  { %1134 = vmatmul.bf16.gmra.mxu2 %v2433_v24  ;;  %1259 = vmatmul.bf16.gmra.mxu3 %v2458_v25 }
  0x62   :  { %894 = vmatmul.bf16.gmra.mxu0 %v2385_v26  ;;  %1014 = vmatmul.bf16.gmra.mxu1 %v2409_v27 }
  0x71   :  { %1139 = vmatmul.bf16.gmra.mxu2 %v2434_v28  ;;  %1264 = vmatmul.bf16.gmra.mxu3 %v2459_v29 }
  0x72   :  { %899 = vmatmul.bf16.gmra.mxu0 %v2386_v30  ;;  %1019 = vmatmul.bf16.gmra.mxu1 %v2410_v31 }
  0x81   :  { %1144 = vmatmul.bf16.gmra.mxu2 %v2435_v32  ;;  %1269 = vmatmul.bf16.gmra.mxu3 %v2460_v33 }
  0x82   :  { %904 = vmatmul.bf16.gmra.mxu0 %v2387_v34  ;;  %1024 = vmatmul.bf16.gmra.mxu1 %v2411_v35  ;;  %v2439_v35 = vld [vmem:[%s3939_s0 + $0x1d0] sm:$0xff] }
  0x91   :  { %1149 = vmatmul.bf16.gmra.mxu2 %v2436_v36  ;;  %1274 = vmatmul.bf16.gmra.mxu3 %v2461_v37  ;;  %v2464_v36 = vld [vmem:[%s3939_s0 + $0x298] sm:$0xff]  ;;  %v2391_v37 = vld [vmem:[%s3939_s0 + $0x50] sm:$0xff] }
  0x92   :  { %909 = vmatmul.bf16.gmra.mxu0 %v2388_v38  ;;  %1029 = vmatmul.bf16.gmra.mxu1 %v2412_v39  ;;  %v2415_v38 = vld [vmem:[%s3939_s0 + $0x110] sm:$0xff] }
  0x9f   :  { %v875_v44 = vpop.f32.mrf.mxu0  ;;  %v995_v45 = vpop.f32.mrf.mxu1 }
  0xa0   :  { %v876_v49 = vadd.f32 %v3255_v46, %v875_v44  ;;  %v996_v50 = vadd.f32 %v3255_v46, %v995_v45 }
  0xa1   :  { %1154 = vmatmul.bf16.gmra.mxu2 %v2437_v40  ;;  %1279 = vmatmul.bf16.gmra.mxu3 %v2462_v41 }
  0xa2   :  { %914 = vmatmul.bf16.gmra.mxu0 %v2389_v42  ;;  %1034 = vmatmul.bf16.gmra.mxu1 %v2413_v43  ;;  %v1365_v53 = vmax.f32 %v876_v49, 0.0  ;;  %v1413_v54 = vmax.f32 %v996_v50, 0.0 }
  0xa4   :  { %v1115_v47 = vpop.f32.mrf.mxu2  ;;  %v1240_v48 = vpop.f32.mrf.mxu3 }
  0xa5   :  { %v1116_v59 = vadd.f32 %v3255_v46, %v1115_v47  ;;  %v1241_v60 = vadd.f32 %v3255_v46, %v1240_v48 }
  0xa7   :  { %v877_v51 = vpop.f32.mrf.mxu0  ;;  %v997_v52 = vpop.f32.mrf.mxu1  ;;  %v1461_v7 = vmax.f32 %v1116_v59, 0.0  ;;  %v1511_v8 = vmax.f32 %v1241_v60, 0.0 }
  0xa8   :  { %v878_v55 = vadd.f32 %v3255_v46, %v877_v51  ;;  %v998_v56 = vadd.f32 %v3255_v46, %v997_v52 }
  0xaa   :  { %v1366_v57 = vmax.f32 %v878_v55, 0.0  ;;  %v1414_v58 = vmax.f32 %v998_v56, 0.0 }
  0xac   :  { %v1117_v61 = vpop.f32.mrf.mxu2  ;;  %v1242_v62 = vpop.f32.mrf.mxu3  ;;  %v2490_v63 = vpack.c.bf16 %v1366_v57, %v1365_v53  ;;  %v2610_v0 = vpack.c.bf16 %v1414_v58, %v1413_v54 }
  0xad   :  { %v1118_v1 = vadd.f32 %v3255_v46, %v1117_v61  ;;  %v1243_v2 = vadd.f32 %v3255_v46, %v1242_v62 }
  0xae   :  { %2491 = vst [vmem:[%s3941_s3] sm:$0xff] %v2490_v63  }
  0xaf   :  { %v1462_v9 = vmax.f32 %v1118_v1, 0.0  ;;  %v1512_v10 = vmax.f32 %v1243_v2, 0.0  ;;  %3000 = vst [vmem:[%s3941_s3 + $0xc0] sm:$0xff] %v2610_v0   ;;  %v880_v11 = vpop.f32.mrf.mxu0  ;;  %v1000_v12 = vpop.f32.mrf.mxu1 }
  0xb0   :  { %v881_v17 = vadd.f32 %v3255_v46, %v880_v11  ;;  %v1001_v18 = vadd.f32 %v3255_v46, %v1000_v12 }
  0xb1   :  { %v2730_v13 = vpack.c.bf16 %v1462_v9, %v1461_v7  ;;  %v2855_v14 = vpack.c.bf16 %v1512_v10, %v1511_v8  ;;  %1159 = vmatmul.bf16.gmra.mxu2 %v2438_v3  ;;  %1284 = vmatmul.bf16.gmra.mxu3 %v2463_v4  ;;  %v2440_v4 = vld [vmem:[%s3939_s0 + $0x1d8] sm:$0xff] }
  0xb2   :  { %919 = vmatmul.bf16.gmra.mxu0 %v2390_v5  ;;  %1039 = vmatmul.bf16.gmra.mxu1 %v2414_v6  ;;  %v1367_v21 = vmax.f32 %v881_v17, 0.0  ;;  %v1415_v22 = vmax.f32 %v1001_v18, 0.0  ;;  %v2465_v5 = vld [vmem:[%s3939_s0 + $0x2a0] sm:$0xff]  ;;  %v2392_v6 = vld [vmem:[%s3939_s0 + $0x58] sm:$0xff] }
  0xb3   :  { %3024 = vst [vmem:[%s3941_s3 + $0x180] sm:$0xff] %v2730_v13   ;;  %v2416_v7 = vld [vmem:[%s3939_s0 + $0x118] sm:$0xff] }
  0xb4   :  { %3049 = vst [vmem:[%s3941_s3 + $0x248] sm:$0xff] %v2855_v14   ;;  %v1120_v15 = vpop.f32.mrf.mxu2  ;;  %v1245_v16 = vpop.f32.mrf.mxu3 }
  0xb5   :  { %v1121_v27 = vadd.f32 %v3255_v46, %v1120_v15  ;;  %v1246_v28 = vadd.f32 %v3255_v46, %v1245_v16 }
  0xb7   :  { %v882_v19 = vpop.f32.mrf.mxu0  ;;  %v1002_v20 = vpop.f32.mrf.mxu1  ;;  %v1463_v39 = vmax.f32 %v1121_v27, 0.0  ;;  %v1513_v40 = vmax.f32 %v1246_v28, 0.0 }
  0xb8   :  { %v883_v23 = vadd.f32 %v3255_v46, %v882_v19  ;;  %v1003_v24 = vadd.f32 %v3255_v46, %v1002_v20 }
  0xba   :  { %v1368_v25 = vmax.f32 %v883_v23, 0.0  ;;  %v1416_v26 = vmax.f32 %v1003_v24, 0.0 }
  0xbc   :  { %v1122_v29 = vpop.f32.mrf.mxu2  ;;  %v1247_v30 = vpop.f32.mrf.mxu3  ;;  %v2495_v31 = vpack.c.bf16 %v1368_v25, %v1367_v21  ;;  %v2615_v32 = vpack.c.bf16 %v1416_v26, %v1415_v22 }
  0xbd   :  { %v1123_v33 = vadd.f32 %v3255_v46, %v1122_v29  ;;  %v1248_v34 = vadd.f32 %v3255_v46, %v1247_v30 }
  0xbe   :  { %2977 = vst [vmem:[%s3941_s3 + $0x8] sm:$0xff] %v2495_v31  }
  0xbf   :  { %v1464_v41 = vmax.f32 %v1123_v33, 0.0  ;;  %v1514_v42 = vmax.f32 %v1248_v34, 0.0  ;;  %3001 = vst [vmem:[%s3941_s3 + $0xc8] sm:$0xff] %v2615_v32   ;;  %v885_v43 = vpop.f32.mrf.mxu0  ;;  %v1005_v44 = vpop.f32.mrf.mxu1 }
  0xc0   :  { %v886_v50 = vadd.f32 %v3255_v46, %v885_v43  ;;  %v1006_v51 = vadd.f32 %v3255_v46, %v1005_v44 }
  0xc1   :  { %v2735_v45 = vpack.c.bf16 %v1464_v41, %v1463_v39  ;;  %v2860_v47 = vpack.c.bf16 %v1514_v42, %v1513_v40  ;;  %1164 = vmatmul.bf16.gmra.mxu2 %v2439_v35  ;;  %1289 = vmatmul.bf16.gmra.mxu3 %v2464_v36  ;;  %v2441_v36 = vld [vmem:[%s3939_s0 + $0x1e0] sm:$0xff] }
  0xc2   :  { %924 = vmatmul.bf16.gmra.mxu0 %v2391_v37  ;;  %1044 = vmatmul.bf16.gmra.mxu1 %v2415_v38  ;;  %v1369_v54 = vmax.f32 %v886_v50, 0.0  ;;  %v1417_v55 = vmax.f32 %v1006_v51, 0.0  ;;  %v2466_v37 = vld [vmem:[%s3939_s0 + $0x2a8] sm:$0xff]  ;;  %v2393_v38 = vld [vmem:[%s3939_s0 + $0x60] sm:$0xff] }
  0xc3   :  { %3025 = vst [vmem:[%s3941_s3 + $0x188] sm:$0xff] %v2735_v45   ;;  %v2417_v39 = vld [vmem:[%s3939_s0 + $0x120] sm:$0xff] }
  0xc4   :  { %3050 = vst [vmem:[%s3941_s3 + $0x250] sm:$0xff] %v2860_v47   ;;  %v1125_v48 = vpop.f32.mrf.mxu2  ;;  %v1250_v49 = vpop.f32.mrf.mxu3 }
  0xc5   :  { %v1126_v60 = vadd.f32 %v3255_v46, %v1125_v48  ;;  %v1251_v61 = vadd.f32 %v3255_v46, %v1250_v49 }
  0xc7   :  { %v887_v52 = vpop.f32.mrf.mxu0  ;;  %v1007_v53 = vpop.f32.mrf.mxu1  ;;  %v1465_v8 = vmax.f32 %v1126_v60, 0.0  ;;  %v1515_v9 = vmax.f32 %v1251_v61, 0.0 }
  0xc8   :  { %v888_v56 = vadd.f32 %v3255_v46, %v887_v52  ;;  %v1008_v57 = vadd.f32 %v3255_v46, %v1007_v53 }
  0xca   :  { %v1370_v58 = vmax.f32 %v888_v56, 0.0  ;;  %v1418_v59 = vmax.f32 %v1008_v57, 0.0 }
  0xcc   :  { %v1127_v62 = vpop.f32.mrf.mxu2  ;;  %v1252_v63 = vpop.f32.mrf.mxu3  ;;  %v2500_v0 = vpack.c.bf16 %v1370_v58, %v1369_v54  ;;  %v2620_v1 = vpack.c.bf16 %v1418_v59, %v1417_v55 }
  0xcd   :  { %v1128_v2 = vadd.f32 %v3255_v46, %v1127_v62  ;;  %v1253_v3 = vadd.f32 %v3255_v46, %v1252_v63 }
  0xce   :  { %2978 = vst [vmem:[%s3941_s3 + $0x10] sm:$0xff] %v2500_v0  }
  0xcf   :  { %v1466_v10 = vmax.f32 %v1128_v2, 0.0  ;;  %v1516_v11 = vmax.f32 %v1253_v3, 0.0  ;;  %3002 = vst [vmem:[%s3941_s3 + $0xd0] sm:$0xff] %v2620_v1   ;;  %v890_v12 = vpop.f32.mrf.mxu0  ;;  %v1010_v13 = vpop.f32.mrf.mxu1 }
  0xd0   :  { %v891_v18 = vadd.f32 %v3255_v46, %v890_v12  ;;  %v1011_v19 = vadd.f32 %v3255_v46, %v1010_v13 }
  0xd1   :  { %v2740_v14 = vpack.c.bf16 %v1466_v10, %v1465_v8  ;;  %v2865_v15 = vpack.c.bf16 %v1516_v11, %v1515_v9  ;;  %1169 = vmatmul.bf16.gmra.mxu2 %v2440_v4  ;;  %1294 = vmatmul.bf16.gmra.mxu3 %v2465_v5  ;;  %v2442_v5 = vld [vmem:[%s3939_s0 + $0x1e8] sm:$0xff] }
  0xd2   :  { %929 = vmatmul.bf16.gmra.mxu0 %v2392_v6  ;;  %1049 = vmatmul.bf16.gmra.mxu1 %v2416_v7  ;;  %v1371_v22 = vmax.f32 %v891_v18, 0.0  ;;  %v1419_v23 = vmax.f32 %v1011_v19, 0.0  ;;  %v2467_v6 = vld [vmem:[%s3939_s0 + $0x2b0] sm:$0xff]  ;;  %v2394_v7 = vld [vmem:[%s3939_s0 + $0x68] sm:$0xff] }
  0xd3   :  { %3026 = vst [vmem:[%s3941_s3 + $0x190] sm:$0xff] %v2740_v14   ;;  %v2418_v8 = vld [vmem:[%s3939_s0 + $0x128] sm:$0xff] }
  0xd4   :  { %3051 = vst [vmem:[%s3941_s3 + $0x258] sm:$0xff] %v2865_v15   ;;  %v1130_v16 = vpop.f32.mrf.mxu2  ;;  %v1255_v17 = vpop.f32.mrf.mxu3 }
  0xd5   :  { %v1131_v28 = vadd.f32 %v3255_v46, %v1130_v16  ;;  %v1256_v29 = vadd.f32 %v3255_v46, %v1255_v17 }
  0xd7   :  { %v892_v20 = vpop.f32.mrf.mxu0  ;;  %v1012_v21 = vpop.f32.mrf.mxu1  ;;  %v1467_v40 = vmax.f32 %v1131_v28, 0.0  ;;  %v1517_v41 = vmax.f32 %v1256_v29, 0.0 }
  0xd8   :  { %v893_v24 = vadd.f32 %v3255_v46, %v892_v20  ;;  %v1013_v25 = vadd.f32 %v3255_v46, %v1012_v21 }
  0xda   :  { %v1372_v26 = vmax.f32 %v893_v24, 0.0  ;;  %v1420_v27 = vmax.f32 %v1013_v25, 0.0 }
  0xdc   :  { %v1132_v30 = vpop.f32.mrf.mxu2  ;;  %v1257_v31 = vpop.f32.mrf.mxu3  ;;  %v2505_v32 = vpack.c.bf16 %v1372_v26, %v1371_v22  ;;  %v2625_v33 = vpack.c.bf16 %v1420_v27, %v1419_v23 }
  0xdd   :  { %v1133_v34 = vadd.f32 %v3255_v46, %v1132_v30  ;;  %v1258_v35 = vadd.f32 %v3255_v46, %v1257_v31 }
  0xde   :  { %2979 = vst [vmem:[%s3941_s3 + $0x18] sm:$0xff] %v2505_v32  }
  0xdf   :  { %v1468_v42 = vmax.f32 %v1133_v34, 0.0  ;;  %v1518_v43 = vmax.f32 %v1258_v35, 0.0  ;;  %3003 = vst [vmem:[%s3941_s3 + $0xd8] sm:$0xff] %v2625_v33   ;;  %v895_v44 = vpop.f32.mrf.mxu0  ;;  %v1015_v45 = vpop.f32.mrf.mxu1 }
  0xe0   :  { %v896_v51 = vadd.f32 %v3255_v46, %v895_v44  ;;  %v1016_v52 = vadd.f32 %v3255_v46, %v1015_v45 }
  0xe1   :  { %v2745_v47 = vpack.c.bf16 %v1468_v42, %v1467_v40  ;;  %v2870_v48 = vpack.c.bf16 %v1518_v43, %v1517_v41  ;;  %1174 = vmatmul.bf16.gmra.mxu2 %v2441_v36  ;;  %1299 = vmatmul.bf16.gmra.mxu3 %v2466_v37  ;;  %v2443_v37 = vld [vmem:[%s3939_s0 + $0x1f0] sm:$0xff] }
  0xe2   :  { %934 = vmatmul.bf16.gmra.mxu0 %v2393_v38  ;;  %1054 = vmatmul.bf16.gmra.mxu1 %v2417_v39  ;;  %v1373_v55 = vmax.f32 %v896_v51, 0.0  ;;  %v1421_v56 = vmax.f32 %v1016_v52, 0.0  ;;  %v2468_v38 = vld [vmem:[%s3939_s0 + $0x2b8] sm:$0xff]  ;;  %v2395_v39 = vld [vmem:[%s3939_s0 + $0x70] sm:$0xff] }
  0xe3   :  { %3027 = vst [vmem:[%s3941_s3 + $0x198] sm:$0xff] %v2745_v47   ;;  %v2419_v40 = vld [vmem:[%s3939_s0 + $0x130] sm:$0xff] }
  0xe4   :  { %3052 = vst [vmem:[%s3941_s3 + $0x260] sm:$0xff] %v2870_v48   ;;  %v1135_v49 = vpop.f32.mrf.mxu2  ;;  %v1260_v50 = vpop.f32.mrf.mxu3 }
  0xe5   :  { %v1136_v61 = vadd.f32 %v3255_v46, %v1135_v49  ;;  %v1261_v62 = vadd.f32 %v3255_v46, %v1260_v50 }
  0xe7   :  { %v897_v53 = vpop.f32.mrf.mxu0  ;;  %v1017_v54 = vpop.f32.mrf.mxu1  ;;  %v1469_v9 = vmax.f32 %v1136_v61, 0.0  ;;  %v1519_v10 = vmax.f32 %v1261_v62, 0.0 }
  0xe8   :  { %v898_v57 = vadd.f32 %v3255_v46, %v897_v53  ;;  %v1018_v58 = vadd.f32 %v3255_v46, %v1017_v54 }
  0xea   :  { %v1374_v59 = vmax.f32 %v898_v57, 0.0  ;;  %v1422_v60 = vmax.f32 %v1018_v58, 0.0 }
  0xec   :  { %v1137_v63 = vpop.f32.mrf.mxu2  ;;  %v1262_v0 = vpop.f32.mrf.mxu3  ;;  %v2510_v1 = vpack.c.bf16 %v1374_v59, %v1373_v55  ;;  %v2630_v2 = vpack.c.bf16 %v1422_v60, %v1421_v56 }
  0xed   :  { %v1138_v3 = vadd.f32 %v3255_v46, %v1137_v63  ;;  %v1263_v4 = vadd.f32 %v3255_v46, %v1262_v0 }
  0xee   :  { %2980 = vst [vmem:[%s3941_s3 + $0x20] sm:$0xff] %v2510_v1  }
  0xef   :  { %v1470_v11 = vmax.f32 %v1138_v3, 0.0  ;;  %v1520_v12 = vmax.f32 %v1263_v4, 0.0  ;;  %3004 = vst [vmem:[%s3941_s3 + $0xe0] sm:$0xff] %v2630_v2   ;;  %v900_v13 = vpop.f32.mrf.mxu0  ;;  %v1020_v14 = vpop.f32.mrf.mxu1 }
  0xf0   :  { %v901_v19 = vadd.f32 %v3255_v46, %v900_v13  ;;  %v1021_v20 = vadd.f32 %v3255_v46, %v1020_v14 }
  0xf1   :  { %v2750_v15 = vpack.c.bf16 %v1470_v11, %v1469_v9  ;;  %v2875_v16 = vpack.c.bf16 %v1520_v12, %v1519_v10  ;;  %1179 = vmatmul.bf16.gmra.mxu2 %v2442_v5  ;;  %1304 = vmatmul.bf16.gmra.mxu3 %v2467_v6  ;;  %v2444_v6 = vld [vmem:[%s3939_s0 + $0x1f8] sm:$0xff] }
  0xf2   :  { %939 = vmatmul.bf16.gmra.mxu0 %v2394_v7  ;;  %1059 = vmatmul.bf16.gmra.mxu1 %v2418_v8  ;;  %v1375_v23 = vmax.f32 %v901_v19, 0.0  ;;  %v1423_v24 = vmax.f32 %v1021_v20, 0.0  ;;  %v2469_v7 = vld [vmem:[%s3939_s0 + $0x2c0] sm:$0xff]  ;;  %v2396_v8 = vld [vmem:[%s3939_s0 + $0x78] sm:$0xff] }
  0xf3   :  { %3028 = vst [vmem:[%s3941_s3 + $0x1a0] sm:$0xff] %v2750_v15   ;;  %v2420_v9 = vld [vmem:[%s3939_s0 + $0x138] sm:$0xff] }
  0xf4   :  { %3053 = vst [vmem:[%s3941_s3 + $0x268] sm:$0xff] %v2875_v16   ;;  %v1140_v17 = vpop.f32.mrf.mxu2  ;;  %v1265_v18 = vpop.f32.mrf.mxu3 }
  0xf5   :  { %v1141_v29 = vadd.f32 %v3255_v46, %v1140_v17  ;;  %v1266_v30 = vadd.f32 %v3255_v46, %v1265_v18 }
  0xf7   :  { %v902_v21 = vpop.f32.mrf.mxu0  ;;  %v1022_v22 = vpop.f32.mrf.mxu1  ;;  %v1471_v41 = vmax.f32 %v1141_v29, 0.0  ;;  %v1521_v42 = vmax.f32 %v1266_v30, 0.0 }
  0xf8   :  { %v903_v25 = vadd.f32 %v3255_v46, %v902_v21  ;;  %v1023_v26 = vadd.f32 %v3255_v46, %v1022_v22 }
  0xfa   :  { %v1376_v27 = vmax.f32 %v903_v25, 0.0  ;;  %v1424_v28 = vmax.f32 %v1023_v26, 0.0 }
  0xfc   :  { %v1142_v31 = vpop.f32.mrf.mxu2  ;;  %v1267_v32 = vpop.f32.mrf.mxu3  ;;  %v2515_v33 = vpack.c.bf16 %v1376_v27, %v1375_v23  ;;  %v2635_v34 = vpack.c.bf16 %v1424_v28, %v1423_v24 }
  0xfd   :  { %v1143_v35 = vadd.f32 %v3255_v46, %v1142_v31  ;;  %v1268_v36 = vadd.f32 %v3255_v46, %v1267_v32 }
  0xfe   :  { %2981 = vst [vmem:[%s3941_s3 + $0x28] sm:$0xff] %v2515_v33  }
  0xff   :  { %v1472_v43 = vmax.f32 %v1143_v35, 0.0  ;;  %v1522_v44 = vmax.f32 %v1268_v36, 0.0  ;;  %3005 = vst [vmem:[%s3941_s3 + $0xe8] sm:$0xff] %v2635_v34   ;;  %v905_v45 = vpop.f32.mrf.mxu0  ;;  %v1025_v47 = vpop.f32.mrf.mxu1 }
 0x100   :  { %v906_v52 = vadd.f32 %v3255_v46, %v905_v45  ;;  %v1026_v53 = vadd.f32 %v3255_v46, %v1025_v47 }
 0x101   :  { %v2755_v48 = vpack.c.bf16 %v1472_v43, %v1471_v41  ;;  %v2880_v49 = vpack.c.bf16 %v1522_v44, %v1521_v42  ;;  %1184 = vmatmul.bf16.gmra.mxu2 %v2443_v37  ;;  %1309 = vmatmul.bf16.gmra.mxu3 %v2468_v38  ;;  %v2445_v38 = vld [vmem:[%s3939_s0 + $0x200] sm:$0xff] }
 0x102   :  { %944 = vmatmul.bf16.gmra.mxu0 %v2395_v39  ;;  %1064 = vmatmul.bf16.gmra.mxu1 %v2419_v40  ;;  %v1377_v56 = vmax.f32 %v906_v52, 0.0  ;;  %v1425_v57 = vmax.f32 %v1026_v53, 0.0  ;;  %v2470_v39 = vld [vmem:[%s3939_s0 + $0x2c8] sm:$0xff]  ;;  %v2397_v40 = vld [vmem:[%s3939_s0 + $0x80] sm:$0xff] }
 0x103   :  { %3029 = vst [vmem:[%s3941_s3 + $0x1a8] sm:$0xff] %v2755_v48   ;;  %v2421_v41 = vld [vmem:[%s3939_s0 + $0x140] sm:$0xff] }
 0x104   :  { %3054 = vst [vmem:[%s3941_s3 + $0x270] sm:$0xff] %v2880_v49   ;;  %v1145_v50 = vpop.f32.mrf.mxu2  ;;  %v1270_v51 = vpop.f32.mrf.mxu3 }
 0x105   :  { %v1146_v62 = vadd.f32 %v3255_v46, %v1145_v50  ;;  %v1271_v63 = vadd.f32 %v3255_v46, %v1270_v51 }
 0x107   :  { %v907_v54 = vpop.f32.mrf.mxu0  ;;  %v1027_v55 = vpop.f32.mrf.mxu1  ;;  %v1473_v10 = vmax.f32 %v1146_v62, 0.0  ;;  %v1523_v11 = vmax.f32 %v1271_v63, 0.0 }
 0x108   :  { %v908_v58 = vadd.f32 %v3255_v46, %v907_v54  ;;  %v1028_v59 = vadd.f32 %v3255_v46, %v1027_v55 }
 0x10a   :  { %v1378_v60 = vmax.f32 %v908_v58, 0.0  ;;  %v1426_v61 = vmax.f32 %v1028_v59, 0.0 }
 0x10c   :  { %v1147_v0 = vpop.f32.mrf.mxu2  ;;  %v1272_v1 = vpop.f32.mrf.mxu3  ;;  %v2520_v2 = vpack.c.bf16 %v1378_v60, %v1377_v56  ;;  %v2640_v3 = vpack.c.bf16 %v1426_v61, %v1425_v57 }
 0x10d   :  { %v1148_v4 = vadd.f32 %v3255_v46, %v1147_v0  ;;  %v1273_v5 = vadd.f32 %v3255_v46, %v1272_v1 }
 0x10e   :  { %2982 = vst [vmem:[%s3941_s3 + $0x30] sm:$0xff] %v2520_v2  }
 0x10f   :  { %v1474_v12 = vmax.f32 %v1148_v4, 0.0  ;;  %v1524_v13 = vmax.f32 %v1273_v5, 0.0  ;;  %3006 = vst [vmem:[%s3941_s3 + $0xf0] sm:$0xff] %v2640_v3   ;;  %v910_v14 = vpop.f32.mrf.mxu0  ;;  %v1030_v15 = vpop.f32.mrf.mxu1 }
 0x110   :  { %v911_v20 = vadd.f32 %v3255_v46, %v910_v14  ;;  %v1031_v21 = vadd.f32 %v3255_v46, %v1030_v15 }
 0x111   :  { %v2760_v16 = vpack.c.bf16 %v1474_v12, %v1473_v10  ;;  %v2885_v17 = vpack.c.bf16 %v1524_v13, %v1523_v11  ;;  %1189 = vmatmul.bf16.gmra.mxu2 %v2444_v6  ;;  %1314 = vmatmul.bf16.gmra.mxu3 %v2469_v7  ;;  %v2446_v7 = vld [vmem:[%s3939_s0 + $0x208] sm:$0xff] }
 0x112   :  { %949 = vmatmul.bf16.gmra.mxu0 %v2396_v8  ;;  %1069 = vmatmul.bf16.gmra.mxu1 %v2420_v9  ;;  %v1379_v24 = vmax.f32 %v911_v20, 0.0  ;;  %v1427_v25 = vmax.f32 %v1031_v21, 0.0  ;;  %v2471_v8 = vld [vmem:[%s3939_s0 + $0x2d0] sm:$0xff]  ;;  %v2398_v9 = vld [vmem:[%s3939_s0 + $0x88] sm:$0xff] }
 0x113   :  { %3030 = vst [vmem:[%s3941_s3 + $0x1b0] sm:$0xff] %v2760_v16   ;;  %v2422_v10 = vld [vmem:[%s3939_s0 + $0x148] sm:$0xff] }
 0x114   :  { %3055 = vst [vmem:[%s3941_s3 + $0x278] sm:$0xff] %v2885_v17   ;;  %v1150_v18 = vpop.f32.mrf.mxu2  ;;  %v1275_v19 = vpop.f32.mrf.mxu3 }
 0x115   :  { %v1151_v30 = vadd.f32 %v3255_v46, %v1150_v18  ;;  %v1276_v31 = vadd.f32 %v3255_v46, %v1275_v19 }
 0x117   :  { %v912_v22 = vpop.f32.mrf.mxu0  ;;  %v1032_v23 = vpop.f32.mrf.mxu1  ;;  %v1475_v42 = vmax.f32 %v1151_v30, 0.0  ;;  %v1525_v43 = vmax.f32 %v1276_v31, 0.0 }
 0x118   :  { %v913_v26 = vadd.f32 %v3255_v46, %v912_v22  ;;  %v1033_v27 = vadd.f32 %v3255_v46, %v1032_v23 }
 0x11a   :  { %v1380_v28 = vmax.f32 %v913_v26, 0.0  ;;  %v1428_v29 = vmax.f32 %v1033_v27, 0.0 }
 0x11c   :  { %v1152_v32 = vpop.f32.mrf.mxu2  ;;  %v1277_v33 = vpop.f32.mrf.mxu3  ;;  %v2525_v34 = vpack.c.bf16 %v1380_v28, %v1379_v24  ;;  %v2645_v35 = vpack.c.bf16 %v1428_v29, %v1427_v25 }
 0x11d   :  { %v1153_v36 = vadd.f32 %v3255_v46, %v1152_v32  ;;  %v1278_v37 = vadd.f32 %v3255_v46, %v1277_v33 }
 0x11e   :  { %2983 = vst [vmem:[%s3941_s3 + $0x38] sm:$0xff] %v2525_v34  }
 0x11f   :  { %v1476_v44 = vmax.f32 %v1153_v36, 0.0  ;;  %v1526_v45 = vmax.f32 %v1278_v37, 0.0  ;;  %3007 = vst [vmem:[%s3941_s3 + $0xf8] sm:$0xff] %v2645_v35   ;;  %v915_v47 = vpop.f32.mrf.mxu0  ;;  %v1035_v48 = vpop.f32.mrf.mxu1 }
 0x120   :  { %v916_v53 = vadd.f32 %v3255_v46, %v915_v47  ;;  %v1036_v54 = vadd.f32 %v3255_v46, %v1035_v48 }
 0x121   :  { %v2765_v49 = vpack.c.bf16 %v1476_v44, %v1475_v42  ;;  %v2890_v50 = vpack.c.bf16 %v1526_v45, %v1525_v43  ;;  %1194 = vmatmul.bf16.gmra.mxu2 %v2445_v38  ;;  %1319 = vmatmul.bf16.gmra.mxu3 %v2470_v39  ;;  %v2447_v39 = vld [vmem:[%s3939_s0 + $0x210] sm:$0xff] }
 0x122   :  { %954 = vmatmul.bf16.gmra.mxu0 %v2397_v40  ;;  %1074 = vmatmul.bf16.gmra.mxu1 %v2421_v41  ;;  %v1381_v57 = vmax.f32 %v916_v53, 0.0  ;;  %v1429_v58 = vmax.f32 %v1036_v54, 0.0  ;;  %v2472_v40 = vld [vmem:[%s3939_s0 + $0x2d8] sm:$0xff]  ;;  %v2399_v41 = vld [vmem:[%s3939_s0 + $0x90] sm:$0xff] }
 0x123   :  { %3031 = vst [vmem:[%s3941_s3 + $0x1b8] sm:$0xff] %v2765_v49   ;;  %v2423_v42 = vld [vmem:[%s3939_s0 + $0x150] sm:$0xff] }
 0x124   :  { %3056 = vst [vmem:[%s3941_s3 + $0x280] sm:$0xff] %v2890_v50   ;;  %v1155_v51 = vpop.f32.mrf.mxu2  ;;  %v1280_v52 = vpop.f32.mrf.mxu3 }
 0x125   :  { %v1156_v63 = vadd.f32 %v3255_v46, %v1155_v51  ;;  %v1281_v0 = vadd.f32 %v3255_v46, %v1280_v52 }
 0x127   :  { %v917_v55 = vpop.f32.mrf.mxu0  ;;  %v1037_v56 = vpop.f32.mrf.mxu1  ;;  %v1477_v11 = vmax.f32 %v1156_v63, 0.0  ;;  %v1527_v12 = vmax.f32 %v1281_v0, 0.0 }
 0x128   :  { %v918_v59 = vadd.f32 %v3255_v46, %v917_v55  ;;  %v1038_v60 = vadd.f32 %v3255_v46, %v1037_v56 }
 0x12a   :  { %v1382_v61 = vmax.f32 %v918_v59, 0.0  ;;  %v1430_v62 = vmax.f32 %v1038_v60, 0.0 }
 0x12c   :  { %v1157_v1 = vpop.f32.mrf.mxu2  ;;  %v1282_v2 = vpop.f32.mrf.mxu3  ;;  %v2530_v3 = vpack.c.bf16 %v1382_v61, %v1381_v57  ;;  %v2650_v4 = vpack.c.bf16 %v1430_v62, %v1429_v58 }
 0x12d   :  { %v1158_v5 = vadd.f32 %v3255_v46, %v1157_v1  ;;  %v1283_v6 = vadd.f32 %v3255_v46, %v1282_v2 }
 0x12e   :  { %2984 = vst [vmem:[%s3941_s3 + $0x40] sm:$0xff] %v2530_v3  }
 0x12f   :  { %v1478_v13 = vmax.f32 %v1158_v5, 0.0  ;;  %v1528_v14 = vmax.f32 %v1283_v6, 0.0  ;;  %3008 = vst [vmem:[%s3941_s3 + $0x100] sm:$0xff] %v2650_v4   ;;  %v920_v15 = vpop.f32.mrf.mxu0  ;;  %v1040_v16 = vpop.f32.mrf.mxu1 }
 0x130   :  { %v921_v21 = vadd.f32 %v3255_v46, %v920_v15  ;;  %v1041_v22 = vadd.f32 %v3255_v46, %v1040_v16 }
 0x131   :  { %v2770_v17 = vpack.c.bf16 %v1478_v13, %v1477_v11  ;;  %v2895_v18 = vpack.c.bf16 %v1528_v14, %v1527_v12  ;;  %1199 = vmatmul.bf16.gmra.mxu2 %v2446_v7  ;;  %1324 = vmatmul.bf16.gmra.mxu3 %v2471_v8  ;;  %v2448_v8 = vld [vmem:[%s3939_s0 + $0x218] sm:$0xff] }
 0x132   :  { %959 = vmatmul.bf16.gmra.mxu0 %v2398_v9  ;;  %1079 = vmatmul.bf16.gmra.mxu1 %v2422_v10  ;;  %v1383_v25 = vmax.f32 %v921_v21, 0.0  ;;  %v1431_v26 = vmax.f32 %v1041_v22, 0.0  ;;  %v2473_v9 = vld [vmem:[%s3939_s0 + $0x2e0] sm:$0xff]  ;;  %v2400_v10 = vld [vmem:[%s3939_s0 + $0x98] sm:$0xff] }
 0x133   :  { %3032 = vst [vmem:[%s3941_s3 + $0x1c0] sm:$0xff] %v2770_v17   ;;  %v2424_v11 = vld [vmem:[%s3939_s0 + $0x158] sm:$0xff] }
 0x134   :  { %3057 = vst [vmem:[%s3941_s3 + $0x288] sm:$0xff] %v2895_v18   ;;  %v1160_v19 = vpop.f32.mrf.mxu2  ;;  %v1285_v20 = vpop.f32.mrf.mxu3 }
 0x135   :  { %v1161_v31 = vadd.f32 %v3255_v46, %v1160_v19  ;;  %v1286_v32 = vadd.f32 %v3255_v46, %v1285_v20 }
 0x137   :  { %v922_v23 = vpop.f32.mrf.mxu0  ;;  %v1042_v24 = vpop.f32.mrf.mxu1  ;;  %v1479_v43 = vmax.f32 %v1161_v31, 0.0  ;;  %v1529_v44 = vmax.f32 %v1286_v32, 0.0 }
 0x138   :  { %v923_v27 = vadd.f32 %v3255_v46, %v922_v23  ;;  %v1043_v28 = vadd.f32 %v3255_v46, %v1042_v24 }
 0x13a   :  { %v1384_v29 = vmax.f32 %v923_v27, 0.0  ;;  %v1432_v30 = vmax.f32 %v1043_v28, 0.0 }
 0x13c   :  { %v1162_v33 = vpop.f32.mrf.mxu2  ;;  %v1287_v34 = vpop.f32.mrf.mxu3  ;;  %v2535_v35 = vpack.c.bf16 %v1384_v29, %v1383_v25  ;;  %v2655_v36 = vpack.c.bf16 %v1432_v30, %v1431_v26 }
 0x13d   :  { %v1163_v37 = vadd.f32 %v3255_v46, %v1162_v33  ;;  %v1288_v38 = vadd.f32 %v3255_v46, %v1287_v34 }
 0x13e   :  { %2985 = vst [vmem:[%s3941_s3 + $0x48] sm:$0xff] %v2535_v35  }
 0x13f   :  { %v1480_v45 = vmax.f32 %v1163_v37, 0.0  ;;  %v1530_v47 = vmax.f32 %v1288_v38, 0.0  ;;  %3009 = vst [vmem:[%s3941_s3 + $0x108] sm:$0xff] %v2655_v36   ;;  %v925_v48 = vpop.f32.mrf.mxu0  ;;  %v1045_v49 = vpop.f32.mrf.mxu1 }
 0x140   :  { %v926_v54 = vadd.f32 %v3255_v46, %v925_v48  ;;  %v1046_v55 = vadd.f32 %v3255_v46, %v1045_v49 }
 0x141   :  { %v2775_v50 = vpack.c.bf16 %v1480_v45, %v1479_v43  ;;  %v2900_v51 = vpack.c.bf16 %v1530_v47, %v1529_v44  ;;  %1204 = vmatmul.bf16.gmra.mxu2 %v2447_v39  ;;  %1329 = vmatmul.bf16.gmra.mxu3 %v2472_v40  ;;  %v2449_v40 = vld [vmem:[%s3939_s0 + $0x220] sm:$0xff] }
 0x142   :  { %964 = vmatmul.bf16.gmra.mxu0 %v2399_v41  ;;  %1084 = vmatmul.bf16.gmra.mxu1 %v2423_v42  ;;  %v1385_v58 = vmax.f32 %v926_v54, 0.0  ;;  %v1433_v59 = vmax.f32 %v1046_v55, 0.0  ;;  %v2474_v41 = vld [vmem:[%s3939_s0 + $0x2e8] sm:$0xff]  ;;  %v2401_v42 = vld [vmem:[%s3939_s0 + $0xa0] sm:$0xff] }
 0x143   :  { %3033 = vst [vmem:[%s3941_s3 + $0x1c8] sm:$0xff] %v2775_v50   ;;  %v2425_v43 = vld [vmem:[%s3939_s0 + $0x160] sm:$0xff] }
 0x144   :  { %3058 = vst [vmem:[%s3941_s3 + $0x290] sm:$0xff] %v2900_v51   ;;  %v1165_v52 = vpop.f32.mrf.mxu2  ;;  %v1290_v53 = vpop.f32.mrf.mxu3 }
 0x145   :  { %v1166_v0 = vadd.f32 %v3255_v46, %v1165_v52  ;;  %v1291_v1 = vadd.f32 %v3255_v46, %v1290_v53 }
 0x147   :  { %v927_v56 = vpop.f32.mrf.mxu0  ;;  %v1047_v57 = vpop.f32.mrf.mxu1  ;;  %v1481_v12 = vmax.f32 %v1166_v0, 0.0  ;;  %v1531_v13 = vmax.f32 %v1291_v1, 0.0 }
 0x148   :  { %v928_v60 = vadd.f32 %v3255_v46, %v927_v56  ;;  %v1048_v61 = vadd.f32 %v3255_v46, %v1047_v57 }
 0x14a   :  { %v1386_v62 = vmax.f32 %v928_v60, 0.0  ;;  %v1434_v63 = vmax.f32 %v1048_v61, 0.0 }
 0x14c   :  { %v1167_v2 = vpop.f32.mrf.mxu2  ;;  %v1292_v3 = vpop.f32.mrf.mxu3  ;;  %v2540_v4 = vpack.c.bf16 %v1386_v62, %v1385_v58  ;;  %v2660_v5 = vpack.c.bf16 %v1434_v63, %v1433_v59 }
 0x14d   :  { %v1168_v6 = vadd.f32 %v3255_v46, %v1167_v2  ;;  %v1293_v7 = vadd.f32 %v3255_v46, %v1292_v3 }
 0x14e   :  { %2986 = vst [vmem:[%s3941_s3 + $0x50] sm:$0xff] %v2540_v4  }
 0x14f   :  { %v1482_v14 = vmax.f32 %v1168_v6, 0.0  ;;  %v1532_v15 = vmax.f32 %v1293_v7, 0.0  ;;  %3010 = vst [vmem:[%s3941_s3 + $0x110] sm:$0xff] %v2660_v5   ;;  %v930_v16 = vpop.f32.mrf.mxu0  ;;  %v1050_v17 = vpop.f32.mrf.mxu1 }
 0x150   :  { %v931_v22 = vadd.f32 %v3255_v46, %v930_v16  ;;  %v1051_v23 = vadd.f32 %v3255_v46, %v1050_v17 }
 0x151   :  { %v2780_v18 = vpack.c.bf16 %v1482_v14, %v1481_v12  ;;  %v2905_v19 = vpack.c.bf16 %v1532_v15, %v1531_v13  ;;  %1209 = vmatmul.bf16.gmra.mxu2 %v2448_v8  ;;  %1334 = vmatmul.bf16.gmra.mxu3 %v2473_v9  ;;  %v2450_v9 = vld [vmem:[%s3939_s0 + $0x228] sm:$0xff] }
 0x152   :  { %969 = vmatmul.bf16.gmra.mxu0 %v2400_v10  ;;  %1089 = vmatmul.bf16.gmra.mxu1 %v2424_v11  ;;  %v1387_v26 = vmax.f32 %v931_v22, 0.0  ;;  %v1435_v27 = vmax.f32 %v1051_v23, 0.0  ;;  %v2475_v10 = vld [vmem:[%s3939_s0 + $0x2f0] sm:$0xff]  ;;  %v2402_v11 = vld [vmem:[%s3939_s0 + $0xa8] sm:$0xff]  ;;  %v3676_v22 = vld [vmem:[%s3940_s2] ss:$0 sm:$0xff] }
 0x153   :  { %3034 = vst [vmem:[%s3941_s3 + $0x1d0] sm:$0xff] %v2780_v18  }
 0x154   :  { %3059 = vst [vmem:[%s3941_s3 + $0x298] sm:$0xff] %v2905_v19   ;;  %v1170_v20 = vpop.f32.mrf.mxu2  ;;  %v1295_v21 = vpop.f32.mrf.mxu3 }
 0x155   :  { %v1171_v32 = vadd.f32 %v3255_v46, %v1170_v20  ;;  %v1296_v33 = vadd.f32 %v3255_v46, %v1295_v21 }
 0x157   :  { %v932_v24 = vpop.f32.mrf.mxu0  ;;  %v1052_v25 = vpop.f32.mrf.mxu1  ;;  %v1483_v44 = vmax.f32 %v1171_v32, 0.0  ;;  %v1533_v45 = vmax.f32 %v1296_v33, 0.0 }
 0x158   :  { %v933_v28 = vadd.f32 %v3255_v46, %v932_v24  ;;  %v1053_v29 = vadd.f32 %v3255_v46, %v1052_v25 }
 0x15a   :  { %v1388_v30 = vmax.f32 %v933_v28, 0.0  ;;  %v1436_v31 = vmax.f32 %v1053_v29, 0.0 }
 0x15c   :  { %v1172_v34 = vpop.f32.mrf.mxu2  ;;  %v1297_v35 = vpop.f32.mrf.mxu3  ;;  %v2545_v36 = vpack.c.bf16 %v1388_v30, %v1387_v26  ;;  %v2665_v37 = vpack.c.bf16 %v1436_v31, %v1435_v27 }
 0x15d   :  { %v1173_v38 = vadd.f32 %v3255_v46, %v1172_v34  ;;  %v1298_v39 = vadd.f32 %v3255_v46, %v1297_v35 }
 0x15e   :  { %2987 = vst [vmem:[%s3941_s3 + $0x58] sm:$0xff] %v2545_v36  }
 0x15f   :  { %v1484_v47 = vmax.f32 %v1173_v38, 0.0  ;;  %v1534_v48 = vmax.f32 %v1298_v39, 0.0  ;;  %3011 = vst [vmem:[%s3941_s3 + $0x118] sm:$0xff] %v2665_v37   ;;  %v935_v49 = vpop.f32.mrf.mxu0  ;;  %v1055_v50 = vpop.f32.mrf.mxu1 }
 0x160   :  { %v936_v55 = vadd.f32 %v3255_v46, %v935_v49  ;;  %v1056_v56 = vadd.f32 %v3255_v46, %v1055_v50 }
 0x161   :  { %v2785_v51 = vpack.c.bf16 %v1484_v47, %v1483_v44  ;;  %v2910_v52 = vpack.c.bf16 %v1534_v48, %v1533_v45  ;;  %1214 = vmatmul.bf16.gmra.mxu2 %v2449_v40  ;;  %1339 = vmatmul.bf16.gmra.mxu3 %v2474_v41  ;;  %v2451_v41 = vld [vmem:[%s3939_s0 + $0x230] sm:$0xff] }
 0x162   :  { %974 = vmatmul.bf16.gmra.mxu0 %v2401_v42  ;;  %1094 = vmatmul.bf16.gmra.mxu1 %v2425_v43  ;;  %v1389_v59 = vmax.f32 %v936_v55, 0.0  ;;  %v1437_v60 = vmax.f32 %v1056_v56, 0.0  ;;  %v2476_v42 = vld [vmem:[%s3939_s0 + $0x2f8] sm:$0xff]  ;;  %v2403_v43 = vld [vmem:[%s3939_s0 + $0xb0] sm:$0xff] }
 0x163   :  { %3035 = vst [vmem:[%s3941_s3 + $0x1d8] sm:$0xff] %v2785_v51   ;;  %v2427_v44 = vld [vmem:[%s3939_s0 + $0x170] sm:$0xff] }
 0x164   :  { %3060 = vst [vmem:[%s3941_s3 + $0x2a0] sm:$0xff] %v2910_v52   ;;  %v1175_v53 = vpop.f32.mrf.mxu2  ;;  %v1300_v54 = vpop.f32.mrf.mxu3 }
 0x165   :  { %v1176_v1 = vadd.f32 %v3255_v46, %v1175_v53  ;;  %v1301_v2 = vadd.f32 %v3255_v46, %v1300_v54 }
 0x167   :  { %v937_v57 = vpop.f32.mrf.mxu0  ;;  %v1057_v58 = vpop.f32.mrf.mxu1  ;;  %v1485_v12 = vmax.f32 %v1176_v1, 0.0  ;;  %v1535_v13 = vmax.f32 %v1301_v2, 0.0 }
 0x168   :  { %v938_v61 = vadd.f32 %v3255_v46, %v937_v57  ;;  %v1058_v62 = vadd.f32 %v3255_v46, %v1057_v58 }
 0x16a   :  { %v1390_v63 = vmax.f32 %v938_v61, 0.0  ;;  %v1438_v0 = vmax.f32 %v1058_v62, 0.0 }
 0x16c   :  { %v1177_v3 = vpop.f32.mrf.mxu2  ;;  %v1302_v4 = vpop.f32.mrf.mxu3  ;;  %v2550_v5 = vpack.c.bf16 %v1390_v63, %v1389_v59  ;;  %v2670_v6 = vpack.c.bf16 %v1438_v0, %v1437_v60 }
 0x16d   :  { %v1178_v7 = vadd.f32 %v3255_v46, %v1177_v3  ;;  %v1303_v8 = vadd.f32 %v3255_v46, %v1302_v4  ;;  %v2426_v46 = vld [vmem:[%s3939_s0 + $0x168] sm:$0xff] }
 0x16e   :  { %2988 = vst [vmem:[%s3941_s3 + $0x60] sm:$0xff] %v2550_v5  }
 0x16f   :  { %v1486_v14 = vmax.f32 %v1178_v7, 0.0  ;;  %v1536_v15 = vmax.f32 %v1303_v8, 0.0  ;;  %3012 = vst [vmem:[%s3941_s3 + $0x120] sm:$0xff] %v2670_v6   ;;  %v940_v16 = vpop.f32.mrf.mxu0  ;;  %v1060_v17 = vpop.f32.mrf.mxu1 }
 0x170   :  { %v941_v23 = vadd.f32 %v3676_v22, %v940_v16  ;;  %v1061_v24 = vadd.f32 %v3676_v22, %v1060_v17 }
 0x171   :  { %v2790_v18 = vpack.c.bf16 %v1486_v14, %v1485_v12  ;;  %v2915_v19 = vpack.c.bf16 %v1536_v15, %v1535_v13  ;;  %1219 = vmatmul.bf16.gmra.mxu2 %v2450_v9  ;;  %1344 = vmatmul.bf16.gmra.mxu3 %v2475_v10  ;;  %v2452_v10 = vld [vmem:[%s3939_s0 + $0x238] sm:$0xff] }
 0x172   :  { %979 = vmatmul.bf16.gmra.mxu0 %v2402_v11  ;;  %1099 = vmatmul.bf16.gmra.mxu1 %v2426_v46  ;;  %v1391_v27 = vmax.f32 %v941_v23, 0.0  ;;  %v1439_v28 = vmax.f32 %v1061_v24, 0.0  ;;  %v2477_v11 = vld [vmem:[%s3939_s0 + $0x300] sm:$0xff]  ;;  %v2404_v46 = vld [vmem:[%s3939_s0 + $0xb8] sm:$0xff] }
 0x173   :  { %3036 = vst [vmem:[%s3941_s3 + $0x1e0] sm:$0xff] %v2790_v18   ;;  %v2428_v12 = vld [vmem:[%s3939_s0 + $0x178] sm:$0xff] }
 0x174   :  { %3061 = vst [vmem:[%s3941_s3 + $0x2a8] sm:$0xff] %v2915_v19   ;;  %v1180_v20 = vpop.f32.mrf.mxu2  ;;  %v1305_v21 = vpop.f32.mrf.mxu3 }
 0x175   :  { %v1181_v33 = vadd.f32 %v3676_v22, %v1180_v20  ;;  %v1306_v34 = vadd.f32 %v3676_v22, %v1305_v21 }
 0x177   :  { %v942_v25 = vpop.f32.mrf.mxu0  ;;  %v1062_v26 = vpop.f32.mrf.mxu1  ;;  %v1487_v45 = vmax.f32 %v1181_v33, 0.0  ;;  %v1537_v47 = vmax.f32 %v1306_v34, 0.0 }
 0x178   :  { %v943_v29 = vadd.f32 %v3676_v22, %v942_v25  ;;  %v1063_v30 = vadd.f32 %v3676_v22, %v1062_v26 }
 0x17a   :  { %v1392_v31 = vmax.f32 %v943_v29, 0.0  ;;  %v1440_v32 = vmax.f32 %v1063_v30, 0.0 }
 0x17c   :  { %v1182_v35 = vpop.f32.mrf.mxu2  ;;  %v1307_v36 = vpop.f32.mrf.mxu3  ;;  %v2555_v37 = vpack.c.bf16 %v1392_v31, %v1391_v27  ;;  %v2675_v38 = vpack.c.bf16 %v1440_v32, %v1439_v28 }
 0x17d   :  { %v1183_v39 = vadd.f32 %v3676_v22, %v1182_v35  ;;  %v1308_v40 = vadd.f32 %v3676_v22, %v1307_v36 }
 0x17e   :  { %2989 = vst [vmem:[%s3941_s3 + $0x68] sm:$0xff] %v2555_v37  }
 0x17f   :  { %v1488_v48 = vmax.f32 %v1183_v39, 0.0  ;;  %v1538_v49 = vmax.f32 %v1308_v40, 0.0  ;;  %3013 = vst [vmem:[%s3941_s3 + $0x128] sm:$0xff] %v2675_v38   ;;  %v945_v50 = vpop.f32.mrf.mxu0  ;;  %v1065_v51 = vpop.f32.mrf.mxu1 }
 0x180   :  { %v946_v56 = vadd.f32 %v3676_v22, %v945_v50  ;;  %v1066_v57 = vadd.f32 %v3676_v22, %v1065_v51 }
 0x181   :  { %v2795_v52 = vpack.c.bf16 %v1488_v48, %v1487_v45  ;;  %v2920_v53 = vpack.c.bf16 %v1538_v49, %v1537_v47  ;;  %1224 = vmatmul.bf16.gmra.mxu2 %v2451_v41  ;;  %1349 = vmatmul.bf16.gmra.mxu3 %v2476_v42  ;;  %v2453_v42 = vld [vmem:[%s3939_s0 + $0x240] sm:$0xff] }
 0x182   :  { %984 = vmatmul.bf16.gmra.mxu0 %v2403_v43  ;;  %1104 = vmatmul.bf16.gmra.mxu1 %v2427_v44  ;;  %v1393_v60 = vmax.f32 %v946_v56, 0.0  ;;  %v1441_v61 = vmax.f32 %v1066_v57, 0.0  ;;  %v2478_v43 = vld [vmem:[%s3939_s0 + $0x308] sm:$0xff] }
 0x183   :  { %3037 = vst [vmem:[%s3941_s3 + $0x1e8] sm:$0xff] %v2795_v52  }
 0x184   :  { %3062 = vst [vmem:[%s3941_s3 + $0x2b0] sm:$0xff] %v2920_v53   ;;  %v1185_v54 = vpop.f32.mrf.mxu2  ;;  %v1310_v55 = vpop.f32.mrf.mxu3 }
 0x185   :  { %v1186_v2 = vadd.f32 %v3676_v22, %v1185_v54  ;;  %v1311_v3 = vadd.f32 %v3676_v22, %v1310_v55 }
 0x187   :  { %v947_v58 = vpop.f32.mrf.mxu0  ;;  %v1067_v59 = vpop.f32.mrf.mxu1  ;;  %v1489_v13 = vmax.f32 %v1186_v2, 0.0  ;;  %v1539_v14 = vmax.f32 %v1311_v3, 0.0 }
 0x188   :  { %v948_v62 = vadd.f32 %v3676_v22, %v947_v58  ;;  %v1068_v63 = vadd.f32 %v3676_v22, %v1067_v59 }
 0x18a   :  { %v1394_v0 = vmax.f32 %v948_v62, 0.0  ;;  %v1442_v1 = vmax.f32 %v1068_v63, 0.0 }
 0x18c   :  { %v1187_v4 = vpop.f32.mrf.mxu2  ;;  %v1312_v5 = vpop.f32.mrf.mxu3  ;;  %v2560_v6 = vpack.c.bf16 %v1394_v0, %v1393_v60  ;;  %v2680_v7 = vpack.c.bf16 %v1442_v1, %v1441_v61 }
 0x18d   :  { %v1188_v8 = vadd.f32 %v3676_v22, %v1187_v4  ;;  %v1313_v9 = vadd.f32 %v3676_v22, %v1312_v5 }
 0x18e   :  { %2990 = vst [vmem:[%s3941_s3 + $0x70] sm:$0xff] %v2560_v6  }
 0x18f   :  { %v1490_v15 = vmax.f32 %v1188_v8, 0.0  ;;  %v1540_v16 = vmax.f32 %v1313_v9, 0.0  ;;  %3014 = vst [vmem:[%s3941_s3 + $0x130] sm:$0xff] %v2680_v7   ;;  %v950_v17 = vpop.f32.mrf.mxu0  ;;  %v1070_v18 = vpop.f32.mrf.mxu1 }
 0x190   :  { %v951_v24 = vadd.f32 %v3676_v22, %v950_v17  ;;  %v1071_v25 = vadd.f32 %v3676_v22, %v1070_v18 }
 0x191   :  { %v2800_v19 = vpack.c.bf16 %v1490_v15, %v1489_v13  ;;  %v2925_v20 = vpack.c.bf16 %v1540_v16, %v1539_v14  ;;  %1229 = vmatmul.bf16.gmra.mxu2 %v2452_v10  ;;  %1354 = vmatmul.bf16.gmra.mxu3 %v2477_v11 }
 0x192   :  { %989 = vmatmul.bf16.gmra.mxu0 %v2404_v46  ;;  %1109 = vmatmul.bf16.gmra.mxu1 %v2428_v12  ;;  %v1395_v28 = vmax.f32 %v951_v24, 0.0  ;;  %v1443_v29 = vmax.f32 %v1071_v25, 0.0 }
 0x193   :  { %3038 = vst [vmem:[%s3941_s3 + $0x1f0] sm:$0xff] %v2800_v19  }
 0x194   :  { %3063 = vst [vmem:[%s3941_s3 + $0x2b8] sm:$0xff] %v2925_v20   ;;  %v1190_v21 = vpop.f32.mrf.mxu2  ;;  %v1315_v23 = vpop.f32.mrf.mxu3 }
 0x195   :  { %v1191_v34 = vadd.f32 %v3676_v22, %v1190_v21  ;;  %v1316_v35 = vadd.f32 %v3676_v22, %v1315_v23 }
 0x197   :  { %v952_v26 = vpop.f32.mrf.mxu0  ;;  %v1072_v27 = vpop.f32.mrf.mxu1  ;;  %v1491_v44 = vmax.f32 %v1191_v34, 0.0  ;;  %v1541_v45 = vmax.f32 %v1316_v35, 0.0 }
 0x198   :  { %v953_v30 = vadd.f32 %v3676_v22, %v952_v26  ;;  %v1073_v31 = vadd.f32 %v3676_v22, %v1072_v27 }
 0x19a   :  { %v1396_v32 = vmax.f32 %v953_v30, 0.0  ;;  %v1444_v33 = vmax.f32 %v1073_v31, 0.0 }
 0x19c   :  { %v1192_v36 = vpop.f32.mrf.mxu2  ;;  %v1317_v37 = vpop.f32.mrf.mxu3  ;;  %v2565_v38 = vpack.c.bf16 %v1396_v32, %v1395_v28  ;;  %v2685_v39 = vpack.c.bf16 %v1444_v33, %v1443_v29 }
 0x19d   :  { %v1193_v40 = vadd.f32 %v3676_v22, %v1192_v36  ;;  %v1318_v41 = vadd.f32 %v3676_v22, %v1317_v37 }
 0x19e   :  { %2991 = vst [vmem:[%s3941_s3 + $0x78] sm:$0xff] %v2565_v38  }
 0x19f   :  { %v1492_v47 = vmax.f32 %v1193_v40, 0.0  ;;  %v1542_v48 = vmax.f32 %v1318_v41, 0.0  ;;  %3015 = vst [vmem:[%s3941_s3 + $0x138] sm:$0xff] %v2685_v39   ;;  %v955_v49 = vpop.f32.mrf.mxu0  ;;  %v1075_v50 = vpop.f32.mrf.mxu1 }
 0x1a0   :  { %v956_v55 = vadd.f32 %v3676_v22, %v955_v49  ;;  %v1076_v56 = vadd.f32 %v3676_v22, %v1075_v50 }
 0x1a1   :  { %v2805_v51 = vpack.c.bf16 %v1492_v47, %v1491_v44  ;;  %v2930_v52 = vpack.c.bf16 %v1542_v48, %v1541_v45  ;;  %1234 = vmatmul.bf16.gmra.mxu2 %v2453_v42  ;;  %1359 = vmatmul.bf16.gmra.mxu3 %v2478_v43 }
 0x1a2   :  { %v1397_v59 = vmax.f32 %v956_v55, 0.0  ;;  %v1445_v60 = vmax.f32 %v1076_v56, 0.0 }
 0x1a3   :  { %3039 = vst [vmem:[%s3941_s3 + $0x1f8] sm:$0xff] %v2805_v51  }
 0x1a4   :  { %3064 = vst [vmem:[%s3941_s3 + $0x2c0] sm:$0xff] %v2930_v52   ;;  %v1195_v53 = vpop.f32.mrf.mxu2  ;;  %v1320_v54 = vpop.f32.mrf.mxu3 }
 0x1a5   :  { %v1196_v1 = vadd.f32 %v3676_v22, %v1195_v53  ;;  %v1321_v2 = vadd.f32 %v3676_v22, %v1320_v54 }
 0x1a7   :  { %v957_v57 = vpop.f32.mrf.mxu0  ;;  %v1077_v58 = vpop.f32.mrf.mxu1  ;;  %v1493_v9 = vmax.f32 %v1196_v1, 0.0  ;;  %v1543_v10 = vmax.f32 %v1321_v2, 0.0 }
 0x1a8   :  { %v958_v61 = vadd.f32 %v3676_v22, %v957_v57  ;;  %v1078_v62 = vadd.f32 %v3676_v22, %v1077_v58 }
 0x1aa   :  { %v1398_v63 = vmax.f32 %v958_v61, 0.0  ;;  %v1446_v0 = vmax.f32 %v1078_v62, 0.0 }
 0x1ac   :  { %v1197_v3 = vpop.f32.mrf.mxu2  ;;  %v1322_v4 = vpop.f32.mrf.mxu3  ;;  %v2570_v5 = vpack.c.bf16 %v1398_v63, %v1397_v59  ;;  %v2690_v6 = vpack.c.bf16 %v1446_v0, %v1445_v60 }
 0x1ad   :  { %v1198_v7 = vadd.f32 %v3676_v22, %v1197_v3  ;;  %v1323_v8 = vadd.f32 %v3676_v22, %v1322_v4 }
 0x1ae   :  { %2992 = vst [vmem:[%s3941_s3 + $0x80] sm:$0xff] %v2570_v5  }
 0x1af   :  { %v1494_v11 = vmax.f32 %v1198_v7, 0.0  ;;  %v1544_v46 = vmax.f32 %v1323_v8, 0.0  ;;  %3016 = vst [vmem:[%s3941_s3 + $0x140] sm:$0xff] %v2690_v6   ;;  %v960_v12 = vpop.f32.mrf.mxu0  ;;  %v1080_v13 = vpop.f32.mrf.mxu1 }
 0x1b0   :  { %v961_v18 = vadd.f32 %v3676_v22, %v960_v12  ;;  %v1081_v19 = vadd.f32 %v3676_v22, %v1080_v13 }
 0x1b1   :  { %v2810_v14 = vpack.c.bf16 %v1494_v11, %v1493_v9  ;;  %v2935_v15 = vpack.c.bf16 %v1544_v46, %v1543_v10 }
 0x1b2   :  { %v1399_v23 = vmax.f32 %v961_v18, 0.0  ;;  %v1447_v24 = vmax.f32 %v1081_v19, 0.0 }
 0x1b3   :  { %3040 = vst [vmem:[%s3941_s3 + $0x200] sm:$0xff] %v2810_v14  }
 0x1b4   :  { %3065 = vst [vmem:[%s3941_s3 + $0x2c8] sm:$0xff] %v2935_v15   ;;  %v1200_v16 = vpop.f32.mrf.mxu2  ;;  %v1325_v17 = vpop.f32.mrf.mxu3 }
 0x1b5   :  { %v1201_v29 = vadd.f32 %v3676_v22, %v1200_v16  ;;  %v1326_v30 = vadd.f32 %v3676_v22, %v1325_v17 }
 0x1b7   :  { %v962_v20 = vpop.f32.mrf.mxu0  ;;  %v1082_v21 = vpop.f32.mrf.mxu1  ;;  %v1495_v37 = vmax.f32 %v1201_v29, 0.0  ;;  %v1545_v38 = vmax.f32 %v1326_v30, 0.0 }
 0x1b8   :  { %v963_v25 = vadd.f32 %v3676_v22, %v962_v20  ;;  %v1083_v26 = vadd.f32 %v3676_v22, %v1082_v21 }
 0x1ba   :  { %v1400_v27 = vmax.f32 %v963_v25, 0.0  ;;  %v1448_v28 = vmax.f32 %v1083_v26, 0.0 }
 0x1bc   :  { %v1202_v31 = vpop.f32.mrf.mxu2  ;;  %v1327_v32 = vpop.f32.mrf.mxu3  ;;  %v2575_v33 = vpack.c.bf16 %v1400_v27, %v1399_v23  ;;  %v2695_v34 = vpack.c.bf16 %v1448_v28, %v1447_v24 }
 0x1bd   :  { %v1203_v35 = vadd.f32 %v3676_v22, %v1202_v31  ;;  %v1328_v36 = vadd.f32 %v3676_v22, %v1327_v32 }
 0x1be   :  { %2993 = vst [vmem:[%s3941_s3 + $0x88] sm:$0xff] %v2575_v33  }
 0x1bf   :  { %v1496_v39 = vmax.f32 %v1203_v35, 0.0  ;;  %v1546_v40 = vmax.f32 %v1328_v36, 0.0  ;;  %3017 = vst [vmem:[%s3941_s3 + $0x148] sm:$0xff] %v2695_v34   ;;  %v965_v41 = vpop.f32.mrf.mxu0  ;;  %v1085_v42 = vpop.f32.mrf.mxu1 }
 0x1c0   :  { %v966_v48 = vadd.f32 %v3676_v22, %v965_v41  ;;  %v1086_v49 = vadd.f32 %v3676_v22, %v1085_v42 }
 0x1c1   :  { %v2815_v43 = vpack.c.bf16 %v1496_v39, %v1495_v37  ;;  %v2940_v44 = vpack.c.bf16 %v1546_v40, %v1545_v38 }
 0x1c2   :  { %v1401_v52 = vmax.f32 %v966_v48, 0.0  ;;  %v1449_v53 = vmax.f32 %v1086_v49, 0.0 }
 0x1c3   :  { %3041 = vst [vmem:[%s3941_s3 + $0x208] sm:$0xff] %v2815_v43  }
 0x1c4   :  { %3066 = vst [vmem:[%s3941_s3 + $0x2d0] sm:$0xff] %v2940_v44   ;;  %v1205_v45 = vpop.f32.mrf.mxu2  ;;  %v1330_v47 = vpop.f32.mrf.mxu3 }
 0x1c5   :  { %v1206_v58 = vadd.f32 %v3676_v22, %v1205_v45  ;;  %v1331_v59 = vadd.f32 %v3676_v22, %v1330_v47 }
 0x1c7   :  { %v967_v50 = vpop.f32.mrf.mxu0  ;;  %v1087_v51 = vpop.f32.mrf.mxu1  ;;  %v1497_v2 = vmax.f32 %v1206_v58, 0.0  ;;  %v1547_v3 = vmax.f32 %v1331_v59, 0.0 }
 0x1c8   :  { %v968_v54 = vadd.f32 %v3676_v22, %v967_v50  ;;  %v1088_v55 = vadd.f32 %v3676_v22, %v1087_v51 }
 0x1ca   :  { %v1402_v56 = vmax.f32 %v968_v54, 0.0  ;;  %v1450_v57 = vmax.f32 %v1088_v55, 0.0 }
 0x1cc   :  { %v1207_v60 = vpop.f32.mrf.mxu2  ;;  %v1332_v61 = vpop.f32.mrf.mxu3  ;;  %v2580_v62 = vpack.c.bf16 %v1402_v56, %v1401_v52  ;;  %v2700_v63 = vpack.c.bf16 %v1450_v57, %v1449_v53 }
 0x1cd   :  { %v1208_v0 = vadd.f32 %v3676_v22, %v1207_v60  ;;  %v1333_v1 = vadd.f32 %v3676_v22, %v1332_v61 }
 0x1ce   :  { %2994 = vst [vmem:[%s3941_s3 + $0x90] sm:$0xff] %v2580_v62  }
 0x1cf   :  { %v1498_v4 = vmax.f32 %v1208_v0, 0.0  ;;  %v1548_v5 = vmax.f32 %v1333_v1, 0.0  ;;  %3018 = vst [vmem:[%s3941_s3 + $0x150] sm:$0xff] %v2700_v63   ;;  %v970_v6 = vpop.f32.mrf.mxu0  ;;  %v1090_v7 = vpop.f32.mrf.mxu1 }
 0x1d0   :  { %v971_v46 = vadd.f32 %v3676_v22, %v970_v6  ;;  %v1091_v12 = vadd.f32 %v3676_v22, %v1090_v7 }
 0x1d1   :  { %v2820_v8 = vpack.c.bf16 %v1498_v4, %v1497_v2  ;;  %v2945_v9 = vpack.c.bf16 %v1548_v5, %v1547_v3 }
 0x1d2   :  { %v1403_v15 = vmax.f32 %v971_v46, 0.0  ;;  %v1451_v16 = vmax.f32 %v1091_v12, 0.0 }
 0x1d3   :  { %3042 = vst [vmem:[%s3941_s3 + $0x210] sm:$0xff] %v2820_v8  }
 0x1d4   :  { %3067 = vst [vmem:[%s3941_s3 + $0x2d8] sm:$0xff] %v2945_v9   ;;  %v1210_v10 = vpop.f32.mrf.mxu2  ;;  %v1335_v11 = vpop.f32.mrf.mxu3 }
 0x1d5   :  { %v1211_v21 = vadd.f32 %v3676_v22, %v1210_v10  ;;  %v1336_v23 = vadd.f32 %v3676_v22, %v1335_v11 }
 0x1d7   :  { %v972_v13 = vpop.f32.mrf.mxu0  ;;  %v1092_v14 = vpop.f32.mrf.mxu1  ;;  %v1499_v30 = vmax.f32 %v1211_v21, 0.0  ;;  %v1549_v31 = vmax.f32 %v1336_v23, 0.0 }
 0x1d8   :  { %v973_v17 = vadd.f32 %v3676_v22, %v972_v13  ;;  %v1093_v18 = vadd.f32 %v3676_v22, %v1092_v14 }
 0x1da   :  { %v1404_v19 = vmax.f32 %v973_v17, 0.0  ;;  %v1452_v20 = vmax.f32 %v1093_v18, 0.0 }
 0x1dc   :  { %v1212_v24 = vpop.f32.mrf.mxu2  ;;  %v1337_v25 = vpop.f32.mrf.mxu3  ;;  %v2585_v26 = vpack.c.bf16 %v1404_v19, %v1403_v15  ;;  %v2705_v27 = vpack.c.bf16 %v1452_v20, %v1451_v16 }
 0x1dd   :  { %v1213_v28 = vadd.f32 %v3676_v22, %v1212_v24  ;;  %v1338_v29 = vadd.f32 %v3676_v22, %v1337_v25 }
 0x1de   :  { %2995 = vst [vmem:[%s3941_s3 + $0x98] sm:$0xff] %v2585_v26  }
 0x1df   :  { %v1500_v32 = vmax.f32 %v1213_v28, 0.0  ;;  %v1550_v33 = vmax.f32 %v1338_v29, 0.0  ;;  %3019 = vst [vmem:[%s3941_s3 + $0x158] sm:$0xff] %v2705_v27   ;;  %v975_v34 = vpop.f32.mrf.mxu0  ;;  %v1095_v35 = vpop.f32.mrf.mxu1 }
 0x1e0   :  { %v976_v40 = vadd.f32 %v3676_v22, %v975_v34  ;;  %v1096_v41 = vadd.f32 %v3676_v22, %v1095_v35 }
 0x1e1   :  { %v2825_v36 = vpack.c.bf16 %v1500_v32, %v1499_v30  ;;  %v2950_v37 = vpack.c.bf16 %v1550_v33, %v1549_v31 }
 0x1e2   :  { %v1405_v44 = vmax.f32 %v976_v40, 0.0  ;;  %v1453_v45 = vmax.f32 %v1096_v41, 0.0 }
 0x1e3   :  { %3043 = vst [vmem:[%s3941_s3 + $0x218] sm:$0xff] %v2825_v36  }
 0x1e4   :  { %3068 = vst [vmem:[%s3941_s3 + $0x2e0] sm:$0xff] %v2950_v37   ;;  %v1215_v38 = vpop.f32.mrf.mxu2  ;;  %v1340_v39 = vpop.f32.mrf.mxu3 }
 0x1e5   :  { %v1216_v51 = vadd.f32 %v3676_v22, %v1215_v38  ;;  %v1341_v52 = vadd.f32 %v3676_v22, %v1340_v39 }
 0x1e7   :  { %v977_v42 = vpop.f32.mrf.mxu0  ;;  %v1097_v43 = vpop.f32.mrf.mxu1  ;;  %v1501_v59 = vmax.f32 %v1216_v51, 0.0  ;;  %v1551_v60 = vmax.f32 %v1341_v52, 0.0 }
 0x1e8   :  { %v978_v47 = vadd.f32 %v3676_v22, %v977_v42  ;;  %v1098_v48 = vadd.f32 %v3676_v22, %v1097_v43 }
 0x1ea   :  { %v1406_v49 = vmax.f32 %v978_v47, 0.0  ;;  %v1454_v50 = vmax.f32 %v1098_v48, 0.0 }
 0x1ec   :  { %v1217_v53 = vpop.f32.mrf.mxu2  ;;  %v1342_v54 = vpop.f32.mrf.mxu3  ;;  %v2590_v55 = vpack.c.bf16 %v1406_v49, %v1405_v44  ;;  %v2710_v56 = vpack.c.bf16 %v1454_v50, %v1453_v45 }
 0x1ed   :  { %v1218_v57 = vadd.f32 %v3676_v22, %v1217_v53  ;;  %v1343_v58 = vadd.f32 %v3676_v22, %v1342_v54 }
 0x1ee   :  { %2996 = vst [vmem:[%s3941_s3 + $0xa0] sm:$0xff] %v2590_v55  }
 0x1ef   :  { %v1502_v61 = vmax.f32 %v1218_v57, 0.0  ;;  %v1552_v62 = vmax.f32 %v1343_v58, 0.0  ;;  %3020 = vst [vmem:[%s3941_s3 + $0x160] sm:$0xff] %v2710_v56   ;;  %v980_v63 = vpop.f32.mrf.mxu0  ;;  %v1100_v0 = vpop.f32.mrf.mxu1 }
 0x1f0   :  { %v981_v5 = vadd.f32 %v3676_v22, %v980_v63  ;;  %v1101_v6 = vadd.f32 %v3676_v22, %v1100_v0 }
 0x1f1   :  { %v2830_v1 = vpack.c.bf16 %v1502_v61, %v1501_v59  ;;  %v2955_v2 = vpack.c.bf16 %v1552_v62, %v1551_v60 }
 0x1f2   :  { %v1407_v9 = vmax.f32 %v981_v5, 0.0  ;;  %v1455_v10 = vmax.f32 %v1101_v6, 0.0 }
 0x1f3   :  { %3044 = vst [vmem:[%s3941_s3 + $0x220] sm:$0xff] %v2830_v1  }
 0x1f4   :  { %3069 = vst [vmem:[%s3941_s3 + $0x2e8] sm:$0xff] %v2955_v2   ;;  %v1220_v3 = vpop.f32.mrf.mxu2  ;;  %v1345_v4 = vpop.f32.mrf.mxu3 }
 0x1f5   :  { %v1221_v14 = vadd.f32 %v3676_v22, %v1220_v3  ;;  %v1346_v15 = vadd.f32 %v3676_v22, %v1345_v4 }
 0x1f7   :  { %v982_v7 = vpop.f32.mrf.mxu0  ;;  %v1102_v8 = vpop.f32.mrf.mxu1  ;;  %v1503_v23 = vmax.f32 %v1221_v14, 0.0  ;;  %v1553_v24 = vmax.f32 %v1346_v15, 0.0 }
 0x1f8   :  { %v983_v11 = vadd.f32 %v3676_v22, %v982_v7  ;;  %v1103_v46 = vadd.f32 %v3676_v22, %v1102_v8 }
 0x1fa   :  { %v1408_v12 = vmax.f32 %v983_v11, 0.0  ;;  %v1456_v13 = vmax.f32 %v1103_v46, 0.0 }
 0x1fc   :  { %v1222_v16 = vpop.f32.mrf.mxu2  ;;  %v1347_v17 = vpop.f32.mrf.mxu3  ;;  %v2595_v18 = vpack.c.bf16 %v1408_v12, %v1407_v9  ;;  %v2715_v19 = vpack.c.bf16 %v1456_v13, %v1455_v10 }
 0x1fd   :  { %v1223_v20 = vadd.f32 %v3676_v22, %v1222_v16  ;;  %v1348_v21 = vadd.f32 %v3676_v22, %v1347_v17 }
 0x1fe   :  { %2997 = vst [vmem:[%s3941_s3 + $0xa8] sm:$0xff] %v2595_v18  }
 0x1ff   :  { %v1504_v25 = vmax.f32 %v1223_v20, 0.0  ;;  %v1554_v26 = vmax.f32 %v1348_v21, 0.0  ;;  %3021 = vst [vmem:[%s3941_s3 + $0x168] sm:$0xff] %v2715_v19   ;;  %v985_v27 = vpop.f32.mrf.mxu0  ;;  %v1105_v28 = vpop.f32.mrf.mxu1 }
 0x200   :  { %v986_v33 = vadd.f32 %v3676_v22, %v985_v27  ;;  %v1106_v34 = vadd.f32 %v3676_v22, %v1105_v28 }
 0x201   :  { %v2835_v29 = vpack.c.bf16 %v1504_v25, %v1503_v23  ;;  %v2960_v30 = vpack.c.bf16 %v1554_v26, %v1553_v24 }
 0x202   :  { %v1409_v37 = vmax.f32 %v986_v33, 0.0  ;;  %v1457_v38 = vmax.f32 %v1106_v34, 0.0 }
 0x203   :  { %3045 = vst [vmem:[%s3941_s3 + $0x228] sm:$0xff] %v2835_v29  }
 0x204   :  { %3070 = vst [vmem:[%s3941_s3 + $0x2f0] sm:$0xff] %v2960_v30   ;;  %v1225_v31 = vpop.f32.mrf.mxu2  ;;  %v1350_v32 = vpop.f32.mrf.mxu3 }
 0x205   :  { %v1226_v43 = vadd.f32 %v3676_v22, %v1225_v31  ;;  %v1351_v44 = vadd.f32 %v3676_v22, %v1350_v32 }
 0x207   :  { %v987_v35 = vpop.f32.mrf.mxu0  ;;  %v1107_v36 = vpop.f32.mrf.mxu1  ;;  %v1505_v52 = vmax.f32 %v1226_v43, 0.0  ;;  %v1555_v53 = vmax.f32 %v1351_v44, 0.0 }
 0x208   :  { %v988_v39 = vadd.f32 %v3676_v22, %v987_v35  ;;  %v1108_v40 = vadd.f32 %v3676_v22, %v1107_v36 }
 0x20a   :  { %v1410_v41 = vmax.f32 %v988_v39, 0.0  ;;  %v1458_v42 = vmax.f32 %v1108_v40, 0.0 }
 0x20c   :  { %v1227_v45 = vpop.f32.mrf.mxu2  ;;  %v1352_v47 = vpop.f32.mrf.mxu3  ;;  %v2600_v48 = vpack.c.bf16 %v1410_v41, %v1409_v37  ;;  %v2720_v49 = vpack.c.bf16 %v1458_v42, %v1457_v38 }
 0x20d   :  { %v1228_v50 = vadd.f32 %v3676_v22, %v1227_v45  ;;  %v1353_v51 = vadd.f32 %v3676_v22, %v1352_v47 }
 0x20e   :  { %2998 = vst [vmem:[%s3941_s3 + $0xb0] sm:$0xff] %v2600_v48  }
 0x20f   :  { %v1506_v54 = vmax.f32 %v1228_v50, 0.0  ;;  %v1556_v55 = vmax.f32 %v1353_v51, 0.0  ;;  %3022 = vst [vmem:[%s3941_s3 + $0x170] sm:$0xff] %v2720_v49   ;;  %v990_v56 = vpop.f32.mrf.mxu0  ;;  %v1110_v57 = vpop.f32.mrf.mxu1 }
 0x210   :  { %v991_v62 = vadd.f32 %v3676_v22, %v990_v56  ;;  %v1111_v63 = vadd.f32 %v3676_v22, %v1110_v57 }
 0x211   :  { %v2840_v58 = vpack.c.bf16 %v1506_v54, %v1505_v52  ;;  %v2965_v59 = vpack.c.bf16 %v1556_v55, %v1555_v53 }
 0x212   :  { %v1411_v2 = vmax.f32 %v991_v62, 0.0  ;;  %v1459_v3 = vmax.f32 %v1111_v63, 0.0 }
 0x213   :  { %3046 = vst [vmem:[%s3941_s3 + $0x230] sm:$0xff] %v2840_v58  }
 0x214   :  { %3071 = vst [vmem:[%s3941_s3 + $0x2f8] sm:$0xff] %v2965_v59   ;;  %v1230_v60 = vpop.f32.mrf.mxu2  ;;  %v1355_v61 = vpop.f32.mrf.mxu3 }
 0x215   :  { %v1231_v8 = vadd.f32 %v3676_v22, %v1230_v60  ;;  %v1356_v9 = vadd.f32 %v3676_v22, %v1355_v61 }
 0x217   :  { %v992_v0 = vpop.f32.mrf.mxu0  ;;  %v1112_v1 = vpop.f32.mrf.mxu1  ;;  %v1507_v15 = vmax.f32 %v1231_v8, 0.0  ;;  %v1557_v16 = vmax.f32 %v1356_v9, 0.0 }
 0x218   :  { %v993_v4 = vadd.f32 %v3676_v22, %v992_v0  ;;  %v1113_v5 = vadd.f32 %v3676_v22, %v1112_v1 }
 0x21a   :  { %v1412_v6 = vmax.f32 %v993_v4, 0.0  ;;  %v1460_v7 = vmax.f32 %v1113_v5, 0.0 }
 0x21c   :  { %v1232_v10 = vpop.f32.mrf.mxu2  ;;  %v1357_v11 = vpop.f32.mrf.mxu3  ;;  %v2605_v46 = vpack.c.bf16 %v1412_v6, %v1411_v2  ;;  %v2725_v12 = vpack.c.bf16 %v1460_v7, %v1459_v3 }
 0x21d   :  { %v1233_v13 = vadd.f32 %v3676_v22, %v1232_v10  ;;  %v1358_v14 = vadd.f32 %v3676_v22, %v1357_v11 }
 0x21e   :  { %2999 = vst [vmem:[%s3941_s3 + $0xb8] sm:$0xff] %v2605_v46  }
 0x21f   :  { %v1508_v17 = vmax.f32 %v1233_v13, 0.0  ;;  %v1558_v18 = vmax.f32 %v1358_v14, 0.0  ;;  %3023 = vst [vmem:[%s3941_s3 + $0x178] sm:$0xff] %v2725_v12  }
 0x221   :  { %v2845_v19 = vpack.c.bf16 %v1508_v17, %v1507_v15  ;;  %v2970_v20 = vpack.c.bf16 %v1558_v18, %v1557_v16 }
 0x223   :  { %3047 = vst [vmem:[%s3941_s3 + $0x238] sm:$0xff] %v2845_v19  }
 0x224   :  { %3072 = vst [vmem:[%s3941_s3 + $0x300] sm:$0xff] %v2970_v20   ;;  %v1235_v21 = vpop.f32.mrf.mxu2  ;;  %v1360_v23 = vpop.f32.mrf.mxu3 }
 0x225   :  { %v1236_v24 = vadd.f32 %v3676_v22, %v1235_v21  ;;  %v1361_v25 = vadd.f32 %v3676_v22, %v1360_v23 }
 0x227   :  { %v1509_v30 = vmax.f32 %v1236_v24, 0.0  ;;  %v1559_v31 = vmax.f32 %v1361_v25, 0.0 }
 0x22c   :  { %v1237_v26 = vpop.f32.mrf.mxu2  ;;  %v1362_v27 = vpop.f32.mrf.mxu3 }
 0x22d   :  { %v1238_v28 = vadd.f32 %v3676_v22, %v1237_v26  ;;  %v1363_v29 = vadd.f32 %v3676_v22, %v1362_v27 }
 0x22f   :  { %v1510_v32 = vmax.f32 %v1238_v28, 0.0  ;;  %v1560_v33 = vmax.f32 %v1363_v29, 0.0 }
 0x231   :  { %v2850_v34 = vpack.c.bf16 %v1510_v32, %v1509_v30  ;;  %v2975_v35 = vpack.c.bf16 %v1560_v33, %v1559_v31 }
 0x233   :  { %3048 = vst [vmem:[%s3941_s3 + $0x240] sm:$0xff] %v2850_v34  }
 0x234   :  { %3073 = vst [vmem:[%s3941_s3 + $0x308] sm:$0xff] %v2975_v35  }

// kernel: net_forward.5
= control target key start
LH: loop header
LB: loop body
LE: loop exit
PB: predicated region body
PF: predicated region fallthrough
CT: control target
= control target key end

     0   :  { %s4369_s1 = inlined_call_operand.vmem [shape: bf16[3200,128], index: 1, kind: input, shape index: {}]   ;;  %s4370_s0 = inlined_call_operand.vmem [shape: bf16[16,3200], index: 0, kind: input, shape index: {}]   ;;  %s4371_s2 = inlined_call_operand.vmem [shape: f32[1,128], index: 2, kind: input, shape index: {}]   ;;  %s4372_s4 = inlined_call_operand.vmem [shape: f32[1,128], index: 4, kind: input, shape index: {}]   ;;  %s4373_s3 = inlined_call_operand.vmem [shape: bf16[128,128], index: 3, kind: input, shape index: {}]   ;;  %s4374_s5 = inlined_call_operand.vmem [shape: bf16[128,128], index: 5, kind: input, shape index: {}]   ;;  %s4375_s6 = inlined_call_operand.vmem [shape: f32[1,128], index: 6, kind: input, shape index: {}]   ;;  %s4376_s7 = inlined_call_operand.vmem [shape: f32[16,128], index: 7, kind: output, shape index: {}]  }
   0x1   :  { %v3304_v0 = vld [vmem:[%s4369_s1 + $0x38] sm:$0xff]  ;;  %v3303_v4 = vld [vmem:[%s4369_s1 + $0x30] sm:$0xff]  ;;  %v3302_v8 = vld [vmem:[%s4369_s1 + $0x28] sm:$0xff] }
   0x2   :  { %v3320_v1 = vld [vmem:[%s4369_s1 + $0xb8] sm:$0xff]  ;;  %1782 = vmatpush.bf16.msra.mxu0 %v3304_v0  ;;  %v3319_v5 = vld [vmem:[%s4369_s1 + $0xb0] sm:$0xff]  ;;  %v3318_v9 = vld [vmem:[%s4369_s1 + $0xa8] sm:$0xff] }
   0x3   :  { %v3312_v2 = vld [vmem:[%s4369_s1 + $0x78] sm:$0xff]  ;;  %1810 = vmatpush.bf16.msra.mxu2 %v3320_v1  ;;  %v3311_v6 = vld [vmem:[%s4369_s1 + $0x70] sm:$0xff]  ;;  %v3310_v10 = vld [vmem:[%s4369_s1 + $0x68] sm:$0xff] }
   0x4   :  { %v3328_v3 = vld [vmem:[%s4369_s1 + $0xf8] sm:$0xff]  ;;  %1796 = vmatpush.bf16.msra.mxu1 %v3312_v2  ;;  %v3327_v7 = vld [vmem:[%s4369_s1 + $0xf0] sm:$0xff]  ;;  %v3326_v11 = vld [vmem:[%s4369_s1 + $0xe8] sm:$0xff] }
   0x5   :  { %1824 = vmatpush.bf16.msra.mxu3 %v3328_v3  ;;  %v3301_v12 = vld [vmem:[%s4369_s1 + $0x20] sm:$0xff]  ;;  %v3300_v16 = vld [vmem:[%s4369_s1 + $0x18] sm:$0xff]  ;;  %v3299_v20 = vld [vmem:[%s4369_s1 + $0x10] sm:$0xff] }
   0x6   :  { %1783 = vmatpush.bf16.msra.mxu0 %v3303_v4  ;;  %v3317_v13 = vld [vmem:[%s4369_s1 + $0xa0] sm:$0xff]  ;;  %v3316_v17 = vld [vmem:[%s4369_s1 + $0x98] sm:$0xff]  ;;  %v3315_v21 = vld [vmem:[%s4369_s1 + $0x90] sm:$0xff] }
   0x7   :  { %1811 = vmatpush.bf16.msra.mxu2 %v3319_v5  ;;  %v3309_v14 = vld [vmem:[%s4369_s1 + $0x60] sm:$0xff]  ;;  %v3308_v18 = vld [vmem:[%s4369_s1 + $0x58] sm:$0xff]  ;;  %v3307_v22 = vld [vmem:[%s4369_s1 + $0x50] sm:$0xff] }
   0x8   :  { %1797 = vmatpush.bf16.msra.mxu1 %v3311_v6  ;;  %v3325_v15 = vld [vmem:[%s4369_s1 + $0xe0] sm:$0xff]  ;;  %v3324_v19 = vld [vmem:[%s4369_s1 + $0xd8] sm:$0xff]  ;;  %v3323_v23 = vld [vmem:[%s4369_s1 + $0xd0] sm:$0xff] }
   0x9   :  { %1825 = vmatpush.bf16.msra.mxu3 %v3327_v7  ;;  %v3298_v24 = vld [vmem:[%s4369_s1 + $0x8] sm:$0xff]  ;;  %v3297_v28 = vld [vmem:[%s4369_s1] sm:$0xff]  ;;  %v3336_v30 = vld [vmem:[%s4369_s1 + $0x138] sm:$0xff] }
   0xa   :  { %1784 = vmatpush.bf16.msra.mxu0 %v3302_v8  ;;  %v3314_v25 = vld [vmem:[%s4369_s1 + $0x88] sm:$0xff]  ;;  %v3313_v29 = vld [vmem:[%s4369_s1 + $0x80] sm:$0xff]  ;;  %v3352_v31 = vld [vmem:[%s4369_s1 + $0x1b8] sm:$0xff] }
   0xb   :  { %1812 = vmatpush.bf16.msra.mxu2 %v3318_v9  ;;  %v3306_v26 = vld [vmem:[%s4369_s1 + $0x48] sm:$0xff]  ;;  %v3305_v32 = vld [vmem:[%s4369_s1 + $0x40] sm:$0xff]  ;;  %v3344_v38 = vld [vmem:[%s4369_s1 + $0x178] sm:$0xff] }
   0xc   :  { %1798 = vmatpush.bf16.msra.mxu1 %v3310_v10  ;;  %v3322_v27 = vld [vmem:[%s4369_s1 + $0xc8] sm:$0xff]  ;;  %v3321_v33 = vld [vmem:[%s4369_s1 + $0xc0] sm:$0xff]  ;;  %v3360_v39 = vld [vmem:[%s4369_s1 + $0x1f8] sm:$0xff] }
   0xd   :  { %1826 = vmatpush.bf16.msra.mxu3 %v3326_v11  ;;  %v2310_v34 = vld [vmem:[%s4370_s0] sm:$0xf]  ;;  %v3284_v35 = vld [vmem:[%s4370_s0 + $0x60] sm:$0xf0]  ;;  %v2318_v36 = vld [vmem:[%s4370_s0 + $0x8] sm:$0xf] }
   0xe   :  { %1785 = vmatpush.bf16.msra.mxu0 %v3301_v12  ;;  %v3285_v37 = vld [vmem:[%s4370_s0 + $0x68] sm:$0xf0]  ;;  %v3272_v40 = vld [vmem:[%s4370_s0 + $0x4] sm:$0xf]  ;;  %v2312_v41 = vld [vmem:[%s4370_s0 + $0x64] sm:$0xf0]  ;;  %v2311_v44 = vor.u32 %v3284_v35, %v2310_v34 }
   0xf   :  { %1813 = vmatpush.bf16.msra.mxu2 %v3317_v13  ;;  %v3273_v42 = vld [vmem:[%s4370_s0 + $0xc] sm:$0xf]  ;;  %v2320_v43 = vld [vmem:[%s4370_s0 + $0x6c] sm:$0xf0]  ;;  %v2319_v45 = vor.u32 %v3285_v37, %v2318_v36  ;;  %v2315_v48 = vor.u32 %v3272_v40, %v2312_v41  ;;  %v3333_v56 = vld [vmem:[%s4369_s1 + $0x120] sm:$0xff] }
  0x10   :  { %1799 = vmatpush.bf16.msra.mxu1 %v3309_v14  ;;  %v3335_v46 = vld [vmem:[%s4369_s1 + $0x130] sm:$0xff]  ;;  %v2323_v49 = vor.u32 %v3273_v42, %v2320_v43  ;;  %v3334_v52 = vld [vmem:[%s4369_s1 + $0x128] sm:$0xff]  ;;  %v3349_v57 = vld [vmem:[%s4369_s1 + $0x1a0] sm:$0xff] }
  0x11   :  { %1827 = vmatpush.bf16.msra.mxu3 %v3325_v15  ;;  %v3351_v47 = vld [vmem:[%s4369_s1 + $0x1b0] sm:$0xff]  ;;  %v3350_v53 = vld [vmem:[%s4369_s1 + $0x1a8] sm:$0xff]  ;;  %v3341_v58 = vld [vmem:[%s4369_s1 + $0x160] sm:$0xff] }
  0x12   :  { %1786 = vmatpush.bf16.msra.mxu0 %v3300_v16  ;;  %v3343_v50 = vld [vmem:[%s4369_s1 + $0x170] sm:$0xff]  ;;  %v3342_v54 = vld [vmem:[%s4369_s1 + $0x168] sm:$0xff]  ;;  %v3357_v59 = vld [vmem:[%s4369_s1 + $0x1e0] sm:$0xff] }
  0x13   :  { %1814 = vmatpush.bf16.msra.mxu2 %v3316_v17  ;;  %v3359_v51 = vld [vmem:[%s4369_s1 + $0x1f0] sm:$0xff]  ;;  %v3358_v55 = vld [vmem:[%s4369_s1 + $0x1e8] sm:$0xff]  ;;  %v3332_v60 = vld [vmem:[%s4369_s1 + $0x118] sm:$0xff] }
  0x14   :  { %1800 = vmatpush.bf16.msra.mxu1 %v3308_v18  ;;  %v3348_v61 = vld [vmem:[%s4369_s1 + $0x198] sm:$0xff]  ;;  %v3331_v0 = vld [vmem:[%s4369_s1 + $0x110] sm:$0xff]  ;;  %v3330_v4 = vld [vmem:[%s4369_s1 + $0x108] sm:$0xff] }
  0x15   :  { %1828 = vmatpush.bf16.msra.mxu3 %v3324_v19  ;;  %v3340_v62 = vld [vmem:[%s4369_s1 + $0x158] sm:$0xff]  ;;  %v3347_v1 = vld [vmem:[%s4369_s1 + $0x190] sm:$0xff]  ;;  %v3346_v5 = vld [vmem:[%s4369_s1 + $0x188] sm:$0xff] }
  0x16   :  { %1787 = vmatpush.bf16.msra.mxu0 %v3299_v20  ;;  %v3356_v63 = vld [vmem:[%s4369_s1 + $0x1d8] sm:$0xff]  ;;  %v3339_v2 = vld [vmem:[%s4369_s1 + $0x150] sm:$0xff]  ;;  %v3338_v6 = vld [vmem:[%s4369_s1 + $0x148] sm:$0xff] }
  0x17   :  { %1815 = vmatpush.bf16.msra.mxu2 %v3315_v21  ;;  %v3355_v3 = vld [vmem:[%s4369_s1 + $0x1d0] sm:$0xff]  ;;  %v3354_v7 = vld [vmem:[%s4369_s1 + $0x1c8] sm:$0xff]  ;;  %v3329_v8 = vld [vmem:[%s4369_s1 + $0x100] sm:$0xff] }
  0x18   :  { %1801 = vmatpush.bf16.msra.mxu1 %v3307_v22  ;;  %v3345_v9 = vld [vmem:[%s4369_s1 + $0x180] sm:$0xff]  ;;  %v3368_v10 = vld [vmem:[%s4369_s1 + $0x238] sm:$0xff]  ;;  %v2326_v12 = vld [vmem:[%s4370_s0 + $0x10] sm:$0xf] }
  0x19   :  { %1829 = vmatpush.bf16.msra.mxu3 %v3323_v23  ;;  %v3384_v11 = vld [vmem:[%s4369_s1 + $0x2b8] sm:$0xff]  ;;  %v3286_v13 = vld [vmem:[%s4370_s0 + $0x70] sm:$0xf0]  ;;  %v3337_v16 = vld [vmem:[%s4369_s1 + $0x140] sm:$0xff] }
  0x1a   :  { %1788 = vmatpush.bf16.msra.mxu0 %v3298_v24  ;;  %v2334_v14 = vld [vmem:[%s4370_s0 + $0x18] sm:$0xf]  ;;  %v3287_v15 = vld [vmem:[%s4370_s0 + $0x78] sm:$0xf0]  ;;  %v3353_v17 = vld [vmem:[%s4369_s1 + $0x1c0] sm:$0xff]  ;;  %v2327_v22 = vor.u32 %v3286_v13, %v2326_v12 }
  0x1b   :  { %1816 = vmatpush.bf16.msra.mxu2 %v3314_v25  ;;  %v3274_v18 = vld [vmem:[%s4370_s0 + $0x14] sm:$0xf]  ;;  %v2328_v19 = vld [vmem:[%s4370_s0 + $0x74] sm:$0xf0]  ;;  %v3275_v20 = vld [vmem:[%s4370_s0 + $0x1c] sm:$0xf]  ;;  %v2335_v23 = vor.u32 %v3287_v15, %v2334_v14 }
  0x1c   :  { %1802 = vmatpush.bf16.msra.mxu1 %v3306_v26  ;;  %v2336_v21 = vld [vmem:[%s4370_s0 + $0x7c] sm:$0xf0]  ;;  %v3376_v24 = vld [vmem:[%s4369_s1 + $0x278] sm:$0xff]  ;;  %v2331_v26 = vor.u32 %v3274_v18, %v2328_v19  ;;  %v3374_v34 = vld [vmem:[%s4369_s1 + $0x268] sm:$0xff] }
  0x1d   :  { %1830 = vmatpush.bf16.msra.mxu3 %v3322_v27  ;;  %v3392_v25 = vld [vmem:[%s4369_s1 + $0x2f8] sm:$0xff]  ;;  %v2339_v27 = vor.u32 %v3275_v20, %v2336_v21  ;;  %v3390_v35 = vld [vmem:[%s4369_s1 + $0x2e8] sm:$0xff]  ;;  %v3365_v36 = vld [vmem:[%s4369_s1 + $0x220] sm:$0xff] }
  0x1e   :  { %1789 = vmatpush.bf16.msra.mxu0 %v3297_v28  ;;  %v3367_v28 = vld [vmem:[%s4369_s1 + $0x230] sm:$0xff]  ;;  %v3381_v37 = vld [vmem:[%s4369_s1 + $0x2a0] sm:$0xff]  ;;  %v3364_v40 = vld [vmem:[%s4369_s1 + $0x218] sm:$0xff] }
  0x1f   :  { %1817 = vmatpush.bf16.msra.mxu2 %v3313_v29  ;;  %v3383_v29 = vld [vmem:[%s4369_s1 + $0x2b0] sm:$0xff]  ;;  %v3380_v41 = vld [vmem:[%s4369_s1 + $0x298] sm:$0xff]  ;;  %v3398_v12 = vld [vmem:[%s4369_s1 + $0x328] sm:$0xff] }
  0x20   :  { %1803 = vmatpush.bf16.msra.mxu1 %v3305_v32  ;;  %v3366_v32 = vld [vmem:[%s4369_s1 + $0x228] sm:$0xff]  ;;  %v3372_v42 = vld [vmem:[%s4369_s1 + $0x258] sm:$0xff]  ;;  %v3405_v18 = vld [vmem:[%s4369_s1 + $0x360] sm:$0xff] }
  0x21   :  { %1831 = vmatpush.bf16.msra.mxu3 %v3321_v33  ;;  %1790 = vmatmul.bf16.vlgmr.msra.gmra.mxu0 %v2311_v44  ;;  %v3382_v33 = vld [vmem:[%s4369_s1 + $0x2a8] sm:$0xff]  ;;  %v3388_v43 = vld [vmem:[%s4369_s1 + $0x2d8] sm:$0xff]  ;;  %v3363_v44 = vld [vmem:[%s4369_s1 + $0x210] sm:$0xff] }
  0x22   :  { %1838 = vmatpush.bf16.msrb.mxu0 %v3336_v30  ;;  %1818 = vmatmul.bf16.vlgmr.msra.gmra.mxu2 %v2319_v45  ;;  %v3375_v30 = vld [vmem:[%s4369_s1 + $0x270] sm:$0xff]  ;;  %v3414_v13 = vld [vmem:[%s4369_s1 + $0x3a8] sm:$0xff]  ;;  %v3421_v19 = vld [vmem:[%s4369_s1 + $0x3e0] sm:$0xff] }
  0x23   :  { %1866 = vmatpush.bf16.msrb.mxu2 %v3352_v31  ;;  %1804 = vmatmul.bf16.vlgmr.msra.gmra.mxu1 %v2315_v48  ;;  %v3391_v31 = vld [vmem:[%s4369_s1 + $0x2f0] sm:$0xff]  ;;  %v3362_v48 = vld [vmem:[%s4369_s1 + $0x208] sm:$0xff]  ;;  %v3396_v20 = vld [vmem:[%s4369_s1 + $0x318] sm:$0xff] }
  0x24   :  { %1852 = vmatpush.bf16.msrb.mxu1 %v3344_v38  ;;  %1832 = vmatmul.bf16.vlgmr.msra.gmra.mxu3 %v2323_v49  ;;  %v3373_v38 = vld [vmem:[%s4369_s1 + $0x260] sm:$0xff]  ;;  %v3379_v45 = vld [vmem:[%s4369_s1 + $0x290] sm:$0xff]  ;;  %v3378_v49 = vld [vmem:[%s4369_s1 + $0x288] sm:$0xff] }
  0x25   :  { %1880 = vmatpush.bf16.msrb.mxu3 %v3360_v39  ;;  %v3389_v39 = vld [vmem:[%s4369_s1 + $0x2e0] sm:$0xff]  ;;  %v3406_v14 = vld [vmem:[%s4369_s1 + $0x368] sm:$0xff]  ;;  %v3412_v21 = vld [vmem:[%s4369_s1 + $0x398] sm:$0xff] }
  0x26   :  { %1839 = vmatpush.bf16.msrb.mxu0 %v3335_v46  ;;  %v3371_v46 = vld [vmem:[%s4369_s1 + $0x250] sm:$0xff]  ;;  %v3422_v15 = vld [vmem:[%s4369_s1 + $0x3e8] sm:$0xff] }
  0x27   :  { %1867 = vmatpush.bf16.msrb.mxu2 %v3351_v47  ;;  %v3387_v47 = vld [vmem:[%s4369_s1 + $0x2d0] sm:$0xff] }
  0x28   :  { %1853 = vmatpush.bf16.msrb.mxu1 %v3343_v50  ;;  %v3370_v50 = vld [vmem:[%s4369_s1 + $0x248] sm:$0xff] }
  0x29   :  { %1881 = vmatpush.bf16.msrb.mxu3 %v3359_v51  ;;  %v3386_v51 = vld [vmem:[%s4369_s1 + $0x2c8] sm:$0xff] }
  0x2a   :  { %1840 = vmatpush.bf16.msrb.mxu0 %v3334_v52  ;;  %v3361_v52 = vld [vmem:[%s4369_s1 + $0x200] sm:$0xff] }
  0x2b   :  { %1868 = vmatpush.bf16.msrb.mxu2 %v3350_v53  ;;  %v3377_v53 = vld [vmem:[%s4369_s1 + $0x280] sm:$0xff] }
  0x2c   :  { %1854 = vmatpush.bf16.msrb.mxu1 %v3342_v54  ;;  %v3400_v54 = vld [vmem:[%s4369_s1 + $0x338] sm:$0xff] }
  0x2d   :  { %1882 = vmatpush.bf16.msrb.mxu3 %v3358_v55  ;;  %v3416_v55 = vld [vmem:[%s4369_s1 + $0x3b8] sm:$0xff] }
  0x2e   :  { %1841 = vmatpush.bf16.msrb.mxu0 %v3333_v56  ;;  %v2342_v56 = vld [vmem:[%s4370_s0 + $0x20] sm:$0xf] }
  0x2f   :  { %1869 = vmatpush.bf16.msrb.mxu2 %v3349_v57  ;;  %v3288_v57 = vld [vmem:[%s4370_s0 + $0x80] sm:$0xf0] }
  0x30   :  { %1855 = vmatpush.bf16.msrb.mxu1 %v3341_v58  ;;  %v2350_v58 = vld [vmem:[%s4370_s0 + $0x28] sm:$0xf] }
  0x31   :  { %1883 = vmatpush.bf16.msrb.mxu3 %v3357_v59  ;;  %v3289_v59 = vld [vmem:[%s4370_s0 + $0x88] sm:$0xf0] }
  0x32   :  { %1842 = vmatpush.bf16.msrb.mxu0 %v3332_v60  ;;  %v3369_v60 = vld [vmem:[%s4369_s1 + $0x240] sm:$0xff] }
  0x33   :  { %1870 = vmatpush.bf16.msrb.mxu2 %v3348_v61  ;;  %v3385_v61 = vld [vmem:[%s4369_s1 + $0x2c0] sm:$0xff] }
  0x34   :  { %1856 = vmatpush.bf16.msrb.mxu1 %v3340_v62  ;;  %v3276_v62 = vld [vmem:[%s4370_s0 + $0x24] sm:$0xf] }
  0x35   :  { %1884 = vmatpush.bf16.msrb.mxu3 %v3356_v63  ;;  %v2344_v63 = vld [vmem:[%s4370_s0 + $0x84] sm:$0xf0] }
  0x36   :  { %1843 = vmatpush.bf16.msrb.mxu0 %v3331_v0  ;;  %v3277_v0 = vld [vmem:[%s4370_s0 + $0x2c] sm:$0xf] }
  0x37   :  { %1871 = vmatpush.bf16.msrb.mxu2 %v3347_v1  ;;  %v2352_v1 = vld [vmem:[%s4370_s0 + $0x8c] sm:$0xf0] }
  0x38   :  { %1857 = vmatpush.bf16.msrb.mxu1 %v3339_v2  ;;  %v2343_v2 = vor.u32 %v3288_v57, %v2342_v56  ;;  %v3430_v56 = vld [vmem:[%s4369_s1 + $0x428] sm:$0xff] }
  0x39   :  { %1885 = vmatpush.bf16.msrb.mxu3 %v3355_v3  ;;  %v2351_v3 = vor.u32 %v3289_v59, %v2350_v58  ;;  %v3446_v57 = vld [vmem:[%s4369_s1 + $0x4a8] sm:$0xff] }
  0x3a   :  { %1844 = vmatpush.bf16.msrb.mxu0 %v3330_v4  ;;  %v3408_v4 = vld [vmem:[%s4369_s1 + $0x378] sm:$0xff]  ;;  %v3438_v58 = vld [vmem:[%s4369_s1 + $0x468] sm:$0xff] }
  0x3b   :  { %1872 = vmatpush.bf16.msrb.mxu2 %v3346_v5  ;;  %v3424_v5 = vld [vmem:[%s4369_s1 + $0x3f8] sm:$0xff]  ;;  %v3454_v59 = vld [vmem:[%s4369_s1 + $0x4e8] sm:$0xff] }
  0x3c   :  { %1858 = vmatpush.bf16.msrb.mxu1 %v3338_v6  ;;  %v2347_v6 = vor.u32 %v3276_v62, %v2344_v63  ;;  %v3437_v62 = vld [vmem:[%s4369_s1 + $0x460] sm:$0xff] }
  0x3d   :  { %1886 = vmatpush.bf16.msrb.mxu3 %v3354_v7  ;;  %v2355_v7 = vor.u32 %v3277_v0, %v2352_v1  ;;  %v3453_v63 = vld [vmem:[%s4369_s1 + $0x4e0] sm:$0xff]  ;;  %v3428_v0 = vld [vmem:[%s4369_s1 + $0x418] sm:$0xff] }
  0x3e   :  { %1845 = vmatpush.bf16.msrb.mxu0 %v3329_v8  ;;  %v3399_v8 = vld [vmem:[%s4369_s1 + $0x330] sm:$0xff]  ;;  %v3444_v1 = vld [vmem:[%s4369_s1 + $0x498] sm:$0xff] }
  0x3f   :  { %1873 = vmatpush.bf16.msrb.mxu2 %v3345_v9  ;;  %v3415_v9 = vld [vmem:[%s4369_s1 + $0x3b0] sm:$0xff] }
  0x40   :  { %1859 = vmatpush.bf16.msrb.mxu1 %v3337_v16  ;;  %v3397_v16 = vld [vmem:[%s4369_s1 + $0x320] sm:$0xff] }
  0x41   :  { %1887 = vmatpush.bf16.msrb.mxu3 %v3353_v17  ;;  %1846 = vmatmul.bf16.vlgmr.msrb.gmra.mxu0 %v2327_v22  ;;  %v3413_v17 = vld [vmem:[%s4369_s1 + $0x3a0] sm:$0xff]  ;;  %v3404_v22 = vld [vmem:[%s4369_s1 + $0x358] sm:$0xff] }
  0x42   :  { %1894 = vmatpush.bf16.msra.mxu0 %v3368_v10  ;;  %1874 = vmatmul.bf16.vlgmr.msrb.gmra.mxu2 %v2335_v23  ;;  %v3407_v10 = vld [vmem:[%s4369_s1 + $0x370] sm:$0xff]  ;;  %v3420_v23 = vld [vmem:[%s4369_s1 + $0x3d8] sm:$0xff] }
  0x43   :  { %1922 = vmatpush.bf16.msra.mxu2 %v3384_v11  ;;  %1860 = vmatmul.bf16.vlgmr.msrb.gmra.mxu1 %v2331_v26  ;;  %v3423_v11 = vld [vmem:[%s4369_s1 + $0x3f0] sm:$0xff] }
  0x44   :  { %1908 = vmatpush.bf16.msra.mxu1 %v3376_v24  ;;  %1888 = vmatmul.bf16.vlgmr.msrb.gmra.mxu3 %v2339_v27  ;;  %v3395_v24 = vld [vmem:[%s4369_s1 + $0x310] sm:$0xff] }
  0x45   :  { %1936 = vmatpush.bf16.msra.mxu3 %v3392_v25  ;;  %v3411_v25 = vld [vmem:[%s4369_s1 + $0x390] sm:$0xff] }
  0x46   :  { %1895 = vmatpush.bf16.msra.mxu0 %v3367_v28  ;;  %v3403_v26 = vld [vmem:[%s4369_s1 + $0x350] sm:$0xff]  ;;  %v3394_v28 = vld [vmem:[%s4369_s1 + $0x308] sm:$0xff] }
  0x47   :  { %1923 = vmatpush.bf16.msra.mxu2 %v3383_v29  ;;  %v3419_v27 = vld [vmem:[%s4369_s1 + $0x3d0] sm:$0xff]  ;;  %v3410_v29 = vld [vmem:[%s4369_s1 + $0x388] sm:$0xff] }
  0x48   :  { %1909 = vmatpush.bf16.msra.mxu1 %v3375_v30  ;;  %v3402_v30 = vld [vmem:[%s4369_s1 + $0x348] sm:$0xff] }
  0x49   :  { %1937 = vmatpush.bf16.msra.mxu3 %v3391_v31  ;;  %v3418_v31 = vld [vmem:[%s4369_s1 + $0x3c8] sm:$0xff] }
  0x4a   :  { %1896 = vmatpush.bf16.msra.mxu0 %v3366_v32  ;;  %v3393_v32 = vld [vmem:[%s4369_s1 + $0x300] sm:$0xff] }
  0x4b   :  { %1924 = vmatpush.bf16.msra.mxu2 %v3382_v33  ;;  %v3409_v33 = vld [vmem:[%s4369_s1 + $0x380] sm:$0xff] }
  0x4c   :  { %1910 = vmatpush.bf16.msra.mxu1 %v3374_v34  ;;  %v3432_v34 = vld [vmem:[%s4369_s1 + $0x438] sm:$0xff] }
  0x4d   :  { %1938 = vmatpush.bf16.msra.mxu3 %v3390_v35  ;;  %v3448_v35 = vld [vmem:[%s4369_s1 + $0x4b8] sm:$0xff] }
  0x4e   :  { %1897 = vmatpush.bf16.msra.mxu0 %v3365_v36  ;;  %v2358_v36 = vld [vmem:[%s4370_s0 + $0x30] sm:$0xf] }
  0x4f   :  { %1925 = vmatpush.bf16.msra.mxu2 %v3381_v37  ;;  %v3290_v37 = vld [vmem:[%s4370_s0 + $0x90] sm:$0xf0] }
  0x50   :  { %1911 = vmatpush.bf16.msra.mxu1 %v3373_v38  ;;  %v2366_v38 = vld [vmem:[%s4370_s0 + $0x38] sm:$0xf] }
  0x51   :  { %1939 = vmatpush.bf16.msra.mxu3 %v3389_v39  ;;  %v3291_v39 = vld [vmem:[%s4370_s0 + $0x98] sm:$0xf0] }
  0x52   :  { %1898 = vmatpush.bf16.msra.mxu0 %v3364_v40  ;;  %v3401_v40 = vld [vmem:[%s4369_s1 + $0x340] sm:$0xff] }
  0x53   :  { %1926 = vmatpush.bf16.msra.mxu2 %v3380_v41  ;;  %v3417_v41 = vld [vmem:[%s4369_s1 + $0x3c0] sm:$0xff] }
  0x54   :  { %1912 = vmatpush.bf16.msra.mxu1 %v3372_v42  ;;  %v3278_v42 = vld [vmem:[%s4370_s0 + $0x34] sm:$0xf] }
  0x55   :  { %1940 = vmatpush.bf16.msra.mxu3 %v3388_v43  ;;  %v2360_v43 = vld [vmem:[%s4370_s0 + $0x94] sm:$0xf0] }
  0x56   :  { %1899 = vmatpush.bf16.msra.mxu0 %v3363_v44  ;;  %v3279_v44 = vld [vmem:[%s4370_s0 + $0x3c] sm:$0xf] }
  0x57   :  { %1927 = vmatpush.bf16.msra.mxu2 %v3379_v45  ;;  %v2368_v45 = vld [vmem:[%s4370_s0 + $0x9c] sm:$0xf0] }
  0x58   :  { %1913 = vmatpush.bf16.msra.mxu1 %v3371_v46  ;;  %v2359_v46 = vor.u32 %v3290_v37, %v2358_v36  ;;  %v3462_v36 = vld [vmem:[%s4369_s1 + $0x528] sm:$0xff] }
  0x59   :  { %1941 = vmatpush.bf16.msra.mxu3 %v3387_v47  ;;  %v2367_v47 = vor.u32 %v3291_v39, %v2366_v38  ;;  %v3478_v37 = vld [vmem:[%s4369_s1 + $0x5a8] sm:$0xff] }
  0x5a   :  { %1900 = vmatpush.bf16.msra.mxu0 %v3362_v48  ;;  %v3440_v48 = vld [vmem:[%s4369_s1 + $0x478] sm:$0xff]  ;;  %v3470_v38 = vld [vmem:[%s4369_s1 + $0x568] sm:$0xff] }
  0x5b   :  { %1928 = vmatpush.bf16.msra.mxu2 %v3378_v49  ;;  %v3456_v49 = vld [vmem:[%s4369_s1 + $0x4f8] sm:$0xff]  ;;  %v3486_v39 = vld [vmem:[%s4369_s1 + $0x5e8] sm:$0xff] }
  0x5c   :  { %1914 = vmatpush.bf16.msra.mxu1 %v3370_v50  ;;  %v2363_v50 = vor.u32 %v3278_v42, %v2360_v43  ;;  %v3469_v42 = vld [vmem:[%s4369_s1 + $0x560] sm:$0xff] }
  0x5d   :  { %1942 = vmatpush.bf16.msra.mxu3 %v3386_v51  ;;  %v2371_v51 = vor.u32 %v3279_v44, %v2368_v45  ;;  %v3485_v43 = vld [vmem:[%s4369_s1 + $0x5e0] sm:$0xff]  ;;  %v3460_v44 = vld [vmem:[%s4369_s1 + $0x518] sm:$0xff] }
  0x5e   :  { %1901 = vmatpush.bf16.msra.mxu0 %v3361_v52  ;;  %v3431_v52 = vld [vmem:[%s4369_s1 + $0x430] sm:$0xff]  ;;  %v3476_v45 = vld [vmem:[%s4369_s1 + $0x598] sm:$0xff] }
  0x5f   :  { %1929 = vmatpush.bf16.msra.mxu2 %v3377_v53  ;;  %v3447_v53 = vld [vmem:[%s4369_s1 + $0x4b0] sm:$0xff] }
  0x60   :  { %1915 = vmatpush.bf16.msra.mxu1 %v3369_v60  ;;  %v3429_v60 = vld [vmem:[%s4369_s1 + $0x420] sm:$0xff] }
  0x61   :  { %1943 = vmatpush.bf16.msra.mxu3 %v3385_v61  ;;  %1902 = vmatmul.bf16.vlgmr.msra.gmra.mxu0 %v2343_v2  ;;  %v3445_v61 = vld [vmem:[%s4369_s1 + $0x4a0] sm:$0xff]  ;;  %v3436_v2 = vld [vmem:[%s4369_s1 + $0x458] sm:$0xff] }
  0x62   :  { %1950 = vmatpush.bf16.msrb.mxu0 %v3400_v54  ;;  %1930 = vmatmul.bf16.vlgmr.msra.gmra.mxu2 %v2351_v3  ;;  %v3439_v54 = vld [vmem:[%s4369_s1 + $0x470] sm:$0xff]  ;;  %v3452_v3 = vld [vmem:[%s4369_s1 + $0x4d8] sm:$0xff] }
  0x63   :  { %1978 = vmatpush.bf16.msrb.mxu2 %v3416_v55  ;;  %1916 = vmatmul.bf16.vlgmr.msra.gmra.mxu1 %v2347_v6  ;;  %v3455_v55 = vld [vmem:[%s4369_s1 + $0x4f0] sm:$0xff] }
  0x64   :  { %1964 = vmatpush.bf16.msrb.mxu1 %v3408_v4  ;;  %1944 = vmatmul.bf16.vlgmr.msra.gmra.mxu3 %v2355_v7  ;;  %v3427_v4 = vld [vmem:[%s4369_s1 + $0x410] sm:$0xff] }
  0x65   :  { %1992 = vmatpush.bf16.msrb.mxu3 %v3424_v5  ;;  %v3443_v5 = vld [vmem:[%s4369_s1 + $0x490] sm:$0xff] }
  0x66   :  { %1951 = vmatpush.bf16.msrb.mxu0 %v3399_v8  ;;  %v3435_v6 = vld [vmem:[%s4369_s1 + $0x450] sm:$0xff]  ;;  %v3426_v8 = vld [vmem:[%s4369_s1 + $0x408] sm:$0xff] }
  0x67   :  { %1979 = vmatpush.bf16.msrb.mxu2 %v3415_v9  ;;  %v3451_v7 = vld [vmem:[%s4369_s1 + $0x4d0] sm:$0xff]  ;;  %v3442_v9 = vld [vmem:[%s4369_s1 + $0x488] sm:$0xff] }
  0x68   :  { %1965 = vmatpush.bf16.msrb.mxu1 %v3407_v10  ;;  %v3434_v10 = vld [vmem:[%s4369_s1 + $0x448] sm:$0xff] }
  0x69   :  { %1993 = vmatpush.bf16.msrb.mxu3 %v3423_v11  ;;  %v3450_v11 = vld [vmem:[%s4369_s1 + $0x4c8] sm:$0xff] }
  0x6a   :  { %1952 = vmatpush.bf16.msrb.mxu0 %v3398_v12  ;;  %v3425_v12 = vld [vmem:[%s4369_s1 + $0x400] sm:$0xff] }
  0x6b   :  { %1980 = vmatpush.bf16.msrb.mxu2 %v3414_v13  ;;  %v3441_v13 = vld [vmem:[%s4369_s1 + $0x480] sm:$0xff] }
  0x6c   :  { %1966 = vmatpush.bf16.msrb.mxu1 %v3406_v14  ;;  %v3464_v14 = vld [vmem:[%s4369_s1 + $0x538] sm:$0xff] }
  0x6d   :  { %1994 = vmatpush.bf16.msrb.mxu3 %v3422_v15  ;;  %v3480_v15 = vld [vmem:[%s4369_s1 + $0x5b8] sm:$0xff] }
  0x6e   :  { %1953 = vmatpush.bf16.msrb.mxu0 %v3397_v16  ;;  %v2374_v16 = vld [vmem:[%s4370_s0 + $0x40] sm:$0xf] }
  0x6f   :  { %1981 = vmatpush.bf16.msrb.mxu2 %v3413_v17  ;;  %v3292_v17 = vld [vmem:[%s4370_s0 + $0xa0] sm:$0xf0] }
  0x70   :  { %1967 = vmatpush.bf16.msrb.mxu1 %v3405_v18  ;;  %v2382_v18 = vld [vmem:[%s4370_s0 + $0x48] sm:$0xf] }
  0x71   :  { %1995 = vmatpush.bf16.msrb.mxu3 %v3421_v19  ;;  %v3293_v19 = vld [vmem:[%s4370_s0 + $0xa8] sm:$0xf0] }
  0x72   :  { %1954 = vmatpush.bf16.msrb.mxu0 %v3396_v20  ;;  %v3433_v20 = vld [vmem:[%s4369_s1 + $0x440] sm:$0xff] }
  0x73   :  { %1982 = vmatpush.bf16.msrb.mxu2 %v3412_v21  ;;  %v3449_v21 = vld [vmem:[%s4369_s1 + $0x4c0] sm:$0xff] }
  0x74   :  { %1968 = vmatpush.bf16.msrb.mxu1 %v3404_v22  ;;  %v3280_v22 = vld [vmem:[%s4370_s0 + $0x44] sm:$0xf] }
  0x75   :  { %1996 = vmatpush.bf16.msrb.mxu3 %v3420_v23  ;;  %v2376_v23 = vld [vmem:[%s4370_s0 + $0xa4] sm:$0xf0] }
  0x76   :  { %1955 = vmatpush.bf16.msrb.mxu0 %v3395_v24  ;;  %v3281_v24 = vld [vmem:[%s4370_s0 + $0x4c] sm:$0xf] }
  0x77   :  { %1983 = vmatpush.bf16.msrb.mxu2 %v3411_v25  ;;  %v2384_v25 = vld [vmem:[%s4370_s0 + $0xac] sm:$0xf0] }
  0x78   :  { %1969 = vmatpush.bf16.msrb.mxu1 %v3403_v26  ;;  %v2375_v26 = vor.u32 %v3292_v17, %v2374_v16  ;;  %v2406_v16 = vld [vmem:[%s4370_s0 + $0x60] sm:$0xf]  ;;  %v3296_v17 = vld [vmem:[%s4370_s0 + $0xc0] sm:$0xf0] }
  0x79   :  { %1997 = vmatpush.bf16.msrb.mxu3 %v3419_v27  ;;  %v2383_v27 = vor.u32 %v3293_v19, %v2382_v18  ;;  %v2407_v18 = vor.u32 %v3296_v17, %v2406_v16 }
  0x7a   :  { %1956 = vmatpush.bf16.msrb.mxu0 %v3394_v28  ;;  %v3472_v28 = vld [vmem:[%s4369_s1 + $0x578] sm:$0xff] }
  0x7b   :  { %1984 = vmatpush.bf16.msrb.mxu2 %v3410_v29  ;;  %v3488_v29 = vld [vmem:[%s4369_s1 + $0x5f8] sm:$0xff] }
  0x7c   :  { %1970 = vmatpush.bf16.msrb.mxu1 %v3402_v30  ;;  %v2379_v30 = vor.u32 %v3280_v22, %v2376_v23 }
  0x7d   :  { %1998 = vmatpush.bf16.msrb.mxu3 %v3418_v31  ;;  %v2387_v31 = vor.u32 %v3281_v24, %v2384_v25 }
  0x7e   :  { %1957 = vmatpush.bf16.msrb.mxu0 %v3393_v32  ;;  %v3463_v32 = vld [vmem:[%s4369_s1 + $0x530] sm:$0xff] }
  0x7f   :  { %1985 = vmatpush.bf16.msrb.mxu2 %v3409_v33  ;;  %v3479_v33 = vld [vmem:[%s4369_s1 + $0x5b0] sm:$0xff] }
  0x80   :  { %1971 = vmatpush.bf16.msrb.mxu1 %v3401_v40  ;;  %v3461_v40 = vld [vmem:[%s4369_s1 + $0x520] sm:$0xff] }
  0x81   :  { %1999 = vmatpush.bf16.msrb.mxu3 %v3417_v41  ;;  %1958 = vmatmul.bf16.vlgmr.msrb.gmra.mxu0 %v2359_v46  ;;  %v3477_v41 = vld [vmem:[%s4369_s1 + $0x5a0] sm:$0xff]  ;;  %v3468_v46 = vld [vmem:[%s4369_s1 + $0x558] sm:$0xff] }
  0x82   :  { %2006 = vmatpush.bf16.msra.mxu0 %v3432_v34  ;;  %1986 = vmatmul.bf16.vlgmr.msrb.gmra.mxu2 %v2367_v47  ;;  %v3471_v34 = vld [vmem:[%s4369_s1 + $0x570] sm:$0xff]  ;;  %v3484_v47 = vld [vmem:[%s4369_s1 + $0x5d8] sm:$0xff] }
  0x83   :  { %2034 = vmatpush.bf16.msra.mxu2 %v3448_v35  ;;  %1972 = vmatmul.bf16.vlgmr.msrb.gmra.mxu1 %v2363_v50  ;;  %v3487_v35 = vld [vmem:[%s4369_s1 + $0x5f0] sm:$0xff] }
  0x84   :  { %2020 = vmatpush.bf16.msra.mxu1 %v3440_v48  ;;  %2000 = vmatmul.bf16.vlgmr.msrb.gmra.mxu3 %v2371_v51  ;;  %v3459_v48 = vld [vmem:[%s4369_s1 + $0x510] sm:$0xff] }
  0x85   :  { %2048 = vmatpush.bf16.msra.mxu3 %v3456_v49  ;;  %v3475_v49 = vld [vmem:[%s4369_s1 + $0x590] sm:$0xff] }
  0x86   :  { %2007 = vmatpush.bf16.msra.mxu0 %v3431_v52  ;;  %v3467_v50 = vld [vmem:[%s4369_s1 + $0x550] sm:$0xff]  ;;  %v3458_v52 = vld [vmem:[%s4369_s1 + $0x508] sm:$0xff] }
  0x87   :  { %2035 = vmatpush.bf16.msra.mxu2 %v3447_v53  ;;  %v3483_v51 = vld [vmem:[%s4369_s1 + $0x5d0] sm:$0xff]  ;;  %v3474_v53 = vld [vmem:[%s4369_s1 + $0x588] sm:$0xff] }
  0x88   :  { %2021 = vmatpush.bf16.msra.mxu1 %v3439_v54  ;;  %v3466_v54 = vld [vmem:[%s4369_s1 + $0x548] sm:$0xff] }
  0x89   :  { %2049 = vmatpush.bf16.msra.mxu3 %v3455_v55  ;;  %v3482_v55 = vld [vmem:[%s4369_s1 + $0x5c8] sm:$0xff] }
  0x8a   :  { %2008 = vmatpush.bf16.msra.mxu0 %v3430_v56  ;;  %v3457_v56 = vld [vmem:[%s4369_s1 + $0x500] sm:$0xff] }
  0x8b   :  { %2036 = vmatpush.bf16.msra.mxu2 %v3446_v57  ;;  %v3473_v57 = vld [vmem:[%s4369_s1 + $0x580] sm:$0xff] }
  0x8c   :  { %2022 = vmatpush.bf16.msra.mxu1 %v3438_v58  ;;  %v3496_v58 = vld [vmem:[%s4369_s1 + $0x638] sm:$0xff] }
  0x8d   :  { %2050 = vmatpush.bf16.msra.mxu3 %v3454_v59  ;;  %v2390_v59 = vld [vmem:[%s4370_s0 + $0x50] sm:$0xf] }
  0x8e   :  { %2009 = vmatpush.bf16.msra.mxu0 %v3429_v60  ;;  %v3294_v60 = vld [vmem:[%s4370_s0 + $0xb0] sm:$0xf0] }
  0x8f   :  { %2037 = vmatpush.bf16.msra.mxu2 %v3445_v61  ;;  %v2398_v61 = vld [vmem:[%s4370_s0 + $0x58] sm:$0xf] }
  0x90   :  { %2023 = vmatpush.bf16.msra.mxu1 %v3437_v62  ;;  %v3295_v62 = vld [vmem:[%s4370_s0 + $0xb8] sm:$0xf0] }
  0x91   :  { %2051 = vmatpush.bf16.msra.mxu3 %v3453_v63  ;;  %v3465_v63 = vld [vmem:[%s4369_s1 + $0x540] sm:$0xff] }
  0x92   :  { %2010 = vmatpush.bf16.msra.mxu0 %v3428_v0  ;;  %v3481_v0 = vld [vmem:[%s4369_s1 + $0x5c0] sm:$0xff] }
  0x93   :  { %2038 = vmatpush.bf16.msra.mxu2 %v3444_v1  ;;  %v3282_v1 = vld [vmem:[%s4370_s0 + $0x54] sm:$0xf] }
  0x94   :  { %2024 = vmatpush.bf16.msra.mxu1 %v3436_v2  ;;  %v2392_v2 = vld [vmem:[%s4370_s0 + $0xb4] sm:$0xf0] }
  0x95   :  { %2052 = vmatpush.bf16.msra.mxu3 %v3452_v3  ;;  %v3283_v3 = vld [vmem:[%s4370_s0 + $0x5c] sm:$0xf] }
  0x96   :  { %2011 = vmatpush.bf16.msra.mxu0 %v3427_v4  ;;  %v2400_v4 = vld [vmem:[%s4370_s0 + $0xbc] sm:$0xf0] }
  0x97   :  { %2039 = vmatpush.bf16.msra.mxu2 %v3443_v5  ;;  %v2391_v5 = vor.u32 %v3294_v60, %v2390_v59 }
  0x98   :  { %2025 = vmatpush.bf16.msra.mxu1 %v3435_v6  ;;  %v2399_v6 = vor.u32 %v3295_v62, %v2398_v61  ;;  %v3503_v61 = vld [vmem:[%s4373_s3 + $0x30] sm:$0xff] }
  0x99   :  { %2053 = vmatpush.bf16.msra.mxu3 %v3451_v7  ;;  %v2395_v7 = vor.u32 %v3282_v1, %v2392_v2 }
  0x9a   :  { %2012 = vmatpush.bf16.msra.mxu0 %v3426_v8  ;;  %v2403_v8 = vor.u32 %v3283_v3, %v2400_v4 }
  0x9b   :  { %2040 = vmatpush.bf16.msra.mxu2 %v3442_v9  ;;  %v3495_v9 = vld [vmem:[%s4369_s1 + $0x630] sm:$0xff] }
  0x9c   :  { %2026 = vmatpush.bf16.msra.mxu1 %v3434_v10  ;;  %v3494_v10 = vld [vmem:[%s4369_s1 + $0x628] sm:$0xff] }
  0x9d   :  { %2054 = vmatpush.bf16.msra.mxu3 %v3450_v11  ;;  %v3493_v11 = vld [vmem:[%s4369_s1 + $0x620] sm:$0xff] }
  0x9e   :  { %2013 = vmatpush.bf16.msra.mxu0 %v3425_v12  ;;  %v3492_v12 = vld [vmem:[%s4369_s1 + $0x618] sm:$0xff]  ;;  %v1791_v19 = vpop.f32.mrf.mxu0 }
  0x9f   :  { %2041 = vmatpush.bf16.msra.mxu2 %v3441_v13  ;;  %v3491_v13 = vld [vmem:[%s4369_s1 + $0x610] sm:$0xff] }
  0xa0   :  { %2027 = vmatpush.bf16.msra.mxu1 %v3433_v20  ;;  %v1805_v20 = vpop.f32.mrf.mxu1 }
  0xa1   :  { %2055 = vmatpush.bf16.msra.mxu3 %v3449_v21  ;;  %2014 = vmatmul.bf16.vlgmr.msra.gmra.mxu0 %v2375_v26 }
  0xa2   :  { %2062 = vmatpush.bf16.msrb.mxu0 %v3464_v14  ;;  %2042 = vmatmul.bf16.vlgmr.msra.gmra.mxu2 %v2383_v27  ;;  %v3490_v14 = vld [vmem:[%s4369_s1 + $0x608] sm:$0xff] }
  0xa3   :  { %2090 = vmatpush.bf16.msrb.mxu2 %v3480_v15  ;;  %2028 = vmatmul.bf16.vlgmr.msra.gmra.mxu1 %v2379_v30  ;;  %v3489_v15 = vld [vmem:[%s4369_s1 + $0x600] sm:$0xff] }
  0xa4   :  { %2076 = vmatpush.bf16.msrb.mxu1 %v3472_v28  ;;  %2056 = vmatmul.bf16.vlgmr.msra.gmra.mxu3 %v2387_v31 }
  0xa5   :  { %2104 = vmatpush.bf16.msrb.mxu3 %v3488_v29  ;;  %v1819_v21 = vpop.f32.mrf.mxu2 }
  0xa6   :  { %2063 = vmatpush.bf16.msrb.mxu0 %v3463_v32  ;;  %v1793_v22 = vpop.f32.mrf.mxu0  ;;  %v3513_v32 = vld [vmem:[%s4371_s2] ss:$0 sm:$0xff] }
  0xa7   :  { %2091 = vmatpush.bf16.msrb.mxu2 %v3479_v33  ;;  %v1833_v23 = vpop.f32.mrf.mxu3 }
  0xa8   :  { %2077 = vmatpush.bf16.msrb.mxu1 %v3471_v34  ;;  %v1807_v24 = vpop.f32.mrf.mxu1 }
  0xa9   :  { %2105 = vmatpush.bf16.msrb.mxu3 %v3487_v35 }
  0xaa   :  { %2064 = vmatpush.bf16.msrb.mxu0 %v3462_v36  ;;  %v1792_v36 = vadd.f32 %v3513_v32, %v1791_v19 }
  0xab   :  { %2092 = vmatpush.bf16.msrb.mxu2 %v3478_v37 }
  0xac   :  { %2078 = vmatpush.bf16.msrb.mxu1 %v3470_v38  ;;  %v1806_v38 = vadd.f32 %v1805_v20, %v1792_v36 }
  0xad   :  { %2106 = vmatpush.bf16.msrb.mxu3 %v3486_v39  ;;  %v1821_v25 = vpop.f32.mrf.mxu2 }
  0xae   :  { %2065 = vmatpush.bf16.msrb.mxu0 %v3461_v40  ;;  %v1794_v40 = vadd.f32 %v3513_v32, %v1793_v22 }
  0xaf   :  { %2093 = vmatpush.bf16.msrb.mxu2 %v3477_v41  ;;  %v1835_v27 = vpop.f32.mrf.mxu3 }
  0xb0   :  { %2079 = vmatpush.bf16.msrb.mxu1 %v3469_v42  ;;  %v1820_v42 = vadd.f32 %v1819_v21, %v1806_v38 }
  0xb1   :  { %2107 = vmatpush.bf16.msrb.mxu3 %v3485_v43 }
  0xb2   :  { %2066 = vmatpush.bf16.msrb.mxu0 %v3460_v44  ;;  %v1808_v44 = vadd.f32 %v1807_v24, %v1794_v40  ;;  %v3498_v24 = vld [vmem:[%s4373_s3 + $0x8] sm:$0xff] }
  0xb3   :  { %2094 = vmatpush.bf16.msrb.mxu2 %v3476_v45 }
  0xb4   :  { %2080 = vmatpush.bf16.msrb.mxu1 %v3468_v46  ;;  %v1834_v46 = vadd.f32 %v1833_v23, %v1820_v42 }
  0xb5   :  { %2108 = vmatpush.bf16.msrb.mxu3 %v3484_v47  ;;  %v1822_v47 = vadd.f32 %v1821_v25, %v1808_v44 }
  0xb6   :  { %2067 = vmatpush.bf16.msrb.mxu0 %v3459_v48 }
  0xb7   :  { %2095 = vmatpush.bf16.msrb.mxu2 %v3475_v49 }
  0xb8   :  { %2081 = vmatpush.bf16.msrb.mxu1 %v3467_v50 }
  0xb9   :  { %2109 = vmatpush.bf16.msrb.mxu3 %v3483_v51 }
  0xba   :  { %2068 = vmatpush.bf16.msrb.mxu0 %v3458_v52  ;;  %v1836_v52 = vadd.f32 %v1835_v27, %v1822_v47 }
  0xbb   :  { %2096 = vmatpush.bf16.msrb.mxu2 %v3474_v53 }
  0xbc   :  { %2082 = vmatpush.bf16.msrb.mxu1 %v3466_v54 }
  0xbd   :  { %2110 = vmatpush.bf16.msrb.mxu3 %v3482_v55  ;;  %v3504_v55 = vld [vmem:[%s4373_s3 + $0x38] sm:$0xff] }
  0xbe   :  { %2069 = vmatpush.bf16.msrb.mxu0 %v3457_v56  ;;  %v1847_v26 = vpop.f32.mrf.mxu0 }
  0xbf   :  { %2097 = vmatpush.bf16.msrb.mxu2 %v3473_v57  ;;  %v1848_v49 = vadd.f32 %v1847_v26, %v1834_v46 }
  0xc0   :  { %2083 = vmatpush.bf16.msrb.mxu1 %v3465_v63  ;;  %v1861_v28 = vpop.f32.mrf.mxu1 }
  0xc1   :  { %2111 = vmatpush.bf16.msrb.mxu3 %v3481_v0  ;;  %2070 = vmatmul.bf16.vlgmr.msrb.gmra.mxu0 %v2391_v5  ;;  %v1862_v53 = vadd.f32 %v1861_v28, %v1848_v49  ;;  %v3502_v0 = vld [vmem:[%s4373_s3 + $0x28] sm:$0xff]  ;;  %v3501_v5 = vld [vmem:[%s4373_s3 + $0x20] sm:$0xff] }
  0xc2   :  { %2118 = vmatpush.bf16.msra.mxu0 %v3496_v58  ;;  %2098 = vmatmul.bf16.vlgmr.msrb.gmra.mxu2 %v2399_v6 }
  0xc3   :  { %2084 = vmatmul.bf16.vlgmr.msrb.gmra.mxu1 %v2395_v7 }
  0xc4   :  { %2112 = vmatmul.bf16.vlgmr.msrb.gmra.mxu3 %v2403_v8  ;;  %2203 = vmatpush.bf16.msra.mxu1 %v3504_v55 }
  0xc5   :  { %v1875_v29 = vpop.f32.mrf.mxu2 }
  0xc6   :  { %2119 = vmatpush.bf16.msra.mxu0 %v3495_v9  ;;  %v1849_v30 = vpop.f32.mrf.mxu0  ;;  %v1876_v58 = vadd.f32 %v1875_v29, %v1862_v53  ;;  %v3497_v29 = vld [vmem:[%s4373_s3] sm:$0xff] }
  0xc7   :  { %v1889_v31 = vpop.f32.mrf.mxu3  ;;  %v1850_v54 = vadd.f32 %v1849_v30, %v1836_v52 }
  0xc8   :  { %v1863_v33 = vpop.f32.mrf.mxu1  ;;  %2204 = vmatpush.bf16.msra.mxu1 %v3503_v61  ;;  %v1890_v1 = vadd.f32 %v1889_v31, %v1876_v58 }
  0xc9   :  { %v1864_v59 = vadd.f32 %v1863_v33, %v1850_v54 }
  0xca   :  { %2120 = vmatpush.bf16.msra.mxu0 %v3494_v10 }
  0xcc   :  { %2205 = vmatpush.bf16.msra.mxu1 %v3502_v0 }
  0xcd   :  { %v1877_v34 = vpop.f32.mrf.mxu2 }
  0xce   :  { %2121 = vmatpush.bf16.msra.mxu0 %v3493_v11  ;;  %v1878_v62 = vadd.f32 %v1877_v34, %v1864_v59 }
  0xcf   :  { %v1891_v37 = vpop.f32.mrf.mxu3 }
  0xd0   :  { %v1892_v3 = vadd.f32 %v1891_v37, %v1878_v62  ;;  %2206 = vmatpush.bf16.msra.mxu1 %v3501_v5  ;;  %v3512_v37 = vld [vmem:[%s4374_s5 + $0x38] sm:$0xff] }
  0xd1   :  { %2288 = vmatpush.bf16.msra.mxu2 %v3512_v37 }
  0xd2   :  { %2122 = vmatpush.bf16.msra.mxu0 %v3492_v12 }
  0xd6   :  { %2123 = vmatpush.bf16.msra.mxu0 %v3491_v13  ;;  %v3500_v13 = vld [vmem:[%s4373_s3 + $0x18] sm:$0xff] }
  0xd7   :  { %2207 = vmatpush.bf16.msra.mxu1 %v3500_v13 }
  0xda   :  { %2124 = vmatpush.bf16.msra.mxu0 %v3490_v14 }
  0xde   :  { %2125 = vmatpush.bf16.msra.mxu0 %v3489_v15  ;;  %v1903_v35 = vpop.f32.mrf.mxu0 }
  0xdf   :  { %v1904_v4 = vadd.f32 %v1903_v35, %v1890_v1 }
  0xe0   :  { %v1917_v39 = vpop.f32.mrf.mxu1 }
  0xe1   :  { %2126 = vmatmul.bf16.vlgmr.msra.gmra.mxu0 %v2407_v18  ;;  %v1918_v8 = vadd.f32 %v1917_v39, %v1904_v4  ;;  %v3499_v18 = vld [vmem:[%s4373_s3 + $0x10] sm:$0xff] }
  0xe2   :  { %2208 = vmatpush.bf16.msra.mxu1 %v3499_v18  ;;  %v3511_v39 = vld [vmem:[%s4374_s5 + $0x30] sm:$0xff] }
  0xe3   :  { %2289 = vmatpush.bf16.msra.mxu2 %v3511_v39 }
  0xe5   :  { %v1931_v41 = vpop.f32.mrf.mxu2 }
  0xe6   :  { %v1905_v43 = vpop.f32.mrf.mxu0  ;;  %v1932_v11 = vadd.f32 %v1931_v41, %v1918_v8  ;;  %2209 = vmatpush.bf16.msra.mxu1 %v3498_v24  ;;  %v3507_v8 = vld [vmem:[%s4374_s5 + $0x10] sm:$0xff] }
  0xe7   :  { %v1945_v45 = vpop.f32.mrf.mxu3  ;;  %v1906_v6 = vadd.f32 %v1905_v43, %v1892_v3 }
  0xe8   :  { %v1919_v48 = vpop.f32.mrf.mxu1  ;;  %v1946_v16 = vadd.f32 %v1945_v45, %v1932_v11  ;;  %v3510_v45 = vld [vmem:[%s4374_s5 + $0x28] sm:$0xff] }
  0xe9   :  { %v1920_v12 = vadd.f32 %v1919_v48, %v1906_v6  ;;  %2290 = vmatpush.bf16.msra.mxu2 %v3510_v45 }
  0xea   :  { %2210 = vmatpush.bf16.msra.mxu1 %v3497_v29 }
  0xed   :  { %v1933_v50 = vpop.f32.mrf.mxu2 }
  0xee   :  { %v1934_v14 = vadd.f32 %v1933_v50, %v1920_v12  ;;  %v3509_v50 = vld [vmem:[%s4374_s5 + $0x20] sm:$0xff] }
  0xef   :  { %v1947_v56 = vpop.f32.mrf.mxu3  ;;  %2291 = vmatpush.bf16.msra.mxu2 %v3509_v50  ;;  %v3514_v12 = vld [vmem:[%s4372_s4] ss:$0 sm:$0xff] }
  0xf0   :  { %v1948_v19 = vadd.f32 %v1947_v56, %v1934_v14 }
  0xfe   :  { %v1959_v51 = vpop.f32.mrf.mxu0 }
  0xff   :  { %v1960_v20 = vadd.f32 %v1959_v51, %v1946_v16 }
 0x100   :  { %v1973_v57 = vpop.f32.mrf.mxu1 }
 0x101   :  { %v1974_v25 = vadd.f32 %v1973_v57, %v1960_v20 }
 0x105   :  { %v1987_v60 = vpop.f32.mrf.mxu2 }
 0x106   :  { %v1961_v63 = vpop.f32.mrf.mxu0  ;;  %v1988_v27 = vadd.f32 %v1987_v60, %v1974_v25 }
 0x107   :  { %v2001_v2 = vpop.f32.mrf.mxu3  ;;  %v1962_v22 = vadd.f32 %v1961_v63, %v1948_v19  ;;  %v3515_v19 = vld [vmem:[%s4375_s6] ss:$0 sm:$0xff] }
 0x108   :  { %v1975_v7 = vpop.f32.mrf.mxu1  ;;  %v2002_v32 = vadd.f32 %v2001_v2, %v1988_v27 }
 0x109   :  { %v1976_v28 = vadd.f32 %v1975_v7, %v1962_v22  ;;  %v3508_v7 = vld [vmem:[%s4374_s5 + $0x18] sm:$0xff] }
 0x10a   :  { %2292 = vmatpush.bf16.msra.mxu2 %v3508_v7 }
 0x10d   :  { %v1989_v9 = vpop.f32.mrf.mxu2 }
 0x10e   :  { %v1990_v30 = vadd.f32 %v1989_v9, %v1976_v28  ;;  %2293 = vmatpush.bf16.msra.mxu2 %v3507_v8  ;;  %v3506_v9 = vld [vmem:[%s4374_s5 + $0x8] sm:$0xff] }
 0x10f   :  { %v2003_v15 = vpop.f32.mrf.mxu3 }
 0x110   :  { %v2004_v35 = vadd.f32 %v2003_v15, %v1990_v30 }
 0x112   :  { %2294 = vmatpush.bf16.msra.mxu2 %v3506_v9 }
 0x11e   :  { %v2015_v10 = vpop.f32.mrf.mxu0 }
 0x11f   :  { %v2016_v36 = vadd.f32 %v2015_v10, %v2002_v32  ;;  %v3505_v10 = vld [vmem:[%s4374_s5] sm:$0xff] }
 0x120   :  { %v2029_v17 = vpop.f32.mrf.mxu1  ;;  %2295 = vmatpush.bf16.msra.mxu2 %v3505_v10 }
 0x121   :  { %v2030_v41 = vadd.f32 %v2029_v17, %v2016_v36 }
 0x125   :  { %v2043_v21 = vpop.f32.mrf.mxu2 }
 0x126   :  { %v2017_v23 = vpop.f32.mrf.mxu0  ;;  %v2044_v43 = vadd.f32 %v2043_v21, %v2030_v41 }
 0x127   :  { %v2057_v26 = vpop.f32.mrf.mxu3  ;;  %v2018_v38 = vadd.f32 %v2017_v23, %v2004_v35 }
 0x128   :  { %v2031_v31 = vpop.f32.mrf.mxu1  ;;  %v2058_v49 = vadd.f32 %v2057_v26, %v2044_v43 }
 0x129   :  { %v2032_v44 = vadd.f32 %v2031_v31, %v2018_v38 }
 0x12d   :  { %v2045_v33 = vpop.f32.mrf.mxu2 }
 0x12e   :  { %v2046_v47 = vadd.f32 %v2045_v33, %v2032_v44 }
 0x12f   :  { %v2059_v40 = vpop.f32.mrf.mxu3 }
 0x130   :  { %v2060_v52 = vadd.f32 %v2059_v40, %v2046_v47 }
 0x13e   :  { %v2071_v34 = vpop.f32.mrf.mxu0 }
 0x13f   :  { %v2072_v53 = vadd.f32 %v2071_v34, %v2058_v49 }
 0x140   :  { %v2085_v42 = vpop.f32.mrf.mxu1 }
 0x141   :  { %v2086_v56 = vadd.f32 %v2085_v42, %v2072_v53 }
 0x145   :  { %v2099_v46 = vpop.f32.mrf.mxu2 }
 0x146   :  { %v2073_v48 = vpop.f32.mrf.mxu0  ;;  %v2100_v59 = vadd.f32 %v2099_v46, %v2086_v56 }
 0x147   :  { %v2113_v51 = vpop.f32.mrf.mxu3  ;;  %v2074_v54 = vadd.f32 %v2073_v48, %v2060_v52 }
 0x148   :  { %v2087_v55 = vpop.f32.mrf.mxu1  ;;  %v2114_v63 = vadd.f32 %v2113_v51, %v2100_v59 }
 0x149   :  { %v2088_v60 = vadd.f32 %v2087_v55, %v2074_v54 }
 0x14d   :  { %v2101_v57 = vpop.f32.mrf.mxu2 }
 0x14e   :  { %v2102_v61 = vadd.f32 %v2101_v57, %v2088_v60 }
 0x14f   :  { %v2115_v62 = vpop.f32.mrf.mxu3 }
 0x150   :  { %v2116_v0 = vadd.f32 %v2115_v62, %v2102_v61 }
 0x15e   :  { %v2127_v58 = vpop.f32.mrf.mxu0 }
 0x15f   :  { %v2128_v1 = vadd.f32 %v2127_v58, %v2114_v63 }
 0x161   :  { %v2132_v4 = vmax.f32 %v2128_v1, 0.0 }
 0x166   :  { %v2129_v2 = vpop.f32.mrf.mxu0 }
 0x167   :  { %v2130_v3 = vadd.f32 %v2129_v2, %v2116_v0 }
 0x169   :  { %v2133_v5 = vmax.f32 %v2130_v3, 0.0 }
 0x16b   :  { %v2134_v6 = vpack.c.bf16 %v2133_v5, %v2132_v4 }
 0x16d   :  { %2211 = vmatmul.bf16.vlgmr.msra.gmra.mxu1 %v2134_v6 }
 0x1ea   :  { %v2212_v11 = vpop.f32.mrf.mxu1 }
 0x1eb   :  { %v2213_v13 = vadd.f32 %v3514_v12, %v2212_v11 }
 0x1ed   :  { %v2217_v16 = vmax.f32 %v2213_v13, 0.0 }
 0x1f2   :  { %v2214_v14 = vpop.f32.mrf.mxu1 }
 0x1f3   :  { %v2215_v15 = vadd.f32 %v3514_v12, %v2214_v14 }
 0x1f5   :  { %v2218_v17 = vmax.f32 %v2215_v15, 0.0 }
 0x1f7   :  { %v2219_v18 = vpack.c.bf16 %v2218_v17, %v2217_v16 }
 0x1f9   :  { %2296 = vmatmul.bf16.vlgmr.msra.gmra.mxu2 %v2219_v18 }
 0x27c   :  { %v2297_v20 = vpop.f32.mrf.mxu2 }
 0x27d   :  { %v2298_v21 = vadd.f32 %v3515_v19, %v2297_v20 }
 0x27f   :  { %2302 = vst [vmem:[%s4376_s7] sm:$0xff] %v2298_v21 }
 0x284   :  { %v2299_v22 = vpop.f32.mrf.mxu2 }
 0x285   :  { %v2300_v23 = vadd.f32 %v3515_v19, %v2299_v22 }
 0x287   :  { %2303 = vst [vmem:[%s4376_s7 + $0x8] sm:$0xff] %v2300_v23 }

// kernel: net_forward.4
= control target key start
LH: loop header
LB: loop body
LE: loop exit
PB: predicated region body
PF: predicated region fallthrough
CT: control target
= control target key end

     0   :  { %s11367_s1 = inlined_call_operand.vmem [shape: bf16[3200,128], index: 1, kind: input, shape index: {}]   ;;  %s11368_s2 = inlined_call_operand.vmem [shape: f32[1,128], index: 2, kind: input, shape index: {}]   ;;  %s11369_s0 = inlined_call_operand.vmem [shape: bf16[208,3200], index: 0, kind: input, shape index: {}]   ;;  %s11370_s3 = inlined_call_operand.vmem [shape: bf16[208,128], index: 3, kind: output, shape index: {}]  }
   0x1   :  { %v7958_v0 = vld [vmem:[%s11367_s1 + $0x38] sm:$0xff]  ;;  %v7957_v1 = vld [vmem:[%s11367_s1 + $0x30] sm:$0xff]  ;;  %v7956_v2 = vld [vmem:[%s11367_s1 + $0x28] sm:$0xff] }
   0x2   :  { %3594 = vmatpush.bf16.msra.mxu0 %v7958_v0  ;;  %8228 = vmatpush.bf16.msra.mxu1 %v7958_v0  ;;  %v7955_v3 = vld [vmem:[%s11367_s1 + $0x20] sm:$0xff]  ;;  %v7954_v4 = vld [vmem:[%s11367_s1 + $0x18] sm:$0xff]  ;;  %v7953_v5 = vld [vmem:[%s11367_s1 + $0x10] sm:$0xff] }
   0x3   :  { %8230 = vmatpush.bf16.msra.mxu3 %v7958_v0  ;;  %8229 = vmatpush.bf16.msra.mxu2 %v7958_v0  ;;  %v7952_v6 = vld [vmem:[%s11367_s1 + $0x8] sm:$0xff]  ;;  %v7951_v7 = vld [vmem:[%s11367_s1] sm:$0xff]  ;;  %v7966_v12 = vld [vmem:[%s11367_s1 + $0x78] sm:$0xff] }
   0x4   :  { %v5528_v8 = vld [vmem:[%s11369_s0] sm:$0xf]  ;;  %v7638_v9 = vld [vmem:[%s11369_s0 + $0x60] sm:$0xf0]  ;;  %v6528_v13 = vld [vmem:[%s11369_s0 + $0x7d0] sm:$0xf] }
   0x5   :  { %v5928_v10 = vld [vmem:[%s11369_s0 + $0x320] sm:$0xf]  ;;  %v7738_v11 = vld [vmem:[%s11369_s0 + $0x380] sm:$0xf0]  ;;  %v7888_v14 = vld [vmem:[%s11369_s0 + $0x830] sm:$0xf0]  ;;  %v5529_v17 = vor.u32 %v7638_v9, %v5528_v8 }
   0x6   :  { %3595 = vmatpush.bf16.msra.mxu0 %v7957_v1  ;;  %8231 = vmatpush.bf16.msra.mxu1 %v7957_v1  ;;  %v7990_v15 = vld [vmem:[%s11367_s1 + $0x138] sm:$0xff]  ;;  %v5929_v18 = vor.u32 %v7738_v11, %v5928_v10  ;;  %v6529_v19 = vor.u32 %v7888_v14, %v6528_v13  ;;  %v6328_v20 = vld [vmem:[%s11369_s0 + $0x640] sm:$0xf]  ;;  %v7838_v21 = vld [vmem:[%s11369_s0 + $0x6a0] sm:$0xf0] }
   0x7   :  { %8233 = vmatpush.bf16.msra.mxu3 %v7957_v1  ;;  %8232 = vmatpush.bf16.msra.mxu2 %v7957_v1  ;;  %v7982_v16 = vld [vmem:[%s11367_s1 + $0xf8] sm:$0xff]  ;;  %v7965_v22 = vld [vmem:[%s11367_s1 + $0x70] sm:$0xff]  ;;  %v6329_v26 = vor.u32 %v7838_v21, %v6328_v20  ;;  %v7964_v27 = vld [vmem:[%s11367_s1 + $0x68] sm:$0xff] }
   0x8   :  { %v7974_v23 = vld [vmem:[%s11367_s1 + $0xb8] sm:$0xff]  ;;  %v7989_v24 = vld [vmem:[%s11367_s1 + $0x130] sm:$0xff]  ;;  %v7988_v29 = vld [vmem:[%s11367_s1 + $0x128] sm:$0xff] }
   0x9   :  { %v7981_v25 = vld [vmem:[%s11367_s1 + $0xf0] sm:$0xff]  ;;  %v7980_v30 = vld [vmem:[%s11367_s1 + $0xe8] sm:$0xff]  ;;  %v7963_v31 = vld [vmem:[%s11367_s1 + $0x60] sm:$0xff] }
   0xa   :  { %3596 = vmatpush.bf16.msra.mxu0 %v7956_v2  ;;  %8234 = vmatpush.bf16.msra.mxu1 %v7956_v2  ;;  %v7973_v28 = vld [vmem:[%s11367_s1 + $0xb0] sm:$0xff]  ;;  %v7972_v32 = vld [vmem:[%s11367_s1 + $0xa8] sm:$0xff]  ;;  %v7987_v33 = vld [vmem:[%s11367_s1 + $0x120] sm:$0xff] }
   0xb   :  { %8236 = vmatpush.bf16.msra.mxu3 %v7956_v2  ;;  %8235 = vmatpush.bf16.msra.mxu2 %v7956_v2  ;;  %v7979_v34 = vld [vmem:[%s11367_s1 + $0xe0] sm:$0xff]  ;;  %v5628_v35 = vld [vmem:[%s11369_s0 + $0xc8] sm:$0xf]  ;;  %v7663_v36 = vld [vmem:[%s11369_s0 + $0x128] sm:$0xf0] }
   0xc   :  { %v6028_v37 = vld [vmem:[%s11369_s0 + $0x3e8] sm:$0xf]  ;;  %v7763_v38 = vld [vmem:[%s11369_s0 + $0x448] sm:$0xf0]  ;;  %v6628_v39 = vld [vmem:[%s11369_s0 + $0x898] sm:$0xf]  ;;  %v5629_v45 = vor.u32 %v7663_v36, %v5628_v35 }
   0xd   :  { %v7913_v40 = vld [vmem:[%s11369_s0 + $0x8f8] sm:$0xf0]  ;;  %v7971_v42 = vld [vmem:[%s11367_s1 + $0xa0] sm:$0xff]  ;;  %v6029_v46 = vor.u32 %v7763_v38, %v6028_v37  ;;  %v6428_v48 = vld [vmem:[%s11369_s0 + $0x708] sm:$0xf] }
   0xe   :  { %3597 = vmatpush.bf16.msra.mxu0 %v7955_v3  ;;  %8237 = vmatpush.bf16.msra.mxu1 %v7955_v3  ;;  %v7962_v41 = vld [vmem:[%s11367_s1 + $0x58] sm:$0xff]  ;;  %v6629_v47 = vor.u32 %v7913_v40, %v6628_v39  ;;  %v7863_v49 = vld [vmem:[%s11369_s0 + $0x768] sm:$0xf0]  ;;  %v7961_v51 = vld [vmem:[%s11367_s1 + $0x50] sm:$0xff] }
   0xf   :  { %8239 = vmatpush.bf16.msra.mxu3 %v7955_v3  ;;  %8238 = vmatpush.bf16.msra.mxu2 %v7955_v3  ;;  %v7978_v43 = vld [vmem:[%s11367_s1 + $0xd8] sm:$0xff]  ;;  %v7977_v52 = vld [vmem:[%s11367_s1 + $0xd0] sm:$0xff]  ;;  %v6429_v54 = vor.u32 %v7863_v49, %v6428_v48  ;;  %v7960_v56 = vld [vmem:[%s11367_s1 + $0x48] sm:$0xff] }
  0x10   :  { %v7986_v44 = vld [vmem:[%s11367_s1 + $0x118] sm:$0xff]  ;;  %v7985_v53 = vld [vmem:[%s11367_s1 + $0x110] sm:$0xff]  ;;  %v7976_v57 = vld [vmem:[%s11367_s1 + $0xc8] sm:$0xff] }
  0x11   :  { %v7970_v50 = vld [vmem:[%s11367_s1 + $0x98] sm:$0xff]  ;;  %v7969_v55 = vld [vmem:[%s11367_s1 + $0x90] sm:$0xff]  ;;  %v7984_v58 = vld [vmem:[%s11367_s1 + $0x108] sm:$0xff] }
  0x12   :  { %3598 = vmatpush.bf16.msra.mxu0 %v7954_v4  ;;  %8240 = vmatpush.bf16.msra.mxu1 %v7954_v4  ;;  %v7968_v59 = vld [vmem:[%s11367_s1 + $0x88] sm:$0xff]  ;;  %v7959_v60 = vld [vmem:[%s11367_s1 + $0x40] sm:$0xff]  ;;  %v5728_v63 = vld [vmem:[%s11369_s0 + $0x190] sm:$0xf] }
  0x13   :  { %8242 = vmatpush.bf16.msra.mxu3 %v7954_v4  ;;  %8241 = vmatpush.bf16.msra.mxu2 %v7954_v4  ;;  %v7975_v61 = vld [vmem:[%s11367_s1 + $0xc0] sm:$0xff]  ;;  %v8014_v0 = vld [vmem:[%s11367_s1 + $0x1f8] sm:$0xff]  ;;  %v7688_v1 = vld [vmem:[%s11369_s0 + $0x1f0] sm:$0xf0] }
  0x14   :  { %v7983_v62 = vld [vmem:[%s11367_s1 + $0x100] sm:$0xff]  ;;  %v6128_v2 = vld [vmem:[%s11369_s0 + $0x4b0] sm:$0xf]  ;;  %v7788_v3 = vld [vmem:[%s11369_s0 + $0x510] sm:$0xf0]  ;;  %v5729_v8 = vor.u32 %v7688_v1, %v5728_v63 }
  0x15   :  { %v6728_v4 = vld [vmem:[%s11369_s0 + $0x960] sm:$0xf]  ;;  %v6129_v9 = vor.u32 %v7788_v3, %v6128_v2  ;;  %v5536_v11 = vld [vmem:[%s11369_s0 + $0x8] sm:$0xf]  ;;  %v7998_v14 = vld [vmem:[%s11367_s1 + $0x178] sm:$0xff] }
  0x16   :  { %3599 = vmatpush.bf16.msra.mxu0 %v7953_v5  ;;  %8243 = vmatpush.bf16.msra.mxu1 %v7953_v5  ;;  %v7627_v20 = vld [vmem:[%s11369_s0 + $0xc] sm:$0xf]  ;;  %v5538_v21 = vld [vmem:[%s11369_s0 + $0x6c] sm:$0xf0]  ;;  %v7652_v35 = vld [vmem:[%s11369_s0 + $0xd4] sm:$0xf] }
  0x17   :  { %8245 = vmatpush.bf16.msra.mxu3 %v7953_v5  ;;  %8244 = vmatpush.bf16.msra.mxu2 %v7953_v5  ;;  %v7938_v5 = vld [vmem:[%s11369_s0 + $0x9c0] sm:$0xf0]  ;;  %v5638_v36 = vld [vmem:[%s11369_s0 + $0x134] sm:$0xf0]  ;;  %v7677_v48 = vld [vmem:[%s11369_s0 + $0x19c] sm:$0xf] }
  0x18   :  { %v6729_v10 = vor.u32 %v7938_v5, %v6728_v4  ;;  %v5641_v39 = vor.u32 %v7652_v35, %v5638_v36  ;;  %v5736_v40 = vld [vmem:[%s11369_s0 + $0x198] sm:$0xf]  ;;  %v5738_v49 = vld [vmem:[%s11369_s0 + $0x1fc] sm:$0xf0]  ;;  %v7690_v63 = vld [vmem:[%s11369_s0 + $0x200] sm:$0xf0] }
  0x19   :  { %v5838_v1 = vld [vmem:[%s11369_s0 + $0x2c4] sm:$0xf0]  ;;  %v6136_v36 = vld [vmem:[%s11369_s0 + $0x4b8] sm:$0xf] }
  0x1a   :  { %3600 = vmatpush.bf16.msra.mxu0 %v7952_v6  ;;  %8246 = vmatpush.bf16.msra.mxu1 %v7952_v6  ;;  %v5936_v5 = vld [vmem:[%s11369_s0 + $0x328] sm:$0xf] }
  0x1b   :  { %8248 = vmatpush.bf16.msra.mxu3 %v7952_v6  ;;  %8247 = vmatpush.bf16.msra.mxu2 %v7952_v6  ;;  %v7967_v6 = vld [vmem:[%s11367_s1 + $0x80] sm:$0xff] }
  0x1e   :  { %3601 = vmatpush.bf16.msra.mxu0 %v7951_v7  ;;  %8249 = vmatpush.bf16.msra.mxu1 %v7951_v7 }
  0x1f   :  { %8251 = vmatpush.bf16.msra.mxu3 %v7951_v7  ;;  %8250 = vmatpush.bf16.msra.mxu2 %v7951_v7  ;;  %v8006_v7 = vld [vmem:[%s11367_s1 + $0x1b8] sm:$0xff] }
  0x21   :  { %3602 = vmatmul.bf16.vlgmr.msra.gmra.mxu0 %v5529_v17  ;;  %3622 = vmatmul.bf16.vlgmr.msra.gmra.mxu1 %v5929_v18  ;;  %v7713_v17 = vld [vmem:[%s11369_s0 + $0x2b8] sm:$0xf0]  ;;  %v6228_v18 = vld [vmem:[%s11369_s0 + $0x578] sm:$0xf] }
  0x22   :  { %3668 = vmatpush.bf16.msrb.mxu1 %v7966_v12  ;;  %3890 = vmatpush.bf16.msrb.mxu0 %v7990_v15  ;;  %v7639_v12 = vld [vmem:[%s11369_s0 + $0x68] sm:$0xf0]  ;;  %v8022_v15 = vld [vmem:[%s11367_s1 + $0x238] sm:$0xff] }
  0x23   :  { %3816 = vmatpush.bf16.msrb.mxu3 %v7982_v16  ;;  %3742 = vmatpush.bf16.msrb.mxu2 %v7974_v23  ;;  %v5537_v13 = vor.u32 %v7639_v12, %v5536_v11  ;;  %v5828_v16 = vld [vmem:[%s11369_s0 + $0x258] sm:$0xf]  ;;  %v5830_v11 = vld [vmem:[%s11369_s0 + $0x2bc] sm:$0xf0]  ;;  %v5844_v12 = vld [vmem:[%s11369_s0 + $0x268] sm:$0xf] }
  0x24   :  { %3652 = vmatmul.bf16.vlgmr.msra.gmra.mxu3 %v6529_v19  ;;  %3642 = vmatmul.bf16.vlgmr.msra.gmra.mxu2 %v6329_v26  ;;  %v7813_v19 = vld [vmem:[%s11369_s0 + $0x5d8] sm:$0xf0]  ;;  %v7664_v26 = vld [vmem:[%s11369_s0 + $0x130] sm:$0xf0] }
  0x25   :  { %v6229_v23 = vor.u32 %v7813_v19, %v6228_v18  ;;  %v6036_v19 = vld [vmem:[%s11369_s0 + $0x3f0] sm:$0xf] }
  0x26   :  { %3669 = vmatpush.bf16.msrb.mxu1 %v7965_v22  ;;  %3891 = vmatpush.bf16.msrb.mxu0 %v7989_v24  ;;  %v5829_v22 = vor.u32 %v7713_v17, %v5828_v16  ;;  %v5541_v24 = vor.u32 %v7627_v20, %v5538_v21  ;;  %v7764_v20 = vld [vmem:[%s11369_s0 + $0x450] sm:$0xf0]  ;;  %v7995_v21 = vld [vmem:[%s11367_s1 + $0x160] sm:$0xff] }
  0x27   :  { %3817 = vmatpush.bf16.msrb.mxu3 %v7981_v25  ;;  %3743 = vmatpush.bf16.msrb.mxu2 %v7973_v28  ;;  %v5636_v25 = vld [vmem:[%s11369_s0 + $0xd0] sm:$0xf] }
  0x28   :  { %v8005_v28 = vld [vmem:[%s11367_s1 + $0x1b0] sm:$0xff] }
  0x2a   :  { %3670 = vmatpush.bf16.msrb.mxu1 %v7964_v27  ;;  %3892 = vmatpush.bf16.msrb.mxu0 %v7988_v29  ;;  %v5637_v27 = vor.u32 %v7664_v26, %v5636_v25  ;;  %v8013_v29 = vld [vmem:[%s11367_s1 + $0x1f0] sm:$0xff]  ;;  %v5930_v25 = vld [vmem:[%s11369_s0 + $0x384] sm:$0xf0] }
  0x2b   :  { %3818 = vmatpush.bf16.msrb.mxu3 %v7980_v30  ;;  %3744 = vmatpush.bf16.msrb.mxu2 %v7972_v32  ;;  %v7997_v30 = vld [vmem:[%s11367_s1 + $0x170] sm:$0xff]  ;;  %v5530_v32 = vld [vmem:[%s11369_s0 + $0x64] sm:$0xf0] }
  0x2c   :  { %v5944_v26 = vld [vmem:[%s11369_s0 + $0x330] sm:$0xf] }
  0x2e   :  { %3671 = vmatpush.bf16.msrb.mxu1 %v7963_v31  ;;  %3893 = vmatpush.bf16.msrb.mxu0 %v7987_v33  ;;  %v7626_v31 = vld [vmem:[%s11369_s0 + $0x4] sm:$0xf]  ;;  %v5544_v33 = vld [vmem:[%s11369_s0 + $0x10] sm:$0xf] }
  0x2f   :  { %3819 = vmatpush.bf16.msrb.mxu3 %v7979_v34  ;;  %3745 = vmatpush.bf16.msrb.mxu2 %v7971_v42  ;;  %v7640_v34 = vld [vmem:[%s11369_s0 + $0x70] sm:$0xf0]  ;;  %v5533_v37 = vor.u32 %v7626_v31, %v5530_v32 }
  0x30   :  { %v5545_v38 = vor.u32 %v7640_v34, %v5544_v33 }
  0x31   :  { %3607 = vmatmul.bf16.gmra.mxu0 %v5629_v45  ;;  %3627 = vmatmul.bf16.gmra.mxu1 %v6029_v46  ;;  %v5630_v45 = vld [vmem:[%s11369_s0 + $0x12c] sm:$0xf0]  ;;  %v5644_v46 = vld [vmem:[%s11369_s0 + $0xd8] sm:$0xf] }
  0x32   :  { %3672 = vmatpush.bf16.msrb.mxu1 %v7962_v41  ;;  %3894 = vmatpush.bf16.msrb.mxu0 %v7986_v44  ;;  %v7689_v41 = vld [vmem:[%s11369_s0 + $0x1f8] sm:$0xf0]  ;;  %v7651_v44 = vld [vmem:[%s11369_s0 + $0xcc] sm:$0xf] }
  0x33   :  { %3820 = vmatpush.bf16.msrb.mxu3 %v7978_v43  ;;  %3746 = vmatpush.bf16.msrb.mxu2 %v7970_v50  ;;  %v5737_v42 = vor.u32 %v7689_v41, %v5736_v40  ;;  %v8021_v43 = vld [vmem:[%s11367_s1 + $0x230] sm:$0xff]  ;;  %v5633_v50 = vor.u32 %v7651_v44, %v5630_v45  ;;  %v8002_v40 = vld [vmem:[%s11367_s1 + $0x198] sm:$0xff] }
  0x34   :  { %3657 = vmatmul.bf16.gmra.mxu3 %v6629_v47  ;;  %3647 = vmatmul.bf16.gmra.mxu2 %v6429_v54  ;;  %v7665_v47 = vld [vmem:[%s11369_s0 + $0x138] sm:$0xf0]  ;;  %v7714_v54 = vld [vmem:[%s11369_s0 + $0x2c0] sm:$0xf0] }
  0x36   :  { %3673 = vmatpush.bf16.msrb.mxu1 %v7961_v51  ;;  %3895 = vmatpush.bf16.msrb.mxu0 %v7985_v53  ;;  %v5645_v51 = vor.u32 %v7665_v47, %v5644_v46  ;;  %v5836_v53 = vld [vmem:[%s11369_s0 + $0x260] sm:$0xf]  ;;  %v8010_v46 = vld [vmem:[%s11367_s1 + $0x1d8] sm:$0xff] }
  0x37   :  { %3821 = vmatpush.bf16.msrb.mxu3 %v7977_v52  ;;  %3747 = vmatpush.bf16.msrb.mxu2 %v7969_v55  ;;  %v5741_v52 = vor.u32 %v7677_v48, %v5738_v49  ;;  %v5837_v55 = vor.u32 %v7714_v54, %v5836_v53  ;;  %v7994_v47 = vld [vmem:[%s11367_s1 + $0x158] sm:$0xff]  ;;  %v7751_v49 = vld [vmem:[%s11369_s0 + $0x3ec] sm:$0xf] }
  0x38   :  { %v7765_v53 = vld [vmem:[%s11369_s0 + $0x458] sm:$0xf0] }
  0x39   :  { %v7777_v54 = vld [vmem:[%s11369_s0 + $0x4bc] sm:$0xf] }
  0x3a   :  { %3674 = vmatpush.bf16.msrb.mxu1 %v7960_v56  ;;  %3896 = vmatpush.bf16.msrb.mxu0 %v7984_v58  ;;  %v8004_v56 = vld [vmem:[%s11367_s1 + $0x1a8] sm:$0xff] }
  0x3b   :  { %3822 = vmatpush.bf16.msrb.mxu3 %v7976_v57  ;;  %3748 = vmatpush.bf16.msrb.mxu2 %v7968_v59  ;;  %v8012_v57 = vld [vmem:[%s11367_s1 + $0x1e8] sm:$0xff] }
  0x3c   :  { %v7996_v58 = vld [vmem:[%s11367_s1 + $0x168] sm:$0xff] }
  0x3d   :  { %v8020_v59 = vld [vmem:[%s11367_s1 + $0x228] sm:$0xff] }
  0x3e   :  { %3675 = vmatpush.bf16.msrb.mxu1 %v7959_v60  ;;  %3897 = vmatpush.bf16.msrb.mxu0 %v7983_v62  ;;  %v7676_v60 = vld [vmem:[%s11369_s0 + $0x194] sm:$0xf]  ;;  %v5744_v62 = vld [vmem:[%s11369_s0 + $0x1a0] sm:$0xf] }
  0x3f   :  { %3823 = vmatpush.bf16.msrb.mxu3 %v7975_v61  ;;  %3749 = vmatpush.bf16.msrb.mxu2 %v7967_v6  ;;  %v5730_v61 = vld [vmem:[%s11369_s0 + $0x1f4] sm:$0xf0]  ;;  %v5745_v3 = vor.u32 %v7690_v63, %v5744_v62  ;;  %v7739_v6 = vld [vmem:[%s11369_s0 + $0x388] sm:$0xf0]  ;;  %v6236_v63 = vld [vmem:[%s11369_s0 + $0x580] sm:$0xf] }
  0x40   :  { %v5733_v2 = vor.u32 %v7676_v60, %v5730_v61 }
  0x41   :  { %3612 = vmatmul.bf16.gmra.mxu0 %v5729_v8  ;;  %3632 = vmatmul.bf16.gmra.mxu1 %v6129_v9  ;;  %v8003_v8 = vld [vmem:[%s11367_s1 + $0x1a0] sm:$0xff] }
  0x42   :  { %3964 = vmatpush.bf16.msra.mxu1 %v7998_v14  ;;  %4186 = vmatpush.bf16.msra.mxu0 %v8022_v15  ;;  %v8011_v9 = vld [vmem:[%s11367_s1 + $0x1e0] sm:$0xff]  ;;  %v7727_v14 = vld [vmem:[%s11369_s0 + $0x32c] sm:$0xf]  ;;  %v5938_v15 = vld [vmem:[%s11369_s0 + $0x38c] sm:$0xf0] }
  0x43   :  { %4112 = vmatpush.bf16.msra.mxu3 %v8014_v0  ;;  %4038 = vmatpush.bf16.msra.mxu2 %v8006_v7  ;;  %v7702_v0 = vld [vmem:[%s11369_s0 + $0x264] sm:$0xf]  ;;  %v5937_v7 = vor.u32 %v7739_v6, %v5936_v5  ;;  %v5941_v18 = vor.u32 %v7727_v14, %v5938_v15  ;;  %v6130_v14 = vld [vmem:[%s11369_s0 + $0x514] sm:$0xf0]  ;;  %v6144_v15 = vld [vmem:[%s11369_s0 + $0x4c0] sm:$0xf] }
  0x44   :  { %3662 = vmatmul.bf16.gmra.mxu3 %v6729_v10  ;;  %3750 = vmatmul.bf16.vlgmr.msrb.gmra.mxu2 %v5537_v13  ;;  %v5841_v4 = vor.u32 %v7702_v0, %v5838_v1  ;;  %v7701_v10 = vld [vmem:[%s11369_s0 + $0x25c] sm:$0xf]  ;;  %v7715_v13 = vld [vmem:[%s11369_s0 + $0x2c8] sm:$0xf0]  ;;  %v7814_v0 = vld [vmem:[%s11369_s0 + $0x5e0] sm:$0xf0] }
  0x45   :  { %v5833_v16 = vor.u32 %v7701_v10, %v5830_v11  ;;  %v5845_v17 = vor.u32 %v7715_v13, %v5844_v12  ;;  %v6237_v5 = vor.u32 %v7814_v0, %v6236_v63  ;;  %v7776_v12 = vld [vmem:[%s11369_s0 + $0x4b4] sm:$0xf]  ;;  %v6436_v0 = vld [vmem:[%s11369_s0 + $0x710] sm:$0xf] }
  0x46   :  { %3965 = vmatpush.bf16.msra.mxu1 %v7997_v30  ;;  %4187 = vmatpush.bf16.msra.mxu0 %v8021_v43  ;;  %v6038_v30 = vld [vmem:[%s11369_s0 + $0x454] sm:$0xf0] }
  0x47   :  { %4039 = vmatpush.bf16.msra.mxu2 %v8005_v28  ;;  %4113 = vmatpush.bf16.msra.mxu3 %v8013_v29  ;;  %v8648_v28 = vld [vmem:[%s11368_s2] ss:$0 sm:$0xff]  ;;  %v7752_v29 = vld [vmem:[%s11369_s0 + $0x3f4] sm:$0xf] }
  0x48   :  { %v6041_v35 = vor.u32 %v7752_v29, %v6038_v30 }
  0x4a   :  { %3966 = vmatpush.bf16.msra.mxu1 %v7996_v58  ;;  %4188 = vmatpush.bf16.msra.mxu0 %v8020_v59 }
  0x4b   :  { %4040 = vmatpush.bf16.msra.mxu2 %v8004_v56  ;;  %4114 = vmatpush.bf16.msra.mxu3 %v8012_v57 }
  0x4e   :  { %3967 = vmatpush.bf16.msra.mxu1 %v7995_v21 }
  0x4f   :  { %4041 = vmatpush.bf16.msra.mxu2 %v8003_v8  ;;  %4115 = vmatpush.bf16.msra.mxu3 %v8011_v9 }
  0x51   :  { %3617 = vmatmul.bf16.gmra.mxu0 %v5829_v22  ;;  %3637 = vmatmul.bf16.gmra.mxu1 %v6229_v23  ;;  %v6037_v22 = vor.u32 %v7764_v20, %v6036_v19  ;;  %v8019_v23 = vld [vmem:[%s11367_s1 + $0x220] sm:$0xff]  ;;  %v6133_v19 = vor.u32 %v7776_v12, %v6130_v14 }
  0x52   :  { %4189 = vmatpush.bf16.msra.mxu0 %v8019_v23  ;;  %3968 = vmatpush.bf16.msra.mxu1 %v7994_v47  ;;  %v7801_v47 = vld [vmem:[%s11369_s0 + $0x57c] sm:$0xf] }
  0x53   :  { %4042 = vmatpush.bf16.msra.mxu2 %v8002_v40  ;;  %4116 = vmatpush.bf16.msra.mxu3 %v8010_v46 }
  0x54   :  { %3824 = vmatmul.bf16.vlgmr.msrb.gmra.mxu3 %v5541_v24  ;;  %3755 = vmatmul.bf16.gmra.mxu2 %v5637_v27  ;;  %v7726_v24 = vld [vmem:[%s11369_s0 + $0x324] sm:$0xf]  ;;  %v7740_v27 = vld [vmem:[%s11369_s0 + $0x390] sm:$0xf0] }
  0x55   :  { %v5933_v31 = vor.u32 %v7726_v24, %v5930_v25  ;;  %v5945_v32 = vor.u32 %v7740_v27, %v5944_v26  ;;  %v6336_v26 = vld [vmem:[%s11369_s0 + $0x648] sm:$0xf]  ;;  %v7839_v27 = vld [vmem:[%s11369_s0 + $0x6a8] sm:$0xf0] }
  0x61   :  { %3676 = vmatmul.bf16.vlgmr.msrb.gmra.mxu1 %v5533_v37  ;;  %3898 = vmatmul.bf16.vlgmr.msrb.gmra.mxu0 %v5545_v38  ;;  %v7789_v37 = vld [vmem:[%s11369_s0 + $0x518] sm:$0xf0] }
  0x64   :  { %3829 = vmatmul.bf16.gmra.mxu3 %v5641_v39  ;;  %3760 = vmatmul.bf16.gmra.mxu2 %v5737_v42  ;;  %v6137_v39 = vor.u32 %v7789_v37, %v6136_v36  ;;  %v8009_v36 = vld [vmem:[%s11367_s1 + $0x1d0] sm:$0xff] }
  0x65   :  { %v7993_v37 = vld [vmem:[%s11367_s1 + $0x150] sm:$0xff]  ;;  %4117 = vmatpush.bf16.msra.mxu3 %v8009_v36 }
  0x66   :  { %3969 = vmatpush.bf16.msra.mxu1 %v7993_v37 }
  0x71   :  { %3681 = vmatmul.bf16.gmra.mxu1 %v5633_v50  ;;  %3903 = vmatmul.bf16.gmra.mxu0 %v5645_v51  ;;  %v6030_v51 = vld [vmem:[%s11369_s0 + $0x44c] sm:$0xf0] }
  0x72   :  { %v6033_v56 = vor.u32 %v7751_v49, %v6030_v51  ;;  %v6244_v49 = vld [vmem:[%s11369_s0 + $0x588] sm:$0xf]  ;;  %v7815_v51 = vld [vmem:[%s11369_s0 + $0x5e8] sm:$0xf0] }
  0x74   :  { %3834 = vmatmul.bf16.gmra.mxu3 %v5741_v52  ;;  %3765 = vmatmul.bf16.gmra.mxu2 %v5837_v55  ;;  %v6044_v52 = vld [vmem:[%s11369_s0 + $0x3f8] sm:$0xf]  ;;  %v6138_v55 = vld [vmem:[%s11369_s0 + $0x51c] sm:$0xf0] }
  0x75   :  { %v6045_v57 = vor.u32 %v7765_v53, %v6044_v52  ;;  %v6141_v62 = vor.u32 %v7777_v54, %v6138_v55  ;;  %v7827_v52 = vld [vmem:[%s11369_s0 + $0x64c] sm:$0xf]  ;;  %v6338_v53 = vld [vmem:[%s11369_s0 + $0x6ac] sm:$0xf0]  ;;  %v6245_v55 = vor.u32 %v7815_v51, %v6244_v49 }
  0x76   :  { %v6341_v63 = vor.u32 %v7827_v52, %v6338_v53 }
  0x81   :  { %3686 = vmatmul.bf16.gmra.mxu1 %v5733_v2  ;;  %3908 = vmatmul.bf16.gmra.mxu0 %v5745_v3  ;;  %v8018_v2 = vld [vmem:[%s11367_s1 + $0x218] sm:$0xff] }
  0x82   :  { %4190 = vmatpush.bf16.msra.mxu0 %v8018_v2  ;;  %v7864_v2 = vld [vmem:[%s11369_s0 + $0x770] sm:$0xf0] }
  0x84   :  { %3839 = vmatmul.bf16.gmra.mxu3 %v5841_v4  ;;  %3770 = vmatmul.bf16.gmra.mxu2 %v5937_v7 }
  0x91   :  { %3691 = vmatmul.bf16.gmra.mxu1 %v5833_v16  ;;  %3913 = vmatmul.bf16.gmra.mxu0 %v5845_v17  ;;  %v7790_v16 = vld [vmem:[%s11369_s0 + $0x520] sm:$0xf0] }
  0x92   :  { %v7802_v17 = vld [vmem:[%s11369_s0 + $0x584] sm:$0xf]  ;;  %v6145_v20 = vor.u32 %v7790_v16, %v6144_v15 }
  0x93   :  { %v7826_v16 = vld [vmem:[%s11369_s0 + $0x644] sm:$0xf] }
  0x94   :  { %3844 = vmatmul.bf16.gmra.mxu3 %v5941_v18  ;;  %3775 = vmatmul.bf16.gmra.mxu2 %v6037_v22  ;;  %v6238_v18 = vld [vmem:[%s11369_s0 + $0x5e4] sm:$0xf0] }
  0x95   :  { %v6241_v25 = vor.u32 %v7802_v17, %v6238_v18  ;;  %v6330_v17 = vld [vmem:[%s11369_s0 + $0x6a4] sm:$0xf0]  ;;  %v6344_v18 = vld [vmem:[%s11369_s0 + $0x650] sm:$0xf] }
  0x9e   :  { %v8656_v33 = vpop.f32.mrf.mxu0  ;;  %v3623_v34 = vpop.f32.mrf.mxu1 }
  0x9f   :  { %v8665_v38 = vadd.f32 %v8648_v28, %v3623_v34 }
  0xa1   :  { %3696 = vmatmul.bf16.gmra.mxu1 %v5933_v31  ;;  %3918 = vmatmul.bf16.gmra.mxu0 %v5945_v32  ;;  %v6337_v32 = vor.u32 %v7839_v27, %v6336_v26 }
  0xa4   :  { %3849 = vmatmul.bf16.gmra.mxu3 %v6041_v35  ;;  %3780 = vmatmul.bf16.gmra.mxu2 %v6137_v39  ;;  %v8001_v35 = vld [vmem:[%s11367_s1 + $0x190] sm:$0xff] }
  0xa5   :  { %4043 = vmatpush.bf16.msra.mxu2 %v8001_v35 }
  0xa6   :  { %v8670_v42 = vpop.f32.mrf.mxu0  ;;  %v3625_v43 = vpop.f32.mrf.mxu1 }
  0xa7   :  { %v3653_v41 = vpop.f32.mrf.mxu3  ;;  %v8676_v45 = vadd.f32 %v8648_v28, %v3625_v43  ;;  %v3643_v48 = vpop.f32.mrf.mxu2  ;;  %v3606_v53 = vadd.f32 %v8648_v28, %v8670_v42  ;;  %v6430_v42 = vld [vmem:[%s11369_s0 + $0x76c] sm:$0xf0] }
  0xa8   :  { %v8673_v44 = vadd.f32 %v8648_v28, %v3653_v41  ;;  %v8688_v50 = vadd.f32 %v8648_v28, %v3643_v48  ;;  %v6230_v48 = vld [vmem:[%s11369_s0 + $0x5dc] sm:$0xf0] }
  0xa9   :  { %v6233_v54 = vor.u32 %v7801_v47, %v6230_v48 }
  0xae   :  { %v8705_v59 = vpop.f32.mrf.mxu0  ;;  %v3628_v60 = vpop.f32.mrf.mxu1 }
  0xaf   :  { %v3655_v58 = vpop.f32.mrf.mxu3  ;;  %v8717_v1 = vadd.f32 %v8648_v28, %v3628_v60  ;;  %v3645_v3 = vpop.f32.mrf.mxu2 }
  0xb0   :  { %v8708_v61 = vadd.f32 %v8648_v28, %v3655_v58  ;;  %v8723_v4 = vadd.f32 %v8648_v28, %v3645_v3 }
  0xb1   :  { %3701 = vmatmul.bf16.gmra.mxu1 %v6033_v56  ;;  %3923 = vmatmul.bf16.gmra.mxu0 %v6045_v57  ;;  %v8017_v57 = vld [vmem:[%s11367_s1 + $0x210] sm:$0xff] }
  0xb2   :  { %4191 = vmatpush.bf16.msra.mxu0 %v8017_v57 }
  0xb4   :  { %3854 = vmatmul.bf16.gmra.mxu3 %v6141_v62  ;;  %3785 = vmatmul.bf16.gmra.mxu2 %v6237_v5 }
  0xb6   :  { %v8725_v7 = vpop.f32.mrf.mxu0  ;;  %v3630_v8 = vpop.f32.mrf.mxu1 }
  0xb7   :  { %v3658_v6 = vpop.f32.mrf.mxu3  ;;  %v8731_v10 = vadd.f32 %v8648_v28, %v3630_v8  ;;  %v3648_v11 = vpop.f32.mrf.mxu2 }
  0xb8   :  { %v8728_v9 = vadd.f32 %v8648_v28, %v3658_v6  ;;  %v8737_v13 = vadd.f32 %v8648_v28, %v3648_v11  ;;  %v6437_v6 = vor.u32 %v7864_v2, %v6436_v0  ;;  %v7851_v2 = vld [vmem:[%s11369_s0 + $0x70c] sm:$0xf] }
  0xbe   :  { %v8754_v22 = vpop.f32.mrf.mxu0  ;;  %v3633_v23 = vpop.f32.mrf.mxu1 }
  0xbf   :  { %v3660_v21 = vpop.f32.mrf.mxu3  ;;  %v8766_v29 = vadd.f32 %v8648_v28, %v3633_v23  ;;  %v3650_v30 = vpop.f32.mrf.mxu2  ;;  %v3604_v23 = vadd.f32 %v8648_v28, %v8656_v33  ;;  %v6536_v33 = vld [vmem:[%s11369_s0 + $0x7d8] sm:$0xf] }
  0xc0   :  { %v8757_v24 = vadd.f32 %v8648_v28, %v3660_v21  ;;  %v8769_v31 = vadd.f32 %v8648_v28, %v3650_v30  ;;  %v6438_v21 = vld [vmem:[%s11369_s0 + $0x774] sm:$0xf0]  ;;  %v8000_v30 = vld [vmem:[%s11367_s1 + $0x188] sm:$0xff] }
  0xc1   :  { %3706 = vmatmul.bf16.gmra.mxu1 %v6133_v19  ;;  %3928 = vmatmul.bf16.gmra.mxu0 %v6145_v20  ;;  %v7840_v19 = vld [vmem:[%s11369_s0 + $0x6b0] sm:$0xf0] }
  0xc2   :  { %v7852_v20 = vld [vmem:[%s11369_s0 + $0x714] sm:$0xf]  ;;  %v6345_v26 = vor.u32 %v7840_v19, %v6344_v18  ;;  %4044 = vmatpush.bf16.msra.mxu2 %v8000_v30  ;;  %v6433_v19 = vor.u32 %v7851_v2, %v6430_v42  ;;  %v7914_v30 = vld [vmem:[%s11369_s0 + $0x900] sm:$0xf0]  ;;  %v3614_v2 = vadd.f32 %v8648_v28, %v8754_v22  ;;  %v6736_v22 = vld [vmem:[%s11369_s0 + $0x968] sm:$0xf] }
  0xc3   :  { %v6441_v37 = vor.u32 %v7852_v20, %v6438_v21 }
  0xc4   :  { %3859 = vmatmul.bf16.gmra.mxu3 %v6241_v25  ;;  %3790 = vmatmul.bf16.gmra.mxu2 %v6337_v32  ;;  %v6333_v25 = vor.u32 %v7826_v16, %v6330_v17  ;;  %v8008_v32 = vld [vmem:[%s11367_s1 + $0x1c8] sm:$0xff]  ;;  %v6538_v16 = vld [vmem:[%s11369_s0 + $0x83c] sm:$0xf0]  ;;  %v3609_v17 = vadd.f32 %v8648_v28, %v8705_v59 }
  0xc5   :  { %4118 = vmatpush.bf16.msra.mxu3 %v8008_v32 }
  0xc6   :  { %v8780_v39 = vpop.f32.mrf.mxu0  ;;  %v3635_v40 = vpop.f32.mrf.mxu1 }
  0xc7   :  { %v3663_v34 = vpop.f32.mrf.mxu3  ;;  %v8786_v43 = vadd.f32 %v8648_v28, %v3635_v40  ;;  %v3751_v46 = vpop.f32.mrf.mxu2  ;;  %v7889_v40 = vld [vmem:[%s11369_s0 + $0x838] sm:$0xf0] }
  0xc8   :  { %v8783_v41 = vadd.f32 %v8648_v28, %v3663_v34  ;;  %v7992_v34 = vld [vmem:[%s11367_s1 + $0x148] sm:$0xff]  ;;  %v6537_v51 = vor.u32 %v7889_v40, %v6536_v33 }
  0xc9   :  { %3970 = vmatpush.bf16.msra.mxu1 %v7992_v34 }
  0xce   :  { %v8809_v58 = vpop.f32.mrf.mxu0  ;;  %v3638_v60 = vpop.f32.mrf.mxu1 }
  0xcf   :  { %v3665_v56 = vpop.f32.mrf.mxu3  ;;  %v8821_v3 = vadd.f32 %v8648_v28, %v3638_v60  ;;  %v3753_v5 = vpop.f32.mrf.mxu2 }
  0xd0   :  { %v8812_v62 = vadd.f32 %v8648_v28, %v3665_v56  ;;  %v8016_v56 = vld [vmem:[%s11367_s1 + $0x208] sm:$0xff] }
  0xd1   :  { %3711 = vmatmul.bf16.gmra.mxu1 %v6233_v54  ;;  %3933 = vmatmul.bf16.gmra.mxu0 %v6245_v55 }
  0xd2   :  { %4192 = vmatpush.bf16.msra.mxu0 %v8016_v56  ;;  %v6530_v56 = vld [vmem:[%s11369_s0 + $0x834] sm:$0xf0] }
  0xd4   :  { %3864 = vmatmul.bf16.gmra.mxu3 %v6341_v63  ;;  %3795 = vmatmul.bf16.gmra.mxu2 %v6437_v6  ;;  %v6444_v6 = vld [vmem:[%s11369_s0 + $0x718] sm:$0xf] }
  0xd6   :  { %v8823_v11 = vpop.f32.mrf.mxu0  ;;  %v3640_v12 = vpop.f32.mrf.mxu1 }
  0xd7   :  { %v3825_v8 = vpop.f32.mrf.mxu3  ;;  %v8826_v14 = vadd.f32 %v8648_v28, %v3640_v12  ;;  %v3756_v15 = vpop.f32.mrf.mxu2 }
  0xde   :  { %v3677_v35 = vpop.f32.mrf.mxu1  ;;  %v3899_v36 = vpop.f32.mrf.mxu0 }
  0xdf   :  { %v3827_v27 = vpop.f32.mrf.mxu3  ;;  %v3678_v47 = vadd.f32 %v3677_v35, %v3604_v23  ;;  %v3758_v48 = vpop.f32.mrf.mxu2 }
  0xe1   :  { %v3752_v49 = vadd.f32 %v3751_v46, %v3678_v47  ;;  %3716 = vmatmul.bf16.gmra.mxu1 %v6333_v25  ;;  %3938 = vmatmul.bf16.gmra.mxu0 %v6345_v26  ;;  %v7999_v47 = vld [vmem:[%s11367_s1 + $0x180] sm:$0xff] }
  0xe2   :  { %4045 = vmatpush.bf16.msra.mxu2 %v7999_v47 }
  0xe3   :  { %v3826_v52 = vadd.f32 %v3825_v8, %v3752_v49  ;;  %v7865_v8 = vld [vmem:[%s11369_s0 + $0x778] sm:$0xf0] }
  0xe4   :  { %3869 = vmatmul.bf16.gmra.mxu3 %v6441_v37  ;;  %3800 = vmatmul.bf16.gmra.mxu2 %v6537_v51  ;;  %v6445_v20 = vor.u32 %v7865_v8, %v6444_v6  ;;  %v3611_v37 = vadd.f32 %v8648_v28, %v8725_v7  ;;  %v7876_v7 = vld [vmem:[%s11369_s0 + $0x7d4] sm:$0xf] }
  0xe5   :  { %v8865_v54 = vadd.f32 %v3899_v36, %v3826_v52  ;;  %v6533_v6 = vor.u32 %v7876_v7, %v6530_v56  ;;  %v3619_v7 = vadd.f32 %v8648_v28, %v8809_v58  ;;  %v7641_v58 = vld [vmem:[%s11369_s0 + $0x78] sm:$0xf0] }
  0xe6   :  { %v3679_v57 = vpop.f32.mrf.mxu1  ;;  %v3901_v60 = vpop.f32.mrf.mxu0 }
  0xe7   :  { %v3830_v55 = vpop.f32.mrf.mxu3  ;;  %v3680_v63 = vadd.f32 %v3679_v57, %v3606_v53  ;;  %v8870_v46 = vpop.f32.mrf.mxu2  ;;  %v6544_v57 = vld [vmem:[%s11369_s0 + $0x7e0] sm:$0xf] }
  0xe9   :  { %v3754_v0 = vadd.f32 %v3753_v5, %v3680_v63  ;;  %v7877_v5 = vld [vmem:[%s11369_s0 + $0x7dc] sm:$0xf] }
  0xea   :  { %v6541_v26 = vor.u32 %v7877_v5, %v6538_v16  ;;  %v7991_v5 = vld [vmem:[%s11367_s1 + $0x140] sm:$0xff] }
  0xeb   :  { %v3828_v12 = vadd.f32 %v3827_v27, %v3754_v0  ;;  %v6636_v27 = vld [vmem:[%s11369_s0 + $0x8a0] sm:$0xf]  ;;  %v6638_v0 = vld [vmem:[%s11369_s0 + $0x904] sm:$0xf0]  ;;  %3971 = vmatpush.bf16.msra.mxu1 %v7991_v5 }
  0xec   :  { %v6637_v59 = vor.u32 %v7914_v30, %v6636_v27  ;;  %v8015_v16 = vld [vmem:[%s11367_s1 + $0x200] sm:$0xff] }
  0xed   :  { %v8892_v18 = vadd.f32 %v3901_v60, %v3828_v12  ;;  %v7890_v60 = vld [vmem:[%s11369_s0 + $0x840] sm:$0xf0]  ;;  %4193 = vmatpush.bf16.msra.mxu0 %v8015_v16 }
  0xee   :  { %v3682_v23 = vpop.f32.mrf.mxu1  ;;  %v3904_v25 = vpop.f32.mrf.mxu0  ;;  %v6545_v8 = vor.u32 %v7890_v60, %v6544_v57 }
  0xef   :  { %v3832_v21 = vpop.f32.mrf.mxu3  ;;  %v3683_v32 = vadd.f32 %v3682_v23, %v3609_v17  ;;  %v3763_v34 = vpop.f32.mrf.mxu2 }
  0xf1   :  { %v3757_v35 = vadd.f32 %v3756_v15, %v3683_v32  ;;  %3721 = vmatmul.bf16.gmra.mxu1 %v6433_v19  ;;  %3943 = vmatmul.bf16.gmra.mxu0 %v6445_v20  ;;  %v8007_v15 = vld [vmem:[%s11367_s1 + $0x1c0] sm:$0xff]  ;;  %v3616_v32 = vadd.f32 %v8648_v28, %v8780_v39  ;;  %v6644_v39 = vld [vmem:[%s11369_s0 + $0x8a8] sm:$0xf] }
  0xf2   :  { %4119 = vmatpush.bf16.msra.mxu3 %v8007_v15 }
  0xf3   :  { %v3831_v36 = vadd.f32 %v3830_v55, %v3757_v35 }
  0xf4   :  { %3874 = vmatmul.bf16.gmra.mxu3 %v6541_v26  ;;  %3805 = vmatmul.bf16.gmra.mxu2 %v6637_v59 }
  0xf5   :  { %v8902_v33 = vadd.f32 %v3904_v25, %v3831_v36 }
  0xf6   :  { %v3684_v49 = vpop.f32.mrf.mxu1  ;;  %v3906_v51 = vpop.f32.mrf.mxu0 }
  0xf7   :  { %v3835_v40 = vpop.f32.mrf.mxu3  ;;  %v3685_v52 = vadd.f32 %v3684_v49, %v3611_v37  ;;  %v3766_v53 = vpop.f32.mrf.mxu2 }
  0xf9   :  { %v3759_v55 = vadd.f32 %v3758_v48, %v3685_v52  ;;  %v7902_v48 = vld [vmem:[%s11369_s0 + $0x8a4] sm:$0xf] }
  0xfa   :  { %v6641_v20 = vor.u32 %v7902_v48, %v6638_v0  ;;  %v8038_v48 = vld [vmem:[%s11367_s1 + $0x2b8] sm:$0xff] }
  0xfb   :  { %v3833_v63 = vadd.f32 %v3832_v21, %v3759_v55  ;;  %v7939_v21 = vld [vmem:[%s11369_s0 + $0x9c8] sm:$0xf0]  ;;  %v6738_v55 = vld [vmem:[%s11369_s0 + $0x9cc] sm:$0xf0]  ;;  %4334 = vmatpush.bf16.msrb.mxu2 %v8038_v48 }
  0xfc   :  { %v6737_v27 = vor.u32 %v7939_v21, %v6736_v22 }
  0xfd   :  { %v8930_v42 = vadd.f32 %v3906_v51, %v3833_v63  ;;  %v7915_v51 = vld [vmem:[%s11369_s0 + $0x908] sm:$0xf0] }
  0xfe   :  { %v3687_v17 = vpop.f32.mrf.mxu1  ;;  %v3909_v19 = vpop.f32.mrf.mxu0  ;;  %v6645_v60 = vor.u32 %v7915_v51, %v6644_v39 }
  0xff   :  { %v3837_v12 = vpop.f32.mrf.mxu3  ;;  %v3688_v23 = vadd.f32 %v3687_v17, %v3614_v2  ;;  %v3768_v25 = vpop.f32.mrf.mxu2 }
 0x101   :  { %v3762_v26 = vadd.f32 %v8870_v46, %v3688_v23  ;;  %3726 = vmatmul.bf16.gmra.mxu1 %v6533_v6  ;;  %3948 = vmatmul.bf16.gmra.mxu0 %v6545_v8  ;;  %v7901_v46 = vld [vmem:[%s11369_s0 + $0x89c] sm:$0xf]  ;;  %v5552_v8 = vld [vmem:[%s11369_s0 + $0x18] sm:$0xf] }
 0x102   :  { %v5553_v17 = vor.u32 %v7641_v58, %v5552_v8  ;;  %v8046_v23 = vld [vmem:[%s11367_s1 + $0x2f8] sm:$0xff] }
 0x103   :  { %v3836_v30 = vadd.f32 %v3835_v40, %v3762_v26  ;;  %v6630_v40 = vld [vmem:[%s11369_s0 + $0x8fc] sm:$0xf0]  ;;  %4408 = vmatpush.bf16.msrb.mxu3 %v8046_v23  ;;  %v7642_v23 = vld [vmem:[%s11369_s0 + $0x80] sm:$0xf0] }
 0x104   :  { %3879 = vmatmul.bf16.gmra.mxu3 %v6641_v20  ;;  %3810 = vmatmul.bf16.gmra.mxu2 %v6737_v27  ;;  %v6633_v57 = vor.u32 %v7901_v46, %v6630_v40  ;;  %v3621_v20 = vadd.f32 %v8648_v28, %v8823_v11  ;;  %v7926_v28 = vld [vmem:[%s11369_s0 + $0x964] sm:$0xf]  ;;  %v6730_v11 = vld [vmem:[%s11369_s0 + $0x9c4] sm:$0xf0] }
 0x105   :  { %v8947_v35 = vadd.f32 %v3909_v19, %v3836_v30  ;;  %v6733_v40 = vor.u32 %v7926_v28, %v6730_v11  ;;  %v8037_v28 = vld [vmem:[%s11367_s1 + $0x2b0] sm:$0xff] }
 0x106   :  { %v3689_v36 = vpop.f32.mrf.mxu1  ;;  %v3911_v37 = vpop.f32.mrf.mxu0  ;;  %v8045_v11 = vld [vmem:[%s11367_s1 + $0x2f0] sm:$0xff]  ;;  %4335 = vmatpush.bf16.msrb.mxu2 %v8037_v28 }
 0x107   :  { %v3840_v59 = vpop.f32.mrf.mxu3  ;;  %v3690_v47 = vadd.f32 %v3689_v36, %v3616_v32  ;;  %v3771_v15 = vpop.f32.mrf.mxu2  ;;  %v6744_v36 = vld [vmem:[%s11369_s0 + $0x970] sm:$0xf]  ;;  %4409 = vmatpush.bf16.msrb.mxu3 %v8045_v11 }
 0x109   :  { %v3764_v49 = vadd.f32 %v3763_v34, %v3690_v47  ;;  %v7927_v34 = vld [vmem:[%s11369_s0 + $0x96c] sm:$0xf] }
 0x10a   :  { %v6741_v6 = vor.u32 %v7927_v34, %v6738_v55 }
 0x10b   :  { %v3838_v52 = vadd.f32 %v3837_v12, %v3764_v49  ;;  %v5554_v49 = vld [vmem:[%s11369_s0 + $0x7c] sm:$0xf0] }
 0x10d   :  { %v8969_v56 = vadd.f32 %v3911_v37, %v3838_v52  ;;  %v7940_v37 = vld [vmem:[%s11369_s0 + $0x9d0] sm:$0xf0]  ;;  %v8054_v52 = vld [vmem:[%s11367_s1 + $0x338] sm:$0xff] }
 0x10e   :  { %v3692_v0 = vpop.f32.mrf.mxu1  ;;  %v3914_v2 = vpop.f32.mrf.mxu0  ;;  %v6745_v39 = vor.u32 %v7940_v37, %v6744_v36  ;;  %4482 = vmatpush.bf16.msrb.mxu0 %v8054_v52  ;;  %v8029_v36 = vld [vmem:[%s11367_s1 + $0x270] sm:$0xff] }
 0x10f   :  { %v3842_v63 = vpop.f32.mrf.mxu3  ;;  %v3693_v12 = vadd.f32 %v3692_v0, %v3619_v7  ;;  %v3773_v5 = vpop.f32.mrf.mxu2 }
 0x111   :  { %v3767_v16 = vadd.f32 %v3766_v53, %v3693_v12  ;;  %3731 = vmatmul.bf16.gmra.mxu1 %v6633_v57  ;;  %3953 = vmatmul.bf16.gmra.mxu0 %v6645_v60  ;;  %v8030_v53 = vld [vmem:[%s11367_s1 + $0x278] sm:$0xff]  ;;  %v5652_v57 = vld [vmem:[%s11369_s0 + $0xe0] sm:$0xf]  ;;  %v7666_v60 = vld [vmem:[%s11369_s0 + $0x140] sm:$0xf0] }
 0x112   :  { %4260 = vmatpush.bf16.msrb.mxu1 %v8030_v53 }
 0x113   :  { %v3841_v19 = vadd.f32 %v3840_v59, %v3767_v16 }
 0x114   :  { %3884 = vmatmul.bf16.gmra.mxu3 %v6741_v6  ;;  %4046 = vmatmul.bf16.vlgmr.msra.gmra.mxu2 %v5553_v17 }
 0x115   :  { %v8982_v22 = vadd.f32 %v3914_v2, %v3841_v19  ;;  %v5653_v2 = vor.u32 %v7666_v60, %v5652_v57  ;;  %v8053_v60 = vld [vmem:[%s11367_s1 + $0x330] sm:$0xff] }
 0x116   :  { %v3694_v26 = vpop.f32.mrf.mxu1  ;;  %v3916_v27 = vpop.f32.mrf.mxu0  ;;  %4261 = vmatpush.bf16.msrb.mxu1 %v8029_v36  ;;  %4483 = vmatpush.bf16.msrb.mxu0 %v8053_v60  ;;  %v5760_v60 = vld [vmem:[%s11369_s0 + $0x1b0] sm:$0xf] }
 0x117   :  { %v3845_v21 = vpop.f32.mrf.mxu3  ;;  %v3695_v30 = vadd.f32 %v3694_v26, %v3621_v20  ;;  %v3776_v32 = vpop.f32.mrf.mxu2 }
 0x119   :  { %v3769_v59 = vadd.f32 %v3768_v25, %v3695_v30  ;;  %v7629_v25 = vld [vmem:[%s11369_s0 + $0x1c] sm:$0xf] }
 0x11a   :  { %v5557_v7 = vor.u32 %v7629_v25, %v5554_v49  ;;  %v5752_v49 = vld [vmem:[%s11369_s0 + $0x1a8] sm:$0xf] }
 0x11b   :  { %v3843_v47 = vadd.f32 %v3842_v63, %v3769_v59 }
 0x11d   :  { %v9008_v46 = vadd.f32 %v3916_v27, %v3843_v47 }
 0x11e   :  { %v3697_v34 = vpop.f32.mrf.mxu1  ;;  %v3919_v55 = vpop.f32.mrf.mxu0 }
 0x11f   :  { %v3847_v51 = vpop.f32.mrf.mxu3  ;;  %v3698_v63 = vadd.f32 %v3697_v34, %v8665_v38  ;;  %v3778_v48 = vpop.f32.mrf.mxu2  ;;  %v7628_v38 = vld [vmem:[%s11369_s0 + $0x14] sm:$0xf] }
 0x121   :  { %v3772_v0 = vadd.f32 %v3771_v15, %v3698_v63  ;;  %3736 = vmatmul.bf16.gmra.mxu1 %v6733_v40  ;;  %3958 = vmatmul.bf16.gmra.mxu0 %v6745_v39  ;;  %v5546_v15 = vld [vmem:[%s11369_s0 + $0x74] sm:$0xf0]  ;;  %v7691_v40 = vld [vmem:[%s11369_s0 + $0x208] sm:$0xf0] }
 0x122   :  { %v5549_v27 = vor.u32 %v7628_v38, %v5546_v15  ;;  %v5753_v34 = vor.u32 %v7691_v40, %v5752_v49  ;;  %v8044_v49 = vld [vmem:[%s11367_s1 + $0x2e8] sm:$0xff] }
 0x123   :  { %v3846_v6 = vadd.f32 %v3845_v21, %v3772_v0  ;;  %v5560_v21 = vld [vmem:[%s11369_s0 + $0x20] sm:$0xf]  ;;  %4410 = vmatpush.bf16.msrb.mxu3 %v8044_v49  ;;  %v7717_v49 = vld [vmem:[%s11369_s0 + $0x2d8] sm:$0xf0] }
 0x124   :  { %4120 = vmatmul.bf16.vlgmr.msra.gmra.mxu3 %v5557_v7  ;;  %4051 = vmatmul.bf16.gmra.mxu2 %v5653_v2  ;;  %v5561_v30 = vor.u32 %v7642_v23, %v5560_v21 }
 0x125   :  { %v9020_v8 = vadd.f32 %v3919_v55, %v3846_v6  ;;  %v7653_v6 = vld [vmem:[%s11369_s0 + $0xdc] sm:$0xf] }
 0x126   :  { %v3699_v12 = vpop.f32.mrf.mxu1  ;;  %v3921_v16 = vpop.f32.mrf.mxu0 }
 0x127   :  { %v3850_v58 = vpop.f32.mrf.mxu3  ;;  %v3700_v17 = vadd.f32 %v3699_v12, %v8676_v45  ;;  %v3781_v19 = vpop.f32.mrf.mxu2  ;;  %v7654_v45 = vld [vmem:[%s11369_s0 + $0xe4] sm:$0xf]  ;;  %v5660_v12 = vld [vmem:[%s11369_s0 + $0xe8] sm:$0xf] }
 0x129   :  { %v3774_v20 = vadd.f32 %v3773_v5, %v3700_v17  ;;  %v5654_v5 = vld [vmem:[%s11369_s0 + $0x144] sm:$0xf0]  ;;  %v5754_v17 = vld [vmem:[%s11369_s0 + $0x20c] sm:$0xf0] }
 0x12a   :  { %v5657_v25 = vor.u32 %v7654_v45, %v5654_v5  ;;  %v5852_v5 = vld [vmem:[%s11369_s0 + $0x270] sm:$0xf] }
 0x12b   :  { %v3848_v53 = vadd.f32 %v3847_v51, %v3774_v20 }
 0x12d   :  { %v9041_v26 = vadd.f32 %v3921_v16, %v3848_v53  ;;  %v7667_v16 = vld [vmem:[%s11369_s0 + $0x148] sm:$0xf0] }
 0x12e   :  { %v3702_v37 = vpop.f32.mrf.mxu1  ;;  %v3924_v47 = vpop.f32.mrf.mxu0  ;;  %v5661_v15 = vor.u32 %v7667_v16, %v5660_v12  ;;  %v8052_v12 = vld [vmem:[%s11367_s1 + $0x328] sm:$0xff] }
 0x12f   :  { %v3852_v59 = vpop.f32.mrf.mxu3  ;;  %v3703_v39 = vadd.f32 %v3702_v37, %v8717_v1  ;;  %v3783_v51 = vpop.f32.mrf.mxu2  ;;  %4484 = vmatpush.bf16.msrb.mxu0 %v8052_v12 }
 0x131   :  { %v3777_v52 = vadd.f32 %v3776_v32, %v3703_v39  ;;  %3972 = vmatmul.bf16.vlgmr.msra.gmra.mxu1 %v5549_v27  ;;  %4194 = vmatmul.bf16.vlgmr.msra.gmra.mxu0 %v5561_v30  ;;  %v7716_v27 = vld [vmem:[%s11369_s0 + $0x2d0] sm:$0xf0] }
 0x132   :  { %v5853_v11 = vor.u32 %v7716_v27, %v5852_v5 }
 0x133   :  { %v3851_v55 = vadd.f32 %v3850_v58, %v3777_v52  ;;  %v5646_v58 = vld [vmem:[%s11369_s0 + $0x13c] sm:$0xf0] }
 0x134   :  { %4125 = vmatmul.bf16.gmra.mxu3 %v5657_v25  ;;  %4056 = vmatmul.bf16.gmra.mxu2 %v5753_v34  ;;  %v5649_v38 = vor.u32 %v7653_v6, %v5646_v58  ;;  %v8036_v25 = vld [vmem:[%s11367_s1 + $0x2a8] sm:$0xff] }
 0x135   :  { %v9059_v7 = vadd.f32 %v3924_v47, %v3851_v55  ;;  %4336 = vmatpush.bf16.msrb.mxu2 %v8036_v25  ;;  %v7678_v55 = vld [vmem:[%s11369_s0 + $0x1a4] sm:$0xf] }
 0x136   :  { %v3704_v63 = vpop.f32.mrf.mxu1  ;;  %v3926_v1 = vpop.f32.mrf.mxu0 }
 0x137   :  { %v3855_v57 = vpop.f32.mrf.mxu3  ;;  %v3705_v0 = vadd.f32 %v3704_v63, %v8731_v10  ;;  %v3786_v2 = vpop.f32.mrf.mxu2 }
 0x139   :  { %v3779_v32 = vadd.f32 %v3778_v48, %v3705_v0  ;;  %v7679_v48 = vld [vmem:[%s11369_s0 + $0x1ac] sm:$0xf] }
 0x13a   :  { %v5757_v45 = vor.u32 %v7679_v48, %v5754_v17  ;;  %v5952_v17 = vld [vmem:[%s11369_s0 + $0x338] sm:$0xf] }
 0x13b   :  { %v3853_v10 = vadd.f32 %v3852_v59, %v3779_v32 }
 0x13d   :  { %v9083_v20 = vadd.f32 %v3926_v1, %v3853_v10  ;;  %v5854_v1 = vld [vmem:[%s11369_s0 + $0x2d4] sm:$0xf0] }
 0x13e   :  { %v3707_v23 = vpop.f32.mrf.mxu1  ;;  %v3929_v53 = vpop.f32.mrf.mxu0 }
 0x13f   :  { %v3857_v21 = vpop.f32.mrf.mxu3  ;;  %v3708_v30 = vadd.f32 %v3707_v23, %v8766_v29  ;;  %v3788_v59 = vpop.f32.mrf.mxu2  ;;  %v8028_v29 = vld [vmem:[%s11367_s1 + $0x268] sm:$0xff] }
 0x140   :  { %4262 = vmatpush.bf16.msrb.mxu1 %v8028_v29 }
 0x141   :  { %v3782_v28 = vadd.f32 %v3781_v19, %v3708_v30  ;;  %3977 = vmatmul.bf16.gmra.mxu1 %v5649_v38  ;;  %4199 = vmatmul.bf16.gmra.mxu0 %v5661_v15  ;;  %v7741_v38 = vld [vmem:[%s11369_s0 + $0x398] sm:$0xf0] }
 0x143   :  { %v3856_v36 = vadd.f32 %v3855_v57, %v3782_v28  ;;  %v5746_v57 = vld [vmem:[%s11369_s0 + $0x204] sm:$0xf0] }
 0x144   :  { %4130 = vmatmul.bf16.gmra.mxu3 %v5757_v45  ;;  %4061 = vmatmul.bf16.gmra.mxu2 %v5853_v11  ;;  %v5749_v32 = vor.u32 %v7678_v55, %v5746_v57  ;;  %v8035_v55 = vld [vmem:[%s11367_s1 + $0x2a0] sm:$0xff] }
 0x145   :  { %v9092_v37 = vadd.f32 %v3929_v53, %v3856_v36  ;;  %v5953_v53 = vor.u32 %v7741_v38, %v5952_v17  ;;  %v8043_v57 = vld [vmem:[%s11367_s1 + $0x2e0] sm:$0xff]  ;;  %4337 = vmatpush.bf16.msrb.mxu2 %v8035_v55 }
 0x146   :  { %v3709_v19 = vpop.f32.mrf.mxu1  ;;  %v3931_v40 = vpop.f32.mrf.mxu0  ;;  %4411 = vmatpush.bf16.msrb.mxu3 %v8043_v57  ;;  %v8027_v17 = vld [vmem:[%s11367_s1 + $0x260] sm:$0xff] }
 0x147   :  { %v3860_v47 = vpop.f32.mrf.mxu3  ;;  %v3710_v39 = vadd.f32 %v3709_v19, %v8786_v43  ;;  %v3791_v52 = vpop.f32.mrf.mxu2  ;;  %v7692_v43 = vld [vmem:[%s11369_s0 + $0x210] sm:$0xf0]  ;;  %4263 = vmatpush.bf16.msrb.mxu1 %v8027_v17  ;;  %v7767_v17 = vld [vmem:[%s11369_s0 + $0x468] sm:$0xf0] }
 0x148   :  { %v5761_v6 = vor.u32 %v7692_v43, %v5760_v60 }
 0x149   :  { %v3784_v34 = vadd.f32 %v3783_v51, %v3710_v39  ;;  %v7704_v51 = vld [vmem:[%s11369_s0 + $0x274] sm:$0xf] }
 0x14a   :  { %v5857_v48 = vor.u32 %v7704_v51, %v5854_v1  ;;  %v6052_v51 = vld [vmem:[%s11369_s0 + $0x400] sm:$0xf]  ;;  %v7766_v1 = vld [vmem:[%s11369_s0 + $0x460] sm:$0xf0] }
 0x14b   :  { %v3858_v63 = vadd.f32 %v3857_v21, %v3784_v34  ;;  %v6053_v12 = vor.u32 %v7766_v1, %v6052_v51  ;;  %v8034_v51 = vld [vmem:[%s11367_s1 + $0x298] sm:$0xff] }
 0x14c   :  { %4338 = vmatpush.bf16.msrb.mxu2 %v8034_v51  ;;  %v6160_v51 = vld [vmem:[%s11369_s0 + $0x4d0] sm:$0xf] }
 0x14d   :  { %v9122_v0 = vadd.f32 %v3931_v40, %v3858_v63 }
 0x14e   :  { %v3712_v16 = vpop.f32.mrf.mxu1  ;;  %v3934_v10 = vpop.f32.mrf.mxu0 }
 0x14f   :  { %v3862_v58 = vpop.f32.mrf.mxu3  ;;  %v3713_v15 = vadd.f32 %v3712_v16, %v8821_v3  ;;  %v3793_v21 = vpop.f32.mrf.mxu2  ;;  %v7703_v3 = vld [vmem:[%s11369_s0 + $0x26c] sm:$0xf] }
 0x151   :  { %v3787_v23 = vadd.f32 %v3786_v2, %v3713_v15  ;;  %3982 = vmatmul.bf16.gmra.mxu1 %v5749_v32  ;;  %4204 = vmatmul.bf16.gmra.mxu0 %v5761_v6  ;;  %v5846_v2 = vld [vmem:[%s11369_s0 + $0x2cc] sm:$0xf0] }
 0x152   :  { %v5849_v40 = vor.u32 %v7703_v3, %v5846_v2 }
 0x153   :  { %v3861_v45 = vadd.f32 %v3860_v47, %v3787_v23  ;;  %v5860_v47 = vld [vmem:[%s11369_s0 + $0x278] sm:$0xf] }
 0x154   :  { %4135 = vmatmul.bf16.gmra.mxu3 %v5857_v48  ;;  %4066 = vmatmul.bf16.gmra.mxu2 %v5953_v53  ;;  %v5861_v39 = vor.u32 %v7717_v49, %v5860_v47 }
 0x155   :  { %v9134_v5 = vadd.f32 %v3934_v10, %v3861_v45  ;;  %v7728_v45 = vld [vmem:[%s11369_s0 + $0x334] sm:$0xf] }
 0x156   :  { %v3714_v30 = vpop.f32.mrf.mxu1  ;;  %v3936_v28 = vpop.f32.mrf.mxu0 }
 0x157   :  { %v3865_v27 = vpop.f32.mrf.mxu3  ;;  %v3715_v11 = vadd.f32 %v3714_v30, %v8826_v14  ;;  %v3796_v36 = vpop.f32.mrf.mxu2  ;;  %v7729_v14 = vld [vmem:[%s11369_s0 + $0x33c] sm:$0xf]  ;;  %v5960_v30 = vld [vmem:[%s11369_s0 + $0x340] sm:$0xf] }
 0x159   :  { %v3789_v25 = vadd.f32 %v3788_v59, %v3715_v11  ;;  %v5954_v59 = vld [vmem:[%s11369_s0 + $0x39c] sm:$0xf0]  ;;  %v6054_v11 = vld [vmem:[%s11369_s0 + $0x464] sm:$0xf0] }
 0x15a   :  { %v5957_v63 = vor.u32 %v7729_v14, %v5954_v59  ;;  %v6152_v59 = vld [vmem:[%s11369_s0 + $0x4c8] sm:$0xf] }
 0x15b   :  { %v3863_v29 = vadd.f32 %v3862_v58, %v3789_v25 }
 0x15d   :  { %v9155_v19 = vadd.f32 %v3936_v28, %v3863_v29 }
 0x15e   :  { %v3717_v60 = vpop.f32.mrf.mxu1  ;;  %v3939_v43 = vpop.f32.mrf.mxu0 }
 0x15f   :  { %v3867_v34 = vpop.f32.mrf.mxu3  ;;  %v3718_v32 = vadd.f32 %v3717_v60, %v8688_v50  ;;  %v3798_v6 = vpop.f32.mrf.mxu2  ;;  %v8051_v50 = vld [vmem:[%s11367_s1 + $0x320] sm:$0xff] }
 0x160   :  { %4485 = vmatpush.bf16.msrb.mxu0 %v8051_v50  ;;  %v6154_v50 = vld [vmem:[%s11369_s0 + $0x52c] sm:$0xf0] }
 0x161   :  { %v3792_v58 = vadd.f32 %v3791_v52, %v3718_v32  ;;  %3987 = vmatmul.bf16.gmra.mxu1 %v5849_v40  ;;  %4209 = vmatmul.bf16.gmra.mxu0 %v5861_v39  ;;  %v7791_v40 = vld [vmem:[%s11369_s0 + $0x528] sm:$0xf0] }
 0x162   :  { %v6153_v57 = vor.u32 %v7791_v40, %v6152_v59  ;;  %v8050_v40 = vld [vmem:[%s11367_s1 + $0x318] sm:$0xff] }
 0x163   :  { %v3866_v16 = vadd.f32 %v3865_v27, %v3792_v58  ;;  %v5946_v27 = vld [vmem:[%s11369_s0 + $0x394] sm:$0xf0] }
 0x164   :  { %4140 = vmatmul.bf16.gmra.mxu3 %v5957_v63  ;;  %4071 = vmatmul.bf16.gmra.mxu2 %v6053_v12  ;;  %v5949_v3 = vor.u32 %v7728_v45, %v5946_v27  ;;  %v7753_v12 = vld [vmem:[%s11369_s0 + $0x3fc] sm:$0xf] }
 0x165   :  { %v9170_v10 = vadd.f32 %v3939_v43, %v3866_v16  ;;  %v6046_v16 = vld [vmem:[%s11369_s0 + $0x45c] sm:$0xf0]  ;;  %v8042_v45 = vld [vmem:[%s11367_s1 + $0x2d8] sm:$0xff]  ;;  %4486 = vmatpush.bf16.msrb.mxu0 %v8050_v40 }
 0x166   :  { %v3719_v38 = vpop.f32.mrf.mxu1  ;;  %v3941_v15 = vpop.f32.mrf.mxu0  ;;  %v8026_v27 = vld [vmem:[%s11367_s1 + $0x258] sm:$0xff]  ;;  %4412 = vmatpush.bf16.msrb.mxu3 %v8042_v45 }
 0x167   :  { %v3870_v48 = vpop.f32.mrf.mxu3  ;;  %v3720_v52 = vadd.f32 %v3719_v38, %v8723_v4  ;;  %v3801_v23 = vpop.f32.mrf.mxu2  ;;  %v7742_v4 = vld [vmem:[%s11369_s0 + $0x3a0] sm:$0xf0]  ;;  %4264 = vmatpush.bf16.msrb.mxu1 %v8026_v27  ;;  %v6260_v40 = vld [vmem:[%s11369_s0 + $0x598] sm:$0xf] }
 0x168   :  { %v5961_v2 = vor.u32 %v7742_v4, %v5960_v30 }
 0x169   :  { %v3794_v53 = vadd.f32 %v3793_v21, %v3720_v52  ;;  %v7754_v21 = vld [vmem:[%s11369_s0 + $0x404] sm:$0xf] }
 0x16a   :  { %v6057_v14 = vor.u32 %v7754_v21, %v6054_v11  ;;  %v6252_v21 = vld [vmem:[%s11369_s0 + $0x590] sm:$0xf]  ;;  %v7816_v11 = vld [vmem:[%s11369_s0 + $0x5f0] sm:$0xf0] }
 0x16b   :  { %v3868_v28 = vadd.f32 %v3867_v34, %v3794_v53 }
 0x16d   :  { %v9197_v25 = vadd.f32 %v3941_v15, %v3868_v28  ;;  %v6049_v15 = vor.u32 %v7753_v12, %v6046_v16 }
 0x16e   :  { %v3722_v49 = vpop.f32.mrf.mxu1  ;;  %v3944_v29 = vpop.f32.mrf.mxu0 }
 0x16f   :  { %v3872_v47 = vpop.f32.mrf.mxu3  ;;  %v3723_v39 = vadd.f32 %v3722_v49, %v8737_v13  ;;  %v3803_v34 = vpop.f32.mrf.mxu2  ;;  %v6253_v49 = vor.u32 %v7816_v11, %v6252_v21  ;;  %v8041_v21 = vld [vmem:[%s11367_s1 + $0x2d0] sm:$0xff] }
 0x170   :  { %4413 = vmatpush.bf16.msrb.mxu3 %v8041_v21  ;;  %v7842_v21 = vld [vmem:[%s11369_s0 + $0x6c0] sm:$0xf0] }
 0x171   :  { %v3797_v55 = vadd.f32 %v3796_v36, %v3723_v39  ;;  %3992 = vmatmul.bf16.gmra.mxu1 %v5949_v3  ;;  %4214 = vmatmul.bf16.gmra.mxu0 %v5961_v2 }
 0x173   :  { %v3871_v60 = vadd.f32 %v3870_v48, %v3797_v55  ;;  %v6060_v48 = vld [vmem:[%s11369_s0 + $0x408] sm:$0xf] }
 0x174   :  { %4145 = vmatmul.bf16.gmra.mxu3 %v6057_v14  ;;  %4076 = vmatmul.bf16.gmra.mxu2 %v6153_v57  ;;  %v6061_v52 = vor.u32 %v7767_v17, %v6060_v48 }
 0x175   :  { %v9206_v43 = vadd.f32 %v3944_v29, %v3871_v60  ;;  %v7778_v60 = vld [vmem:[%s11369_s0 + $0x4c4] sm:$0xf] }
 0x176   :  { %v3724_v1 = vpop.f32.mrf.mxu1  ;;  %v3946_v32 = vpop.f32.mrf.mxu0 }
 0x177   :  { %v3875_v63 = vpop.f32.mrf.mxu3  ;;  %v3725_v58 = vadd.f32 %v3724_v1, %v8769_v31  ;;  %v3806_v13 = vpop.f32.mrf.mxu2  ;;  %v7792_v1 = vld [vmem:[%s11369_s0 + $0x530] sm:$0xf0] }
 0x178   :  { %v6161_v12 = vor.u32 %v7792_v1, %v6160_v51  ;;  %v8049_v51 = vld [vmem:[%s11367_s1 + $0x310] sm:$0xff] }
 0x179   :  { %v3799_v36 = vadd.f32 %v3798_v6, %v3725_v58  ;;  %v7779_v6 = vld [vmem:[%s11369_s0 + $0x4cc] sm:$0xf]  ;;  %4487 = vmatpush.bf16.msrb.mxu0 %v8049_v51 }
 0x17a   :  { %v6157_v28 = vor.u32 %v7779_v6, %v6154_v50  ;;  %v6352_v6 = vld [vmem:[%s11369_s0 + $0x658] sm:$0xf]  ;;  %v7841_v50 = vld [vmem:[%s11369_s0 + $0x6b8] sm:$0xf0] }
 0x17b   :  { %v3873_v31 = vadd.f32 %v3872_v47, %v3799_v36  ;;  %v6353_v45 = vor.u32 %v7841_v50, %v6352_v6 }
 0x17d   :  { %v9230_v38 = vadd.f32 %v3946_v32, %v3873_v31  ;;  %v6254_v32 = vld [vmem:[%s11369_s0 + $0x5f4] sm:$0xf0] }
 0x17e   :  { %v3727_v30 = vpop.f32.mrf.mxu1  ;;  %v3949_v4 = vpop.f32.mrf.mxu0 }
 0x17f   :  { %v3877_v53 = vpop.f32.mrf.mxu3  ;;  %v3728_v3 = vadd.f32 %v3727_v30, %v8673_v44  ;;  %v3808_v2 = vpop.f32.mrf.mxu2 }
 0x181   :  { %v3802_v47 = vadd.f32 %v3801_v23, %v3728_v3  ;;  %3997 = vmatmul.bf16.gmra.mxu1 %v6049_v15  ;;  %4219 = vmatmul.bf16.gmra.mxu0 %v6061_v52 }
 0x183   :  { %v3876_v29 = vadd.f32 %v3875_v63, %v3802_v47  ;;  %v6146_v63 = vld [vmem:[%s11369_s0 + $0x524] sm:$0xf0] }
 0x184   :  { %4150 = vmatmul.bf16.gmra.mxu3 %v6157_v28  ;;  %4081 = vmatmul.bf16.gmra.mxu2 %v6253_v49  ;;  %v6149_v36 = vor.u32 %v7778_v60, %v6146_v63  ;;  %v8033_v28 = vld [vmem:[%s11367_s1 + $0x290] sm:$0xff] }
 0x185   :  { %v9245_v14 = vadd.f32 %v3949_v4, %v3876_v29  ;;  %4339 = vmatpush.bf16.msrb.mxu2 %v8033_v28  ;;  %v7803_v29 = vld [vmem:[%s11369_s0 + $0x58c] sm:$0xf] }
 0x186   :  { %v3729_v39 = vpop.f32.mrf.mxu1  ;;  %v3951_v55 = vpop.f32.mrf.mxu0 }
 0x187   :  { %v3880_v59 = vpop.f32.mrf.mxu3  ;;  %v3730_v44 = vadd.f32 %v3729_v39, %v8708_v61  ;;  %v3811_v57 = vpop.f32.mrf.mxu2 }
 0x189   :  { %v3804_v23 = vadd.f32 %v3803_v34, %v3730_v44  ;;  %v7804_v34 = vld [vmem:[%s11369_s0 + $0x594] sm:$0xf] }
 0x18a   :  { %v6257_v31 = vor.u32 %v7804_v34, %v6254_v32  ;;  %v6452_v32 = vld [vmem:[%s11369_s0 + $0x720] sm:$0xf] }
 0x18b   :  { %v3878_v61 = vadd.f32 %v3877_v53, %v3804_v23 }
 0x18d   :  { %v9269_v58 = vadd.f32 %v3951_v55, %v3878_v61  ;;  %v6354_v55 = vld [vmem:[%s11369_s0 + $0x6bc] sm:$0xf0] }
 0x18e   :  { %v3732_v48 = vpop.f32.mrf.mxu1  ;;  %v3954_v17 = vpop.f32.mrf.mxu0 }
 0x18f   :  { %v3882_v16 = vpop.f32.mrf.mxu3  ;;  %v3733_v15 = vadd.f32 %v3732_v48, %v8728_v9  ;;  %v3813_v52 = vpop.f32.mrf.mxu2  ;;  %v8025_v9 = vld [vmem:[%s11367_s1 + $0x250] sm:$0xff] }
 0x190   :  { %4265 = vmatpush.bf16.msrb.mxu1 %v8025_v9 }
 0x191   :  { %v3807_v53 = vadd.f32 %v3806_v13, %v3733_v15  ;;  %4002 = vmatmul.bf16.gmra.mxu1 %v6149_v36  ;;  %4224 = vmatmul.bf16.gmra.mxu0 %v6161_v12  ;;  %v7866_v36 = vld [vmem:[%s11369_s0 + $0x780] sm:$0xf0] }
 0x193   :  { %v3881_v27 = vadd.f32 %v3880_v59, %v3807_v53  ;;  %v6246_v59 = vld [vmem:[%s11369_s0 + $0x5ec] sm:$0xf0] }
 0x194   :  { %4155 = vmatmul.bf16.gmra.mxu3 %v6257_v31  ;;  %4086 = vmatmul.bf16.gmra.mxu2 %v6353_v45  ;;  %v6249_v23 = vor.u32 %v7803_v29, %v6246_v59  ;;  %v8032_v29 = vld [vmem:[%s11367_s1 + $0x288] sm:$0xff] }
 0x195   :  { %v9278_v30 = vadd.f32 %v3954_v17, %v3881_v27  ;;  %v6453_v17 = vor.u32 %v7866_v36, %v6452_v32  ;;  %v8040_v59 = vld [vmem:[%s11367_s1 + $0x2c8] sm:$0xff]  ;;  %4340 = vmatpush.bf16.msrb.mxu2 %v8032_v29 }
 0x196   :  { %v3734_v13 = vpop.f32.mrf.mxu1  ;;  %v3956_v11 = vpop.f32.mrf.mxu0  ;;  %4414 = vmatpush.bf16.msrb.mxu3 %v8040_v59  ;;  %v8048_v36 = vld [vmem:[%s11367_s1 + $0x308] sm:$0xff] }
 0x197   :  { %v3885_v4 = vpop.f32.mrf.mxu3  ;;  %v3735_v3 = vadd.f32 %v3734_v13, %v8757_v24  ;;  %v4047_v47 = vpop.f32.mrf.mxu2  ;;  %v7817_v24 = vld [vmem:[%s11369_s0 + $0x5f8] sm:$0xf0]  ;;  %4488 = vmatpush.bf16.msrb.mxu0 %v8048_v36 }
 0x198   :  { %v6261_v60 = vor.u32 %v7817_v24, %v6260_v40  ;;  %v8024_v40 = vld [vmem:[%s11367_s1 + $0x248] sm:$0xff] }
 0x199   :  { %v3809_v49 = vadd.f32 %v3808_v2, %v3735_v3  ;;  %v7829_v2 = vld [vmem:[%s11369_s0 + $0x65c] sm:$0xf]  ;;  %4266 = vmatpush.bf16.msrb.mxu1 %v8024_v40 }
 0x19a   :  { %v6357_v34 = vor.u32 %v7829_v2, %v6354_v55  ;;  %v6552_v55 = vld [vmem:[%s11369_s0 + $0x7e8] sm:$0xf] }
 0x19b   :  { %v3883_v39 = vadd.f32 %v3882_v16, %v3809_v49 }
 0x19d   :  { %v9308_v44 = vadd.f32 %v3956_v11, %v3883_v39 }
 0x19e   :  { %v3737_v1 = vpop.f32.mrf.mxu1  ;;  %v3959_v61 = vpop.f32.mrf.mxu0 }
 0x19f   :  { %v3887_v63 = vpop.f32.mrf.mxu3  ;;  %v3738_v12 = vadd.f32 %v3737_v1, %v8783_v41  ;;  %v4049_v16 = vpop.f32.mrf.mxu2  ;;  %v7828_v41 = vld [vmem:[%s11369_s0 + $0x654] sm:$0xf] }
 0x1a1   :  { %v3812_v48 = vadd.f32 %v3811_v57, %v3738_v12  ;;  %4007 = vmatmul.bf16.gmra.mxu1 %v6249_v23  ;;  %4229 = vmatmul.bf16.gmra.mxu0 %v6261_v60  ;;  %v6346_v57 = vld [vmem:[%s11369_s0 + $0x6b4] sm:$0xf0]  ;;  %v7891_v23 = vld [vmem:[%s11369_s0 + $0x848] sm:$0xf0] }
 0x1a2   :  { %v6349_v11 = vor.u32 %v7828_v41, %v6346_v57  ;;  %v6553_v1 = vor.u32 %v7891_v23, %v6552_v55  ;;  %v8039_v55 = vld [vmem:[%s11367_s1 + $0x2c0] sm:$0xff] }
 0x1a3   :  { %v3886_v31 = vadd.f32 %v3885_v4, %v3812_v48  ;;  %v6360_v4 = vld [vmem:[%s11369_s0 + $0x660] sm:$0xf]  ;;  %4415 = vmatpush.bf16.msrb.mxu3 %v8039_v55  ;;  %v7917_v55 = vld [vmem:[%s11369_s0 + $0x918] sm:$0xf0] }
 0x1a4   :  { %4160 = vmatmul.bf16.gmra.mxu3 %v6357_v34  ;;  %4091 = vmatmul.bf16.gmra.mxu2 %v6453_v17  ;;  %v6361_v3 = vor.u32 %v7842_v21, %v6360_v4 }
 0x1a5   :  { %v9320_v6 = vadd.f32 %v3959_v61, %v3886_v31  ;;  %v7853_v31 = vld [vmem:[%s11369_s0 + $0x71c] sm:$0xf] }
 0x1a6   :  { %v3739_v15 = vpop.f32.mrf.mxu1  ;;  %v3961_v53 = vpop.f32.mrf.mxu0 }
 0x1a7   :  { %v4121_v50 = vpop.f32.mrf.mxu3  ;;  %v3740_v45 = vadd.f32 %v3739_v15, %v8812_v62  ;;  %v4052_v27 = vpop.f32.mrf.mxu2  ;;  %v7854_v62 = vld [vmem:[%s11369_s0 + $0x724] sm:$0xf]  ;;  %v6460_v15 = vld [vmem:[%s11369_s0 + $0x728] sm:$0xf] }
 0x1a9   :  { %v3814_v28 = vadd.f32 %v3813_v52, %v3740_v45  ;;  %v6454_v52 = vld [vmem:[%s11369_s0 + $0x784] sm:$0xf0]  ;;  %v6554_v45 = vld [vmem:[%s11369_s0 + $0x84c] sm:$0xf0] }
 0x1aa   :  { %v6457_v2 = vor.u32 %v7854_v62, %v6454_v52  ;;  %v6652_v52 = vld [vmem:[%s11369_s0 + $0x8b0] sm:$0xf] }
 0x1ab   :  { %v3888_v9 = vadd.f32 %v3887_v63, %v3814_v28 }
 0x1ad   :  { %v9341_v13 = vadd.f32 %v3961_v53, %v3888_v9  ;;  %v7867_v53 = vld [vmem:[%s11369_s0 + $0x788] sm:$0xf0] }
 0x1ae   :  { %v3973_v24 = vpop.f32.mrf.mxu1  ;;  %v4195_v39 = vpop.f32.mrf.mxu0  ;;  %v6461_v57 = vor.u32 %v7867_v53, %v6460_v15  ;;  %v8047_v15 = vld [vmem:[%s11367_s1 + $0x300] sm:$0xff] }
 0x1af   :  { %v4123_v49 = vpop.f32.mrf.mxu3  ;;  %v3974_v60 = vadd.f32 %v3973_v24, %v8865_v54  ;;  %v4054_v63 = vpop.f32.mrf.mxu2  ;;  %4489 = vmatpush.bf16.msrb.mxu0 %v8047_v15 }
 0x1b1   :  { %v4048_v51 = vadd.f32 %v4047_v47, %v3974_v60  ;;  %4012 = vmatmul.bf16.gmra.mxu1 %v6349_v11  ;;  %4234 = vmatmul.bf16.gmra.mxu0 %v6361_v3  ;;  %v7916_v11 = vld [vmem:[%s11369_s0 + $0x910] sm:$0xf0] }
 0x1b2   :  { %v6653_v59 = vor.u32 %v7916_v11, %v6652_v52 }
 0x1b3   :  { %v4122_v61 = vadd.f32 %v4121_v50, %v4048_v51  ;;  %v6446_v50 = vld [vmem:[%s11369_s0 + $0x77c] sm:$0xf0] }
 0x1b4   :  { %4165 = vmatmul.bf16.gmra.mxu3 %v6457_v2  ;;  %4096 = vmatmul.bf16.gmra.mxu2 %v6553_v1  ;;  %v6449_v41 = vor.u32 %v7853_v31, %v6446_v50  ;;  %v8031_v2 = vld [vmem:[%s11367_s1 + $0x280] sm:$0xff] }
 0x1b5   :  { %v9359_v34 = vadd.f32 %v4195_v39, %v4122_v61  ;;  %4341 = vmatpush.bf16.msrb.mxu2 %v8031_v2  ;;  %v7878_v1 = vld [vmem:[%s11369_s0 + $0x7e4] sm:$0xf]  ;;  %v6546_v61 = vld [vmem:[%s11369_s0 + $0x844] sm:$0xf0] }
 0x1b6   :  { %v3975_v12 = vpop.f32.mrf.mxu1  ;;  %v4197_v54 = vpop.f32.mrf.mxu0  ;;  %v8023_v50 = vld [vmem:[%s11367_s1 + $0x240] sm:$0xff] }
 0x1b7   :  { %v4126_v32 = vpop.f32.mrf.mxu3  ;;  %v3976_v48 = vadd.f32 %v3975_v12, %v8892_v18  ;;  %v4057_v17 = vpop.f32.mrf.mxu2  ;;  %v6654_v12 = vld [vmem:[%s11369_s0 + $0x914] sm:$0xf0]  ;;  %4267 = vmatpush.bf16.msrb.mxu1 %v8023_v50 }
 0x1b9   :  { %v4050_v47 = vadd.f32 %v4049_v16, %v3976_v48  ;;  %v7879_v16 = vld [vmem:[%s11369_s0 + $0x7ec] sm:$0xf]  ;;  %v6549_v48 = vor.u32 %v7878_v1, %v6546_v61  ;;  %v8070_v61 = vld [vmem:[%s11367_s1 + $0x3b8] sm:$0xff] }
 0x1ba   :  { %v6557_v62 = vor.u32 %v7879_v16, %v6554_v45  ;;  %v6752_v45 = vld [vmem:[%s11369_s0 + $0x978] sm:$0xf]  ;;  %4630 = vmatpush.bf16.msra.mxu2 %v8070_v61 }
 0x1bb   :  { %v4124_v18 = vadd.f32 %v4123_v49, %v4050_v47 }
 0x1bd   :  { %v9383_v28 = vadd.f32 %v4197_v54, %v4124_v18 }
 0x1be   :  { %v3978_v21 = vpop.f32.mrf.mxu1  ;;  %v4200_v9 = vpop.f32.mrf.mxu0 }
 0x1bf   :  { %v4128_v4 = vpop.f32.mrf.mxu3  ;;  %v3979_v3 = vadd.f32 %v3978_v21, %v8902_v33  ;;  %v4059_v49 = vpop.f32.mrf.mxu2 }
 0x1c1   :  { %v4053_v29 = vadd.f32 %v4052_v27, %v3979_v3  ;;  %4017 = vmatmul.bf16.gmra.mxu1 %v6449_v41  ;;  %4239 = vmatmul.bf16.gmra.mxu0 %v6461_v57  ;;  %v7941_v41 = vld [vmem:[%s11369_s0 + $0x9d8] sm:$0xf0] }
 0x1c3   :  { %v4127_v40 = vadd.f32 %v4126_v32, %v4053_v29  ;;  %v6560_v32 = vld [vmem:[%s11369_s0 + $0x7f0] sm:$0xf] }
 0x1c4   :  { %4170 = vmatmul.bf16.gmra.mxu3 %v6557_v62  ;;  %4101 = vmatmul.bf16.gmra.mxu2 %v6653_v59 }
 0x1c5   :  { %v9392_v24 = vadd.f32 %v4200_v9, %v4127_v40  ;;  %v6753_v9 = vor.u32 %v7941_v41, %v6752_v45 }
 0x1c6   :  { %v3980_v33 = vpop.f32.mrf.mxu1  ;;  %v4202_v23 = vpop.f32.mrf.mxu0 }
 0x1c7   :  { %v4131_v39 = vpop.f32.mrf.mxu3  ;;  %v3981_v27 = vadd.f32 %v3980_v33, %v8930_v42  ;;  %v4062_v60 = vpop.f32.mrf.mxu2  ;;  %v7892_v42 = vld [vmem:[%s11369_s0 + $0x850] sm:$0xf0] }
 0x1c8   :  { %v6561_v47 = vor.u32 %v7892_v42, %v6560_v32 }
 0x1c9   :  { %v4055_v51 = vadd.f32 %v4054_v63, %v3981_v27  ;;  %v7904_v63 = vld [vmem:[%s11369_s0 + $0x8b4] sm:$0xf] }
 0x1ca   :  { %v6657_v16 = vor.u32 %v7904_v63, %v6654_v12  ;;  %v5568_v63 = vld [vmem:[%s11369_s0 + $0x28] sm:$0xf]  ;;  %v7643_v12 = vld [vmem:[%s11369_s0 + $0x88] sm:$0xf0] }
 0x1cb   :  { %v4129_v36 = vadd.f32 %v4128_v4, %v4055_v51  ;;  %v5569_v50 = vor.u32 %v7643_v12, %v5568_v63 }
 0x1cd   :  { %v9419_v54 = vadd.f32 %v4202_v23, %v4129_v36 }
 0x1ce   :  { %v3983_v53 = vpop.f32.mrf.mxu1  ;;  %v4205_v18 = vpop.f32.mrf.mxu0 }
 0x1cf   :  { %v4133_v31 = vpop.f32.mrf.mxu3  ;;  %v3984_v57 = vadd.f32 %v3983_v53, %v8947_v35  ;;  %v4064_v4 = vpop.f32.mrf.mxu2  ;;  %v7903_v35 = vld [vmem:[%s11369_s0 + $0x8ac] sm:$0xf] }
 0x1d1   :  { %v4058_v21 = vadd.f32 %v4057_v17, %v3984_v57  ;;  %4022 = vmatmul.bf16.gmra.mxu1 %v6549_v48  ;;  %4244 = vmatmul.bf16.gmra.mxu0 %v6561_v47  ;;  %v6646_v17 = vld [vmem:[%s11369_s0 + $0x90c] sm:$0xf0] }
 0x1d2   :  { %v6649_v27 = vor.u32 %v7903_v35, %v6646_v17 }
 0x1d3   :  { %v4132_v62 = vadd.f32 %v4131_v39, %v4058_v21  ;;  %v6660_v39 = vld [vmem:[%s11369_s0 + $0x8b8] sm:$0xf] }
 0x1d4   :  { %4175 = vmatmul.bf16.gmra.mxu3 %v6657_v16  ;;  %4106 = vmatmul.bf16.gmra.mxu2 %v6753_v9  ;;  %v6661_v51 = vor.u32 %v7917_v55, %v6660_v39  ;;  %v8078_v16 = vld [vmem:[%s11367_s1 + $0x3f8] sm:$0xff]  ;;  %v7928_v9 = vld [vmem:[%s11369_s0 + $0x974] sm:$0xf] }
 0x1d5   :  { %v9434_v52 = vadd.f32 %v4205_v18, %v4132_v62  ;;  %4704 = vmatpush.bf16.msra.mxu3 %v8078_v16  ;;  %v6746_v62 = vld [vmem:[%s11369_s0 + $0x9d4] sm:$0xf0]  ;;  %v7644_v16 = vld [vmem:[%s11369_s0 + $0x90] sm:$0xf0] }
 0x1d6   :  { %v3985_v3 = vpop.f32.mrf.mxu1  ;;  %v4207_v29 = vpop.f32.mrf.mxu0  ;;  %v8086_v39 = vld [vmem:[%s11367_s1 + $0x438] sm:$0xff] }
 0x1d7   :  { %v4136_v11 = vpop.f32.mrf.mxu3  ;;  %v3986_v59 = vadd.f32 %v3985_v3, %v8969_v56  ;;  %v4067_v40 = vpop.f32.mrf.mxu2  ;;  %v7929_v56 = vld [vmem:[%s11369_s0 + $0x97c] sm:$0xf]  ;;  %4778 = vmatpush.bf16.msra.mxu0 %v8086_v39 }
 0x1d9   :  { %v4060_v2 = vadd.f32 %v4059_v49, %v3986_v59  ;;  %v6754_v49 = vld [vmem:[%s11369_s0 + $0x9dc] sm:$0xf0] }
 0x1da   :  { %v6757_v36 = vor.u32 %v7929_v56, %v6754_v49  ;;  %v5668_v49 = vld [vmem:[%s11369_s0 + $0xf0] sm:$0xf] }
 0x1db   :  { %v4134_v33 = vadd.f32 %v4133_v31, %v4060_v2  ;;  %v6749_v2 = vor.u32 %v7928_v9, %v6746_v62  ;;  %v8069_v9 = vld [vmem:[%s11367_s1 + $0x3b0] sm:$0xff] }
 0x1dc   :  { %v8077_v62 = vld [vmem:[%s11367_s1 + $0x3f0] sm:$0xff]  ;;  %4631 = vmatpush.bf16.msra.mxu2 %v8069_v9 }
 0x1dd   :  { %v9455_v23 = vadd.f32 %v4207_v29, %v4134_v33  ;;  %v5570_v29 = vld [vmem:[%s11369_s0 + $0x8c] sm:$0xf0]  ;;  %4705 = vmatpush.bf16.msra.mxu3 %v8077_v62 }
 0x1de   :  { %v3988_v32 = vpop.f32.mrf.mxu1  ;;  %v4210_v42 = vpop.f32.mrf.mxu0 }
 0x1df   :  { %v4138_v1 = vpop.f32.mrf.mxu3  ;;  %v3989_v48 = vadd.f32 %v3988_v32, %v8982_v22  ;;  %v4069_v47 = vpop.f32.mrf.mxu2  ;;  %v8062_v22 = vld [vmem:[%s11367_s1 + $0x378] sm:$0xff] }
 0x1e0   :  { %4556 = vmatpush.bf16.msra.mxu1 %v8062_v22 }
 0x1e1   :  { %v4063_v31 = vadd.f32 %v4062_v60, %v3989_v48  ;;  %4027 = vmatmul.bf16.gmra.mxu1 %v6649_v27  ;;  %4249 = vmatmul.bf16.gmra.mxu0 %v6661_v51  ;;  %v7668_v27 = vld [vmem:[%s11369_s0 + $0x150] sm:$0xf0] }
 0x1e2   :  { %v5669_v32 = vor.u32 %v7668_v27, %v5668_v49  ;;  %v8085_v27 = vld [vmem:[%s11367_s1 + $0x430] sm:$0xff] }
 0x1e3   :  { %v4137_v15 = vadd.f32 %v4136_v11, %v4063_v31  ;;  %v6760_v11 = vld [vmem:[%s11369_s0 + $0x980] sm:$0xf]  ;;  %4779 = vmatpush.bf16.msra.mxu0 %v8085_v27 }
 0x1e4   :  { %4180 = vmatmul.bf16.gmra.mxu3 %v6757_v36  ;;  %4342 = vmatmul.bf16.vlgmr.msrb.gmra.mxu2 %v5569_v50  ;;  %v5776_v27 = vld [vmem:[%s11369_s0 + $0x1c0] sm:$0xf] }
 0x1e5   :  { %v9467_v53 = vadd.f32 %v4210_v42, %v4137_v15 }
 0x1e6   :  { %v3990_v45 = vpop.f32.mrf.mxu1  ;;  %v4212_v41 = vpop.f32.mrf.mxu0 }
 0x1e7   :  { %v4141_v18 = vpop.f32.mrf.mxu3  ;;  %v3991_v60 = vadd.f32 %v3990_v45, %v9008_v46  ;;  %v4072_v57 = vpop.f32.mrf.mxu2  ;;  %v7942_v46 = vld [vmem:[%s11369_s0 + $0x9e0] sm:$0xf0] }
 0x1e8   :  { %v6761_v35 = vor.u32 %v7942_v46, %v6760_v11  ;;  %v8061_v11 = vld [vmem:[%s11367_s1 + $0x370] sm:$0xff] }
 0x1e9   :  { %v4065_v21 = vadd.f32 %v4064_v4, %v3991_v60  ;;  %v7631_v4 = vld [vmem:[%s11369_s0 + $0x2c] sm:$0xf]  ;;  %4557 = vmatpush.bf16.msra.mxu1 %v8061_v11 }
 0x1ea   :  { %v5573_v56 = vor.u32 %v7631_v4, %v5570_v29  ;;  %v5768_v29 = vld [vmem:[%s11369_s0 + $0x1b8] sm:$0xf] }
 0x1eb   :  { %v4139_v3 = vadd.f32 %v4138_v1, %v4065_v21 }
 0x1ed   :  { %v9494_v59 = vadd.f32 %v4212_v41, %v4139_v3 }
 0x1ee   :  { %v3993_v55 = vpop.f32.mrf.mxu1  ;;  %v4215_v33 = vpop.f32.mrf.mxu0 }
 0x1ef   :  { %v4143_v17 = vpop.f32.mrf.mxu3  ;;  %v3994_v51 = vadd.f32 %v3993_v55, %v9020_v8  ;;  %v4074_v1 = vpop.f32.mrf.mxu2  ;;  %v7630_v8 = vld [vmem:[%s11369_s0 + $0x24] sm:$0xf] }
 0x1f1   :  { %v4068_v61 = vadd.f32 %v4067_v40, %v3994_v51  ;;  %4032 = vmatmul.bf16.gmra.mxu1 %v6749_v2  ;;  %4254 = vmatmul.bf16.gmra.mxu0 %v6761_v35  ;;  %v5562_v40 = vld [vmem:[%s11369_s0 + $0x84] sm:$0xf0]  ;;  %v7693_v2 = vld [vmem:[%s11369_s0 + $0x218] sm:$0xf0] }
 0x1f2   :  { %v5565_v41 = vor.u32 %v7630_v8, %v5562_v40  ;;  %v5769_v55 = vor.u32 %v7693_v2, %v5768_v29  ;;  %v8076_v29 = vld [vmem:[%s11367_s1 + $0x3e8] sm:$0xff] }
 0x1f3   :  { %v4142_v42 = vadd.f32 %v4141_v18, %v4068_v61  ;;  %v5576_v18 = vld [vmem:[%s11369_s0 + $0x30] sm:$0xf]  ;;  %4706 = vmatpush.bf16.msra.mxu3 %v8076_v29  ;;  %v7719_v29 = vld [vmem:[%s11369_s0 + $0x2e8] sm:$0xf0] }
 0x1f4   :  { %4416 = vmatmul.bf16.vlgmr.msrb.gmra.mxu3 %v5573_v56  ;;  %4347 = vmatmul.bf16.gmra.mxu2 %v5669_v32  ;;  %v5577_v60 = vor.u32 %v7644_v16, %v5576_v18 }
 0x1f5   :  { %v9506_v36 = vadd.f32 %v4215_v33, %v4142_v42  ;;  %v7655_v42 = vld [vmem:[%s11369_s0 + $0xec] sm:$0xf] }
 0x1f6   :  { %v3995_v12 = vpop.f32.mrf.mxu1  ;;  %v4217_v48 = vpop.f32.mrf.mxu0 }
 0x1f7   :  { %v4146_v63 = vpop.f32.mrf.mxu3  ;;  %v3996_v31 = vadd.f32 %v3995_v12, %v9041_v26  ;;  %v4077_v50 = vpop.f32.mrf.mxu2  ;;  %v7656_v26 = vld [vmem:[%s11369_s0 + $0xf4] sm:$0xf]  ;;  %v5676_v12 = vld [vmem:[%s11369_s0 + $0xf8] sm:$0xf] }
 0x1f9   :  { %v4070_v15 = vadd.f32 %v4069_v47, %v3996_v31  ;;  %v5670_v47 = vld [vmem:[%s11369_s0 + $0x154] sm:$0xf0]  ;;  %v5770_v31 = vld [vmem:[%s11369_s0 + $0x21c] sm:$0xf0] }
 0x1fa   :  { %v5673_v4 = vor.u32 %v7656_v26, %v5670_v47  ;;  %v5868_v47 = vld [vmem:[%s11369_s0 + $0x280] sm:$0xf] }
 0x1fb   :  { %v4144_v22 = vadd.f32 %v4143_v17, %v4070_v15 }
 0x1fd   :  { %v9527_v45 = vadd.f32 %v4217_v48, %v4144_v22  ;;  %v7669_v48 = vld [vmem:[%s11369_s0 + $0x158] sm:$0xf0] }
 0x1fe   :  { %v3998_v46 = vpop.f32.mrf.mxu1  ;;  %v4220_v3 = vpop.f32.mrf.mxu0  ;;  %v5677_v40 = vor.u32 %v7669_v48, %v5676_v12  ;;  %v8084_v12 = vld [vmem:[%s11367_s1 + $0x428] sm:$0xff] }
 0x1ff   :  { %v4148_v21 = vpop.f32.mrf.mxu3  ;;  %v3999_v35 = vadd.f32 %v3998_v46, %v9059_v7  ;;  %v4079_v17 = vpop.f32.mrf.mxu2  ;;  %4780 = vmatpush.bf16.msra.mxu0 %v8084_v12 }
 0x201   :  { %v4073_v39 = vadd.f32 %v4072_v57, %v3999_v35  ;;  %4268 = vmatmul.bf16.vlgmr.msrb.gmra.mxu1 %v5565_v41  ;;  %4490 = vmatmul.bf16.vlgmr.msrb.gmra.mxu0 %v5577_v60  ;;  %v7718_v41 = vld [vmem:[%s11369_s0 + $0x2e0] sm:$0xf0] }
 0x202   :  { %v5869_v62 = vor.u32 %v7718_v41, %v5868_v47 }
 0x203   :  { %v4147_v33 = vadd.f32 %v4146_v63, %v4073_v39  ;;  %v5662_v63 = vld [vmem:[%s11369_s0 + $0x14c] sm:$0xf0] }
 0x204   :  { %4421 = vmatmul.bf16.gmra.mxu3 %v5673_v4  ;;  %4352 = vmatmul.bf16.gmra.mxu2 %v5769_v55  ;;  %v5665_v8 = vor.u32 %v7655_v42, %v5662_v63  ;;  %v8068_v4 = vld [vmem:[%s11367_s1 + $0x3a8] sm:$0xff] }
 0x205   :  { %v9545_v56 = vadd.f32 %v4220_v3, %v4147_v33  ;;  %4632 = vmatpush.bf16.msra.mxu2 %v8068_v4  ;;  %v7680_v33 = vld [vmem:[%s11369_s0 + $0x1b4] sm:$0xf] }
 0x206   :  { %v4000_v51 = vpop.f32.mrf.mxu1  ;;  %v4222_v7 = vpop.f32.mrf.mxu0 }
 0x207   :  { %v4151_v49 = vpop.f32.mrf.mxu3  ;;  %v4001_v61 = vadd.f32 %v4000_v51, %v9083_v20  ;;  %v4082_v32 = vpop.f32.mrf.mxu2 }
 0x209   :  { %v4075_v57 = vadd.f32 %v4074_v1, %v4001_v61  ;;  %v7681_v1 = vld [vmem:[%s11369_s0 + $0x1bc] sm:$0xf] }
 0x20a   :  { %v5773_v26 = vor.u32 %v7681_v1, %v5770_v31  ;;  %v5968_v31 = vld [vmem:[%s11369_s0 + $0x348] sm:$0xf] }
 0x20b   :  { %v4149_v20 = vadd.f32 %v4148_v21, %v4075_v57 }
 0x20d   :  { %v9569_v15 = vadd.f32 %v4222_v7, %v4149_v20  ;;  %v5870_v7 = vld [vmem:[%s11369_s0 + $0x2e4] sm:$0xf0] }
 0x20e   :  { %v4003_v16 = vpop.f32.mrf.mxu1  ;;  %v4225_v22 = vpop.f32.mrf.mxu0 }
 0x20f   :  { %v4153_v18 = vpop.f32.mrf.mxu3  ;;  %v4004_v60 = vadd.f32 %v4003_v16, %v9092_v37  ;;  %v4084_v21 = vpop.f32.mrf.mxu2  ;;  %v8060_v37 = vld [vmem:[%s11367_s1 + $0x368] sm:$0xff] }
 0x210   :  { %4558 = vmatpush.bf16.msra.mxu1 %v8060_v37 }
 0x211   :  { %v4078_v9 = vadd.f32 %v4077_v50, %v4004_v60  ;;  %4273 = vmatmul.bf16.gmra.mxu1 %v5665_v8  ;;  %4495 = vmatmul.bf16.gmra.mxu0 %v5677_v40  ;;  %v7743_v8 = vld [vmem:[%s11369_s0 + $0x3a8] sm:$0xf0] }
 0x213   :  { %v4152_v11 = vadd.f32 %v4151_v49, %v4078_v9  ;;  %v5762_v49 = vld [vmem:[%s11369_s0 + $0x214] sm:$0xf0] }
 0x214   :  { %4426 = vmatmul.bf16.gmra.mxu3 %v5773_v26  ;;  %4357 = vmatmul.bf16.gmra.mxu2 %v5869_v62  ;;  %v5765_v57 = vor.u32 %v7680_v33, %v5762_v49  ;;  %v8067_v33 = vld [vmem:[%s11367_s1 + $0x3a0] sm:$0xff] }
 0x215   :  { %v9578_v46 = vadd.f32 %v4225_v22, %v4152_v11  ;;  %v5969_v22 = vor.u32 %v7743_v8, %v5968_v31  ;;  %v8075_v49 = vld [vmem:[%s11367_s1 + $0x3e0] sm:$0xff]  ;;  %4633 = vmatpush.bf16.msra.mxu2 %v8067_v33 }
 0x216   :  { %v4005_v50 = vpop.f32.mrf.mxu1  ;;  %v4227_v2 = vpop.f32.mrf.mxu0  ;;  %4707 = vmatpush.bf16.msra.mxu3 %v8075_v49  ;;  %v8059_v31 = vld [vmem:[%s11367_s1 + $0x360] sm:$0xff] }
 0x217   :  { %v4156_v3 = vpop.f32.mrf.mxu3  ;;  %v4006_v35 = vadd.f32 %v4005_v50, %v9122_v0  ;;  %v4087_v39 = vpop.f32.mrf.mxu2  ;;  %v7694_v0 = vld [vmem:[%s11369_s0 + $0x220] sm:$0xf0]  ;;  %4559 = vmatpush.bf16.msra.mxu1 %v8059_v31  ;;  %v7769_v31 = vld [vmem:[%s11369_s0 + $0x478] sm:$0xf0] }
 0x218   :  { %v5777_v42 = vor.u32 %v7694_v0, %v5776_v27 }
 0x219   :  { %v4080_v55 = vadd.f32 %v4079_v17, %v4006_v35  ;;  %v7706_v17 = vld [vmem:[%s11369_s0 + $0x284] sm:$0xf] }
 0x21a   :  { %v5873_v1 = vor.u32 %v7706_v17, %v5870_v7  ;;  %v6068_v17 = vld [vmem:[%s11369_s0 + $0x410] sm:$0xf]  ;;  %v7768_v7 = vld [vmem:[%s11369_s0 + $0x470] sm:$0xf0] }
 0x21b   :  { %v4154_v51 = vadd.f32 %v4153_v18, %v4080_v55  ;;  %v6069_v12 = vor.u32 %v7768_v7, %v6068_v17  ;;  %v8066_v17 = vld [vmem:[%s11367_s1 + $0x398] sm:$0xff] }
 0x21c   :  { %4634 = vmatpush.bf16.msra.mxu2 %v8066_v17  ;;  %v6176_v17 = vld [vmem:[%s11369_s0 + $0x4e0] sm:$0xf] }
 0x21d   :  { %v9608_v61 = vadd.f32 %v4227_v2, %v4154_v51 }
 0x21e   :  { %v4008_v48 = vpop.f32.mrf.mxu1  ;;  %v4230_v20 = vpop.f32.mrf.mxu0 }
 0x21f   :  { %v4158_v63 = vpop.f32.mrf.mxu3  ;;  %v4009_v40 = vadd.f32 %v4008_v48, %v9134_v5  ;;  %v4089_v18 = vpop.f32.mrf.mxu2  ;;  %v7705_v5 = vld [vmem:[%s11369_s0 + $0x27c] sm:$0xf] }
 0x221   :  { %v4083_v16 = vadd.f32 %v4082_v32, %v4009_v40  ;;  %4278 = vmatmul.bf16.gmra.mxu1 %v5765_v57  ;;  %4500 = vmatmul.bf16.gmra.mxu0 %v5777_v42  ;;  %v5862_v32 = vld [vmem:[%s11369_s0 + $0x2dc] sm:$0xf0] }
 0x222   :  { %v5865_v2 = vor.u32 %v7705_v5, %v5862_v32 }
 0x223   :  { %v4157_v26 = vadd.f32 %v4156_v3, %v4083_v16  ;;  %v5876_v3 = vld [vmem:[%s11369_s0 + $0x288] sm:$0xf] }
 0x224   :  { %4431 = vmatmul.bf16.gmra.mxu3 %v5873_v1  ;;  %4362 = vmatmul.bf16.gmra.mxu2 %v5969_v22  ;;  %v5877_v35 = vor.u32 %v7719_v29, %v5876_v3 }
 0x225   :  { %v9620_v47 = vadd.f32 %v4230_v20, %v4157_v26  ;;  %v7730_v26 = vld [vmem:[%s11369_s0 + $0x344] sm:$0xf] }
 0x226   :  { %v4010_v60 = vpop.f32.mrf.mxu1  ;;  %v4232_v9 = vpop.f32.mrf.mxu0 }
 0x227   :  { %v4161_v41 = vpop.f32.mrf.mxu3  ;;  %v4011_v62 = vadd.f32 %v4010_v60, %v9155_v19  ;;  %v4092_v11 = vpop.f32.mrf.mxu2  ;;  %v7731_v19 = vld [vmem:[%s11369_s0 + $0x34c] sm:$0xf]  ;;  %v5976_v60 = vld [vmem:[%s11369_s0 + $0x350] sm:$0xf] }
 0x229   :  { %v4085_v4 = vadd.f32 %v4084_v21, %v4011_v62  ;;  %v5970_v21 = vld [vmem:[%s11369_s0 + $0x3ac] sm:$0xf0]  ;;  %v6070_v62 = vld [vmem:[%s11369_s0 + $0x474] sm:$0xf0] }
 0x22a   :  { %v5973_v51 = vor.u32 %v7731_v19, %v5970_v21  ;;  %v6168_v21 = vld [vmem:[%s11369_s0 + $0x4d8] sm:$0xf] }
 0x22b   :  { %v4159_v37 = vadd.f32 %v4158_v63, %v4085_v4 }
 0x22d   :  { %v9641_v50 = vadd.f32 %v4232_v9, %v4159_v37 }
 0x22e   :  { %v4013_v27 = vpop.f32.mrf.mxu1  ;;  %v4235_v0 = vpop.f32.mrf.mxu0 }
 0x22f   :  { %v4163_v55 = vpop.f32.mrf.mxu3  ;;  %v4014_v57 = vadd.f32 %v4013_v27, %v9170_v10  ;;  %v4094_v42 = vpop.f32.mrf.mxu2  ;;  %v8083_v10 = vld [vmem:[%s11367_s1 + $0x420] sm:$0xff] }
 0x230   :  { %4781 = vmatpush.bf16.msra.mxu0 %v8083_v10  ;;  %v6170_v10 = vld [vmem:[%s11369_s0 + $0x53c] sm:$0xf0] }
 0x231   :  { %v4088_v63 = vadd.f32 %v4087_v39, %v4014_v57  ;;  %4283 = vmatmul.bf16.gmra.mxu1 %v5865_v2  ;;  %4505 = vmatmul.bf16.gmra.mxu0 %v5877_v35  ;;  %v7793_v2 = vld [vmem:[%s11369_s0 + $0x538] sm:$0xf0] }
 0x232   :  { %v6169_v49 = vor.u32 %v7793_v2, %v6168_v21  ;;  %v8082_v2 = vld [vmem:[%s11367_s1 + $0x418] sm:$0xff] }
 0x233   :  { %v4162_v48 = vadd.f32 %v4161_v41, %v4088_v63  ;;  %v5962_v41 = vld [vmem:[%s11369_s0 + $0x3a4] sm:$0xf0] }
 0x234   :  { %4436 = vmatmul.bf16.gmra.mxu3 %v5973_v51  ;;  %4367 = vmatmul.bf16.gmra.mxu2 %v6069_v12  ;;  %v5965_v5 = vor.u32 %v7730_v26, %v5962_v41  ;;  %v7755_v12 = vld [vmem:[%s11369_s0 + $0x40c] sm:$0xf]  ;;  %v8074_v26 = vld [vmem:[%s11367_s1 + $0x3d8] sm:$0xff] }
 0x235   :  { %v9656_v20 = vadd.f32 %v4235_v0, %v4162_v48  ;;  %v6062_v48 = vld [vmem:[%s11369_s0 + $0x46c] sm:$0xf0]  ;;  %v8058_v41 = vld [vmem:[%s11367_s1 + $0x358] sm:$0xff]  ;;  %4708 = vmatpush.bf16.msra.mxu3 %v8074_v26  ;;  %4782 = vmatpush.bf16.msra.mxu0 %v8082_v2  ;;  %v6276_v2 = vld [vmem:[%s11369_s0 + $0x5a8] sm:$0xf] }
 0x236   :  { %v4015_v8 = vpop.f32.mrf.mxu1  ;;  %v4237_v40 = vpop.f32.mrf.mxu0  ;;  %4560 = vmatpush.bf16.msra.mxu1 %v8058_v41 }
 0x237   :  { %v4166_v1 = vpop.f32.mrf.mxu3  ;;  %v4016_v39 = vadd.f32 %v4015_v8, %v9197_v25  ;;  %v4097_v16 = vpop.f32.mrf.mxu2  ;;  %v7744_v25 = vld [vmem:[%s11369_s0 + $0x3b0] sm:$0xf0] }
 0x238   :  { %v5977_v32 = vor.u32 %v7744_v25, %v5976_v60 }
 0x239   :  { %v4090_v22 = vadd.f32 %v4089_v18, %v4016_v39  ;;  %v7756_v18 = vld [vmem:[%s11369_s0 + $0x414] sm:$0xf] }
 0x23a   :  { %v6073_v19 = vor.u32 %v7756_v18, %v6070_v62  ;;  %v6268_v18 = vld [vmem:[%s11369_s0 + $0x5a0] sm:$0xf]  ;;  %v7818_v62 = vld [vmem:[%s11369_s0 + $0x600] sm:$0xf0] }
 0x23b   :  { %v4164_v9 = vadd.f32 %v4163_v55, %v4090_v22 }
 0x23d   :  { %v9683_v4 = vadd.f32 %v4237_v40, %v4164_v9  ;;  %v6065_v40 = vor.u32 %v7755_v12, %v6062_v48 }
 0x23e   :  { %v4018_v29 = vpop.f32.mrf.mxu1  ;;  %v4240_v37 = vpop.f32.mrf.mxu0 }
 0x23f   :  { %v4168_v3 = vpop.f32.mrf.mxu3  ;;  %v4019_v35 = vadd.f32 %v4018_v29, %v9206_v43  ;;  %v4099_v55 = vpop.f32.mrf.mxu2  ;;  %v6269_v29 = vor.u32 %v7818_v62, %v6268_v18  ;;  %v8073_v18 = vld [vmem:[%s11367_s1 + $0x3d0] sm:$0xff] }
 0x240   :  { %4709 = vmatpush.bf16.msra.mxu3 %v8073_v18  ;;  %v7844_v18 = vld [vmem:[%s11369_s0 + $0x6d0] sm:$0xf0] }
 0x241   :  { %v4093_v33 = vadd.f32 %v4092_v11, %v4019_v35  ;;  %4288 = vmatmul.bf16.gmra.mxu1 %v5965_v5  ;;  %4510 = vmatmul.bf16.gmra.mxu0 %v5977_v32 }
 0x243   :  { %v4167_v27 = vadd.f32 %v4166_v1, %v4093_v33  ;;  %v6076_v1 = vld [vmem:[%s11369_s0 + $0x418] sm:$0xf] }
 0x244   :  { %4441 = vmatmul.bf16.gmra.mxu3 %v6073_v19  ;;  %4372 = vmatmul.bf16.gmra.mxu2 %v6169_v49  ;;  %v6077_v39 = vor.u32 %v7769_v31, %v6076_v1 }
 0x245   :  { %v9692_v0 = vadd.f32 %v4240_v37, %v4167_v27  ;;  %v7780_v27 = vld [vmem:[%s11369_s0 + $0x4d4] sm:$0xf] }
 0x246   :  { %v4020_v7 = vpop.f32.mrf.mxu1  ;;  %v4242_v57 = vpop.f32.mrf.mxu0 }
 0x247   :  { %v4171_v51 = vpop.f32.mrf.mxu3  ;;  %v4021_v63 = vadd.f32 %v4020_v7, %v9230_v38  ;;  %v4102_v43 = vpop.f32.mrf.mxu2  ;;  %v7794_v7 = vld [vmem:[%s11369_s0 + $0x540] sm:$0xf0] }
 0x248   :  { %v6177_v12 = vor.u32 %v7794_v7, %v6176_v17  ;;  %v8081_v17 = vld [vmem:[%s11367_s1 + $0x410] sm:$0xff] }
 0x249   :  { %v4095_v11 = vadd.f32 %v4094_v42, %v4021_v63  ;;  %v7781_v42 = vld [vmem:[%s11369_s0 + $0x4dc] sm:$0xf]  ;;  %4783 = vmatpush.bf16.msra.mxu0 %v8081_v17 }
 0x24a   :  { %v6173_v9 = vor.u32 %v7781_v42, %v6170_v10  ;;  %v6368_v42 = vld [vmem:[%s11369_s0 + $0x668] sm:$0xf]  ;;  %v7843_v10 = vld [vmem:[%s11369_s0 + $0x6c8] sm:$0xf0] }
 0x24b   :  { %v4169_v38 = vadd.f32 %v4168_v3, %v4095_v11  ;;  %v6369_v26 = vor.u32 %v7843_v10, %v6368_v42 }
 0x24d   :  { %v9716_v8 = vadd.f32 %v4242_v57, %v4169_v38  ;;  %v6270_v57 = vld [vmem:[%s11369_s0 + $0x604] sm:$0xf0] }
 0x24e   :  { %v4023_v60 = vpop.f32.mrf.mxu1  ;;  %v4245_v25 = vpop.f32.mrf.mxu0 }
 0x24f   :  { %v4173_v22 = vpop.f32.mrf.mxu3  ;;  %v4024_v5 = vadd.f32 %v4023_v60, %v9245_v14  ;;  %v4104_v32 = vpop.f32.mrf.mxu2 }
 0x251   :  { %v4098_v3 = vadd.f32 %v4097_v16, %v4024_v5  ;;  %4293 = vmatmul.bf16.gmra.mxu1 %v6065_v40  ;;  %4515 = vmatmul.bf16.gmra.mxu0 %v6077_v39 }
 0x253   :  { %v4172_v37 = vadd.f32 %v4171_v51, %v4098_v3  ;;  %v6162_v51 = vld [vmem:[%s11369_s0 + $0x534] sm:$0xf0] }
 0x254   :  { %4446 = vmatmul.bf16.gmra.mxu3 %v6173_v9  ;;  %4377 = vmatmul.bf16.gmra.mxu2 %v6269_v29  ;;  %v6165_v11 = vor.u32 %v7780_v27, %v6162_v51  ;;  %v8065_v9 = vld [vmem:[%s11367_s1 + $0x390] sm:$0xff] }
 0x255   :  { %v9731_v19 = vadd.f32 %v4245_v25, %v4172_v37  ;;  %4635 = vmatpush.bf16.msra.mxu2 %v8065_v9  ;;  %v7805_v37 = vld [vmem:[%s11369_s0 + $0x59c] sm:$0xf] }
 0x256   :  { %v4025_v35 = vpop.f32.mrf.mxu1  ;;  %v4247_v33 = vpop.f32.mrf.mxu0 }
 0x257   :  { %v4176_v21 = vpop.f32.mrf.mxu3  ;;  %v4026_v14 = vadd.f32 %v4025_v35, %v9269_v58  ;;  %v4107_v49 = vpop.f32.mrf.mxu2 }
 0x259   :  { %v4100_v16 = vadd.f32 %v4099_v55, %v4026_v14  ;;  %v7806_v55 = vld [vmem:[%s11369_s0 + $0x5a4] sm:$0xf] }
 0x25a   :  { %v6273_v38 = vor.u32 %v7806_v55, %v6270_v57  ;;  %v6468_v57 = vld [vmem:[%s11369_s0 + $0x730] sm:$0xf] }
 0x25b   :  { %v4174_v58 = vadd.f32 %v4173_v22, %v4100_v16 }
 0x25d   :  { %v9755_v63 = vadd.f32 %v4247_v33, %v4174_v58  ;;  %v6370_v33 = vld [vmem:[%s11369_s0 + $0x6cc] sm:$0xf0] }
 0x25e   :  { %v4028_v1 = vpop.f32.mrf.mxu1  ;;  %v4250_v31 = vpop.f32.mrf.mxu0 }
 0x25f   :  { %v4178_v48 = vpop.f32.mrf.mxu3  ;;  %v4029_v40 = vadd.f32 %v4028_v1, %v9278_v30  ;;  %v4109_v39 = vpop.f32.mrf.mxu2  ;;  %v8057_v30 = vld [vmem:[%s11367_s1 + $0x350] sm:$0xff] }
 0x260   :  { %4561 = vmatpush.bf16.msra.mxu1 %v8057_v30 }
 0x261   :  { %v4103_v22 = vadd.f32 %v4102_v43, %v4029_v40  ;;  %4298 = vmatmul.bf16.gmra.mxu1 %v6165_v11  ;;  %4520 = vmatmul.bf16.gmra.mxu0 %v6177_v12  ;;  %v7868_v11 = vld [vmem:[%s11369_s0 + $0x790] sm:$0xf0] }
 0x263   :  { %v4177_v41 = vadd.f32 %v4176_v21, %v4103_v22  ;;  %v6262_v21 = vld [vmem:[%s11369_s0 + $0x5fc] sm:$0xf0] }
 0x264   :  { %4451 = vmatmul.bf16.gmra.mxu3 %v6273_v38  ;;  %4382 = vmatmul.bf16.gmra.mxu2 %v6369_v26  ;;  %v6265_v16 = vor.u32 %v7805_v37, %v6262_v21  ;;  %v8064_v37 = vld [vmem:[%s11367_s1 + $0x388] sm:$0xff] }
 0x265   :  { %v9764_v60 = vadd.f32 %v4250_v31, %v4177_v41  ;;  %v6469_v31 = vor.u32 %v7868_v11, %v6468_v57  ;;  %v8072_v21 = vld [vmem:[%s11367_s1 + $0x3c8] sm:$0xff]  ;;  %4636 = vmatpush.bf16.msra.mxu2 %v8064_v37 }
 0x266   :  { %v4030_v43 = vpop.f32.mrf.mxu1  ;;  %v4252_v62 = vpop.f32.mrf.mxu0  ;;  %4710 = vmatpush.bf16.msra.mxu3 %v8072_v21  ;;  %v8080_v11 = vld [vmem:[%s11367_s1 + $0x408] sm:$0xff] }
 0x267   :  { %v4181_v25 = vpop.f32.mrf.mxu3  ;;  %v4031_v5 = vadd.f32 %v4030_v43, %v9308_v44  ;;  %v4343_v3 = vpop.f32.mrf.mxu2  ;;  %v7819_v44 = vld [vmem:[%s11369_s0 + $0x608] sm:$0xf0]  ;;  %4784 = vmatpush.bf16.msra.mxu0 %v8080_v11 }
 0x268   :  { %v6277_v27 = vor.u32 %v7819_v44, %v6276_v2  ;;  %v8056_v2 = vld [vmem:[%s11367_s1 + $0x348] sm:$0xff] }
 0x269   :  { %v4105_v29 = vadd.f32 %v4104_v32, %v4031_v5  ;;  %v7831_v32 = vld [vmem:[%s11369_s0 + $0x66c] sm:$0xf]  ;;  %4562 = vmatpush.bf16.msra.mxu1 %v8056_v2 }
 0x26a   :  { %v6373_v55 = vor.u32 %v7831_v32, %v6370_v33  ;;  %v6568_v33 = vld [vmem:[%s11369_s0 + $0x7f8] sm:$0xf] }
 0x26b   :  { %v4179_v35 = vadd.f32 %v4178_v48, %v4105_v29 }
 0x26d   :  { %v9794_v14 = vadd.f32 %v4252_v62, %v4179_v35 }
 0x26e   :  { %v4033_v7 = vpop.f32.mrf.mxu1  ;;  %v4255_v58 = vpop.f32.mrf.mxu0 }
 0x26f   :  { %v4183_v51 = vpop.f32.mrf.mxu3  ;;  %v4034_v12 = vadd.f32 %v4033_v7, %v9320_v6  ;;  %v4345_v48 = vpop.f32.mrf.mxu2  ;;  %v7830_v6 = vld [vmem:[%s11369_s0 + $0x664] sm:$0xf] }
 0x271   :  { %v4108_v1 = vadd.f32 %v4107_v49, %v4034_v12  ;;  %4303 = vmatmul.bf16.gmra.mxu1 %v6265_v16  ;;  %4525 = vmatmul.bf16.gmra.mxu0 %v6277_v27  ;;  %v6362_v49 = vld [vmem:[%s11369_s0 + $0x6c4] sm:$0xf0]  ;;  %v7893_v16 = vld [vmem:[%s11369_s0 + $0x858] sm:$0xf0] }
 0x272   :  { %v6365_v62 = vor.u32 %v7830_v6, %v6362_v49  ;;  %v6569_v7 = vor.u32 %v7893_v16, %v6568_v33  ;;  %v8071_v33 = vld [vmem:[%s11367_s1 + $0x3c0] sm:$0xff] }
 0x273   :  { %v4182_v38 = vadd.f32 %v4181_v25, %v4108_v1  ;;  %v6376_v25 = vld [vmem:[%s11369_s0 + $0x670] sm:$0xf]  ;;  %4711 = vmatpush.bf16.msra.mxu3 %v8071_v33  ;;  %v7919_v33 = vld [vmem:[%s11369_s0 + $0x928] sm:$0xf0] }
 0x274   :  { %4456 = vmatmul.bf16.gmra.mxu3 %v6373_v55  ;;  %4387 = vmatmul.bf16.gmra.mxu2 %v6469_v31  ;;  %v6377_v5 = vor.u32 %v7844_v18, %v6376_v25 }
 0x275   :  { %v9806_v42 = vadd.f32 %v4255_v58, %v4182_v38  ;;  %v7855_v38 = vld [vmem:[%s11369_s0 + $0x72c] sm:$0xf] }
 0x276   :  { %v4035_v40 = vpop.f32.mrf.mxu1  ;;  %v4257_v22 = vpop.f32.mrf.mxu0 }
 0x277   :  { %v4417_v10 = vpop.f32.mrf.mxu3  ;;  %v4036_v26 = vadd.f32 %v4035_v40, %v9341_v13  ;;  %v4348_v41 = vpop.f32.mrf.mxu2  ;;  %v7856_v13 = vld [vmem:[%s11369_s0 + $0x734] sm:$0xf]  ;;  %v6476_v40 = vld [vmem:[%s11369_s0 + $0x738] sm:$0xf] }
 0x279   :  { %v4110_v9 = vadd.f32 %v4109_v39, %v4036_v26  ;;  %v6470_v39 = vld [vmem:[%s11369_s0 + $0x794] sm:$0xf0]  ;;  %v6570_v26 = vld [vmem:[%s11369_s0 + $0x85c] sm:$0xf0] }
 0x27a   :  { %v6473_v32 = vor.u32 %v7856_v13, %v6470_v39  ;;  %v6668_v39 = vld [vmem:[%s11369_s0 + $0x8c0] sm:$0xf] }
 0x27b   :  { %v4184_v30 = vadd.f32 %v4183_v51, %v4110_v9 }
 0x27d   :  { %v9827_v43 = vadd.f32 %v4257_v22, %v4184_v30  ;;  %v7869_v22 = vld [vmem:[%s11369_s0 + $0x798] sm:$0xf0] }
 0x27e   :  { %v4269_v44 = vpop.f32.mrf.mxu1  ;;  %v4491_v35 = vpop.f32.mrf.mxu0  ;;  %v6477_v49 = vor.u32 %v7869_v22, %v6476_v40  ;;  %v8079_v40 = vld [vmem:[%s11367_s1 + $0x400] sm:$0xff] }
 0x27f   :  { %v4419_v29 = vpop.f32.mrf.mxu3  ;;  %v4270_v27 = vadd.f32 %v4269_v44, %v9359_v34  ;;  %v4350_v51 = vpop.f32.mrf.mxu2  ;;  %4785 = vmatpush.bf16.msra.mxu0 %v8079_v40 }
 0x281   :  { %v4344_v17 = vadd.f32 %v4343_v3, %v4270_v27  ;;  %4308 = vmatmul.bf16.gmra.mxu1 %v6365_v62  ;;  %4530 = vmatmul.bf16.gmra.mxu0 %v6377_v5  ;;  %v7918_v62 = vld [vmem:[%s11369_s0 + $0x920] sm:$0xf0] }
 0x282   :  { %v6669_v21 = vor.u32 %v7918_v62, %v6668_v39 }
 0x283   :  { %v4418_v58 = vadd.f32 %v4417_v10, %v4344_v17  ;;  %v6462_v10 = vld [vmem:[%s11369_s0 + $0x78c] sm:$0xf0] }
 0x284   :  { %4461 = vmatmul.bf16.gmra.mxu3 %v6473_v32  ;;  %4392 = vmatmul.bf16.gmra.mxu2 %v6569_v7  ;;  %v6465_v6 = vor.u32 %v7855_v38, %v6462_v10  ;;  %v8063_v32 = vld [vmem:[%s11367_s1 + $0x380] sm:$0xff]  ;;  %v7880_v7 = vld [vmem:[%s11369_s0 + $0x7f4] sm:$0xf] }
 0x285   :  { %v9845_v55 = vadd.f32 %v4491_v35, %v4418_v58  ;;  %4637 = vmatpush.bf16.msra.mxu2 %v8063_v32  ;;  %v6562_v58 = vld [vmem:[%s11369_s0 + $0x854] sm:$0xf0]  ;;  %v8055_v10 = vld [vmem:[%s11367_s1 + $0x340] sm:$0xff] }
 0x286   :  { %v4271_v12 = vpop.f32.mrf.mxu1  ;;  %v4493_v34 = vpop.f32.mrf.mxu0  ;;  %4563 = vmatpush.bf16.msra.mxu1 %v8055_v10 }
 0x287   :  { %v4422_v57 = vpop.f32.mrf.mxu3  ;;  %v4272_v1 = vadd.f32 %v4271_v12, %v9383_v28  ;;  %v4353_v31 = vpop.f32.mrf.mxu2  ;;  %v6670_v12 = vld [vmem:[%s11369_s0 + $0x924] sm:$0xf0] }
 0x289   :  { %v4346_v3 = vadd.f32 %v4345_v48, %v4272_v1  ;;  %v7881_v48 = vld [vmem:[%s11369_s0 + $0x7fc] sm:$0xf]  ;;  %v6565_v1 = vor.u32 %v7880_v7, %v6562_v58 }
 0x28a   :  { %v6573_v13 = vor.u32 %v7881_v48, %v6570_v26  ;;  %v6768_v26 = vld [vmem:[%s11369_s0 + $0x988] sm:$0xf]  ;;  %v8102_v58 = vld [vmem:[%s11367_s1 + $0x4b8] sm:$0xff] }
 0x28b   :  { %v4420_v28 = vadd.f32 %v4419_v29, %v4346_v3  ;;  %4926 = vmatpush.bf16.msrb.mxu2 %v8102_v58 }
 0x28d   :  { %v9869_v9 = vadd.f32 %v4493_v34, %v4420_v28 }
 0x28e   :  { %v4274_v18 = vpop.f32.mrf.mxu1  ;;  %v4496_v30 = vpop.f32.mrf.mxu0 }
 0x28f   :  { %v4424_v25 = vpop.f32.mrf.mxu3  ;;  %v4275_v5 = vadd.f32 %v4274_v18, %v9392_v24  ;;  %v4355_v29 = vpop.f32.mrf.mxu2 }
 0x291   :  { %v4349_v37 = vadd.f32 %v4348_v41, %v4275_v5  ;;  %4313 = vmatmul.bf16.gmra.mxu1 %v6465_v6  ;;  %4535 = vmatmul.bf16.gmra.mxu0 %v6477_v49  ;;  %v7943_v6 = vld [vmem:[%s11369_s0 + $0x9e8] sm:$0xf0] }
 0x293   :  { %v4423_v2 = vadd.f32 %v4422_v57, %v4349_v37  ;;  %v6576_v57 = vld [vmem:[%s11369_s0 + $0x800] sm:$0xf] }
 0x294   :  { %4466 = vmatmul.bf16.gmra.mxu3 %v6573_v13  ;;  %4397 = vmatmul.bf16.gmra.mxu2 %v6669_v21 }
 0x295   :  { %v9878_v44 = vadd.f32 %v4496_v30, %v4423_v2  ;;  %v6769_v30 = vor.u32 %v7943_v6, %v6768_v26 }
 0x296   :  { %v4276_v24 = vpop.f32.mrf.mxu1  ;;  %v4498_v16 = vpop.f32.mrf.mxu0 }
 0x297   :  { %v4427_v35 = vpop.f32.mrf.mxu3  ;;  %v4277_v41 = vadd.f32 %v4276_v24, %v9419_v54  ;;  %v4358_v27 = vpop.f32.mrf.mxu2  ;;  %v7894_v54 = vld [vmem:[%s11369_s0 + $0x860] sm:$0xf0] }
 0x298   :  { %v6577_v3 = vor.u32 %v7894_v54, %v6576_v57 }
 0x299   :  { %v4351_v17 = vadd.f32 %v4350_v51, %v4277_v41  ;;  %v7906_v51 = vld [vmem:[%s11369_s0 + $0x8c4] sm:$0xf] }
 0x29a   :  { %v6673_v48 = vor.u32 %v7906_v51, %v6670_v12  ;;  %v5584_v51 = vld [vmem:[%s11369_s0 + $0x38] sm:$0xf]  ;;  %v7645_v12 = vld [vmem:[%s11369_s0 + $0x98] sm:$0xf0] }
 0x29b   :  { %v4425_v11 = vadd.f32 %v4424_v25, %v4351_v17  ;;  %v5585_v10 = vor.u32 %v7645_v12, %v5584_v51 }
 0x29d   :  { %v9905_v34 = vadd.f32 %v4498_v16, %v4425_v11 }
 0x29e   :  { %v4279_v22 = vpop.f32.mrf.mxu1  ;;  %v4501_v28 = vpop.f32.mrf.mxu0 }
 0x29f   :  { %v4429_v38 = vpop.f32.mrf.mxu3  ;;  %v4280_v49 = vadd.f32 %v4279_v22, %v9434_v52  ;;  %v4360_v25 = vpop.f32.mrf.mxu2  ;;  %v7905_v52 = vld [vmem:[%s11369_s0 + $0x8bc] sm:$0xf] }
 0x2a1   :  { %v4354_v18 = vadd.f32 %v4353_v31, %v4280_v49  ;;  %4318 = vmatmul.bf16.gmra.mxu1 %v6565_v1  ;;  %4540 = vmatmul.bf16.gmra.mxu0 %v6577_v3  ;;  %v6662_v31 = vld [vmem:[%s11369_s0 + $0x91c] sm:$0xf0] }
 0x2a2   :  { %v6665_v41 = vor.u32 %v7905_v52, %v6662_v31 }
 0x2a3   :  { %v4428_v13 = vadd.f32 %v4427_v35, %v4354_v18  ;;  %v6676_v35 = vld [vmem:[%s11369_s0 + $0x8c8] sm:$0xf] }
 0x2a4   :  { %4471 = vmatmul.bf16.gmra.mxu3 %v6673_v48  ;;  %4402 = vmatmul.bf16.gmra.mxu2 %v6769_v30  ;;  %v6677_v17 = vor.u32 %v7919_v33, %v6676_v35  ;;  %v8110_v48 = vld [vmem:[%s11367_s1 + $0x4f8] sm:$0xff]  ;;  %v7930_v30 = vld [vmem:[%s11369_s0 + $0x984] sm:$0xf] }
 0x2a5   :  { %v9920_v39 = vadd.f32 %v4501_v28, %v4428_v13  ;;  %5000 = vmatpush.bf16.msrb.mxu3 %v8110_v48  ;;  %v6762_v13 = vld [vmem:[%s11369_s0 + $0x9e4] sm:$0xf0]  ;;  %v8118_v35 = vld [vmem:[%s11367_s1 + $0x538] sm:$0xff]  ;;  %v7646_v48 = vld [vmem:[%s11369_s0 + $0xa0] sm:$0xf0] }
 0x2a6   :  { %v4281_v5 = vpop.f32.mrf.mxu1  ;;  %v4503_v37 = vpop.f32.mrf.mxu0  ;;  %5074 = vmatpush.bf16.msrb.mxu0 %v8118_v35 }
 0x2a7   :  { %v4432_v62 = vpop.f32.mrf.mxu3  ;;  %v4282_v21 = vadd.f32 %v4281_v5, %v9455_v23  ;;  %v4363_v2 = vpop.f32.mrf.mxu2  ;;  %v7931_v23 = vld [vmem:[%s11369_s0 + $0x98c] sm:$0xf] }
 0x2a9   :  { %v4356_v32 = vadd.f32 %v4355_v29, %v4282_v21  ;;  %v6770_v29 = vld [vmem:[%s11369_s0 + $0x9ec] sm:$0xf0] }
 0x2aa   :  { %v6773_v11 = vor.u32 %v7931_v23, %v6770_v29  ;;  %v5684_v29 = vld [vmem:[%s11369_s0 + $0x100] sm:$0xf] }
 0x2ab   :  { %v4430_v24 = vadd.f32 %v4429_v38, %v4356_v32  ;;  %v6765_v32 = vor.u32 %v7930_v30, %v6762_v13  ;;  %v8101_v30 = vld [vmem:[%s11367_s1 + $0x4b0] sm:$0xff] }
 0x2ac   :  { %v8109_v13 = vld [vmem:[%s11367_s1 + $0x4f0] sm:$0xff]  ;;  %4927 = vmatpush.bf16.msrb.mxu2 %v8101_v30 }
 0x2ad   :  { %v9941_v16 = vadd.f32 %v4503_v37, %v4430_v24  ;;  %v5586_v37 = vld [vmem:[%s11369_s0 + $0x9c] sm:$0xf0]  ;;  %5001 = vmatpush.bf16.msrb.mxu3 %v8109_v13 }
 0x2ae   :  { %v4284_v57 = vpop.f32.mrf.mxu1  ;;  %v4506_v54 = vpop.f32.mrf.mxu0 }
 0x2af   :  { %v4434_v7 = vpop.f32.mrf.mxu3  ;;  %v4285_v1 = vadd.f32 %v4284_v57, %v9467_v53  ;;  %v4365_v3 = vpop.f32.mrf.mxu2  ;;  %v8094_v53 = vld [vmem:[%s11367_s1 + $0x478] sm:$0xff] }
 0x2b0   :  { %4852 = vmatpush.bf16.msrb.mxu1 %v8094_v53 }
 0x2b1   :  { %v4359_v38 = vadd.f32 %v4358_v27, %v4285_v1  ;;  %4323 = vmatmul.bf16.gmra.mxu1 %v6665_v41  ;;  %4545 = vmatmul.bf16.gmra.mxu0 %v6677_v17  ;;  %v7670_v41 = vld [vmem:[%s11369_s0 + $0x160] sm:$0xf0] }
 0x2b2   :  { %v5685_v57 = vor.u32 %v7670_v41, %v5684_v29  ;;  %v8117_v41 = vld [vmem:[%s11367_s1 + $0x530] sm:$0xff] }
 0x2b3   :  { %v4433_v40 = vadd.f32 %v4432_v62, %v4359_v38  ;;  %v6776_v62 = vld [vmem:[%s11369_s0 + $0x990] sm:$0xf]  ;;  %5075 = vmatpush.bf16.msrb.mxu0 %v8117_v41 }
 0x2b4   :  { %4476 = vmatmul.bf16.gmra.mxu3 %v6773_v11  ;;  %4638 = vmatmul.bf16.vlgmr.msra.gmra.mxu2 %v5585_v10  ;;  %v5792_v41 = vld [vmem:[%s11369_s0 + $0x1d0] sm:$0xf] }
 0x2b5   :  { %v9953_v22 = vadd.f32 %v4506_v54, %v4433_v40 }
 0x2b6   :  { %v4286_v26 = vpop.f32.mrf.mxu1  ;;  %v4508_v6 = vpop.f32.mrf.mxu0 }
 0x2b7   :  { %v4437_v28 = vpop.f32.mrf.mxu3  ;;  %v4287_v27 = vadd.f32 %v4286_v26, %v9494_v59  ;;  %v4368_v49 = vpop.f32.mrf.mxu2  ;;  %v7944_v59 = vld [vmem:[%s11369_s0 + $0x9f0] sm:$0xf0] }
 0x2b8   :  { %v6777_v52 = vor.u32 %v7944_v59, %v6776_v62  ;;  %v8093_v62 = vld [vmem:[%s11367_s1 + $0x470] sm:$0xff] }
 0x2b9   :  { %v4361_v18 = vadd.f32 %v4360_v25, %v4287_v27  ;;  %v7633_v25 = vld [vmem:[%s11369_s0 + $0x3c] sm:$0xf]  ;;  %4853 = vmatpush.bf16.msrb.mxu1 %v8093_v62 }
 0x2ba   :  { %v5589_v23 = vor.u32 %v7633_v25, %v5586_v37  ;;  %v5784_v37 = vld [vmem:[%s11369_s0 + $0x1c8] sm:$0xf] }
 0x2bb   :  { %v4435_v5 = vadd.f32 %v4434_v7, %v4361_v18 }
 0x2bd   :  { %v9980_v21 = vadd.f32 %v4508_v6, %v4435_v5 }
 0x2be   :  { %v4289_v33 = vpop.f32.mrf.mxu1  ;;  %v4511_v24 = vpop.f32.mrf.mxu0 }
 0x2bf   :  { %v4439_v31 = vpop.f32.mrf.mxu3  ;;  %v4290_v17 = vadd.f32 %v4289_v33, %v9506_v36  ;;  %v4370_v7 = vpop.f32.mrf.mxu2  ;;  %v7632_v36 = vld [vmem:[%s11369_s0 + $0x34] sm:$0xf] }
 0x2c1   :  { %v4364_v58 = vadd.f32 %v4363_v2, %v4290_v17  ;;  %4328 = vmatmul.bf16.gmra.mxu1 %v6765_v32  ;;  %4550 = vmatmul.bf16.gmra.mxu0 %v6777_v52  ;;  %v5578_v2 = vld [vmem:[%s11369_s0 + $0x94] sm:$0xf0]  ;;  %v7695_v32 = vld [vmem:[%s11369_s0 + $0x228] sm:$0xf0] }
 0x2c2   :  { %v5581_v6 = vor.u32 %v7632_v36, %v5578_v2  ;;  %v5785_v33 = vor.u32 %v7695_v32, %v5784_v37  ;;  %v8108_v37 = vld [vmem:[%s11367_s1 + $0x4e8] sm:$0xff] }
 0x2c3   :  { %v4438_v54 = vadd.f32 %v4437_v28, %v4364_v58  ;;  %v5592_v28 = vld [vmem:[%s11369_s0 + $0x40] sm:$0xf]  ;;  %5002 = vmatpush.bf16.msrb.mxu3 %v8108_v37  ;;  %v7721_v37 = vld [vmem:[%s11369_s0 + $0x2f8] sm:$0xf0] }
 0x2c4   :  { %4712 = vmatmul.bf16.vlgmr.msra.gmra.mxu3 %v5589_v23  ;;  %4643 = vmatmul.bf16.gmra.mxu2 %v5685_v57  ;;  %v5593_v27 = vor.u32 %v7646_v48, %v5592_v28 }
 0x2c5   :  { %v9992_v11 = vadd.f32 %v4511_v24, %v4438_v54  ;;  %v7657_v54 = vld [vmem:[%s11369_s0 + $0xfc] sm:$0xf] }
 0x2c6   :  { %v4291_v12 = vpop.f32.mrf.mxu1  ;;  %v4513_v1 = vpop.f32.mrf.mxu0 }
 0x2c7   :  { %v4442_v51 = vpop.f32.mrf.mxu3  ;;  %v4292_v38 = vadd.f32 %v4291_v12, %v9527_v45  ;;  %v4373_v10 = vpop.f32.mrf.mxu2  ;;  %v7658_v45 = vld [vmem:[%s11369_s0 + $0x104] sm:$0xf]  ;;  %v5692_v12 = vld [vmem:[%s11369_s0 + $0x108] sm:$0xf] }
 0x2c9   :  { %v4366_v40 = vadd.f32 %v4365_v3, %v4292_v38  ;;  %v5686_v3 = vld [vmem:[%s11369_s0 + $0x164] sm:$0xf0]  ;;  %v5786_v38 = vld [vmem:[%s11369_s0 + $0x22c] sm:$0xf0] }
 0x2ca   :  { %v5689_v25 = vor.u32 %v7658_v45, %v5686_v3  ;;  %v5884_v3 = vld [vmem:[%s11369_s0 + $0x290] sm:$0xf] }
 0x2cb   :  { %v4440_v53 = vadd.f32 %v4439_v31, %v4366_v40 }
 0x2cd   :  { %v10013_v26 = vadd.f32 %v4513_v1, %v4440_v53  ;;  %v7671_v1 = vld [vmem:[%s11369_s0 + $0x168] sm:$0xf0] }
 0x2ce   :  { %v4294_v59 = vpop.f32.mrf.mxu1  ;;  %v4516_v5 = vpop.f32.mrf.mxu0  ;;  %v5693_v2 = vor.u32 %v7671_v1, %v5692_v12  ;;  %v8116_v12 = vld [vmem:[%s11367_s1 + $0x528] sm:$0xff] }
 0x2cf   :  { %v4444_v18 = vpop.f32.mrf.mxu3  ;;  %v4295_v52 = vadd.f32 %v4294_v59, %v9545_v56  ;;  %v4375_v31 = vpop.f32.mrf.mxu2  ;;  %5076 = vmatpush.bf16.msrb.mxu0 %v8116_v12 }
 0x2d1   :  { %v4369_v35 = vadd.f32 %v4368_v49, %v4295_v52  ;;  %4564 = vmatmul.bf16.vlgmr.msra.gmra.mxu1 %v5581_v6  ;;  %4786 = vmatmul.bf16.vlgmr.msra.gmra.mxu0 %v5593_v27  ;;  %v7720_v6 = vld [vmem:[%s11369_s0 + $0x2f0] sm:$0xf0] }
 0x2d2   :  { %v5885_v13 = vor.u32 %v7720_v6, %v5884_v3 }
 0x2d3   :  { %v4443_v24 = vadd.f32 %v4442_v51, %v4369_v35  ;;  %v5678_v51 = vld [vmem:[%s11369_s0 + $0x15c] sm:$0xf0] }
 0x2d4   :  { %4717 = vmatmul.bf16.gmra.mxu3 %v5689_v25  ;;  %4648 = vmatmul.bf16.gmra.mxu2 %v5785_v33  ;;  %v5681_v36 = vor.u32 %v7657_v54, %v5678_v51  ;;  %v8100_v25 = vld [vmem:[%s11367_s1 + $0x4a8] sm:$0xff] }
 0x2d5   :  { %v10031_v23 = vadd.f32 %v4516_v5, %v4443_v24  ;;  %4928 = vmatpush.bf16.msrb.mxu2 %v8100_v25  ;;  %v7682_v24 = vld [vmem:[%s11369_s0 + $0x1c4] sm:$0xf] }
 0x2d6   :  { %v4296_v17 = vpop.f32.mrf.mxu1  ;;  %v4518_v56 = vpop.f32.mrf.mxu0 }
 0x2d7   :  { %v4447_v29 = vpop.f32.mrf.mxu3  ;;  %v4297_v58 = vadd.f32 %v4296_v17, %v9569_v15  ;;  %v4378_v57 = vpop.f32.mrf.mxu2 }
 0x2d9   :  { %v4371_v49 = vadd.f32 %v4370_v7, %v4297_v58  ;;  %v7683_v7 = vld [vmem:[%s11369_s0 + $0x1cc] sm:$0xf] }
 0x2da   :  { %v5789_v45 = vor.u32 %v7683_v7, %v5786_v38  ;;  %v5984_v38 = vld [vmem:[%s11369_s0 + $0x358] sm:$0xf] }
 0x2db   :  { %v4445_v15 = vadd.f32 %v4444_v18, %v4371_v49 }
 0x2dd   :  { %v10055_v40 = vadd.f32 %v4518_v56, %v4445_v15  ;;  %v5886_v56 = vld [vmem:[%s11369_s0 + $0x2f4] sm:$0xf0] }
 0x2de   :  { %v4299_v48 = vpop.f32.mrf.mxu1  ;;  %v4521_v53 = vpop.f32.mrf.mxu0 }
 0x2df   :  { %v4449_v28 = vpop.f32.mrf.mxu3  ;;  %v4300_v27 = vadd.f32 %v4299_v48, %v9578_v46  ;;  %v4380_v18 = vpop.f32.mrf.mxu2  ;;  %v8092_v46 = vld [vmem:[%s11367_s1 + $0x468] sm:$0xff] }
 0x2e0   :  { %4854 = vmatpush.bf16.msrb.mxu1 %v8092_v46 }
 0x2e1   :  { %v4374_v30 = vadd.f32 %v4373_v10, %v4300_v27  ;;  %4569 = vmatmul.bf16.gmra.mxu1 %v5681_v36  ;;  %4791 = vmatmul.bf16.gmra.mxu0 %v5693_v2  ;;  %v7745_v36 = vld [vmem:[%s11369_s0 + $0x3b8] sm:$0xf0] }
 0x2e3   :  { %v4448_v62 = vadd.f32 %v4447_v29, %v4374_v30  ;;  %v5778_v29 = vld [vmem:[%s11369_s0 + $0x224] sm:$0xf0] }
 0x2e4   :  { %4722 = vmatmul.bf16.gmra.mxu3 %v5789_v45  ;;  %4653 = vmatmul.bf16.gmra.mxu2 %v5885_v13  ;;  %v5781_v49 = vor.u32 %v7682_v24, %v5778_v29  ;;  %v8099_v24 = vld [vmem:[%s11367_s1 + $0x4a0] sm:$0xff] }
 0x2e5   :  { %v10064_v59 = vadd.f32 %v4521_v53, %v4448_v62  ;;  %v5985_v53 = vor.u32 %v7745_v36, %v5984_v38  ;;  %v8107_v29 = vld [vmem:[%s11367_s1 + $0x4e0] sm:$0xff]  ;;  %4929 = vmatpush.bf16.msrb.mxu2 %v8099_v24 }
 0x2e6   :  { %v4301_v10 = vpop.f32.mrf.mxu1  ;;  %v4523_v32 = vpop.f32.mrf.mxu0  ;;  %5003 = vmatpush.bf16.msrb.mxu3 %v8107_v29  ;;  %v8091_v38 = vld [vmem:[%s11367_s1 + $0x460] sm:$0xff] }
 0x2e7   :  { %v4452_v5 = vpop.f32.mrf.mxu3  ;;  %v4302_v52 = vadd.f32 %v4301_v10, %v9608_v61  ;;  %v4383_v35 = vpop.f32.mrf.mxu2  ;;  %v7696_v61 = vld [vmem:[%s11369_s0 + $0x230] sm:$0xf0]  ;;  %4855 = vmatpush.bf16.msrb.mxu1 %v8091_v38  ;;  %v7771_v38 = vld [vmem:[%s11369_s0 + $0x488] sm:$0xf0] }
 0x2e8   :  { %v5793_v54 = vor.u32 %v7696_v61, %v5792_v41 }
 0x2e9   :  { %v4376_v33 = vadd.f32 %v4375_v31, %v4302_v52  ;;  %v7708_v31 = vld [vmem:[%s11369_s0 + $0x294] sm:$0xf] }
 0x2ea   :  { %v5889_v7 = vor.u32 %v7708_v31, %v5886_v56  ;;  %v6084_v31 = vld [vmem:[%s11369_s0 + $0x420] sm:$0xf]  ;;  %v7770_v56 = vld [vmem:[%s11369_s0 + $0x480] sm:$0xf0] }
 0x2eb   :  { %v4450_v17 = vadd.f32 %v4449_v28, %v4376_v33  ;;  %v6085_v12 = vor.u32 %v7770_v56, %v6084_v31  ;;  %v8098_v31 = vld [vmem:[%s11367_s1 + $0x498] sm:$0xff] }
 0x2ec   :  { %4930 = vmatpush.bf16.msrb.mxu2 %v8098_v31  ;;  %v6192_v31 = vld [vmem:[%s11369_s0 + $0x4f0] sm:$0xf] }
 0x2ed   :  { %v10094_v58 = vadd.f32 %v4523_v32, %v4450_v17 }
 0x2ee   :  { %v4304_v1 = vpop.f32.mrf.mxu1  ;;  %v4526_v15 = vpop.f32.mrf.mxu0 }
 0x2ef   :  { %v4454_v51 = vpop.f32.mrf.mxu3  ;;  %v4305_v2 = vadd.f32 %v4304_v1, %v9620_v47  ;;  %v4385_v28 = vpop.f32.mrf.mxu2  ;;  %v7707_v47 = vld [vmem:[%s11369_s0 + $0x28c] sm:$0xf] }
 0x2f1   :  { %v4379_v48 = vadd.f32 %v4378_v57, %v4305_v2  ;;  %4574 = vmatmul.bf16.gmra.mxu1 %v5781_v49  ;;  %4796 = vmatmul.bf16.gmra.mxu0 %v5793_v54  ;;  %v5878_v57 = vld [vmem:[%s11369_s0 + $0x2ec] sm:$0xf0] }
 0x2f2   :  { %v5881_v32 = vor.u32 %v7707_v47, %v5878_v57 }
 0x2f3   :  { %v4453_v45 = vadd.f32 %v4452_v5, %v4379_v48  ;;  %v5892_v5 = vld [vmem:[%s11369_s0 + $0x298] sm:$0xf] }
 0x2f4   :  { %4727 = vmatmul.bf16.gmra.mxu3 %v5889_v7  ;;  %4658 = vmatmul.bf16.gmra.mxu2 %v5985_v53  ;;  %v5893_v52 = vor.u32 %v7721_v37, %v5892_v5 }
 0x2f5   :  { %v10106_v3 = vadd.f32 %v4526_v15, %v4453_v45  ;;  %v7732_v45 = vld [vmem:[%s11369_s0 + $0x354] sm:$0xf] }
 0x2f6   :  { %v4306_v27 = vpop.f32.mrf.mxu1  ;;  %v4528_v30 = vpop.f32.mrf.mxu0 }
 0x2f7   :  { %v4457_v6 = vpop.f32.mrf.mxu3  ;;  %v4307_v13 = vadd.f32 %v4306_v27, %v9641_v50  ;;  %v4388_v62 = vpop.f32.mrf.mxu2  ;;  %v7733_v50 = vld [vmem:[%s11369_s0 + $0x35c] sm:$0xf]  ;;  %v5992_v27 = vld [vmem:[%s11369_s0 + $0x360] sm:$0xf] }
 0x2f9   :  { %v4381_v25 = vadd.f32 %v4380_v18, %v4307_v13  ;;  %v5986_v18 = vld [vmem:[%s11369_s0 + $0x3bc] sm:$0xf0]  ;;  %v6086_v13 = vld [vmem:[%s11369_s0 + $0x484] sm:$0xf0] }
 0x2fa   :  { %v5989_v17 = vor.u32 %v7733_v50, %v5986_v18  ;;  %v6184_v18 = vld [vmem:[%s11369_s0 + $0x4e8] sm:$0xf] }
 0x2fb   :  { %v4455_v46 = vadd.f32 %v4454_v51, %v4381_v25 }
 0x2fd   :  { %v10127_v10 = vadd.f32 %v4528_v30, %v4455_v46 }
 0x2fe   :  { %v4309_v41 = vpop.f32.mrf.mxu1  ;;  %v4531_v61 = vpop.f32.mrf.mxu0 }
 0x2ff   :  { %v4459_v33 = vpop.f32.mrf.mxu3  ;;  %v4310_v49 = vadd.f32 %v4309_v41, %v9656_v20  ;;  %v4390_v54 = vpop.f32.mrf.mxu2  ;;  %v8115_v20 = vld [vmem:[%s11367_s1 + $0x520] sm:$0xff] }
 0x300   :  { %5077 = vmatpush.bf16.msrb.mxu0 %v8115_v20  ;;  %v6186_v20 = vld [vmem:[%s11369_s0 + $0x54c] sm:$0xf0] }
 0x301   :  { %v4384_v51 = vadd.f32 %v4383_v35, %v4310_v49  ;;  %4579 = vmatmul.bf16.gmra.mxu1 %v5881_v32  ;;  %4801 = vmatmul.bf16.gmra.mxu0 %v5893_v52  ;;  %v7795_v32 = vld [vmem:[%s11369_s0 + $0x548] sm:$0xf0] }
 0x302   :  { %v6185_v29 = vor.u32 %v7795_v32, %v6184_v18  ;;  %v8114_v32 = vld [vmem:[%s11367_s1 + $0x518] sm:$0xff] }
 0x303   :  { %v4458_v1 = vadd.f32 %v4457_v6, %v4384_v51  ;;  %v5978_v6 = vld [vmem:[%s11369_s0 + $0x3b4] sm:$0xf0] }
 0x304   :  { %4732 = vmatmul.bf16.gmra.mxu3 %v5989_v17  ;;  %4663 = vmatmul.bf16.gmra.mxu2 %v6085_v12  ;;  %v5981_v47 = vor.u32 %v7732_v45, %v5978_v6  ;;  %v7757_v12 = vld [vmem:[%s11369_s0 + $0x41c] sm:$0xf] }
 0x305   :  { %v10142_v15 = vadd.f32 %v4531_v61, %v4458_v1  ;;  %v6078_v1 = vld [vmem:[%s11369_s0 + $0x47c] sm:$0xf0]  ;;  %v8106_v45 = vld [vmem:[%s11367_s1 + $0x4d8] sm:$0xff]  ;;  %5078 = vmatpush.bf16.msrb.mxu0 %v8114_v32 }
 0x306   :  { %v4311_v36 = vpop.f32.mrf.mxu1  ;;  %v4533_v2 = vpop.f32.mrf.mxu0  ;;  %v8090_v6 = vld [vmem:[%s11367_s1 + $0x458] sm:$0xff]  ;;  %5004 = vmatpush.bf16.msrb.mxu3 %v8106_v45 }
 0x307   :  { %v4462_v7 = vpop.f32.mrf.mxu3  ;;  %v4312_v35 = vadd.f32 %v4311_v36, %v9683_v4  ;;  %v4393_v48 = vpop.f32.mrf.mxu2  ;;  %v7746_v4 = vld [vmem:[%s11369_s0 + $0x3c0] sm:$0xf0]  ;;  %4856 = vmatpush.bf16.msrb.mxu1 %v8090_v6  ;;  %v6292_v32 = vld [vmem:[%s11369_s0 + $0x5b8] sm:$0xf] }
 0x308   :  { %v5993_v57 = vor.u32 %v7746_v4, %v5992_v27 }
 0x309   :  { %v4386_v53 = vadd.f32 %v4385_v28, %v4312_v35  ;;  %v7758_v28 = vld [vmem:[%s11369_s0 + $0x424] sm:$0xf] }
 0x30a   :  { %v6089_v50 = vor.u32 %v7758_v28, %v6086_v13  ;;  %v6284_v28 = vld [vmem:[%s11369_s0 + $0x5b0] sm:$0xf]  ;;  %v7820_v13 = vld [vmem:[%s11369_s0 + $0x610] sm:$0xf0] }
 0x30b   :  { %v4460_v30 = vadd.f32 %v4459_v33, %v4386_v53 }
 0x30d   :  { %v10169_v25 = vadd.f32 %v4533_v2, %v4460_v30  ;;  %v6081_v2 = vor.u32 %v7757_v12, %v6078_v1 }
 0x30e   :  { %v4314_v37 = vpop.f32.mrf.mxu1  ;;  %v4536_v46 = vpop.f32.mrf.mxu0 }
 0x30f   :  { %v4464_v5 = vpop.f32.mrf.mxu3  ;;  %v4315_v52 = vadd.f32 %v4314_v37, %v9692_v0  ;;  %v4395_v33 = vpop.f32.mrf.mxu2  ;;  %v6285_v37 = vor.u32 %v7820_v13, %v6284_v28  ;;  %v8105_v28 = vld [vmem:[%s11367_s1 + $0x4d0] sm:$0xff] }
 0x310   :  { %5005 = vmatpush.bf16.msrb.mxu3 %v8105_v28  ;;  %v7846_v28 = vld [vmem:[%s11369_s0 + $0x6e0] sm:$0xf0] }
 0x311   :  { %v4389_v24 = vadd.f32 %v4388_v62, %v4315_v52  ;;  %4584 = vmatmul.bf16.gmra.mxu1 %v5981_v47  ;;  %4806 = vmatmul.bf16.gmra.mxu0 %v5993_v57 }
 0x313   :  { %v4463_v41 = vadd.f32 %v4462_v7, %v4389_v24  ;;  %v6092_v7 = vld [vmem:[%s11369_s0 + $0x428] sm:$0xf] }
 0x314   :  { %4737 = vmatmul.bf16.gmra.mxu3 %v6089_v50  ;;  %4668 = vmatmul.bf16.gmra.mxu2 %v6185_v29  ;;  %v6093_v35 = vor.u32 %v7771_v38, %v6092_v7 }
 0x315   :  { %v10178_v61 = vadd.f32 %v4536_v46, %v4463_v41  ;;  %v7782_v41 = vld [vmem:[%s11369_s0 + $0x4e4] sm:$0xf] }
 0x316   :  { %v4316_v56 = vpop.f32.mrf.mxu1  ;;  %v4538_v49 = vpop.f32.mrf.mxu0 }
 0x317   :  { %v4467_v17 = vpop.f32.mrf.mxu3  ;;  %v4317_v51 = vadd.f32 %v4316_v56, %v9716_v8  ;;  %v4398_v0 = vpop.f32.mrf.mxu2  ;;  %v7796_v56 = vld [vmem:[%s11369_s0 + $0x550] sm:$0xf0] }
 0x318   :  { %v6193_v12 = vor.u32 %v7796_v56, %v6192_v31  ;;  %v8113_v31 = vld [vmem:[%s11367_s1 + $0x510] sm:$0xff] }
 0x319   :  { %v4391_v62 = vadd.f32 %v4390_v54, %v4317_v51  ;;  %v7783_v54 = vld [vmem:[%s11369_s0 + $0x4ec] sm:$0xf]  ;;  %5079 = vmatpush.bf16.msrb.mxu0 %v8113_v31 }
 0x31a   :  { %v6189_v30 = vor.u32 %v7783_v54, %v6186_v20  ;;  %v6384_v54 = vld [vmem:[%s11369_s0 + $0x678] sm:$0xf]  ;;  %v7845_v20 = vld [vmem:[%s11369_s0 + $0x6d8] sm:$0xf0] }
 0x31b   :  { %v4465_v8 = vadd.f32 %v4464_v5, %v4391_v62  ;;  %v6385_v45 = vor.u32 %v7845_v20, %v6384_v54 }
 0x31d   :  { %v10202_v36 = vadd.f32 %v4538_v49, %v4465_v8  ;;  %v6286_v49 = vld [vmem:[%s11369_s0 + $0x614] sm:$0xf0] }
 0x31e   :  { %v4319_v27 = vpop.f32.mrf.mxu1  ;;  %v4541_v4 = vpop.f32.mrf.mxu0 }
 0x31f   :  { %v4469_v53 = vpop.f32.mrf.mxu3  ;;  %v4320_v47 = vadd.f32 %v4319_v27, %v9731_v19  ;;  %v4400_v57 = vpop.f32.mrf.mxu2 }
 0x321   :  { %v4394_v5 = vadd.f32 %v4393_v48, %v4320_v47  ;;  %4589 = vmatmul.bf16.gmra.mxu1 %v6081_v2  ;;  %4811 = vmatmul.bf16.gmra.mxu0 %v6093_v35 }
 0x323   :  { %v4468_v46 = vadd.f32 %v4467_v17, %v4394_v5  ;;  %v6178_v17 = vld [vmem:[%s11369_s0 + $0x544] sm:$0xf0] }
 0x324   :  { %4742 = vmatmul.bf16.gmra.mxu3 %v6189_v30  ;;  %4673 = vmatmul.bf16.gmra.mxu2 %v6285_v37  ;;  %v6181_v62 = vor.u32 %v7782_v41, %v6178_v17  ;;  %v8097_v30 = vld [vmem:[%s11367_s1 + $0x490] sm:$0xff] }
 0x325   :  { %v10217_v50 = vadd.f32 %v4541_v4, %v4468_v46  ;;  %4931 = vmatpush.bf16.msrb.mxu2 %v8097_v30  ;;  %v7807_v46 = vld [vmem:[%s11369_s0 + $0x5ac] sm:$0xf] }
 0x326   :  { %v4321_v52 = vpop.f32.mrf.mxu1  ;;  %v4543_v24 = vpop.f32.mrf.mxu0 }
 0x327   :  { %v4472_v18 = vpop.f32.mrf.mxu3  ;;  %v4322_v19 = vadd.f32 %v4321_v52, %v9755_v63  ;;  %v4403_v29 = vpop.f32.mrf.mxu2 }
 0x329   :  { %v4396_v48 = vadd.f32 %v4395_v33, %v4322_v19  ;;  %v7808_v33 = vld [vmem:[%s11369_s0 + $0x5b4] sm:$0xf] }
 0x32a   :  { %v6289_v8 = vor.u32 %v7808_v33, %v6286_v49  ;;  %v6484_v49 = vld [vmem:[%s11369_s0 + $0x740] sm:$0xf] }
 0x32b   :  { %v4470_v63 = vadd.f32 %v4469_v53, %v4396_v48 }
 0x32d   :  { %v10241_v51 = vadd.f32 %v4543_v24, %v4470_v63  ;;  %v6386_v24 = vld [vmem:[%s11369_s0 + $0x6dc] sm:$0xf0] }
 0x32e   :  { %v4324_v7 = vpop.f32.mrf.mxu1  ;;  %v4546_v38 = vpop.f32.mrf.mxu0 }
 0x32f   :  { %v4474_v1 = vpop.f32.mrf.mxu3  ;;  %v4325_v2 = vadd.f32 %v4324_v7, %v9764_v60  ;;  %v4405_v35 = vpop.f32.mrf.mxu2  ;;  %v8089_v60 = vld [vmem:[%s11367_s1 + $0x450] sm:$0xff] }
 0x330   :  { %4857 = vmatpush.bf16.msrb.mxu1 %v8089_v60 }
 0x331   :  { %v4399_v53 = vadd.f32 %v4398_v0, %v4325_v2  ;;  %4594 = vmatmul.bf16.gmra.mxu1 %v6181_v62  ;;  %4816 = vmatmul.bf16.gmra.mxu0 %v6193_v12  ;;  %v7870_v62 = vld [vmem:[%s11369_s0 + $0x7a0] sm:$0xf0] }
 0x333   :  { %v4473_v6 = vadd.f32 %v4472_v18, %v4399_v53  ;;  %v6278_v18 = vld [vmem:[%s11369_s0 + $0x60c] sm:$0xf0] }
 0x334   :  { %4747 = vmatmul.bf16.gmra.mxu3 %v6289_v8  ;;  %4678 = vmatmul.bf16.gmra.mxu2 %v6385_v45  ;;  %v6281_v48 = vor.u32 %v7807_v46, %v6278_v18  ;;  %v8096_v46 = vld [vmem:[%s11367_s1 + $0x488] sm:$0xff] }
 0x335   :  { %v10250_v27 = vadd.f32 %v4546_v38, %v4473_v6  ;;  %v6485_v38 = vor.u32 %v7870_v62, %v6484_v49  ;;  %v8104_v18 = vld [vmem:[%s11367_s1 + $0x4c8] sm:$0xff]  ;;  %4932 = vmatpush.bf16.msrb.mxu2 %v8096_v46 }
 0x336   :  { %v4326_v0 = vpop.f32.mrf.mxu1  ;;  %v4548_v13 = vpop.f32.mrf.mxu0  ;;  %5006 = vmatpush.bf16.msrb.mxu3 %v8104_v18  ;;  %v8112_v62 = vld [vmem:[%s11367_s1 + $0x508] sm:$0xff] }
 0x337   :  { %v4477_v4 = vpop.f32.mrf.mxu3  ;;  %v4327_v47 = vadd.f32 %v4326_v0, %v9794_v14  ;;  %v4639_v5 = vpop.f32.mrf.mxu2  ;;  %v7821_v14 = vld [vmem:[%s11369_s0 + $0x618] sm:$0xf0]  ;;  %5080 = vmatpush.bf16.msrb.mxu0 %v8112_v62 }
 0x338   :  { %v6293_v41 = vor.u32 %v7821_v14, %v6292_v32  ;;  %v8088_v32 = vld [vmem:[%s11367_s1 + $0x448] sm:$0xff] }
 0x339   :  { %v4401_v37 = vadd.f32 %v4400_v57, %v4327_v47  ;;  %v7833_v57 = vld [vmem:[%s11369_s0 + $0x67c] sm:$0xf]  ;;  %4858 = vmatpush.bf16.msrb.mxu1 %v8088_v32 }
 0x33a   :  { %v6389_v33 = vor.u32 %v7833_v57, %v6386_v24  ;;  %v6584_v24 = vld [vmem:[%s11369_s0 + $0x808] sm:$0xf] }
 0x33b   :  { %v4475_v52 = vadd.f32 %v4474_v1, %v4401_v37 }
 0x33d   :  { %v10280_v19 = vadd.f32 %v4548_v13, %v4475_v52 }
 0x33e   :  { %v4329_v56 = vpop.f32.mrf.mxu1  ;;  %v4551_v63 = vpop.f32.mrf.mxu0 }
 0x33f   :  { %v4479_v17 = vpop.f32.mrf.mxu3  ;;  %v4330_v12 = vadd.f32 %v4329_v56, %v9806_v42  ;;  %v4641_v1 = vpop.f32.mrf.mxu2  ;;  %v7832_v42 = vld [vmem:[%s11369_s0 + $0x674] sm:$0xf] }
 0x341   :  { %v4404_v7 = vadd.f32 %v4403_v29, %v4330_v12  ;;  %4599 = vmatmul.bf16.gmra.mxu1 %v6281_v48  ;;  %4821 = vmatmul.bf16.gmra.mxu0 %v6293_v41  ;;  %v6378_v29 = vld [vmem:[%s11369_s0 + $0x6d4] sm:$0xf0]  ;;  %v7895_v48 = vld [vmem:[%s11369_s0 + $0x868] sm:$0xf0] }
 0x342   :  { %v6381_v13 = vor.u32 %v7832_v42, %v6378_v29  ;;  %v6585_v56 = vor.u32 %v7895_v48, %v6584_v24  ;;  %v8103_v24 = vld [vmem:[%s11367_s1 + $0x4c0] sm:$0xff] }
 0x343   :  { %v4478_v8 = vadd.f32 %v4477_v4, %v4404_v7  ;;  %v6392_v4 = vld [vmem:[%s11369_s0 + $0x680] sm:$0xf]  ;;  %5007 = vmatpush.bf16.msrb.mxu3 %v8103_v24  ;;  %v7921_v24 = vld [vmem:[%s11369_s0 + $0x938] sm:$0xf0] }
 0x344   :  { %4752 = vmatmul.bf16.gmra.mxu3 %v6389_v33  ;;  %4683 = vmatmul.bf16.gmra.mxu2 %v6485_v38  ;;  %v6393_v47 = vor.u32 %v7846_v28, %v6392_v4 }
 0x345   :  { %v10292_v54 = vadd.f32 %v4551_v63, %v4478_v8  ;;  %v7857_v8 = vld [vmem:[%s11369_s0 + $0x73c] sm:$0xf] }
 0x346   :  { %v4331_v2 = vpop.f32.mrf.mxu1  ;;  %v4553_v53 = vpop.f32.mrf.mxu0 }
 0x347   :  { %v4713_v20 = vpop.f32.mrf.mxu3  ;;  %v4332_v45 = vadd.f32 %v4331_v2, %v9827_v43  ;;  %v4644_v6 = vpop.f32.mrf.mxu2  ;;  %v7858_v43 = vld [vmem:[%s11369_s0 + $0x744] sm:$0xf]  ;;  %v6492_v2 = vld [vmem:[%s11369_s0 + $0x748] sm:$0xf] }
 0x349   :  { %v4406_v30 = vadd.f32 %v4405_v35, %v4332_v45  ;;  %v6486_v35 = vld [vmem:[%s11369_s0 + $0x7a4] sm:$0xf0]  ;;  %v6586_v45 = vld [vmem:[%s11369_s0 + $0x86c] sm:$0xf0] }
 0x34a   :  { %v6489_v57 = vor.u32 %v7858_v43, %v6486_v35  ;;  %v6684_v35 = vld [vmem:[%s11369_s0 + $0x8d0] sm:$0xf] }
 0x34b   :  { %v4480_v60 = vadd.f32 %v4479_v17, %v4406_v30 }
 0x34d   :  { %v10313_v0 = vadd.f32 %v4553_v53, %v4480_v60  ;;  %v7871_v53 = vld [vmem:[%s11369_s0 + $0x7a8] sm:$0xf0] }
 0x34e   :  { %v4565_v14 = vpop.f32.mrf.mxu1  ;;  %v4787_v52 = vpop.f32.mrf.mxu0  ;;  %v6493_v29 = vor.u32 %v7871_v53, %v6492_v2  ;;  %v8111_v2 = vld [vmem:[%s11367_s1 + $0x500] sm:$0xff] }
 0x34f   :  { %v4715_v37 = vpop.f32.mrf.mxu3  ;;  %v4566_v41 = vadd.f32 %v4565_v14, %v9845_v55  ;;  %v4646_v17 = vpop.f32.mrf.mxu2  ;;  %5081 = vmatpush.bf16.msrb.mxu0 %v8111_v2 }
 0x351   :  { %v4640_v31 = vadd.f32 %v4639_v5, %v4566_v41  ;;  %4604 = vmatmul.bf16.gmra.mxu1 %v6381_v13  ;;  %4826 = vmatmul.bf16.gmra.mxu0 %v6393_v47  ;;  %v7920_v13 = vld [vmem:[%s11369_s0 + $0x930] sm:$0xf0] }
 0x352   :  { %v6685_v18 = vor.u32 %v7920_v13, %v6684_v35 }
 0x353   :  { %v4714_v63 = vadd.f32 %v4713_v20, %v4640_v31  ;;  %v6478_v20 = vld [vmem:[%s11369_s0 + $0x79c] sm:$0xf0] }
 0x354   :  { %4757 = vmatmul.bf16.gmra.mxu3 %v6489_v57  ;;  %4688 = vmatmul.bf16.gmra.mxu2 %v6585_v56  ;;  %v6481_v42 = vor.u32 %v7857_v8, %v6478_v20  ;;  %v8095_v57 = vld [vmem:[%s11367_s1 + $0x480] sm:$0xff] }
 0x355   :  { %v10331_v33 = vadd.f32 %v4787_v52, %v4714_v63  ;;  %4933 = vmatpush.bf16.msrb.mxu2 %v8095_v57  ;;  %v7882_v56 = vld [vmem:[%s11369_s0 + $0x804] sm:$0xf]  ;;  %v6578_v63 = vld [vmem:[%s11369_s0 + $0x864] sm:$0xf0] }
 0x356   :  { %v4567_v12 = vpop.f32.mrf.mxu1  ;;  %v4789_v55 = vpop.f32.mrf.mxu0  ;;  %v8087_v20 = vld [vmem:[%s11367_s1 + $0x440] sm:$0xff] }
 0x357   :  { %v4718_v49 = vpop.f32.mrf.mxu3  ;;  %v4568_v7 = vadd.f32 %v4567_v12, %v9869_v9  ;;  %v4649_v38 = vpop.f32.mrf.mxu2  ;;  %v6686_v12 = vld [vmem:[%s11369_s0 + $0x934] sm:$0xf0]  ;;  %4859 = vmatpush.bf16.msrb.mxu1 %v8087_v20 }
 0x359   :  { %v4642_v5 = vadd.f32 %v4641_v1, %v4568_v7  ;;  %v7883_v1 = vld [vmem:[%s11369_s0 + $0x80c] sm:$0xf]  ;;  %v6581_v7 = vor.u32 %v7882_v56, %v6578_v63  ;;  %v8134_v63 = vld [vmem:[%s11367_s1 + $0x5b8] sm:$0xff] }
 0x35a   :  { %v6589_v43 = vor.u32 %v7883_v1, %v6586_v45  ;;  %v6784_v45 = vld [vmem:[%s11369_s0 + $0x998] sm:$0xf]  ;;  %5222 = vmatpush.bf16.msra.mxu2 %v8134_v63 }
 0x35b   :  { %v4716_v9 = vadd.f32 %v4715_v37, %v4642_v5 }
 0x35d   :  { %v10355_v30 = vadd.f32 %v4789_v55, %v4716_v9 }
 0x35e   :  { %v4570_v28 = vpop.f32.mrf.mxu1  ;;  %v4792_v60 = vpop.f32.mrf.mxu0 }
 0x35f   :  { %v4720_v4 = vpop.f32.mrf.mxu3  ;;  %v4571_v47 = vadd.f32 %v4570_v28, %v9878_v44  ;;  %v4651_v37 = vpop.f32.mrf.mxu2 }
 0x361   :  { %v4645_v46 = vadd.f32 %v4644_v6, %v4571_v47  ;;  %4609 = vmatmul.bf16.gmra.mxu1 %v6481_v42  ;;  %4831 = vmatmul.bf16.gmra.mxu0 %v6493_v29  ;;  %v7945_v42 = vld [vmem:[%s11369_s0 + $0x9f8] sm:$0xf0] }
 0x363   :  { %v4719_v32 = vadd.f32 %v4718_v49, %v4645_v46  ;;  %v6592_v49 = vld [vmem:[%s11369_s0 + $0x810] sm:$0xf] }
 0x364   :  { %4762 = vmatmul.bf16.gmra.mxu3 %v6589_v43  ;;  %4693 = vmatmul.bf16.gmra.mxu2 %v6685_v18 }
 0x365   :  { %v10364_v14 = vadd.f32 %v4792_v60, %v4719_v32  ;;  %v6785_v60 = vor.u32 %v7945_v42, %v6784_v45 }
 0x366   :  { %v4572_v44 = vpop.f32.mrf.mxu1  ;;  %v4794_v48 = vpop.f32.mrf.mxu0 }
 0x367   :  { %v4723_v52 = vpop.f32.mrf.mxu3  ;;  %v4573_v6 = vadd.f32 %v4572_v44, %v9905_v34  ;;  %v4654_v41 = vpop.f32.mrf.mxu2  ;;  %v7896_v34 = vld [vmem:[%s11369_s0 + $0x870] sm:$0xf0] }
 0x368   :  { %v6593_v5 = vor.u32 %v7896_v34, %v6592_v49 }
 0x369   :  { %v4647_v31 = vadd.f32 %v4646_v17, %v4573_v6  ;;  %v7908_v17 = vld [vmem:[%s11369_s0 + $0x8d4] sm:$0xf] }
 0x36a   :  { %v6689_v1 = vor.u32 %v7908_v17, %v6686_v12  ;;  %v5600_v17 = vld [vmem:[%s11369_s0 + $0x48] sm:$0xf]  ;;  %v7647_v12 = vld [vmem:[%s11369_s0 + $0xa8] sm:$0xf0] }
 0x36b   :  { %v4721_v62 = vadd.f32 %v4720_v4, %v4647_v31  ;;  %v5601_v20 = vor.u32 %v7647_v12, %v5600_v17 }
 0x36d   :  { %v10391_v55 = vadd.f32 %v4794_v48, %v4721_v62 }
 0x36e   :  { %v4575_v53 = vpop.f32.mrf.mxu1  ;;  %v4797_v9 = vpop.f32.mrf.mxu0 }
 0x36f   :  { %v4725_v8 = vpop.f32.mrf.mxu3  ;;  %v4576_v29 = vadd.f32 %v4575_v53, %v9920_v39  ;;  %v4656_v4 = vpop.f32.mrf.mxu2  ;;  %v7907_v39 = vld [vmem:[%s11369_s0 + $0x8cc] sm:$0xf] }
 0x371   :  { %v4650_v28 = vadd.f32 %v4649_v38, %v4576_v29  ;;  %4614 = vmatmul.bf16.gmra.mxu1 %v6581_v7  ;;  %4836 = vmatmul.bf16.gmra.mxu0 %v6593_v5  ;;  %v6678_v38 = vld [vmem:[%s11369_s0 + $0x92c] sm:$0xf0] }
 0x372   :  { %v6681_v6 = vor.u32 %v7907_v39, %v6678_v38 }
 0x373   :  { %v4724_v43 = vadd.f32 %v4723_v52, %v4650_v28  ;;  %v6692_v52 = vld [vmem:[%s11369_s0 + $0x8d8] sm:$0xf] }
 0x374   :  { %4767 = vmatmul.bf16.gmra.mxu3 %v6689_v1  ;;  %4698 = vmatmul.bf16.gmra.mxu2 %v6785_v60  ;;  %v6693_v31 = vor.u32 %v7921_v24, %v6692_v52  ;;  %v8142_v1 = vld [vmem:[%s11367_s1 + $0x5f8] sm:$0xff]  ;;  %v7932_v60 = vld [vmem:[%s11369_s0 + $0x994] sm:$0xf] }
 0x375   :  { %v10406_v35 = vadd.f32 %v4797_v9, %v4724_v43  ;;  %5296 = vmatpush.bf16.msra.mxu3 %v8142_v1  ;;  %v6778_v43 = vld [vmem:[%s11369_s0 + $0x9f4] sm:$0xf0]  ;;  %v7648_v1 = vld [vmem:[%s11369_s0 + $0xb0] sm:$0xf0] }
 0x376   :  { %v4577_v47 = vpop.f32.mrf.mxu1  ;;  %v4799_v46 = vpop.f32.mrf.mxu0  ;;  %v8150_v52 = vld [vmem:[%s11367_s1 + $0x638] sm:$0xff] }
 0x377   :  { %v4728_v13 = vpop.f32.mrf.mxu3  ;;  %v4578_v18 = vadd.f32 %v4577_v47, %v9941_v16  ;;  %v4659_v32 = vpop.f32.mrf.mxu2  ;;  %v7933_v16 = vld [vmem:[%s11369_s0 + $0x99c] sm:$0xf]  ;;  %5370 = vmatpush.bf16.msra.mxu0 %v8150_v52 }
 0x379   :  { %v4652_v57 = vadd.f32 %v4651_v37, %v4578_v18  ;;  %v6786_v37 = vld [vmem:[%s11369_s0 + $0x9fc] sm:$0xf0] }
 0x37a   :  { %v6789_v62 = vor.u32 %v7933_v16, %v6786_v37  ;;  %v5700_v37 = vld [vmem:[%s11369_s0 + $0x110] sm:$0xf] }
 0x37b   :  { %v4726_v44 = vadd.f32 %v4725_v8, %v4652_v57  ;;  %v6781_v57 = vor.u32 %v7932_v60, %v6778_v43  ;;  %v8133_v60 = vld [vmem:[%s11367_s1 + $0x5b0] sm:$0xff] }
 0x37c   :  { %v8141_v43 = vld [vmem:[%s11367_s1 + $0x5f0] sm:$0xff]  ;;  %5223 = vmatpush.bf16.msra.mxu2 %v8133_v60 }
 0x37d   :  { %v10427_v48 = vadd.f32 %v4799_v46, %v4726_v44  ;;  %v5602_v46 = vld [vmem:[%s11369_s0 + $0xac] sm:$0xf0]  ;;  %5297 = vmatpush.bf16.msra.mxu3 %v8141_v43 }
 0x37e   :  { %v4580_v49 = vpop.f32.mrf.mxu1  ;;  %v4802_v34 = vpop.f32.mrf.mxu0 }
 0x37f   :  { %v4730_v56 = vpop.f32.mrf.mxu3  ;;  %v4581_v7 = vadd.f32 %v4580_v49, %v9953_v22  ;;  %v4661_v5 = vpop.f32.mrf.mxu2  ;;  %v8126_v22 = vld [vmem:[%s11367_s1 + $0x578] sm:$0xff] }
 0x380   :  { %5148 = vmatpush.bf16.msra.mxu1 %v8126_v22 }
 0x381   :  { %v4655_v8 = vadd.f32 %v4654_v41, %v4581_v7  ;;  %4619 = vmatmul.bf16.gmra.mxu1 %v6681_v6  ;;  %4841 = vmatmul.bf16.gmra.mxu0 %v6693_v31  ;;  %v7672_v6 = vld [vmem:[%s11369_s0 + $0x170] sm:$0xf0] }
 0x382   :  { %v5701_v49 = vor.u32 %v7672_v6, %v5700_v37  ;;  %v8149_v6 = vld [vmem:[%s11367_s1 + $0x630] sm:$0xff] }
 0x383   :  { %v4729_v2 = vadd.f32 %v4728_v13, %v4655_v8  ;;  %v6792_v13 = vld [vmem:[%s11369_s0 + $0x9a0] sm:$0xf]  ;;  %5371 = vmatpush.bf16.msra.mxu0 %v8149_v6 }
 0x384   :  { %4772 = vmatmul.bf16.gmra.mxu3 %v6789_v62  ;;  %4934 = vmatmul.bf16.vlgmr.msrb.gmra.mxu2 %v5601_v20  ;;  %v5808_v6 = vld [vmem:[%s11369_s0 + $0x1e0] sm:$0xf] }
 0x385   :  { %v10439_v53 = vadd.f32 %v4802_v34, %v4729_v2 }
 0x386   :  { %v4582_v45 = vpop.f32.mrf.mxu1  ;;  %v4804_v42 = vpop.f32.mrf.mxu0 }
 0x387   :  { %v4733_v9 = vpop.f32.mrf.mxu3  ;;  %v4583_v41 = vadd.f32 %v4582_v45, %v9980_v21  ;;  %v4664_v29 = vpop.f32.mrf.mxu2  ;;  %v7946_v21 = vld [vmem:[%s11369_s0 + $0xa00] sm:$0xf0] }
 0x388   :  { %v6793_v39 = vor.u32 %v7946_v21, %v6792_v13  ;;  %v8125_v13 = vld [vmem:[%s11367_s1 + $0x570] sm:$0xff] }
 0x389   :  { %v4657_v28 = vadd.f32 %v4656_v4, %v4583_v41  ;;  %v7635_v4 = vld [vmem:[%s11369_s0 + $0x4c] sm:$0xf]  ;;  %5149 = vmatpush.bf16.msra.mxu1 %v8125_v13 }
 0x38a   :  { %v5605_v16 = vor.u32 %v7635_v4, %v5602_v46  ;;  %v5800_v46 = vld [vmem:[%s11369_s0 + $0x1d8] sm:$0xf] }
 0x38b   :  { %v4731_v47 = vadd.f32 %v4730_v56, %v4657_v28 }
 0x38d   :  { %v10466_v18 = vadd.f32 %v4804_v42, %v4731_v47 }
 0x38e   :  { %v4585_v24 = vpop.f32.mrf.mxu1  ;;  %v4807_v44 = vpop.f32.mrf.mxu0 }
 0x38f   :  { %v4735_v38 = vpop.f32.mrf.mxu3  ;;  %v4586_v31 = vadd.f32 %v4585_v24, %v9992_v11  ;;  %v4666_v56 = vpop.f32.mrf.mxu2  ;;  %v7634_v11 = vld [vmem:[%s11369_s0 + $0x44] sm:$0xf] }
 0x391   :  { %v4660_v63 = vadd.f32 %v4659_v32, %v4586_v31  ;;  %4624 = vmatmul.bf16.gmra.mxu1 %v6781_v57  ;;  %4846 = vmatmul.bf16.gmra.mxu0 %v6793_v39  ;;  %v5594_v32 = vld [vmem:[%s11369_s0 + $0xa4] sm:$0xf0]  ;;  %v7697_v57 = vld [vmem:[%s11369_s0 + $0x238] sm:$0xf0] }
 0x392   :  { %v5597_v42 = vor.u32 %v7634_v11, %v5594_v32  ;;  %v5801_v24 = vor.u32 %v7697_v57, %v5800_v46  ;;  %v8140_v46 = vld [vmem:[%s11367_s1 + $0x5e8] sm:$0xff] }
 0x393   :  { %v4734_v34 = vadd.f32 %v4733_v9, %v4660_v63  ;;  %v5608_v9 = vld [vmem:[%s11369_s0 + $0x50] sm:$0xf]  ;;  %5298 = vmatpush.bf16.msra.mxu3 %v8140_v46  ;;  %v7723_v46 = vld [vmem:[%s11369_s0 + $0x308] sm:$0xf0] }
 0x394   :  { %5008 = vmatmul.bf16.vlgmr.msrb.gmra.mxu3 %v5605_v16  ;;  %4939 = vmatmul.bf16.gmra.mxu2 %v5701_v49  ;;  %v5609_v41 = vor.u32 %v7648_v1, %v5608_v9 }
 0x395   :  { %v10478_v62 = vadd.f32 %v4807_v44, %v4734_v34  ;;  %v7659_v34 = vld [vmem:[%s11369_s0 + $0x10c] sm:$0xf] }
 0x396   :  { %v4587_v12 = vpop.f32.mrf.mxu1  ;;  %v4809_v7 = vpop.f32.mrf.mxu0 }
 0x397   :  { %v4738_v17 = vpop.f32.mrf.mxu3  ;;  %v4588_v8 = vadd.f32 %v4587_v12, %v10013_v26  ;;  %v4669_v20 = vpop.f32.mrf.mxu2  ;;  %v7660_v26 = vld [vmem:[%s11369_s0 + $0x114] sm:$0xf]  ;;  %v5708_v12 = vld [vmem:[%s11369_s0 + $0x118] sm:$0xf] }
 0x399   :  { %v4662_v2 = vadd.f32 %v4661_v5, %v4588_v8  ;;  %v5702_v5 = vld [vmem:[%s11369_s0 + $0x174] sm:$0xf0]  ;;  %v5802_v8 = vld [vmem:[%s11369_s0 + $0x23c] sm:$0xf0] }
 0x39a   :  { %v5705_v4 = vor.u32 %v7660_v26, %v5702_v5  ;;  %v5900_v5 = vld [vmem:[%s11369_s0 + $0x2a0] sm:$0xf] }
 0x39b   :  { %v4736_v22 = vadd.f32 %v4735_v38, %v4662_v2 }
 0x39d   :  { %v10499_v45 = vadd.f32 %v4809_v7, %v4736_v22  ;;  %v7673_v7 = vld [vmem:[%s11369_s0 + $0x178] sm:$0xf0] }
 0x39e   :  { %v4590_v21 = vpop.f32.mrf.mxu1  ;;  %v4812_v47 = vpop.f32.mrf.mxu0  ;;  %v5709_v32 = vor.u32 %v7673_v7, %v5708_v12  ;;  %v8148_v12 = vld [vmem:[%s11367_s1 + $0x628] sm:$0xff] }
 0x39f   :  { %v4740_v28 = vpop.f32.mrf.mxu3  ;;  %v4591_v39 = vadd.f32 %v4590_v21, %v10031_v23  ;;  %v4671_v38 = vpop.f32.mrf.mxu2  ;;  %5372 = vmatpush.bf16.msra.mxu0 %v8148_v12 }
 0x3a1   :  { %v4665_v52 = vadd.f32 %v4664_v29, %v4591_v39  ;;  %4860 = vmatmul.bf16.vlgmr.msrb.gmra.mxu1 %v5597_v42  ;;  %5082 = vmatmul.bf16.vlgmr.msrb.gmra.mxu0 %v5609_v41  ;;  %v7722_v42 = vld [vmem:[%s11369_s0 + $0x300] sm:$0xf0] }
 0x3a2   :  { %v5901_v43 = vor.u32 %v7722_v42, %v5900_v5 }
 0x3a3   :  { %v4739_v44 = vadd.f32 %v4738_v17, %v4665_v52  ;;  %v5694_v17 = vld [vmem:[%s11369_s0 + $0x16c] sm:$0xf0] }
 0x3a4   :  { %5013 = vmatmul.bf16.gmra.mxu3 %v5705_v4  ;;  %4944 = vmatmul.bf16.gmra.mxu2 %v5801_v24  ;;  %v5697_v11 = vor.u32 %v7659_v34, %v5694_v17  ;;  %v8132_v4 = vld [vmem:[%s11367_s1 + $0x5a8] sm:$0xff] }
 0x3a5   :  { %v10517_v16 = vadd.f32 %v4812_v47, %v4739_v44  ;;  %5224 = vmatpush.bf16.msra.mxu2 %v8132_v4  ;;  %v7684_v44 = vld [vmem:[%s11369_s0 + $0x1d4] sm:$0xf] }
 0x3a6   :  { %v4592_v31 = vpop.f32.mrf.mxu1  ;;  %v4814_v23 = vpop.f32.mrf.mxu0 }
 0x3a7   :  { %v4743_v37 = vpop.f32.mrf.mxu3  ;;  %v4593_v63 = vadd.f32 %v4592_v31, %v10055_v40  ;;  %v4674_v49 = vpop.f32.mrf.mxu2 }
 0x3a9   :  { %v4667_v29 = vadd.f32 %v4666_v56, %v4593_v63  ;;  %v7685_v56 = vld [vmem:[%s11369_s0 + $0x1dc] sm:$0xf] }
 0x3aa   :  { %v5805_v26 = vor.u32 %v7685_v56, %v5802_v8  ;;  %v6000_v8 = vld [vmem:[%s11369_s0 + $0x368] sm:$0xf] }
 0x3ab   :  { %v4741_v40 = vadd.f32 %v4740_v28, %v4667_v29 }
 0x3ad   :  { %v10541_v2 = vadd.f32 %v4814_v23, %v4741_v40  ;;  %v5902_v23 = vld [vmem:[%s11369_s0 + $0x304] sm:$0xf0] }
 0x3ae   :  { %v4595_v1 = vpop.f32.mrf.mxu1  ;;  %v4817_v22 = vpop.f32.mrf.mxu0 }
 0x3af   :  { %v4745_v9 = vpop.f32.mrf.mxu3  ;;  %v4596_v41 = vadd.f32 %v4595_v1, %v10064_v59  ;;  %v4676_v28 = vpop.f32.mrf.mxu2  ;;  %v8124_v59 = vld [vmem:[%s11367_s1 + $0x568] sm:$0xff] }
 0x3b0   :  { %5150 = vmatpush.bf16.msra.mxu1 %v8124_v59 }
 0x3b1   :  { %v4670_v60 = vadd.f32 %v4669_v20, %v4596_v41  ;;  %4865 = vmatmul.bf16.gmra.mxu1 %v5697_v11  ;;  %5087 = vmatmul.bf16.gmra.mxu0 %v5709_v32  ;;  %v7747_v11 = vld [vmem:[%s11369_s0 + $0x3c8] sm:$0xf0] }
 0x3b3   :  { %v4744_v13 = vadd.f32 %v4743_v37, %v4670_v60  ;;  %v5794_v37 = vld [vmem:[%s11369_s0 + $0x234] sm:$0xf0] }
 0x3b4   :  { %5018 = vmatmul.bf16.gmra.mxu3 %v5805_v26  ;;  %4949 = vmatmul.bf16.gmra.mxu2 %v5901_v43  ;;  %v5797_v29 = vor.u32 %v7684_v44, %v5794_v37  ;;  %v8131_v44 = vld [vmem:[%s11367_s1 + $0x5a0] sm:$0xff] }
 0x3b5   :  { %v10550_v21 = vadd.f32 %v4817_v22, %v4744_v13  ;;  %v6001_v22 = vor.u32 %v7747_v11, %v6000_v8  ;;  %v8139_v37 = vld [vmem:[%s11367_s1 + $0x5e0] sm:$0xff]  ;;  %5225 = vmatpush.bf16.msra.mxu2 %v8131_v44 }
 0x3b6   :  { %v4597_v20 = vpop.f32.mrf.mxu1  ;;  %v4819_v57 = vpop.f32.mrf.mxu0  ;;  %5299 = vmatpush.bf16.msra.mxu3 %v8139_v37  ;;  %v8123_v8 = vld [vmem:[%s11367_s1 + $0x560] sm:$0xff] }
 0x3b7   :  { %v4748_v47 = vpop.f32.mrf.mxu3  ;;  %v4598_v39 = vadd.f32 %v4597_v20, %v10094_v58  ;;  %v4679_v52 = vpop.f32.mrf.mxu2  ;;  %v7698_v58 = vld [vmem:[%s11369_s0 + $0x240] sm:$0xf0]  ;;  %5151 = vmatpush.bf16.msra.mxu1 %v8123_v8  ;;  %v7773_v8 = vld [vmem:[%s11369_s0 + $0x498] sm:$0xf0] }
 0x3b8   :  { %v5809_v34 = vor.u32 %v7698_v58, %v5808_v6 }
 0x3b9   :  { %v4672_v24 = vadd.f32 %v4671_v38, %v4598_v39  ;;  %v7710_v38 = vld [vmem:[%s11369_s0 + $0x2a4] sm:$0xf] }
 0x3ba   :  { %v5905_v56 = vor.u32 %v7710_v38, %v5902_v23  ;;  %v6100_v38 = vld [vmem:[%s11369_s0 + $0x430] sm:$0xf]  ;;  %v7772_v23 = vld [vmem:[%s11369_s0 + $0x490] sm:$0xf0] }
 0x3bb   :  { %v4746_v31 = vadd.f32 %v4745_v9, %v4672_v24  ;;  %v6101_v12 = vor.u32 %v7772_v23, %v6100_v38  ;;  %v8130_v38 = vld [vmem:[%s11367_s1 + $0x598] sm:$0xff] }
 0x3bc   :  { %5226 = vmatpush.bf16.msra.mxu2 %v8130_v38  ;;  %v6208_v38 = vld [vmem:[%s11369_s0 + $0x500] sm:$0xf] }
 0x3bd   :  { %v10580_v63 = vadd.f32 %v4819_v57, %v4746_v31 }
 0x3be   :  { %v4600_v7 = vpop.f32.mrf.mxu1  ;;  %v4822_v40 = vpop.f32.mrf.mxu0 }
 0x3bf   :  { %v4750_v17 = vpop.f32.mrf.mxu3  ;;  %v4601_v32 = vadd.f32 %v4600_v7, %v10106_v3  ;;  %v4681_v9 = vpop.f32.mrf.mxu2  ;;  %v7709_v3 = vld [vmem:[%s11369_s0 + $0x29c] sm:$0xf] }
 0x3c1   :  { %v4675_v1 = vadd.f32 %v4674_v49, %v4601_v32  ;;  %4870 = vmatmul.bf16.gmra.mxu1 %v5797_v29  ;;  %5092 = vmatmul.bf16.gmra.mxu0 %v5809_v34  ;;  %v5894_v49 = vld [vmem:[%s11369_s0 + $0x2fc] sm:$0xf0] }
 0x3c2   :  { %v5897_v57 = vor.u32 %v7709_v3, %v5894_v49 }
 0x3c3   :  { %v4749_v26 = vadd.f32 %v4748_v47, %v4675_v1  ;;  %v5908_v47 = vld [vmem:[%s11369_s0 + $0x2a8] sm:$0xf] }
 0x3c4   :  { %5023 = vmatmul.bf16.gmra.mxu3 %v5905_v56  ;;  %4954 = vmatmul.bf16.gmra.mxu2 %v6001_v22  ;;  %v5909_v39 = vor.u32 %v7723_v46, %v5908_v47 }
 0x3c5   :  { %v10592_v5 = vadd.f32 %v4822_v40, %v4749_v26  ;;  %v7734_v26 = vld [vmem:[%s11369_s0 + $0x364] sm:$0xf] }
 0x3c6   :  { %v4602_v41 = vpop.f32.mrf.mxu1  ;;  %v4824_v60 = vpop.f32.mrf.mxu0 }
 0x3c7   :  { %v4753_v42 = vpop.f32.mrf.mxu3  ;;  %v4603_v43 = vadd.f32 %v4602_v41, %v10127_v10  ;;  %v4684_v13 = vpop.f32.mrf.mxu2  ;;  %v7735_v10 = vld [vmem:[%s11369_s0 + $0x36c] sm:$0xf]  ;;  %v6008_v41 = vld [vmem:[%s11369_s0 + $0x370] sm:$0xf] }
 0x3c9   :  { %v4677_v4 = vadd.f32 %v4676_v28, %v4603_v43  ;;  %v6002_v28 = vld [vmem:[%s11369_s0 + $0x3cc] sm:$0xf0]  ;;  %v6102_v43 = vld [vmem:[%s11369_s0 + $0x494] sm:$0xf0] }
 0x3ca   :  { %v6005_v31 = vor.u32 %v7735_v10, %v6002_v28  ;;  %v6200_v28 = vld [vmem:[%s11369_s0 + $0x4f8] sm:$0xf] }
 0x3cb   :  { %v4751_v59 = vadd.f32 %v4750_v17, %v4677_v4 }
 0x3cd   :  { %v10613_v20 = vadd.f32 %v4824_v60, %v4751_v59 }
 0x3ce   :  { %v4605_v6 = vpop.f32.mrf.mxu1  ;;  %v4827_v58 = vpop.f32.mrf.mxu0 }
 0x3cf   :  { %v4755_v24 = vpop.f32.mrf.mxu3  ;;  %v4606_v29 = vadd.f32 %v4605_v6, %v10142_v15  ;;  %v4686_v34 = vpop.f32.mrf.mxu2  ;;  %v8147_v15 = vld [vmem:[%s11367_s1 + $0x620] sm:$0xff] }
 0x3d0   :  { %5373 = vmatpush.bf16.msra.mxu0 %v8147_v15  ;;  %v6202_v15 = vld [vmem:[%s11369_s0 + $0x55c] sm:$0xf0] }
 0x3d1   :  { %v4680_v17 = vadd.f32 %v4679_v52, %v4606_v29  ;;  %4875 = vmatmul.bf16.gmra.mxu1 %v5897_v57  ;;  %5097 = vmatmul.bf16.gmra.mxu0 %v5909_v39  ;;  %v7797_v57 = vld [vmem:[%s11369_s0 + $0x558] sm:$0xf0] }
 0x3d2   :  { %v6201_v37 = vor.u32 %v7797_v57, %v6200_v28  ;;  %v8146_v57 = vld [vmem:[%s11367_s1 + $0x618] sm:$0xff] }
 0x3d3   :  { %v4754_v7 = vadd.f32 %v4753_v42, %v4680_v17  ;;  %v5994_v42 = vld [vmem:[%s11369_s0 + $0x3c4] sm:$0xf0] }
 0x3d4   :  { %5028 = vmatmul.bf16.gmra.mxu3 %v6005_v31  ;;  %4959 = vmatmul.bf16.gmra.mxu2 %v6101_v12  ;;  %v5997_v3 = vor.u32 %v7734_v26, %v5994_v42  ;;  %v7759_v12 = vld [vmem:[%s11369_s0 + $0x42c] sm:$0xf]  ;;  %v8138_v26 = vld [vmem:[%s11367_s1 + $0x5d8] sm:$0xff] }
 0x3d5   :  { %v10628_v40 = vadd.f32 %v4827_v58, %v4754_v7  ;;  %v6094_v7 = vld [vmem:[%s11369_s0 + $0x48c] sm:$0xf0]  ;;  %v8122_v42 = vld [vmem:[%s11367_s1 + $0x558] sm:$0xff]  ;;  %5300 = vmatpush.bf16.msra.mxu3 %v8138_v26  ;;  %5374 = vmatpush.bf16.msra.mxu0 %v8146_v57  ;;  %v6308_v57 = vld [vmem:[%s11369_s0 + $0x5c8] sm:$0xf] }
 0x3d6   :  { %v4607_v11 = vpop.f32.mrf.mxu1  ;;  %v4829_v32 = vpop.f32.mrf.mxu0  ;;  %5152 = vmatpush.bf16.msra.mxu1 %v8122_v42 }
 0x3d7   :  { %v4758_v56 = vpop.f32.mrf.mxu3  ;;  %v4608_v52 = vadd.f32 %v4607_v11, %v10169_v25  ;;  %v4689_v1 = vpop.f32.mrf.mxu2  ;;  %v7748_v25 = vld [vmem:[%s11369_s0 + $0x3d0] sm:$0xf0] }
 0x3d8   :  { %v6009_v49 = vor.u32 %v7748_v25, %v6008_v41 }
 0x3d9   :  { %v4682_v22 = vadd.f32 %v4681_v9, %v4608_v52  ;;  %v7760_v9 = vld [vmem:[%s11369_s0 + $0x434] sm:$0xf] }
 0x3da   :  { %v6105_v10 = vor.u32 %v7760_v9, %v6102_v43  ;;  %v6300_v9 = vld [vmem:[%s11369_s0 + $0x5c0] sm:$0xf]  ;;  %v7822_v43 = vld [vmem:[%s11369_s0 + $0x620] sm:$0xf0] }
 0x3db   :  { %v4756_v60 = vadd.f32 %v4755_v24, %v4682_v22 }
 0x3dd   :  { %v10655_v4 = vadd.f32 %v4829_v32, %v4756_v60  ;;  %v6097_v32 = vor.u32 %v7759_v12, %v6094_v7 }
 0x3de   :  { %v4610_v46 = vpop.f32.mrf.mxu1  ;;  %v4832_v59 = vpop.f32.mrf.mxu0 }
 0x3df   :  { %v4760_v47 = vpop.f32.mrf.mxu3  ;;  %v4611_v39 = vadd.f32 %v4610_v46, %v10178_v61  ;;  %v4691_v24 = vpop.f32.mrf.mxu2  ;;  %v6301_v46 = vor.u32 %v7822_v43, %v6300_v9  ;;  %v8137_v9 = vld [vmem:[%s11367_s1 + $0x5d0] sm:$0xff] }
 0x3e0   :  { %5301 = vmatpush.bf16.msra.mxu3 %v8137_v9  ;;  %v7848_v9 = vld [vmem:[%s11369_s0 + $0x6f0] sm:$0xf0] }
 0x3e1   :  { %v4685_v44 = vadd.f32 %v4684_v13, %v4611_v39  ;;  %4880 = vmatmul.bf16.gmra.mxu1 %v5997_v3  ;;  %5102 = vmatmul.bf16.gmra.mxu0 %v6009_v49 }
 0x3e3   :  { %v4759_v6 = vadd.f32 %v4758_v56, %v4685_v44  ;;  %v6108_v56 = vld [vmem:[%s11369_s0 + $0x438] sm:$0xf] }
 0x3e4   :  { %5033 = vmatmul.bf16.gmra.mxu3 %v6105_v10  ;;  %4964 = vmatmul.bf16.gmra.mxu2 %v6201_v37  ;;  %v6109_v52 = vor.u32 %v7773_v8, %v6108_v56 }
 0x3e5   :  { %v10664_v58 = vadd.f32 %v4832_v59, %v4759_v6  ;;  %v7784_v6 = vld [vmem:[%s11369_s0 + $0x4f4] sm:$0xf] }
 0x3e6   :  { %v4612_v23 = vpop.f32.mrf.mxu1  ;;  %v4834_v29 = vpop.f32.mrf.mxu0 }
 0x3e7   :  { %v4763_v31 = vpop.f32.mrf.mxu3  ;;  %v4613_v17 = vadd.f32 %v4612_v23, %v10202_v36  ;;  %v4694_v61 = vpop.f32.mrf.mxu2  ;;  %v7798_v23 = vld [vmem:[%s11369_s0 + $0x560] sm:$0xf0] }
 0x3e8   :  { %v6209_v12 = vor.u32 %v7798_v23, %v6208_v38  ;;  %v8145_v38 = vld [vmem:[%s11367_s1 + $0x610] sm:$0xff] }
 0x3e9   :  { %v4687_v13 = vadd.f32 %v4686_v34, %v4613_v17  ;;  %v7785_v34 = vld [vmem:[%s11369_s0 + $0x4fc] sm:$0xf]  ;;  %5375 = vmatpush.bf16.msra.mxu0 %v8145_v38 }
 0x3ea   :  { %v6205_v60 = vor.u32 %v7785_v34, %v6202_v15  ;;  %v6400_v34 = vld [vmem:[%s11369_s0 + $0x688] sm:$0xf]  ;;  %v7847_v15 = vld [vmem:[%s11369_s0 + $0x6e8] sm:$0xf0] }
 0x3eb   :  { %v4761_v36 = vadd.f32 %v4760_v47, %v4687_v13  ;;  %v6401_v26 = vor.u32 %v7847_v15, %v6400_v34 }
 0x3ed   :  { %v10688_v11 = vadd.f32 %v4834_v29, %v4761_v36  ;;  %v6302_v29 = vld [vmem:[%s11369_s0 + $0x624] sm:$0xf0] }
 0x3ee   :  { %v4615_v41 = vpop.f32.mrf.mxu1  ;;  %v4837_v25 = vpop.f32.mrf.mxu0 }
 0x3ef   :  { %v4765_v22 = vpop.f32.mrf.mxu3  ;;  %v4616_v3 = vadd.f32 %v4615_v41, %v10217_v50  ;;  %v4696_v49 = vpop.f32.mrf.mxu2 }
 0x3f1   :  { %v4690_v47 = vadd.f32 %v4689_v1, %v4616_v3  ;;  %4885 = vmatmul.bf16.gmra.mxu1 %v6097_v32  ;;  %5107 = vmatmul.bf16.gmra.mxu0 %v6109_v52 }
 0x3f3   :  { %v4764_v59 = vadd.f32 %v4763_v31, %v4690_v47  ;;  %v6194_v31 = vld [vmem:[%s11369_s0 + $0x554] sm:$0xf0] }
 0x3f4   :  { %5038 = vmatmul.bf16.gmra.mxu3 %v6205_v60  ;;  %4969 = vmatmul.bf16.gmra.mxu2 %v6301_v46  ;;  %v6197_v13 = vor.u32 %v7784_v6, %v6194_v31  ;;  %v8129_v60 = vld [vmem:[%s11367_s1 + $0x590] sm:$0xff] }
 0x3f5   :  { %v10703_v10 = vadd.f32 %v4837_v25, %v4764_v59  ;;  %5227 = vmatpush.bf16.msra.mxu2 %v8129_v60  ;;  %v7809_v59 = vld [vmem:[%s11369_s0 + $0x5bc] sm:$0xf] }
 0x3f6   :  { %v4617_v39 = vpop.f32.mrf.mxu1  ;;  %v4839_v44 = vpop.f32.mrf.mxu0 }
 0x3f7   :  { %v4768_v28 = vpop.f32.mrf.mxu3  ;;  %v4618_v50 = vadd.f32 %v4617_v39, %v10241_v51  ;;  %v4699_v37 = vpop.f32.mrf.mxu2 }
 0x3f9   :  { %v4692_v1 = vadd.f32 %v4691_v24, %v4618_v50  ;;  %v7810_v24 = vld [vmem:[%s11369_s0 + $0x5c4] sm:$0xf] }
 0x3fa   :  { %v6305_v36 = vor.u32 %v7810_v24, %v6302_v29  ;;  %v6500_v29 = vld [vmem:[%s11369_s0 + $0x750] sm:$0xf] }
 0x3fb   :  { %v4766_v51 = vadd.f32 %v4765_v22, %v4692_v1 }
 0x3fd   :  { %v10727_v17 = vadd.f32 %v4839_v44, %v4766_v51  ;;  %v6402_v44 = vld [vmem:[%s11369_s0 + $0x6ec] sm:$0xf0] }
 0x3fe   :  { %v4620_v56 = vpop.f32.mrf.mxu1  ;;  %v4842_v8 = vpop.f32.mrf.mxu0 }
 0x3ff   :  { %v4770_v7 = vpop.f32.mrf.mxu3  ;;  %v4621_v32 = vadd.f32 %v4620_v56, %v10250_v27  ;;  %v4701_v52 = vpop.f32.mrf.mxu2  ;;  %v8121_v27 = vld [vmem:[%s11367_s1 + $0x550] sm:$0xff] }
 0x400   :  { %5153 = vmatpush.bf16.msra.mxu1 %v8121_v27 }
 0x401   :  { %v4695_v22 = vadd.f32 %v4694_v61, %v4621_v32  ;;  %4890 = vmatmul.bf16.gmra.mxu1 %v6197_v13  ;;  %5112 = vmatmul.bf16.gmra.mxu0 %v6209_v12  ;;  %v7872_v13 = vld [vmem:[%s11369_s0 + $0x7b0] sm:$0xf0] }
 0x403   :  { %v4769_v42 = vadd.f32 %v4768_v28, %v4695_v22  ;;  %v6294_v28 = vld [vmem:[%s11369_s0 + $0x61c] sm:$0xf0] }
 0x404   :  { %5043 = vmatmul.bf16.gmra.mxu3 %v6305_v36  ;;  %4974 = vmatmul.bf16.gmra.mxu2 %v6401_v26  ;;  %v6297_v1 = vor.u32 %v7809_v59, %v6294_v28  ;;  %v8128_v59 = vld [vmem:[%s11367_s1 + $0x588] sm:$0xff] }
 0x405   :  { %v10736_v41 = vadd.f32 %v4842_v8, %v4769_v42  ;;  %v6501_v8 = vor.u32 %v7872_v13, %v6500_v29  ;;  %v8136_v28 = vld [vmem:[%s11367_s1 + $0x5c8] sm:$0xff]  ;;  %5228 = vmatpush.bf16.msra.mxu2 %v8128_v59 }
 0x406   :  { %v4622_v61 = vpop.f32.mrf.mxu1  ;;  %v4844_v43 = vpop.f32.mrf.mxu0  ;;  %5302 = vmatpush.bf16.msra.mxu3 %v8136_v28  ;;  %v8144_v13 = vld [vmem:[%s11367_s1 + $0x608] sm:$0xff] }
 0x407   :  { %v4773_v25 = vpop.f32.mrf.mxu3  ;;  %v4623_v3 = vadd.f32 %v4622_v61, %v10280_v19  ;;  %v4935_v47 = vpop.f32.mrf.mxu2  ;;  %v7823_v19 = vld [vmem:[%s11369_s0 + $0x628] sm:$0xf0]  ;;  %5376 = vmatpush.bf16.msra.mxu0 %v8144_v13 }
 0x408   :  { %v6309_v6 = vor.u32 %v7823_v19, %v6308_v57  ;;  %v8120_v57 = vld [vmem:[%s11367_s1 + $0x548] sm:$0xff] }
 0x409   :  { %v4697_v46 = vadd.f32 %v4696_v49, %v4623_v3  ;;  %v7835_v49 = vld [vmem:[%s11369_s0 + $0x68c] sm:$0xf]  ;;  %5154 = vmatpush.bf16.msra.mxu1 %v8120_v57 }
 0x40a   :  { %v6405_v24 = vor.u32 %v7835_v49, %v6402_v44  ;;  %v6600_v44 = vld [vmem:[%s11369_s0 + $0x818] sm:$0xf] }
 0x40b   :  { %v4771_v39 = vadd.f32 %v4770_v7, %v4697_v46 }
 0x40d   :  { %v10766_v50 = vadd.f32 %v4844_v43, %v4771_v39 }
 0x40e   :  { %v4625_v23 = vpop.f32.mrf.mxu1  ;;  %v4847_v51 = vpop.f32.mrf.mxu0 }
 0x40f   :  { %v4775_v31 = vpop.f32.mrf.mxu3  ;;  %v4626_v12 = vadd.f32 %v4625_v23, %v10292_v54  ;;  %v4937_v7 = vpop.f32.mrf.mxu2  ;;  %v7834_v54 = vld [vmem:[%s11369_s0 + $0x684] sm:$0xf] }
 0x411   :  { %v4700_v56 = vadd.f32 %v4699_v37, %v4626_v12  ;;  %4895 = vmatmul.bf16.gmra.mxu1 %v6297_v1  ;;  %5117 = vmatmul.bf16.gmra.mxu0 %v6309_v6  ;;  %v6394_v37 = vld [vmem:[%s11369_s0 + $0x6e4] sm:$0xf0]  ;;  %v7897_v1 = vld [vmem:[%s11369_s0 + $0x878] sm:$0xf0] }
 0x412   :  { %v6397_v43 = vor.u32 %v7834_v54, %v6394_v37  ;;  %v6601_v23 = vor.u32 %v7897_v1, %v6600_v44  ;;  %v8135_v44 = vld [vmem:[%s11367_s1 + $0x5c0] sm:$0xff] }
 0x413   :  { %v4774_v36 = vadd.f32 %v4773_v25, %v4700_v56  ;;  %v6408_v25 = vld [vmem:[%s11369_s0 + $0x690] sm:$0xf]  ;;  %5303 = vmatpush.bf16.msra.mxu3 %v8135_v44  ;;  %v7923_v44 = vld [vmem:[%s11369_s0 + $0x948] sm:$0xf0] }
 0x414   :  { %5048 = vmatmul.bf16.gmra.mxu3 %v6405_v24  ;;  %4979 = vmatmul.bf16.gmra.mxu2 %v6501_v8  ;;  %v6409_v3 = vor.u32 %v7848_v9, %v6408_v25 }
 0x415   :  { %v10778_v34 = vadd.f32 %v4847_v51, %v4774_v36  ;;  %v7859_v36 = vld [vmem:[%s11369_s0 + $0x74c] sm:$0xf] }
 0x416   :  { %v4627_v32 = vpop.f32.mrf.mxu1  ;;  %v4849_v22 = vpop.f32.mrf.mxu0 }
 0x417   :  { %v5009_v15 = vpop.f32.mrf.mxu3  ;;  %v4628_v26 = vadd.f32 %v4627_v32, %v10313_v0  ;;  %v4940_v42 = vpop.f32.mrf.mxu2  ;;  %v7860_v0 = vld [vmem:[%s11369_s0 + $0x754] sm:$0xf]  ;;  %v6508_v32 = vld [vmem:[%s11369_s0 + $0x758] sm:$0xf] }
 0x419   :  { %v4702_v60 = vadd.f32 %v4701_v52, %v4628_v26  ;;  %v6502_v52 = vld [vmem:[%s11369_s0 + $0x7b4] sm:$0xf0]  ;;  %v6602_v26 = vld [vmem:[%s11369_s0 + $0x87c] sm:$0xf0] }
 0x41a   :  { %v6505_v49 = vor.u32 %v7860_v0, %v6502_v52  ;;  %v6700_v52 = vld [vmem:[%s11369_s0 + $0x8e0] sm:$0xf] }
 0x41b   :  { %v4776_v27 = vadd.f32 %v4775_v31, %v4702_v60 }
 0x41d   :  { %v10799_v61 = vadd.f32 %v4849_v22, %v4776_v27  ;;  %v7873_v22 = vld [vmem:[%s11369_s0 + $0x7b8] sm:$0xf0] }
 0x41e   :  { %v4861_v19 = vpop.f32.mrf.mxu1  ;;  %v5083_v39 = vpop.f32.mrf.mxu0  ;;  %v6509_v37 = vor.u32 %v7873_v22, %v6508_v32  ;;  %v8143_v32 = vld [vmem:[%s11367_s1 + $0x600] sm:$0xff] }
 0x41f   :  { %v5011_v46 = vpop.f32.mrf.mxu3  ;;  %v4862_v6 = vadd.f32 %v4861_v19, %v10331_v33  ;;  %v4942_v31 = vpop.f32.mrf.mxu2  ;;  %5377 = vmatpush.bf16.msra.mxu0 %v8143_v32 }
 0x421   :  { %v4936_v38 = vadd.f32 %v4935_v47, %v4862_v6  ;;  %4900 = vmatmul.bf16.gmra.mxu1 %v6397_v43  ;;  %5122 = vmatmul.bf16.gmra.mxu0 %v6409_v3  ;;  %v7922_v43 = vld [vmem:[%s11369_s0 + $0x940] sm:$0xf0] }
 0x422   :  { %v6701_v28 = vor.u32 %v7922_v43, %v6700_v52 }
 0x423   :  { %v5010_v51 = vadd.f32 %v5009_v15, %v4936_v38  ;;  %v6494_v15 = vld [vmem:[%s11369_s0 + $0x7ac] sm:$0xf0] }
 0x424   :  { %5053 = vmatmul.bf16.gmra.mxu3 %v6505_v49  ;;  %4984 = vmatmul.bf16.gmra.mxu2 %v6601_v23  ;;  %v6497_v54 = vor.u32 %v7859_v36, %v6494_v15  ;;  %v8127_v49 = vld [vmem:[%s11367_s1 + $0x580] sm:$0xff]  ;;  %v7884_v23 = vld [vmem:[%s11369_s0 + $0x814] sm:$0xf] }
 0x425   :  { %v10817_v24 = vadd.f32 %v5083_v39, %v5010_v51  ;;  %5229 = vmatpush.bf16.msra.mxu2 %v8127_v49  ;;  %v6594_v51 = vld [vmem:[%s11369_s0 + $0x874] sm:$0xf0]  ;;  %v8119_v15 = vld [vmem:[%s11367_s1 + $0x540] sm:$0xff] }
 0x426   :  { %v4863_v12 = vpop.f32.mrf.mxu1  ;;  %v5085_v33 = vpop.f32.mrf.mxu0  ;;  %5155 = vmatpush.bf16.msra.mxu1 %v8119_v15 }
 0x427   :  { %v5014_v29 = vpop.f32.mrf.mxu3  ;;  %v4864_v56 = vadd.f32 %v4863_v12, %v10355_v30  ;;  %v4945_v8 = vpop.f32.mrf.mxu2  ;;  %v6702_v12 = vld [vmem:[%s11369_s0 + $0x944] sm:$0xf0] }
 0x429   :  { %v4938_v47 = vadd.f32 %v4937_v7, %v4864_v56  ;;  %v7885_v7 = vld [vmem:[%s11369_s0 + $0x81c] sm:$0xf]  ;;  %v6597_v56 = vor.u32 %v7884_v23, %v6594_v51 }
 0x42a   :  { %v6605_v0 = vor.u32 %v7885_v7, %v6602_v26  ;;  %v6800_v26 = vld [vmem:[%s11369_s0 + $0x9a8] sm:$0xf] }
 0x42b   :  { %v5012_v30 = vadd.f32 %v5011_v46, %v4938_v47 }
 0x42d   :  { %v10841_v60 = vadd.f32 %v5085_v33, %v5012_v30 }
 0x42e   :  { %v4866_v9 = vpop.f32.mrf.mxu1  ;;  %v5088_v27 = vpop.f32.mrf.mxu0 }
 0x42f   :  { %v5016_v25 = vpop.f32.mrf.mxu3  ;;  %v4867_v3 = vadd.f32 %v4866_v9, %v10364_v14  ;;  %v4947_v46 = vpop.f32.mrf.mxu2 }
 0x431   :  { %v4941_v59 = vadd.f32 %v4940_v42, %v4867_v3  ;;  %4905 = vmatmul.bf16.gmra.mxu1 %v6497_v54  ;;  %5127 = vmatmul.bf16.gmra.mxu0 %v6509_v37  ;;  %v7947_v54 = vld [vmem:[%s11369_s0 + $0xa08] sm:$0xf0] }
 0x433   :  { %v5015_v57 = vadd.f32 %v5014_v29, %v4941_v59  ;;  %v6608_v29 = vld [vmem:[%s11369_s0 + $0x820] sm:$0xf] }
 0x434   :  { %5058 = vmatmul.bf16.gmra.mxu3 %v6605_v0  ;;  %4989 = vmatmul.bf16.gmra.mxu2 %v6701_v28 }
 0x435   :  { %v10850_v19 = vadd.f32 %v5088_v27, %v5015_v57  ;;  %v6801_v27 = vor.u32 %v7947_v54, %v6800_v26 }
 0x436   :  { %v4868_v14 = vpop.f32.mrf.mxu1  ;;  %v5090_v1 = vpop.f32.mrf.mxu0 }
 0x437   :  { %v5019_v39 = vpop.f32.mrf.mxu3  ;;  %v4869_v42 = vadd.f32 %v4868_v14, %v10391_v55  ;;  %v4950_v6 = vpop.f32.mrf.mxu2  ;;  %v7898_v55 = vld [vmem:[%s11369_s0 + $0x880] sm:$0xf0] }
 0x438   :  { %v6609_v47 = vor.u32 %v7898_v55, %v6608_v29 }
 0x439   :  { %v4943_v38 = vadd.f32 %v4942_v31, %v4869_v42  ;;  %v7910_v31 = vld [vmem:[%s11369_s0 + $0x8e4] sm:$0xf] }
 0x43a   :  { %v6705_v7 = vor.u32 %v7910_v31, %v6702_v12  ;;  %v7649_v31 = vld [vmem:[%s11369_s0 + $0xb8] sm:$0xf0] }
 0x43b   :  { %v5017_v13 = vadd.f32 %v5016_v25, %v4943_v38 }
 0x43d   :  { %v10877_v33 = vadd.f32 %v5090_v1, %v5017_v13  ;;  %v5616_v13 = vld [vmem:[%s11369_s0 + $0x58] sm:$0xf] }
 0x43e   :  { %v4871_v22 = vpop.f32.mrf.mxu1  ;;  %v5093_v30 = vpop.f32.mrf.mxu0 }
 0x43f   :  { %v5021_v36 = vpop.f32.mrf.mxu3  ;;  %v4872_v37 = vadd.f32 %v4871_v22, %v10406_v35  ;;  %v4952_v25 = vpop.f32.mrf.mxu2  ;;  %v7909_v35 = vld [vmem:[%s11369_s0 + $0x8dc] sm:$0xf] }
 0x441   :  { %v4946_v9 = vadd.f32 %v4945_v8, %v4872_v37  ;;  %4910 = vmatmul.bf16.gmra.mxu1 %v6597_v56  ;;  %5132 = vmatmul.bf16.gmra.mxu0 %v6609_v47  ;;  %v6694_v8 = vld [vmem:[%s11369_s0 + $0x93c] sm:$0xf0] }
 0x442   :  { %v6697_v42 = vor.u32 %v7909_v35, %v6694_v8 }
 0x443   :  { %v5020_v0 = vadd.f32 %v5019_v39, %v4946_v9  ;;  %v6708_v39 = vld [vmem:[%s11369_s0 + $0x8e8] sm:$0xf]  ;;  %v6808_v9 = vld [vmem:[%s11369_s0 + $0x9b0] sm:$0xf] }
 0x444   :  { %5063 = vmatmul.bf16.gmra.mxu3 %v6705_v7  ;;  %4994 = vmatmul.bf16.gmra.mxu2 %v6801_v27  ;;  %v6709_v38 = vor.u32 %v7923_v44, %v6708_v39  ;;  %v7948_v27 = vld [vmem:[%s11369_s0 + $0xa10] sm:$0xf0]  ;;  %v5716_v39 = vld [vmem:[%s11369_s0 + $0x120] sm:$0xf]  ;;  %v7674_v44 = vld [vmem:[%s11369_s0 + $0x180] sm:$0xf0] }
 0x445   :  { %v10892_v52 = vadd.f32 %v5093_v30, %v5020_v0 }
 0x446   :  { %v4873_v3 = vpop.f32.mrf.mxu1  ;;  %v5095_v59 = vpop.f32.mrf.mxu0 }
 0x447   :  { %v5024_v43 = vpop.f32.mrf.mxu3  ;;  %v4874_v28 = vadd.f32 %v4873_v3, %v10427_v48  ;;  %v4955_v57 = vpop.f32.mrf.mxu2  ;;  %v7935_v48 = vld [vmem:[%s11369_s0 + $0x9ac] sm:$0xf] }
 0x449   :  { %v4948_v49 = vadd.f32 %v4947_v46, %v4874_v28  ;;  %v6802_v46 = vld [vmem:[%s11369_s0 + $0xa0c] sm:$0xf0] }
 0x44a   :  { %v6805_v55 = vor.u32 %v7935_v48, %v6802_v46 }
 0x44b   :  { %v5022_v14 = vadd.f32 %v5021_v36, %v4948_v49  ;;  %v5617_v36 = vor.u32 %v7649_v31, %v5616_v13 }
 0x44d   :  { %v10913_v1 = vadd.f32 %v5095_v59, %v5022_v14  ;;  %v6809_v59 = vor.u32 %v7948_v27, %v6808_v9  ;;  %v5816_v9 = vld [vmem:[%s11369_s0 + $0x1e8] sm:$0xf]  ;;  %v7699_v27 = vld [vmem:[%s11369_s0 + $0x248] sm:$0xf0] }
 0x44e   :  { %v4876_v51 = vpop.f32.mrf.mxu1  ;;  %v5098_v29 = vpop.f32.mrf.mxu0 }
 0x44f   :  { %v5026_v23 = vpop.f32.mrf.mxu3  ;;  %v4877_v12 = vadd.f32 %v4876_v51, %v10439_v53  ;;  %v4957_v56 = vpop.f32.mrf.mxu2  ;;  %v7934_v53 = vld [vmem:[%s11369_s0 + $0x9a4] sm:$0xf] }
 0x451   :  { %v4951_v47 = vadd.f32 %v4950_v6, %v4877_v12  ;;  %4915 = vmatmul.bf16.gmra.mxu1 %v6697_v42  ;;  %5137 = vmatmul.bf16.gmra.mxu0 %v6709_v38  ;;  %v6794_v6 = vld [vmem:[%s11369_s0 + $0xa04] sm:$0xf0]  ;;  %v5717_v42 = vor.u32 %v7674_v44, %v5716_v39 }
 0x452   :  { %v6797_v3 = vor.u32 %v7934_v53, %v6794_v6 }
 0x453   :  { %v5025_v15 = vadd.f32 %v5024_v43, %v4951_v47  ;;  %v5624_v47 = vld [vmem:[%s11369_s0 + $0x60] sm:$0xf] }
 0x454   :  { %5068 = vmatmul.bf16.gmra.mxu3 %v6805_v55  ;;  %5230 = vmatmul.bf16.vlgmr.msra.gmra.mxu2 %v5617_v36  ;;  %v7650_v36 = vld [vmem:[%s11369_s0 + $0xc0] sm:$0xf0] }
 0x455   :  { %v10922_v32 = vadd.f32 %v5098_v29, %v5025_v15 }
 0x456   :  { %v4878_v30 = vpop.f32.mrf.mxu1  ;;  %v5100_v7 = vpop.f32.mrf.mxu0 }
 0x457   :  { %v5029_v22 = vpop.f32.mrf.mxu3  ;;  %v4879_v26 = vadd.f32 %v4878_v30, %v10466_v18  ;;  %v4960_v54 = vpop.f32.mrf.mxu2  ;;  %v7637_v18 = vld [vmem:[%s11369_s0 + $0x5c] sm:$0xf] }
 0x459   :  { %v4953_v37 = vadd.f32 %v4952_v25, %v4879_v26  ;;  %v5618_v25 = vld [vmem:[%s11369_s0 + $0xbc] sm:$0xf0] }
 0x45a   :  { %v5621_v8 = vor.u32 %v7637_v18, %v5618_v25 }
 0x45b   :  { %v5027_v0 = vadd.f32 %v5026_v23, %v4953_v37 }
 0x45d   :  { %v10943_v43 = vadd.f32 %v5100_v7, %v5027_v0  ;;  %v5625_v7 = vor.u32 %v7650_v36, %v5624_v47  ;;  %v5916_v47 = vld [vmem:[%s11369_s0 + $0x2b0] sm:$0xf]  ;;  %v7724_v36 = vld [vmem:[%s11369_s0 + $0x310] sm:$0xf0] }
 0x45e   :  { %v4881_v49 = vpop.f32.mrf.mxu1  ;;  %v5103_v35 = vpop.f32.mrf.mxu0 }
 0x45f   :  { %v5031_v28 = vpop.f32.mrf.mxu3  ;;  %v4882_v14 = vadd.f32 %v4881_v49, %v10478_v62  ;;  %v4962_v48 = vpop.f32.mrf.mxu2  ;;  %v7636_v62 = vld [vmem:[%s11369_s0 + $0x54] sm:$0xf] }
 0x461   :  { %v4956_v46 = vadd.f32 %v4955_v57, %v4882_v14  ;;  %4920 = vmatmul.bf16.gmra.mxu1 %v6797_v3  ;;  %5142 = vmatmul.bf16.gmra.mxu0 %v6809_v59  ;;  %v5610_v57 = vld [vmem:[%s11369_s0 + $0xb4] sm:$0xf0]  ;;  %v5817_v3 = vor.u32 %v7699_v27, %v5816_v9 }
 0x462   :  { %v5613_v30 = vor.u32 %v7636_v62, %v5610_v57 }
 0x463   :  { %v5030_v38 = vadd.f32 %v5029_v22, %v4956_v46  ;;  %v5724_v46 = vld [vmem:[%s11369_s0 + $0x128] sm:$0xf] }
 0x464   :  { %5304 = vmatmul.bf16.vlgmr.msra.gmra.mxu3 %v5621_v8  ;;  %5235 = vmatmul.bf16.gmra.mxu2 %v5717_v42  ;;  %v7675_v42 = vld [vmem:[%s11369_s0 + $0x188] sm:$0xf0] }
 0x465   :  { %v10952_v23 = vadd.f32 %v5103_v35, %v5030_v38 }
 0x466   :  { %v4883_v29 = vpop.f32.mrf.mxu1  ;;  %v5105_v55 = vpop.f32.mrf.mxu0 }
 0x467   :  { %v5034_v51 = vpop.f32.mrf.mxu3  ;;  %v4884_v13 = vadd.f32 %v4883_v29, %v10499_v45  ;;  %v4965_v31 = vpop.f32.mrf.mxu2  ;;  %v7662_v45 = vld [vmem:[%s11369_s0 + $0x124] sm:$0xf] }
 0x469   :  { %v4958_v12 = vadd.f32 %v4957_v56, %v4884_v13  ;;  %v5718_v56 = vld [vmem:[%s11369_s0 + $0x184] sm:$0xf0] }
 0x46a   :  { %v5721_v6 = vor.u32 %v7662_v45, %v5718_v56 }
 0x46b   :  { %v5032_v15 = vadd.f32 %v5031_v28, %v4958_v12 }
 0x46d   :  { %v10973_v22 = vadd.f32 %v5105_v55, %v5032_v15  ;;  %v5725_v55 = vor.u32 %v7675_v42, %v5724_v46  ;;  %v6016_v46 = vld [vmem:[%s11369_s0 + $0x378] sm:$0xf]  ;;  %v7749_v42 = vld [vmem:[%s11369_s0 + $0x3d8] sm:$0xf0] }
 0x46e   :  { %v4886_v37 = vpop.f32.mrf.mxu1  ;;  %v5108_v53 = vpop.f32.mrf.mxu0 }
 0x46f   :  { %v5036_v26 = vpop.f32.mrf.mxu3  ;;  %v4887_v0 = vadd.f32 %v4886_v37, %v10517_v16  ;;  %v4967_v18 = vpop.f32.mrf.mxu2  ;;  %v7661_v16 = vld [vmem:[%s11369_s0 + $0x11c] sm:$0xf] }
 0x471   :  { %v4961_v25 = vadd.f32 %v4960_v54, %v4887_v0  ;;  %5156 = vmatmul.bf16.vlgmr.msra.gmra.mxu1 %v5613_v30  ;;  %5378 = vmatmul.bf16.vlgmr.msra.gmra.mxu0 %v5625_v7  ;;  %v5710_v54 = vld [vmem:[%s11369_s0 + $0x17c] sm:$0xf0]  ;;  %v5917_v30 = vor.u32 %v7724_v36, %v5916_v47 }
 0x472   :  { %v5713_v29 = vor.u32 %v7661_v16, %v5710_v54 }
 0x473   :  { %v5035_v59 = vadd.f32 %v5034_v51, %v4961_v25  ;;  %v5824_v25 = vld [vmem:[%s11369_s0 + $0x1f0] sm:$0xf] }
 0x474   :  { %5309 = vmatmul.bf16.gmra.mxu3 %v5721_v6  ;;  %5240 = vmatmul.bf16.gmra.mxu2 %v5817_v3  ;;  %v7700_v3 = vld [vmem:[%s11369_s0 + $0x250] sm:$0xf0] }
 0x475   :  { %v10982_v28 = vadd.f32 %v5108_v53, %v5035_v59 }
 0x476   :  { %v4888_v35 = vpop.f32.mrf.mxu1  ;;  %v5110_v8 = vpop.f32.mrf.mxu0 }
 0x477   :  { %v5039_v49 = vpop.f32.mrf.mxu3  ;;  %v4889_v39 = vadd.f32 %v4888_v35, %v10541_v2  ;;  %v4970_v44 = vpop.f32.mrf.mxu2  ;;  %v7687_v2 = vld [vmem:[%s11369_s0 + $0x1ec] sm:$0xf] }
 0x479   :  { %v4963_v14 = vadd.f32 %v4962_v48, %v4889_v39  ;;  %v5818_v48 = vld [vmem:[%s11369_s0 + $0x24c] sm:$0xf0] }
 0x47a   :  { %v5821_v57 = vor.u32 %v7687_v2, %v5818_v48 }
 0x47b   :  { %v5037_v38 = vadd.f32 %v5036_v26, %v4963_v14 }
 0x47d   :  { %v11003_v51 = vadd.f32 %v5110_v8, %v5037_v38  ;;  %v5825_v8 = vor.u32 %v7700_v3, %v5824_v25  ;;  %v6116_v25 = vld [vmem:[%s11369_s0 + $0x440] sm:$0xf]  ;;  %v7774_v3 = vld [vmem:[%s11369_s0 + $0x4a0] sm:$0xf0] }
 0x47e   :  { %v4891_v12 = vpop.f32.mrf.mxu1  ;;  %v5113_v62 = vpop.f32.mrf.mxu0 }
 0x47f   :  { %v5041_v13 = vpop.f32.mrf.mxu3  ;;  %v4892_v15 = vadd.f32 %v4891_v12, %v10550_v21  ;;  %v4972_v45 = vpop.f32.mrf.mxu2  ;;  %v7686_v21 = vld [vmem:[%s11369_s0 + $0x1e4] sm:$0xf] }
 0x481   :  { %v4966_v56 = vadd.f32 %v4965_v31, %v4892_v15  ;;  %5161 = vmatmul.bf16.gmra.mxu1 %v5713_v29  ;;  %5383 = vmatmul.bf16.gmra.mxu0 %v5725_v55  ;;  %v5810_v31 = vld [vmem:[%s11369_s0 + $0x244] sm:$0xf0]  ;;  %v6017_v29 = vor.u32 %v7749_v42, %v6016_v46 }
 0x482   :  { %v5813_v35 = vor.u32 %v7686_v21, %v5810_v31 }
 0x483   :  { %v5040_v7 = vadd.f32 %v5039_v49, %v4966_v56  ;;  %v5924_v56 = vld [vmem:[%s11369_s0 + $0x2b8] sm:$0xf] }
 0x484   :  { %5314 = vmatmul.bf16.gmra.mxu3 %v5821_v57  ;;  %5245 = vmatmul.bf16.gmra.mxu2 %v5917_v30  ;;  %v7725_v30 = vld [vmem:[%s11369_s0 + $0x318] sm:$0xf0] }
 0x485   :  { %v11012_v26 = vadd.f32 %v5113_v62, %v5040_v7 }
 0x486   :  { %v4893_v53 = vpop.f32.mrf.mxu1  ;;  %v5115_v6 = vpop.f32.mrf.mxu0 }
 0x487   :  { %v5044_v37 = vpop.f32.mrf.mxu3  ;;  %v4894_v9 = vadd.f32 %v4893_v53, %v10580_v63  ;;  %v4975_v27 = vpop.f32.mrf.mxu2  ;;  %v7712_v63 = vld [vmem:[%s11369_s0 + $0x2b4] sm:$0xf] }
 0x489   :  { %v4968_v0 = vadd.f32 %v4967_v18, %v4894_v9  ;;  %v5918_v18 = vld [vmem:[%s11369_s0 + $0x314] sm:$0xf0] }
 0x48a   :  { %v5921_v54 = vor.u32 %v7712_v63, %v5918_v18 }
 0x48b   :  { %v5042_v59 = vadd.f32 %v5041_v13, %v4968_v0 }
 0x48d   :  { %v11033_v49 = vadd.f32 %v5115_v6, %v5042_v59  ;;  %v5925_v6 = vor.u32 %v7725_v30, %v5924_v56  ;;  %v6216_v56 = vld [vmem:[%s11369_s0 + $0x508] sm:$0xf]  ;;  %v7799_v30 = vld [vmem:[%s11369_s0 + $0x568] sm:$0xf0] }
 0x48e   :  { %v4896_v14 = vpop.f32.mrf.mxu1  ;;  %v5118_v16 = vpop.f32.mrf.mxu0 }
 0x48f   :  { %v5046_v39 = vpop.f32.mrf.mxu3  ;;  %v4897_v38 = vadd.f32 %v4896_v14, %v10592_v5  ;;  %v4977_v2 = vpop.f32.mrf.mxu2  ;;  %v7711_v5 = vld [vmem:[%s11369_s0 + $0x2ac] sm:$0xf] }
 0x491   :  { %v4971_v48 = vadd.f32 %v4970_v44, %v4897_v38  ;;  %5166 = vmatmul.bf16.gmra.mxu1 %v5813_v35  ;;  %5388 = vmatmul.bf16.gmra.mxu0 %v5825_v8  ;;  %v5910_v44 = vld [vmem:[%s11369_s0 + $0x30c] sm:$0xf0]  ;;  %v6117_v35 = vor.u32 %v7774_v3, %v6116_v25 }
 0x492   :  { %v5913_v53 = vor.u32 %v7711_v5, %v5910_v44 }
 0x493   :  { %v5045_v55 = vadd.f32 %v5044_v37, %v4971_v48  ;;  %v6024_v48 = vld [vmem:[%s11369_s0 + $0x380] sm:$0xf] }
 0x494   :  { %5319 = vmatmul.bf16.gmra.mxu3 %v5921_v54  ;;  %5250 = vmatmul.bf16.gmra.mxu2 %v6017_v29  ;;  %v7750_v29 = vld [vmem:[%s11369_s0 + $0x3e0] sm:$0xf0] }
 0x495   :  { %v11042_v13 = vadd.f32 %v5118_v16, %v5045_v55 }
 0x496   :  { %v4898_v62 = vpop.f32.mrf.mxu1  ;;  %v5120_v57 = vpop.f32.mrf.mxu0 }
 0x497   :  { %v5049_v12 = vpop.f32.mrf.mxu3  ;;  %v4899_v47 = vadd.f32 %v4898_v62, %v10613_v20  ;;  %v4980_v36 = vpop.f32.mrf.mxu2  ;;  %v7737_v20 = vld [vmem:[%s11369_s0 + $0x37c] sm:$0xf] }
 0x499   :  { %v4973_v15 = vadd.f32 %v4972_v45, %v4899_v47  ;;  %v6018_v45 = vld [vmem:[%s11369_s0 + $0x3dc] sm:$0xf0] }
 0x49a   :  { %v6021_v31 = vor.u32 %v7737_v20, %v6018_v45 }
 0x49b   :  { %v5047_v7 = vadd.f32 %v5046_v39, %v4973_v15 }
 0x49d   :  { %v11063_v37 = vadd.f32 %v5120_v57, %v5047_v7  ;;  %v6025_v57 = vor.u32 %v7750_v29, %v6024_v48  ;;  %v6316_v48 = vld [vmem:[%s11369_s0 + $0x5d0] sm:$0xf]  ;;  %v7824_v29 = vld [vmem:[%s11369_s0 + $0x630] sm:$0xf0] }
 0x49e   :  { %v4901_v0 = vpop.f32.mrf.mxu1  ;;  %v5123_v21 = vpop.f32.mrf.mxu0 }
 0x49f   :  { %v5051_v9 = vpop.f32.mrf.mxu3  ;;  %v4902_v59 = vadd.f32 %v4901_v0, %v10628_v40  ;;  %v4982_v63 = vpop.f32.mrf.mxu2  ;;  %v7736_v40 = vld [vmem:[%s11369_s0 + $0x374] sm:$0xf] }
 0x4a1   :  { %v4976_v18 = vadd.f32 %v4975_v27, %v4902_v59  ;;  %5171 = vmatmul.bf16.gmra.mxu1 %v5913_v53  ;;  %5393 = vmatmul.bf16.gmra.mxu0 %v5925_v6  ;;  %v6010_v27 = vld [vmem:[%s11369_s0 + $0x3d4] sm:$0xf0]  ;;  %v6217_v53 = vor.u32 %v7799_v30, %v6216_v56 }
 0x4a2   :  { %v6013_v62 = vor.u32 %v7736_v40, %v6010_v27 }
 0x4a3   :  { %v5050_v8 = vadd.f32 %v5049_v12, %v4976_v18  ;;  %v6124_v18 = vld [vmem:[%s11369_s0 + $0x448] sm:$0xf] }
 0x4a4   :  { %5324 = vmatmul.bf16.gmra.mxu3 %v6021_v31  ;;  %5255 = vmatmul.bf16.gmra.mxu2 %v6117_v35  ;;  %v7775_v35 = vld [vmem:[%s11369_s0 + $0x4a8] sm:$0xf0] }
 0x4a5   :  { %v11072_v39 = vadd.f32 %v5123_v21, %v5050_v8 }
 0x4a6   :  { %v4903_v16 = vpop.f32.mrf.mxu1  ;;  %v5125_v54 = vpop.f32.mrf.mxu0 }
 0x4a7   :  { %v5054_v14 = vpop.f32.mrf.mxu3  ;;  %v4904_v46 = vadd.f32 %v4903_v16, %v10655_v4  ;;  %v4985_v42 = vpop.f32.mrf.mxu2  ;;  %v7762_v4 = vld [vmem:[%s11369_s0 + $0x444] sm:$0xf] }
 0x4a9   :  { %v4978_v38 = vadd.f32 %v4977_v2, %v4904_v46  ;;  %v6118_v2 = vld [vmem:[%s11369_s0 + $0x4a4] sm:$0xf0] }
 0x4aa   :  { %v6121_v44 = vor.u32 %v7762_v4, %v6118_v2 }
 0x4ab   :  { %v5052_v55 = vadd.f32 %v5051_v9, %v4978_v38 }
 0x4ad   :  { %v11093_v12 = vadd.f32 %v5125_v54, %v5052_v55  ;;  %v6125_v54 = vor.u32 %v7775_v35, %v6124_v18  ;;  %v6416_v18 = vld [vmem:[%s11369_s0 + $0x698] sm:$0xf]  ;;  %v7849_v35 = vld [vmem:[%s11369_s0 + $0x6f8] sm:$0xf0] }
 0x4ae   :  { %v4906_v15 = vpop.f32.mrf.mxu1  ;;  %v5128_v5 = vpop.f32.mrf.mxu0 }
 0x4af   :  { %v5056_v47 = vpop.f32.mrf.mxu3  ;;  %v4907_v7 = vadd.f32 %v4906_v15, %v10664_v58  ;;  %v4987_v20 = vpop.f32.mrf.mxu2  ;;  %v7761_v58 = vld [vmem:[%s11369_s0 + $0x43c] sm:$0xf] }
 0x4b1   :  { %v4981_v45 = vadd.f32 %v4980_v36, %v4907_v7  ;;  %5176 = vmatmul.bf16.gmra.mxu1 %v6013_v62  ;;  %5398 = vmatmul.bf16.gmra.mxu0 %v6025_v57  ;;  %v6110_v36 = vld [vmem:[%s11369_s0 + $0x49c] sm:$0xf0]  ;;  %v6317_v62 = vor.u32 %v7824_v29, %v6316_v48 }
 0x4b2   :  { %v6113_v16 = vor.u32 %v7761_v58, %v6110_v36 }
 0x4b3   :  { %v5055_v6 = vadd.f32 %v5054_v14, %v4981_v45  ;;  %v6224_v45 = vld [vmem:[%s11369_s0 + $0x510] sm:$0xf] }
 0x4b4   :  { %5329 = vmatmul.bf16.gmra.mxu3 %v6121_v44  ;;  %5260 = vmatmul.bf16.gmra.mxu2 %v6217_v53  ;;  %v7800_v53 = vld [vmem:[%s11369_s0 + $0x570] sm:$0xf0] }
 0x4b5   :  { %v11102_v9 = vadd.f32 %v5128_v5, %v5055_v6 }
 0x4b6   :  { %v4908_v21 = vpop.f32.mrf.mxu1  ;;  %v5130_v31 = vpop.f32.mrf.mxu0 }
 0x4b7   :  { %v5059_v0 = vpop.f32.mrf.mxu3  ;;  %v4909_v25 = vadd.f32 %v4908_v21, %v10688_v11  ;;  %v4990_v3 = vpop.f32.mrf.mxu2  ;;  %v7787_v11 = vld [vmem:[%s11369_s0 + $0x50c] sm:$0xf] }
 0x4b9   :  { %v4983_v59 = vadd.f32 %v4982_v63, %v4909_v25  ;;  %v6218_v63 = vld [vmem:[%s11369_s0 + $0x56c] sm:$0xf0] }
 0x4ba   :  { %v6221_v27 = vor.u32 %v7787_v11, %v6218_v63 }
 0x4bb   :  { %v5057_v8 = vadd.f32 %v5056_v47, %v4983_v59 }
 0x4bd   :  { %v11123_v14 = vadd.f32 %v5130_v31, %v5057_v8  ;;  %v6225_v31 = vor.u32 %v7800_v53, %v6224_v45  ;;  %v6516_v45 = vld [vmem:[%s11369_s0 + $0x760] sm:$0xf]  ;;  %v7874_v53 = vld [vmem:[%s11369_s0 + $0x7c0] sm:$0xf0] }
 0x4be   :  { %v4911_v38 = vpop.f32.mrf.mxu1  ;;  %v5133_v40 = vpop.f32.mrf.mxu0 }
 0x4bf   :  { %v5061_v46 = vpop.f32.mrf.mxu3  ;;  %v4912_v55 = vadd.f32 %v4911_v38, %v10703_v10  ;;  %v4992_v4 = vpop.f32.mrf.mxu2  ;;  %v7786_v10 = vld [vmem:[%s11369_s0 + $0x504] sm:$0xf] }
 0x4c1   :  { %v4986_v2 = vadd.f32 %v4985_v42, %v4912_v55  ;;  %5181 = vmatmul.bf16.gmra.mxu1 %v6113_v16  ;;  %5403 = vmatmul.bf16.gmra.mxu0 %v6125_v54  ;;  %v6210_v42 = vld [vmem:[%s11369_s0 + $0x564] sm:$0xf0]  ;;  %v6417_v16 = vor.u32 %v7849_v35, %v6416_v18 }
 0x4c2   :  { %v6213_v21 = vor.u32 %v7786_v10, %v6210_v42 }
 0x4c3   :  { %v5060_v57 = vadd.f32 %v5059_v0, %v4986_v2  ;;  %v6324_v2 = vld [vmem:[%s11369_s0 + $0x5d8] sm:$0xf] }
 0x4c4   :  { %5334 = vmatmul.bf16.gmra.mxu3 %v6221_v27  ;;  %5265 = vmatmul.bf16.gmra.mxu2 %v6317_v62  ;;  %v7825_v62 = vld [vmem:[%s11369_s0 + $0x638] sm:$0xf0] }
 0x4c5   :  { %v11132_v47 = vadd.f32 %v5133_v40, %v5060_v57 }
 0x4c6   :  { %v4913_v5 = vpop.f32.mrf.mxu1  ;;  %v5135_v44 = vpop.f32.mrf.mxu0 }
 0x4c7   :  { %v5064_v15 = vpop.f32.mrf.mxu3  ;;  %v4914_v56 = vadd.f32 %v4913_v5, %v10727_v17  ;;  %v4995_v30 = vpop.f32.mrf.mxu2  ;;  %v7812_v17 = vld [vmem:[%s11369_s0 + $0x5d4] sm:$0xf] }
 0x4c9   :  { %v4988_v7 = vadd.f32 %v4987_v20, %v4914_v56  ;;  %v6318_v20 = vld [vmem:[%s11369_s0 + $0x634] sm:$0xf0] }
 0x4ca   :  { %v6321_v36 = vor.u32 %v7812_v17, %v6318_v20 }
 0x4cb   :  { %v5062_v6 = vadd.f32 %v5061_v46, %v4988_v7 }
 0x4cd   :  { %v11153_v0 = vadd.f32 %v5135_v44, %v5062_v6  ;;  %v6325_v44 = vor.u32 %v7825_v62, %v6324_v2  ;;  %v6616_v2 = vld [vmem:[%s11369_s0 + $0x828] sm:$0xf]  ;;  %v7899_v62 = vld [vmem:[%s11369_s0 + $0x888] sm:$0xf0] }
 0x4ce   :  { %v4916_v59 = vpop.f32.mrf.mxu1  ;;  %v5138_v58 = vpop.f32.mrf.mxu0 }
 0x4cf   :  { %v5066_v25 = vpop.f32.mrf.mxu3  ;;  %v4917_v8 = vadd.f32 %v4916_v59, %v10736_v41  ;;  %v4997_v11 = vpop.f32.mrf.mxu2  ;;  %v7811_v41 = vld [vmem:[%s11369_s0 + $0x5cc] sm:$0xf] }
 0x4d1   :  { %v4991_v63 = vadd.f32 %v4990_v3, %v4917_v8  ;;  %5186 = vmatmul.bf16.gmra.mxu1 %v6213_v21  ;;  %5408 = vmatmul.bf16.gmra.mxu0 %v6225_v31  ;;  %v6310_v3 = vld [vmem:[%s11369_s0 + $0x62c] sm:$0xf0]  ;;  %v6517_v21 = vor.u32 %v7874_v53, %v6516_v45 }
 0x4d2   :  { %v6313_v5 = vor.u32 %v7811_v41, %v6310_v3 }
 0x4d3   :  { %v5065_v54 = vadd.f32 %v5064_v15, %v4991_v63  ;;  %v6424_v63 = vld [vmem:[%s11369_s0 + $0x6a0] sm:$0xf] }
 0x4d4   :  { %5339 = vmatmul.bf16.gmra.mxu3 %v6321_v36  ;;  %5270 = vmatmul.bf16.gmra.mxu2 %v6417_v16  ;;  %v7850_v16 = vld [vmem:[%s11369_s0 + $0x700] sm:$0xf0] }
 0x4d5   :  { %v11162_v46 = vadd.f32 %v5138_v58, %v5065_v54 }
 0x4d6   :  { %v4918_v40 = vpop.f32.mrf.mxu1  ;;  %v5140_v27 = vpop.f32.mrf.mxu0 }
 0x4d7   :  { %v5069_v38 = vpop.f32.mrf.mxu3  ;;  %v4919_v48 = vadd.f32 %v4918_v40, %v10766_v50  ;;  %v5231_v29 = vpop.f32.mrf.mxu2  ;;  %v7837_v50 = vld [vmem:[%s11369_s0 + $0x69c] sm:$0xf] }
 0x4d9   :  { %v4993_v55 = vadd.f32 %v4992_v4, %v4919_v48  ;;  %v6418_v4 = vld [vmem:[%s11369_s0 + $0x6fc] sm:$0xf0] }
 0x4da   :  { %v6421_v42 = vor.u32 %v7837_v50, %v6418_v4  ;;  %v6617_v4 = vor.u32 %v7899_v62, %v6616_v2 }
 0x4db   :  { %v5067_v57 = vadd.f32 %v5066_v25, %v4993_v55 }
 0x4dd   :  { %v11183_v15 = vadd.f32 %v5140_v27, %v5067_v57  ;;  %v6425_v27 = vor.u32 %v7850_v16, %v6424_v63  ;;  %v6716_v63 = vld [vmem:[%s11369_s0 + $0x8f0] sm:$0xf]  ;;  %v7924_v16 = vld [vmem:[%s11369_s0 + $0x950] sm:$0xf0] }
 0x4de   :  { %v4921_v7 = vpop.f32.mrf.mxu1  ;;  %v5143_v10 = vpop.f32.mrf.mxu0 }
 0x4df   :  { %v5071_v56 = vpop.f32.mrf.mxu3  ;;  %v4922_v6 = vadd.f32 %v4921_v7, %v10778_v34  ;;  %v5233_v17 = vpop.f32.mrf.mxu2  ;;  %v7836_v34 = vld [vmem:[%s11369_s0 + $0x694] sm:$0xf] }
 0x4e1   :  { %v4996_v20 = vadd.f32 %v4995_v30, %v4922_v6  ;;  %5191 = vmatmul.bf16.gmra.mxu1 %v6313_v5  ;;  %5413 = vmatmul.bf16.gmra.mxu0 %v6325_v44  ;;  %v6410_v30 = vld [vmem:[%s11369_s0 + $0x6f4] sm:$0xf0]  ;;  %v6510_v6 = vld [vmem:[%s11369_s0 + $0x7bc] sm:$0xf0] }
 0x4e2   :  { %v6413_v40 = vor.u32 %v7836_v34, %v6410_v30 }
 0x4e3   :  { %v5070_v31 = vadd.f32 %v5069_v38, %v4996_v20  ;;  %v7875_v20 = vld [vmem:[%s11369_s0 + $0x7c8] sm:$0xf0] }
 0x4e4   :  { %5344 = vmatmul.bf16.gmra.mxu3 %v6421_v42  ;;  %5275 = vmatmul.bf16.gmra.mxu2 %v6517_v21 }
 0x4e5   :  { %v11192_v25 = vadd.f32 %v5143_v10, %v5070_v31  ;;  %v6618_v31 = vld [vmem:[%s11369_s0 + $0x88c] sm:$0xf0] }
 0x4e6   :  { %v4923_v58 = vpop.f32.mrf.mxu1  ;;  %v5145_v36 = vpop.f32.mrf.mxu0 }
 0x4e7   :  { %v5305_v59 = vpop.f32.mrf.mxu3  ;;  %v4924_v18 = vadd.f32 %v4923_v58, %v10799_v61  ;;  %v5236_v35 = vpop.f32.mrf.mxu2  ;;  %v7862_v61 = vld [vmem:[%s11369_s0 + $0x764] sm:$0xf] }
 0x4e9   :  { %v4998_v8 = vadd.f32 %v4997_v11, %v4924_v18  ;;  %v6518_v11 = vld [vmem:[%s11369_s0 + $0x7c4] sm:$0xf0] }
 0x4ea   :  { %v6521_v3 = vor.u32 %v7862_v61, %v6518_v11 }
 0x4eb   :  { %v5072_v54 = vadd.f32 %v5071_v56, %v4998_v8 }
 0x4ed   :  { %v11213_v38 = vadd.f32 %v5145_v36, %v5072_v54 }
 0x4ee   :  { %v5157_v55 = vpop.f32.mrf.mxu1  ;;  %v5379_v41 = vpop.f32.mrf.mxu0 }
 0x4ef   :  { %v5307_v48 = vpop.f32.mrf.mxu3  ;;  %v5158_v57 = vadd.f32 %v5157_v55, %v10817_v24  ;;  %v5238_v50 = vpop.f32.mrf.mxu2  ;;  %v7861_v24 = vld [vmem:[%s11369_s0 + $0x75c] sm:$0xf] }
 0x4f0   :  { %v6513_v58 = vor.u32 %v7861_v24, %v6510_v6 }
 0x4f1   :  { %5196 = vmatmul.bf16.gmra.mxu1 %v6413_v40  ;;  %5418 = vmatmul.bf16.gmra.mxu0 %v6425_v27  ;;  %v5232_v5 = vadd.f32 %v5231_v29, %v5158_v57  ;;  %v6524_v29 = vld [vmem:[%s11369_s0 + $0x768] sm:$0xf] }
 0x4f2   :  { %v6525_v36 = vor.u32 %v7875_v20, %v6524_v29 }
 0x4f3   :  { %v5306_v10 = vadd.f32 %v5305_v59, %v5232_v5  ;;  %v7886_v5 = vld [vmem:[%s11369_s0 + $0x824] sm:$0xf] }
 0x4f4   :  { %5349 = vmatmul.bf16.gmra.mxu3 %v6521_v3  ;;  %5280 = vmatmul.bf16.gmra.mxu2 %v6617_v4 }
 0x4f6   :  { %v5159_v56 = vpop.f32.mrf.mxu1  ;;  %v5381_v7 = vpop.f32.mrf.mxu0 }
 0x4f7   :  { %v5310_v44 = vpop.f32.mrf.mxu3  ;;  %v5160_v42 = vadd.f32 %v5159_v56, %v10841_v60  ;;  %v11223_v45 = vpop.f32.mrf.mxu2  ;;  %v5380_v60 = vadd.f32 %v5379_v41, %v5306_v10  ;;  %v6610_v56 = vld [vmem:[%s11369_s0 + $0x884] sm:$0xf0]  ;;  %v6718_v10 = vld [vmem:[%s11369_s0 + $0x954] sm:$0xf0] }
 0x4f9   :  { %v5234_v53 = vadd.f32 %v5233_v17, %v5160_v42  ;;  %v7887_v17 = vld [vmem:[%s11369_s0 + $0x82c] sm:$0xf]  ;;  %v5444_v54 = vmax.f32 %v5380_v60, 0.0 }
 0x4fa   :  { %v6621_v30 = vor.u32 %v7887_v17, %v6618_v31  ;;  %v7949_v17 = vld [vmem:[%s11369_s0 + $0xa18] sm:$0xf0] }
 0x4fb   :  { %v5308_v21 = vadd.f32 %v5307_v48, %v5234_v53  ;;  %v6717_v48 = vor.u32 %v7924_v16, %v6716_v63  ;;  %v6613_v53 = vor.u32 %v7886_v5, %v6610_v56 }
 0x4fd   :  { %v5382_v59 = vadd.f32 %v5381_v7, %v5308_v21  ;;  %v6816_v21 = vld [vmem:[%s11369_s0 + $0x9b8] sm:$0xf] }
 0x4fe   :  { %v5162_v8 = vpop.f32.mrf.mxu1  ;;  %v5384_v34 = vpop.f32.mrf.mxu0 }
 0x4ff   :  { %v5312_v18 = vpop.f32.mrf.mxu3  ;;  %v5445_v61 = vmax.f32 %v5382_v59, 0.0  ;;  %v5163_v11 = vadd.f32 %v5162_v8, %v10850_v19  ;;  %v5243_v40 = vpop.f32.mrf.mxu2  ;;  %v6817_v8 = vor.u32 %v7949_v17, %v6816_v21  ;;  %v6810_v17 = vld [vmem:[%s11369_s0 + $0xa14] sm:$0xf0] }
 0x501   :  { %v8154_v27 = vpack.c.bf16 %v5445_v61, %v5444_v54  ;;  %5201 = vmatmul.bf16.gmra.mxu1 %v6513_v58  ;;  %5423 = vmatmul.bf16.gmra.mxu0 %v6525_v36  ;;  %v5237_v55 = vadd.f32 %v5236_v35, %v5163_v11  ;;  %v6624_v35 = vld [vmem:[%s11369_s0 + $0x830] sm:$0xf] }
 0x503   :  { %8155 = vst [vmem:[%s11370_s3] sm:$0xff] %v8154_v27   ;;  %v5311_v62 = vadd.f32 %v5310_v44, %v5237_v55  ;;  %v7900_v44 = vld [vmem:[%s11369_s0 + $0x890] sm:$0xf0]  ;;  %v7911_v27 = vld [vmem:[%s11369_s0 + $0x8ec] sm:$0xf]  ;;  %v7925_v55 = vld [vmem:[%s11369_s0 + $0x958] sm:$0xf0] }
 0x504   :  { %5354 = vmatmul.bf16.gmra.mxu3 %v6621_v30  ;;  %5285 = vmatmul.bf16.gmra.mxu2 %v6717_v48  ;;  %v6625_v24 = vor.u32 %v7900_v44, %v6624_v35  ;;  %v6710_v48 = vld [vmem:[%s11369_s0 + $0x94c] sm:$0xf0] }
 0x505   :  { %v5385_v7 = vadd.f32 %v5384_v34, %v5311_v62  ;;  %v6713_v62 = vor.u32 %v7911_v27, %v6710_v48 }
 0x506   :  { %v5164_v3 = vpop.f32.mrf.mxu1  ;;  %v5386_v2 = vpop.f32.mrf.mxu0 }
 0x507   :  { %v5315_v41 = vpop.f32.mrf.mxu3  ;;  %v5165_v57 = vadd.f32 %v5164_v3, %v10877_v33  ;;  %v5246_v4 = vpop.f32.mrf.mxu2  ;;  %v5446_v31 = vmax.f32 %v5385_v7, 0.0  ;;  %v6818_v3 = vld [vmem:[%s11369_s0 + $0xa1c] sm:$0xf0] }
 0x509   :  { %v5239_v19 = vadd.f32 %v5238_v50, %v5165_v57  ;;  %v7912_v50 = vld [vmem:[%s11369_s0 + $0x8f4] sm:$0xf] }
 0x50a   :  { %v6721_v60 = vor.u32 %v7912_v50, %v6718_v10 }
 0x50b   :  { %v5313_v33 = vadd.f32 %v5312_v18, %v5239_v19 }
 0x50d   :  { %v5387_v42 = vadd.f32 %v5386_v2, %v5313_v33 }
 0x50e   :  { %v5167_v29 = vpop.f32.mrf.mxu1  ;;  %v5389_v20 = vpop.f32.mrf.mxu0 }
 0x50f   :  { %v5317_v6 = vpop.f32.mrf.mxu3  ;;  %v5447_v59 = vmax.f32 %v5387_v42, 0.0  ;;  %v5168_v58 = vadd.f32 %v5167_v29, %v10892_v52  ;;  %v5248_v36 = vpop.f32.mrf.mxu2 }
 0x511   :  { %v8159_v18 = vpack.c.bf16 %v5447_v59, %v5446_v31  ;;  %5206 = vmatmul.bf16.gmra.mxu1 %v6613_v53  ;;  %5428 = vmatmul.bf16.gmra.mxu0 %v6625_v24  ;;  %v5242_v34 = vadd.f32 %v11223_v45, %v5168_v58  ;;  %v6724_v45 = vld [vmem:[%s11369_s0 + $0x8f8] sm:$0xf]  ;;  %v7950_v31 = vld [vmem:[%s11369_s0 + $0xa20] sm:$0xf0] }
 0x512   :  { %v6725_v57 = vor.u32 %v7925_v55, %v6724_v45 }
 0x513   :  { %8216 = vst [vmem:[%s11370_s3 + $0x8] sm:$0xff] %v8159_v18   ;;  %v5316_v54 = vadd.f32 %v5315_v41, %v5242_v34 }
 0x514   :  { %5359 = vmatmul.bf16.gmra.mxu3 %v6721_v60  ;;  %5290 = vmatmul.bf16.gmra.mxu2 %v6817_v8 }
 0x515   :  { %v5390_v41 = vadd.f32 %v5389_v20, %v5316_v54 }
 0x516   :  { %v5169_v63 = vpop.f32.mrf.mxu1  ;;  %v5391_v16 = vpop.f32.mrf.mxu0 }
 0x517   :  { %v5320_v30 = vpop.f32.mrf.mxu3  ;;  %v5170_v61 = vadd.f32 %v5169_v63, %v10913_v1  ;;  %v5251_v52 = vpop.f32.mrf.mxu2  ;;  %v5448_v44 = vmax.f32 %v5390_v41, 0.0 }
 0x519   :  { %v5244_v11 = vadd.f32 %v5243_v40, %v5170_v61  ;;  %v7937_v40 = vld [vmem:[%s11369_s0 + $0x9bc] sm:$0xf] }
 0x51a   :  { %v6821_v35 = vor.u32 %v7937_v40, %v6818_v3 }
 0x51b   :  { %v5318_v1 = vadd.f32 %v5317_v6, %v5244_v11 }
 0x51d   :  { %v5392_v2 = vadd.f32 %v5391_v16, %v5318_v1 }
 0x51e   :  { %v5172_v5 = vpop.f32.mrf.mxu1  ;;  %v5394_v56 = vpop.f32.mrf.mxu0 }
 0x51f   :  { %v5322_v19 = vpop.f32.mrf.mxu3  ;;  %v5449_v7 = vmax.f32 %v5392_v2, 0.0  ;;  %v5173_v33 = vadd.f32 %v5172_v5, %v10922_v32  ;;  %v5253_v50 = vpop.f32.mrf.mxu2  ;;  %v7936_v32 = vld [vmem:[%s11369_s0 + $0x9b4] sm:$0xf] }
 0x521   :  { %v8164_v10 = vpack.c.bf16 %v5449_v7, %v5448_v44  ;;  %5211 = vmatmul.bf16.gmra.mxu1 %v6713_v62  ;;  %5433 = vmatmul.bf16.gmra.mxu0 %v6725_v57  ;;  %v5247_v42 = vadd.f32 %v5246_v4, %v5173_v33  ;;  %v6824_v4 = vld [vmem:[%s11369_s0 + $0x9c0] sm:$0xf] }
 0x522   :  { %v6825_v18 = vor.u32 %v7950_v31, %v6824_v4 }
 0x523   :  { %8217 = vst [vmem:[%s11370_s3 + $0x10] sm:$0xff] %v8164_v10   ;;  %v5321_v29 = vadd.f32 %v5320_v30, %v5247_v42 }
 0x524   :  { %5364 = vmatmul.bf16.gmra.mxu3 %v6821_v35 }
 0x525   :  { %v5395_v59 = vadd.f32 %v5394_v56, %v5321_v29 }
 0x526   :  { %v5174_v24 = vpop.f32.mrf.mxu1  ;;  %v5396_v6 = vpop.f32.mrf.mxu0 }
 0x527   :  { %v5325_v53 = vpop.f32.mrf.mxu3  ;;  %v5175_v20 = vadd.f32 %v5174_v24, %v10943_v43  ;;  %v5256_v60 = vpop.f32.mrf.mxu2  ;;  %v5450_v63 = vmax.f32 %v5395_v59, 0.0 }
 0x529   :  { %v5249_v21 = vadd.f32 %v5248_v36, %v5175_v20  ;;  %v6813_v36 = vor.u32 %v7936_v32, %v6810_v17 }
 0x52b   :  { %v5323_v43 = vadd.f32 %v5322_v19, %v5249_v21 }
 0x52d   :  { %v5397_v58 = vadd.f32 %v5396_v6, %v5323_v43 }
 0x52e   :  { %v5177_v34 = vpop.f32.mrf.mxu1  ;;  %v5399_v30 = vpop.f32.mrf.mxu0 }
 0x52f   :  { %v5327_v8 = vpop.f32.mrf.mxu3  ;;  %v5451_v16 = vmax.f32 %v5397_v58, 0.0  ;;  %v5178_v54 = vadd.f32 %v5177_v34, %v10952_v23  ;;  %v5258_v61 = vpop.f32.mrf.mxu2 }
 0x531   :  { %v8169_v11 = vpack.c.bf16 %v5451_v16, %v5450_v63  ;;  %5216 = vmatmul.bf16.gmra.mxu1 %v6813_v36  ;;  %5438 = vmatmul.bf16.gmra.mxu0 %v6825_v18  ;;  %v5252_v27 = vadd.f32 %v5251_v52, %v5178_v54 }
 0x533   :  { %8218 = vst [vmem:[%s11370_s3 + $0x18] sm:$0xff] %v8169_v11   ;;  %v5326_v41 = vadd.f32 %v5325_v53, %v5252_v27 }
 0x535   :  { %v5400_v2 = vadd.f32 %v5399_v30, %v5326_v41 }
 0x536   :  { %v5179_v45 = vpop.f32.mrf.mxu1  ;;  %v5401_v55 = vpop.f32.mrf.mxu0 }
 0x537   :  { %v5330_v48 = vpop.f32.mrf.mxu3  ;;  %v5180_v1 = vadd.f32 %v5179_v45, %v10973_v22  ;;  %v5261_v40 = vpop.f32.mrf.mxu2  ;;  %v5452_v56 = vmax.f32 %v5400_v2, 0.0 }
 0x539   :  { %v5254_v3 = vadd.f32 %v5253_v50, %v5180_v1 }
 0x53b   :  { %v5328_v62 = vadd.f32 %v5327_v8, %v5254_v3 }
 0x53d   :  { %v5402_v23 = vadd.f32 %v5401_v55, %v5328_v62 }
 0x53e   :  { %v5182_v19 = vpop.f32.mrf.mxu1  ;;  %v5404_v5 = vpop.f32.mrf.mxu0 }
 0x53f   :  { %v5332_v57 = vpop.f32.mrf.mxu3  ;;  %v5453_v35 = vmax.f32 %v5402_v23, 0.0  ;;  %v5183_v44 = vadd.f32 %v5182_v19, %v10982_v28  ;;  %v5263_v7 = vpop.f32.mrf.mxu2 }
 0x541   :  { %v8174_v52 = vpack.c.bf16 %v5453_v35, %v5452_v56  ;;  %v5257_v33 = vadd.f32 %v5256_v60, %v5183_v44 }
 0x543   :  { %8219 = vst [vmem:[%s11370_s3 + $0x20] sm:$0xff] %v8174_v52   ;;  %v5331_v42 = vadd.f32 %v5330_v48, %v5257_v33 }
 0x545   :  { %v5405_v29 = vadd.f32 %v5404_v5, %v5331_v42 }
 0x546   :  { %v5184_v10 = vpop.f32.mrf.mxu1  ;;  %v5406_v50 = vpop.f32.mrf.mxu0 }
 0x547   :  { %v5335_v22 = vpop.f32.mrf.mxu3  ;;  %v5185_v53 = vadd.f32 %v5184_v10, %v11003_v51  ;;  %v5266_v6 = vpop.f32.mrf.mxu2  ;;  %v5454_v4 = vmax.f32 %v5405_v29, 0.0 }
 0x549   :  { %v5259_v24 = vadd.f32 %v5258_v61, %v5185_v53 }
 0x54b   :  { %v5333_v20 = vadd.f32 %v5332_v57, %v5259_v24 }
 0x54d   :  { %v5407_v21 = vadd.f32 %v5406_v50, %v5333_v20 }
 0x54e   :  { %v5187_v28 = vpop.f32.mrf.mxu1  ;;  %v5409_v17 = vpop.f32.mrf.mxu0 }
 0x54f   :  { %v5337_v32 = vpop.f32.mrf.mxu3  ;;  %v5455_v31 = vmax.f32 %v5407_v21, 0.0  ;;  %v5188_v59 = vadd.f32 %v5187_v28, %v11012_v26  ;;  %v5268_v58 = vpop.f32.mrf.mxu2 }
 0x551   :  { %v8179_v43 = vpack.c.bf16 %v5455_v31, %v5454_v4  ;;  %v5262_v60 = vadd.f32 %v5261_v40, %v5188_v59 }
 0x553   :  { %8220 = vst [vmem:[%s11370_s3 + $0x28] sm:$0xff] %v8179_v43   ;;  %v5336_v8 = vadd.f32 %v5335_v22, %v5262_v60 }
 0x555   :  { %v5410_v63 = vadd.f32 %v5409_v17, %v5336_v8 }
 0x556   :  { %v5189_v36 = vpop.f32.mrf.mxu1  ;;  %v5411_v18 = vpop.f32.mrf.mxu0 }
 0x557   :  { %v5340_v51 = vpop.f32.mrf.mxu3  ;;  %v5190_v34 = vadd.f32 %v5189_v36, %v11033_v49  ;;  %v5271_v11 = vpop.f32.mrf.mxu2  ;;  %v5456_v48 = vmax.f32 %v5410_v63, 0.0 }
 0x559   :  { %v5264_v30 = vadd.f32 %v5263_v7, %v5190_v34 }
 0x55b   :  { %v5338_v16 = vadd.f32 %v5337_v32, %v5264_v30 }
 0x55d   :  { %v5412_v54 = vadd.f32 %v5411_v18, %v5338_v16 }
 0x55e   :  { %v5192_v26 = vpop.f32.mrf.mxu1  ;;  %v5414_v27 = vpop.f32.mrf.mxu0 }
 0x55f   :  { %v5342_v61 = vpop.f32.mrf.mxu3  ;;  %v5457_v45 = vmax.f32 %v5412_v54, 0.0  ;;  %v5193_v55 = vadd.f32 %v5192_v26, %v11042_v13  ;;  %v5273_v23 = vpop.f32.mrf.mxu2 }
 0x561   :  { %v8184_v41 = vpack.c.bf16 %v5457_v45, %v5456_v48  ;;  %v5267_v1 = vadd.f32 %v5266_v6, %v5193_v55 }
 0x563   :  { %8221 = vst [vmem:[%s11370_s3 + $0x30] sm:$0xff] %v8184_v41   ;;  %v5341_v2 = vadd.f32 %v5340_v51, %v5267_v1 }
 0x565   :  { %v5415_v19 = vadd.f32 %v5414_v27, %v5341_v2 }
 0x566   :  { %v5194_v49 = vpop.f32.mrf.mxu1  ;;  %v5416_v3 = vpop.f32.mrf.mxu0 }
 0x567   :  { %v5345_v40 = vpop.f32.mrf.mxu3  ;;  %v5195_v62 = vadd.f32 %v5194_v49, %v11063_v37  ;;  %v5458_v7 = vmax.f32 %v5415_v19, 0.0  ;;  %v5276_v10 = vpop.f32.mrf.mxu2 }
 0x569   :  { %v5269_v57 = vadd.f32 %v5268_v58, %v5195_v62 }
 0x56b   :  { %v5343_v5 = vadd.f32 %v5342_v61, %v5269_v57 }
 0x56d   :  { %v5417_v56 = vadd.f32 %v5416_v3, %v5343_v5 }
 0x56e   :  { %v5197_v44 = vpop.f32.mrf.mxu1  ;;  %v5419_v13 = vpop.f32.mrf.mxu0 }
 0x56f   :  { %v5347_v35 = vpop.f32.mrf.mxu3  ;;  %v5459_v52 = vmax.f32 %v5417_v56, 0.0  ;;  %v5198_v33 = vadd.f32 %v5197_v44, %v11072_v39  ;;  %v5278_v32 = vpop.f32.mrf.mxu2 }
 0x571   :  { %v8189_v22 = vpack.c.bf16 %v5459_v52, %v5458_v7  ;;  %v5272_v50 = vadd.f32 %v5271_v11, %v5198_v33 }
 0x573   :  { %8222 = vst [vmem:[%s11370_s3 + $0x38] sm:$0xff] %v8189_v22   ;;  %v5346_v24 = vadd.f32 %v5345_v40, %v5272_v50 }
 0x575   :  { %v5420_v20 = vadd.f32 %v5419_v13, %v5346_v24 }
 0x576   :  { %v5199_v42 = vpop.f32.mrf.mxu1  ;;  %v5421_v53 = vpop.f32.mrf.mxu0 }
 0x577   :  { %v5350_v37 = vpop.f32.mrf.mxu3  ;;  %v5200_v6 = vadd.f32 %v5199_v42, %v11093_v12  ;;  %v5460_v31 = vmax.f32 %v5420_v20, 0.0  ;;  %v5281_v51 = vpop.f32.mrf.mxu2 }
 0x579   :  { %v5274_v29 = vadd.f32 %v5273_v23, %v5200_v6 }
 0x57b   :  { %v5348_v21 = vadd.f32 %v5347_v35, %v5274_v29 }
 0x57d   :  { %v5422_v28 = vadd.f32 %v5421_v53, %v5348_v21 }
 0x57e   :  { %v5202_v39 = vpop.f32.mrf.mxu1  ;;  %v5424_v4 = vpop.f32.mrf.mxu0 }
 0x57f   :  { %v5352_v17 = vpop.f32.mrf.mxu3  ;;  %v5461_v59 = vmax.f32 %v5422_v28, 0.0  ;;  %v5203_v43 = vadd.f32 %v5202_v39, %v11102_v9  ;;  %v5283_v48 = vpop.f32.mrf.mxu2 }
 0x581   :  { %v8194_v60 = vpack.c.bf16 %v5461_v59, %v5460_v31  ;;  %v5277_v58 = vadd.f32 %v5276_v10, %v5203_v43 }
 0x583   :  { %8223 = vst [vmem:[%s11370_s3 + $0x40] sm:$0xff] %v8194_v60   ;;  %v5351_v18 = vadd.f32 %v5350_v37, %v5277_v58 }
 0x585   :  { %v5425_v63 = vadd.f32 %v5424_v4, %v5351_v18 }
 0x586   :  { %v5204_v12 = vpop.f32.mrf.mxu1  ;;  %v5426_v36 = vpop.f32.mrf.mxu0 }
 0x587   :  { %v5205_v8 = vadd.f32 %v5204_v12, %v11123_v14  ;;  %v5355_v34 = vpop.f32.mrf.mxu3  ;;  %v5462_v9 = vmax.f32 %v5425_v63, 0.0  ;;  %v5286_v2 = vpop.f32.mrf.mxu2 }
 0x589   :  { %v5279_v30 = vadd.f32 %v5278_v32, %v5205_v8 }
 0x58b   :  { %v5353_v16 = vadd.f32 %v5352_v17, %v5279_v30 }
 0x58d   :  { %v5427_v54 = vadd.f32 %v5426_v36, %v5353_v16 }
 0x58e   :  { %v5207_v61 = vpop.f32.mrf.mxu1  ;;  %v5429_v11 = vpop.f32.mrf.mxu0 }
 0x58f   :  { %v5463_v26 = vmax.f32 %v5427_v54, 0.0  ;;  %v5208_v27 = vadd.f32 %v5207_v61, %v11132_v47  ;;  %v5357_v55 = vpop.f32.mrf.mxu3  ;;  %v5288_v52 = vpop.f32.mrf.mxu2 }
 0x591   :  { %v8199_v45 = vpack.c.bf16 %v5463_v26, %v5462_v9  ;;  %v5282_v41 = vadd.f32 %v5281_v51, %v5208_v27 }
 0x593   :  { %8224 = vst [vmem:[%s11370_s3 + $0x48] sm:$0xff] %v8199_v45   ;;  %v5356_v40 = vadd.f32 %v5355_v34, %v5282_v41 }
 0x595   :  { %v5430_v62 = vadd.f32 %v5429_v11, %v5356_v40 }
 0x596   :  { %v5209_v14 = vpop.f32.mrf.mxu1  ;;  %v5431_v1 = vpop.f32.mrf.mxu0 }
 0x597   :  { %v5210_v49 = vadd.f32 %v5209_v14, %v11153_v0  ;;  %v5360_v57 = vpop.f32.mrf.mxu3  ;;  %v5464_v56 = vmax.f32 %v5430_v62, 0.0  ;;  %v5291_v6 = vpop.f32.mrf.mxu2 }
 0x599   :  { %v5284_v3 = vadd.f32 %v5283_v48, %v5210_v49 }
 0x59b   :  { %v5358_v23 = vadd.f32 %v5357_v55, %v5284_v3 }
 0x59d   :  { %v5432_v19 = vadd.f32 %v5431_v1, %v5358_v23 }
 0x59e   :  { %v5212_v47 = vpop.f32.mrf.mxu1  ;;  %v5434_v5 = vpop.f32.mrf.mxu0 }
 0x59f   :  { %v5465_v35 = vmax.f32 %v5432_v19, 0.0  ;;  %v5213_v44 = vadd.f32 %v5212_v47, %v11162_v46  ;;  %v5362_v0 = vpop.f32.mrf.mxu3  ;;  %v5293_v59 = vpop.f32.mrf.mxu2 }
 0x5a1   :  { %v8204_v13 = vpack.c.bf16 %v5465_v35, %v5464_v56  ;;  %v5287_v7 = vadd.f32 %v5286_v2, %v5213_v44 }
 0x5a3   :  { %8225 = vst [vmem:[%s11370_s3 + $0x50] sm:$0xff] %v8204_v13   ;;  %v5361_v22 = vadd.f32 %v5360_v57, %v5287_v7 }
 0x5a5   :  { %v5435_v42 = vadd.f32 %v5434_v5, %v5361_v22 }
 0x5a6   :  { %v5214_v33 = vpop.f32.mrf.mxu1  ;;  %v5436_v50 = vpop.f32.mrf.mxu0 }
 0x5a7   :  { %v5215_v10 = vadd.f32 %v5214_v33, %v11183_v15  ;;  %v5466_v46 = vmax.f32 %v5435_v42, 0.0  ;;  %v5365_v32 = vpop.f32.mrf.mxu3 }
 0x5a9   :  { %v5289_v37 = vadd.f32 %v5288_v52, %v5215_v10 }
 0x5ab   :  { %v5363_v53 = vadd.f32 %v5362_v0, %v5289_v37 }
 0x5ad   :  { %v5437_v24 = vadd.f32 %v5436_v50, %v5363_v53 }
 0x5ae   :  { %v5217_v29 = vpop.f32.mrf.mxu1  ;;  %v5439_v17 = vpop.f32.mrf.mxu0 }
 0x5af   :  { %v5467_v20 = vmax.f32 %v5437_v24, 0.0  ;;  %v5218_v21 = vadd.f32 %v5217_v29, %v11192_v25  ;;  %v5367_v60 = vpop.f32.mrf.mxu3 }
 0x5b1   :  { %v8209_v28 = vpack.c.bf16 %v5467_v20, %v5466_v46  ;;  %v5292_v39 = vadd.f32 %v5291_v6, %v5218_v21 }
 0x5b3   :  { %8226 = vst [vmem:[%s11370_s3 + $0x58] sm:$0xff] %v8209_v28   ;;  %v5366_v4 = vadd.f32 %v5365_v32, %v5292_v39 }
 0x5b5   :  { %v5440_v58 = vadd.f32 %v5439_v17, %v5366_v4 }
 0x5b6   :  { %v5219_v15 = vpop.f32.mrf.mxu1  ;;  %v5441_v12 = vpop.f32.mrf.mxu0 }
 0x5b7   :  { %v5220_v31 = vadd.f32 %v5219_v15, %v11213_v38  ;;  %v5468_v25 = vmax.f32 %v5440_v58, 0.0 }
 0x5b9   :  { %v5294_v43 = vadd.f32 %v5293_v59, %v5220_v31 }
 0x5bb   :  { %v5368_v51 = vadd.f32 %v5367_v60, %v5294_v43 }
 0x5bd   :  { %v5442_v36 = vadd.f32 %v5441_v12, %v5368_v51 }
 0x5bf   :  { %v5469_v18 = vmax.f32 %v5442_v36, 0.0 }
 0x5c1   :  { %v8214_v8 = vpack.c.bf16 %v5469_v18, %v5468_v25 }
 0x5c3   :  { %8227 = vst [vmem:[%s11370_s3 + $0x60] sm:$0xff] %v8214_v8  }

</bundles_post_ra>
